<compile_context>
chip_gen: v5e
topology: v5e:2x2
jax: 0.10.0
libtpu: 0.0.40
codegen_flags: <defaults>
</compile_context>

<pallas_src>
import functools
import math

import jax
import jax.numpy as jnp
from jax.experimental import pallas as pl
from jax.experimental.pallas import tpu as pltpu

BN_EPS = 1e-5
LANE = 128


def _round_up(v, m):
    return ((v + m - 1) // m) * m


def _pick_block_batch(n, max_b=8):
    """Images per grid step: divides n, <= max_b, keeps >= 2 grid steps."""
    target = max(1, min(max_b, n // 2 if n >= 2 else 1))
    for b in range(target, 0, -1):
        if n % b == 0:
            return b
    return 1


def _pick_rows(h, w, b, target_m=128):
    """H-rows per accumulator chunk so M = b*rows*w ~= target_m and rows | h."""
    rows = max(1, min(h, target_m // max(1, b * w)))
    while h % rows:
        rows -= 1
    return rows


# ------------------------------ Pallas kernel -------------------------------

def _basic_block_kernel(has_downsample, B, H, W, RW,
                        x_ref, w1_ref, s1_ref, b1_ref, w2_ref, s2_ref, b2_ref,
                        *rest):
    """Fused BasicBlock for B images (one grid step); everything stays in VMEM.

    x_ref  : [B, H, W, Cin_p] bf16 (NHWC, channel-padded, no spatial halo)
    w1_ref : [3, 3*Cin_p, Cp] bf16   (K index = dw*Cin_p + c, per dh)
    w2_ref : [3, 3*Cp,   Cp] bf16
    s*/b*  : [1, Cp] f32 folded BN affine (zero in padded lanes)
    rest   : (dw_ref [Cin_p,Cp] bf16, ds_ref, db_ref,)?  o_ref [B,H,W,Cp] bf16,
             s1_pad [B,H+2,W,3*Cin_p] bf16, s2_pad [B,H+2,W,3*Cp] bf16
    """
    if has_downsample:
        dwt_ref, ds_ref, db_ref, o_ref, s1_pad, s2_pad = rest
    else:
        o_ref, s1_pad, s2_pad = rest

    cin_p = x_ref.shape[3]
    cp = o_ref.shape[3]
    m = B * RW * W
    bf = jnp.bfloat16

    s1v, b1v = s1_ref[...], b1_ref[...]
    s2v, b2v = s2_ref[...], b2_ref[...]

    # ---- stage input into conv1's dw-wide slab (bf16, one shift per group) ----
    # s1_pad[b, hs, w, dw*Cin_p + c] = x[b, hs-1, w+dw-1, c], zero outside.
    zrow1 = jnp.zeros((B, 1, W, 3 * cin_p), bf)
    s1_pad[:, 0:1, :, :] = zrow1                                   # halo row hs=0
    s1_pad[:, H + 1:H + 2, :, :] = zrow1                           # halo row hs=H+1
    s1_pad[:, 1:H + 1, :, cin_p:2 * cin_p] = x_ref[...]            # dw=1 (center)
    s1_pad[:, 1:H + 1, 1:W, 0:cin_p] = x_ref[:, :, 0:W - 1, :]     # dw=0 -> x[w-1]
    s1_pad[:, 1:H + 1, 0:1, 0:cin_p] = jnp.zeros((B, H, 1, cin_p), bf)
    s1_pad[:, 1:H + 1, 0:W - 1, 2 * cin_p:3 * cin_p] = x_ref[:, :, 1:W, :]  # x[w+1]
    s1_pad[:, 1:H + 1, W - 1:W, 2 * cin_p:3 * cin_p] = jnp.zeros((B, H, 1, cin_p), bf)

    # halo rows of conv2's slab (interior rows are fully written below)
    zrow2 = jnp.zeros((B, 1, W, 3 * cp), bf)
    s2_pad[:, 0:1, :, :] = zrow2
    s2_pad[:, H + 1:H + 2, :, :] = zrow2

    # ---- conv1 (3 wide-K matmuls) + BN1 + ReLU, chunked over H; stage into s2 ----
    for h0 in range(0, H, RW):
        acc = jnp.zeros((m, cp), jnp.float32)
        for dh in range(3):
            lhs = s1_pad[:, h0 + dh:h0 + dh + RW, :, :].reshape(m, 3 * cin_p)
            acc = acc + jnp.dot(lhs, w1_ref[dh],
                                preferred_element_type=jnp.float32)
        y = jnp.maximum(acc * s1v + b1v, 0.0)                      # BN1 + ReLU
        y = y.astype(bf).reshape(B, RW, W, cp)
        s2_pad[:, 1 + h0:1 + h0 + RW, :, cp:2 * cp] = y            # center group
        s2_pad[:, 1 + h0:1 + h0 + RW, 1:W, 0:cp] = y[:, :, 0:W - 1, :]
        s2_pad[:, 1 + h0:1 + h0 + RW, 0:1, 0:cp] = jnp.zeros((B, RW, 1, cp), bf)
        s2_pad[:, 1 + h0:1 + h0 + RW, 0:W - 1, 2 * cp:3 * cp] = y[:, :, 1:W, :]
        s2_pad[:, 1 + h0:1 + h0 + RW, W - 1:W, 2 * cp:3 * cp] = \
            jnp.zeros((B, RW, 1, cp), bf)

    # ---- conv2 + BN2, residual (identity or 1x1-conv+BN), final ReLU ----
    for h0 in range(0, H, RW):
        acc = jnp.zeros((m, cp), jnp.float32)
        for dh in range(3):
            lhs = s2_pad[:, h0 + dh:h0 + dh + RW, :, :].reshape(m, 3 * cp)
            acc = acc + jnp.dot(lhs, w2_ref[dh],
                                preferred_element_type=jnp.float32)
        out2 = acc * s2v + b2v

        xres = x_ref[:, h0:h0 + RW, :, :].reshape(m, cin_p)
        if has_downsample:
            res = jnp.dot(xres, dwt_ref[...],
                          preferred_element_type=jnp.float32)
            res = res * ds_ref[...] + db_ref[...]
        else:
            res = xres.astype(jnp.float32)                         # Cin_p == Cp

        o_ref[:, h0:h0 + RW, :, :] = jnp.maximum(out2 + res, 0.0).reshape(
            B, RW, W, cp).astype(o_ref.dtype)


# ----------------------------- forward wrapper ------------------------------

def basic_block_forward(prm, x, *, has_downsample, block_batch=8):
    """x: [N, H, W, Cin_p] bf16 NHWC channel-padded. Returns same-format bf16."""
    N, H, W, cin_p = x.shape
    cp = prm["w1"].shape[2]
    assert prm["w1"].shape[1] == 3 * cin_p
    if not has_downsample:
        assert cin_p == cp, "identity residual needs matching (padded) channels"

    B = _pick_block_batch(N, block_batch)
    RW = _pick_rows(H, W, B)

    kern = functools.partial(_basic_block_kernel, has_downsample, B, H, W, RW)

    vec = pl.BlockSpec((1, cp), lambda i: (0, 0))
    in_specs = [
        pl.BlockSpec((B, H, W, cin_p), lambda i: (i, 0, 0, 0)),
        pl.BlockSpec((3, 3 * cin_p, cp), lambda i: (0, 0, 0)),
        vec, vec,
        pl.BlockSpec((3, 3 * cp, cp), lambda i: (0, 0, 0)),
        vec, vec,
    ]
    args = [x, prm["w1"], prm["s1"], prm["b1"], prm["w2"], prm["s2"], prm["b2"]]
    if has_downsample:
        in_specs += [pl.BlockSpec((cin_p, cp), lambda i: (0, 0)), vec, vec]
        args += [prm["dw"], prm["ds"], prm["db"]]

    return pl.pallas_call(
        kern,
        out_shape=jax.ShapeDtypeStruct((N, H, W, cp), jnp.bfloat16),
        grid=(N // B,),
        in_specs=in_specs,
        out_specs=pl.BlockSpec((B, H, W, cp), lambda i: (i, 0, 0, 0)),
        scratch_shapes=[
            pltpu.VMEM((B, H + 2, W, 3 * cin_p), jnp.bfloat16),   # conv1 slab
            pltpu.VMEM((B, H + 2, W, 3 * cp), jnp.bfloat16),      # conv2 slab
        ],
        compiler_params=pltpu.CompilerParams(
            dimension_semantics=("parallel",)),      # shard batch across TCs (v7x)
    )(*args)


# ----------------------- parameter init / one-time prep ---------------------

def init_bn(c):
    return dict(gamma=jnp.ones((c,), jnp.float32),
                beta=jnp.zeros((c,), jnp.float32),
                mean=jnp.zeros((c,), jnp.float32),
                var=jnp.ones((c,), jnp.float32))


def init_block_params(key, inplanes, planes, has_downsample):
    ks = jax.random.split(key, 3)
    p = {
        "w1": jax.random.normal(ks[0], (3, 3, inplanes, planes), jnp.float32)
              * math.sqrt(2.0 / (9 * inplanes)),
        "bn1": init_bn(planes),
        "w2": jax.random.normal(ks[1], (3, 3, planes, planes), jnp.float32)
              * math.sqrt(2.0 / (9 * planes)),
        "bn2": init_bn(planes),
    }
    if has_downsample:
        p["dw"] = (jax.random.normal(ks[2], (inplanes, planes), jnp.float32)
                   * math.sqrt(2.0 / inplanes))
        p["dbn"] = init_bn(planes)
    return p


def _bn_affine_padded(bn, cp):
    scale = bn["gamma"] / jnp.sqrt(bn["var"] + BN_EPS)
    bias = bn["beta"] - bn["mean"] * scale
    pad = cp - scale.shape[0]
    return (jnp.pad(scale, (0, pad)).reshape(1, cp).astype(jnp.float32),
            jnp.pad(bias, (0, pad)).reshape(1, cp).astype(jnp.float32))


def _pad_conv3x3_wide(w_hwio, cin_p, cout_p):
    """[3,3,Cin,Cout] -> [3, 3*Cin_p, Cout_p] bf16 (K index = dw*Cin_p + c)."""
    kh, kw, cin, cout = w_hwio.shape
    w = jnp.pad(w_hwio, ((0, 0), (0, 0), (0, cin_p - cin), (0, cout_p - cout)))
    return w.reshape(kh, kw * cin_p, cout_p).astype(jnp.bfloat16)


def prepare_block_params(raw, has_downsample):
    """One-time prep: fold BN, pad channels to 128, widen K, cast to bf16."""
    cin, cout = raw["w1"].shape[2], raw["w1"].shape[3]
    cin_p, cp = _round_up(cin, LANE), _round_up(cout, LANE)
    prm = {"w1": _pad_conv3x3_wide(raw["w1"], cin_p, cp),
           "w2": _pad_conv3x3_wide(raw["w2"], cp, cp)}
    prm["s1"], prm["b1"] = _bn_affine_padded(raw["bn1"], cp)
    prm["s2"], prm["b2"] = _bn_affine_padded(raw["bn2"], cp)
    if has_downsample:
        prm["dw"] = jnp.pad(raw["dw"], ((0, cin_p - cin), (0, cp - cout))
                            ).astype(jnp.bfloat16)
        prm["ds"], prm["db"] = _bn_affine_padded(raw["dbn"], cp)
    return prm


# -------------------- activation format helpers (once per net) --------------

def to_nhwc_padded(x_nchw, cin_p):
    x = jnp.transpose(x_nchw, (0, 2, 3, 1))
    c = x.shape[-1]
    x = jnp.pad(x, ((0, 0), (0, 0), (0, 0), (0, cin_p - c)))
    return x.astype(jnp.bfloat16)


def from_nhwc_padded(y_nhwc_p, planes):
    return jnp.transpose(y_nhwc_p[..., :planes].astype(jnp.float32),
                         (0, 3, 1, 2))


# -------------------------- plain-JAX reference -----------------------------

def _ref_block(x_nchw, raw, has_downsample):
    def bn(y, b):
        scale = b["gamma"] / jnp.sqrt(b["var"] + BN_EPS)
        return y * scale + (b["beta"] - b["mean"] * scale)

    bf = lambda a: a.astype(jnp.bfloat16).astype(jnp.float32)
    conv = lambda a, w: jax.lax.conv_general_dilated(
        bf(a), bf(w), (1, 1), ((1, 1), (1, 1)),
        dimension_numbers=("NHWC", "HWIO", "NHWC"))

    x = jnp.transpose(x_nchw, (0, 2, 3, 1)).astype(jnp.float32)
    out = jnp.maximum(bn(conv(x, raw["w1"]), raw["bn1"]), 0.0)
    out = bn(conv(out, raw["w2"]), raw["bn2"])
    if has_downsample:
        ident = bn(jnp.einsum("nhwc,cd->nhwd", bf(x), bf(raw["dw"])), raw["dbn"])
    else:
        ident = x
    out = jnp.maximum(out + ident, 0.0)
    return jnp.transpose(out, (0, 3, 1, 2))


# ----------------------------------- main -----------------------------------

if __name__ == "__main__":
    key = jax.random.PRNGKey(0)
    k1, k2, kx = jax.random.split(key, 3)

    # Block A: inplanes == planes == 16, stride 1, identity residual.
    raw_a = init_block_params(k1, 16, 16, has_downsample=False)
    prm_a = prepare_block_params(raw_a, has_downsample=False)
    # Block B: 16 -> 32 channels, fused 1x1-conv + BN downsample residual.
    raw_b = init_block_params(k2, 16, 32, has_downsample=True)
    prm_b = prepare_block_params(raw_b, has_downsample=True)

    x = jax.random.normal(kx, (2, 16, 16, 16), jnp.float32)        # NCHW
    cin_p = prm_a["w1"].shape[1] // 3
    x_p = to_nhwc_padded(x, cin_p)                                  # NHWC bf16, padded

    fwd_a = jax.jit(functools.partial(basic_block_forward, has_downsample=False))
    fwd_b = jax.jit(functools.partial(basic_block_forward, has_downsample=True))

    # Blocks chain directly in padded-NHWC bf16 (no repack between blocks).
    y_a_p = jax.block_until_ready(fwd_a(prm_a, x_p))
    y_b_p = jax.block_until_ready(fwd_b(prm_b, y_a_p))

    y_a = from_nhwc_padded(y_a_p, 16)
    y_b = from_nhwc_padded(y_b_p, 32)

    assert y_a.shape == (2, 16, 16, 16), y_a.shape
    assert y_b.shape == (2, 32, 16, 16), y_b.shape
    assert bool(jnp.all(jnp.isfinite(y_a))) and bool(jnp.all(jnp.isfinite(y_b)))

    # References see the same bf16-stored activations the kernel sees.
    x_q = x.astype(jnp.bfloat16).astype(jnp.float32)
    ref_a = _ref_block(x_q, raw_a, has_downsample=False)
    ref_b = _ref_block(y_a, raw_b, has_downsample=True)
    assert jnp.allclose(y_a, ref_a, atol=3e-2, rtol=3e-2), \
        float(jnp.max(jnp.abs(y_a - ref_a)))
    assert jnp.allclose(y_b, ref_b, atol=3e-2, rtol=3e-2), \
        float(jnp.max(jnp.abs(y_b - ref_b)))

    print("KERNEL_OK")
</pallas_src>

<mosaic_0001>
module attributes {stable_mosaic.version = 11 : i64} {
  func.func @_basic_block_kernel(%arg0: i32, %arg1: memref<1x16x16x128xbf16, #tpu.memory_space<vmem>>, %arg2: memref<3x384x128xbf16, #tpu.memory_space<vmem>>, %arg3: memref<1x128xf32, #tpu.memory_space<vmem>>, %arg4: memref<1x128xf32, #tpu.memory_space<vmem>>, %arg5: memref<3x384x128xbf16, #tpu.memory_space<vmem>>, %arg6: memref<1x128xf32, #tpu.memory_space<vmem>>, %arg7: memref<1x128xf32, #tpu.memory_space<vmem>>, %arg8: memref<1x16x16x128xbf16, #tpu.memory_space<vmem>>, %arg9: memref<1x18x16x384xbf16, #tpu.memory_space<vmem>>, %arg10: memref<1x18x16x384xbf16, #tpu.memory_space<vmem>>) attributes {dimension_semantics = [#tpu.dimension_semantics<parallel>], iteration_bounds = array<i64: 2>, scalar_prefetch = 0 : i64, scratch_operands = 2 : i64, tpu.core_type = #tpu.core_type<tc>, window_params = [{transform_indices = @transform_0, window_bounds = array<i64: 1, 16, 16, 128>}, {pipeline_mode = #tpu.pipeline_mode<synchronous>, transform_indices = @transform_1, window_bounds = array<i64: 3, 384, 128>}, {pipeline_mode = #tpu.pipeline_mode<synchronous>, transform_indices = @transform_2, window_bounds = array<i64: 1, 128>}, {pipeline_mode = #tpu.pipeline_mode<synchronous>, transform_indices = @transform_3, window_bounds = array<i64: 1, 128>}, {pipeline_mode = #tpu.pipeline_mode<synchronous>, transform_indices = @transform_4, window_bounds = array<i64: 3, 384, 128>}, {pipeline_mode = #tpu.pipeline_mode<synchronous>, transform_indices = @transform_5, window_bounds = array<i64: 1, 128>}, {pipeline_mode = #tpu.pipeline_mode<synchronous>, transform_indices = @transform_6, window_bounds = array<i64: 1, 128>}, {transform_indices = @transform_7, window_bounds = array<i64: 1, 16, 16, 128>}]} {
    %c0 = arith.constant 0 : index
    %c0_0 = arith.constant 0 : index
    %0 = vector.load %arg3[%c0, %c0_0] : memref<1x128xf32, #tpu.memory_space<vmem>>, vector<1x128xf32>
    %c0_1 = arith.constant 0 : index
    %c0_2 = arith.constant 0 : index
    %1 = vector.load %arg4[%c0_1, %c0_2] : memref<1x128xf32, #tpu.memory_space<vmem>>, vector<1x128xf32>
    %c0_3 = arith.constant 0 : index
    %c0_4 = arith.constant 0 : index
    %2 = vector.load %arg6[%c0_3, %c0_4] : memref<1x128xf32, #tpu.memory_space<vmem>>, vector<1x128xf32>
    %c0_5 = arith.constant 0 : index
    %c0_6 = arith.constant 0 : index
    %3 = vector.load %arg7[%c0_5, %c0_6] : memref<1x128xf32, #tpu.memory_space<vmem>>, vector<1x128xf32>
    %cst = arith.constant 0.000000e+00 : bf16
    %4 = vector.broadcast %cst : bf16 to vector<1x1x16x384xbf16>
    %c0_7 = arith.constant 0 : index
    %c0_8 = arith.constant 0 : index
    %c0_9 = arith.constant 0 : index
    %c0_10 = arith.constant 0 : index
    %5 = vector.load %arg9[%c0_7, %c0_8, %c0_9, %c0_10] : memref<1x18x16x384xbf16, #tpu.memory_space<vmem>>, vector<1x1x16x384xbf16>
    tpu.vector_store %arg9[%c0_7, %c0_8, %c0_9, %c0_10], %4 {strides = array<i32>} : memref<1x18x16x384xbf16, #tpu.memory_space<vmem>>, vector<1x1x16x384xbf16>,
    %c0_11 = arith.constant 0 : index
    %c17 = arith.constant 17 : index
    %c0_12 = arith.constant 0 : index
    %c0_13 = arith.constant 0 : index
    %6 = vector.load %arg9[%c0_11, %c17, %c0_12, %c0_13] : memref<1x18x16x384xbf16, #tpu.memory_space<vmem>>, vector<1x1x16x384xbf16>
    tpu.vector_store %arg9[%c0_11, %c17, %c0_12, %c0_13], %4 {strides = array<i32>} : memref<1x18x16x384xbf16, #tpu.memory_space<vmem>>, vector<1x1x16x384xbf16>,
    %c0_14 = arith.constant 0 : index
    %c0_15 = arith.constant 0 : index
    %c0_16 = arith.constant 0 : index
    %c0_17 = arith.constant 0 : index
    %7 = vector.load %arg1[%c0_14, %c0_15, %c0_16, %c0_17] : memref<1x16x16x128xbf16, #tpu.memory_space<vmem>>, vector<1x16x16x128xbf16>
    %c0_18 = arith.constant 0 : index
    %c1 = arith.constant 1 : index
    %c0_19 = arith.constant 0 : index
    %c128 = arith.constant 128 : index
    %8 = vector.load %arg9[%c0_18, %c1, %c0_19, %c128] : memref<1x18x16x384xbf16, #tpu.memory_space<vmem>>, vector<1x16x16x128xbf16>
    tpu.vector_store %arg9[%c0_18, %c1, %c0_19, %c128], %7 {strides = array<i32>} : memref<1x18x16x384xbf16, #tpu.memory_space<vmem>>, vector<1x16x16x128xbf16>,
    %c0_20 = arith.constant 0 : index
    %c0_21 = arith.constant 0 : index
    %c0_22 = arith.constant 0 : index
    %c0_23 = arith.constant 0 : index
    %9 = vector.load %arg1[%c0_20, %c0_21, %c0_22, %c0_23] : memref<1x16x16x128xbf16, #tpu.memory_space<vmem>>, vector<1x16x15x128xbf16>
    %c0_24 = arith.constant 0 : index
    %c1_25 = arith.constant 1 : index
    %c1_26 = arith.constant 1 : index
    %c0_27 = arith.constant 0 : index
    %10 = vector.load %arg9[%c0_24, %c1_25, %c1_26, %c0_27] : memref<1x18x16x384xbf16, #tpu.memory_space<vmem>>, vector<1x16x15x128xbf16>
    tpu.vector_store %arg9[%c0_24, %c1_25, %c1_26, %c0_27], %9 {strides = array<i32>} : memref<1x18x16x384xbf16, #tpu.memory_space<vmem>>, vector<1x16x15x128xbf16>,
    %cst_28 = arith.constant 0.000000e+00 : bf16
    %11 = vector.broadcast %cst_28 : bf16 to vector<1x16x1x128xbf16>
    %c0_29 = arith.constant 0 : index
    %c1_30 = arith.constant 1 : index
    %c0_31 = arith.constant 0 : index
    %c0_32 = arith.constant 0 : index
    %12 = vector.load %arg9[%c0_29, %c1_30, %c0_31, %c0_32] : memref<1x18x16x384xbf16, #tpu.memory_space<vmem>>, vector<1x16x1x128xbf16>
    tpu.vector_store %arg9[%c0_29, %c1_30, %c0_31, %c0_32], %11 {strides = array<i32>} : memref<1x18x16x384xbf16, #tpu.memory_space<vmem>>, vector<1x16x1x128xbf16>,
    %c0_33 = arith.constant 0 : index
    %c0_34 = arith.constant 0 : index
    %c1_35 = arith.constant 1 : index
    %c0_36 = arith.constant 0 : index
    %13 = vector.load %arg1[%c0_33, %c0_34, %c1_35, %c0_36] : memref<1x16x16x128xbf16, #tpu.memory_space<vmem>>, vector<1x16x15x128xbf16>
    %c0_37 = arith.constant 0 : index
    %c1_38 = arith.constant 1 : index
    %c0_39 = arith.constant 0 : index
    %c256 = arith.constant 256 : index
    %14 = vector.load %arg9[%c0_37, %c1_38, %c0_39, %c256] : memref<1x18x16x384xbf16, #tpu.memory_space<vmem>>, vector<1x16x15x128xbf16>
    tpu.vector_store %arg9[%c0_37, %c1_38, %c0_39, %c256], %13 {strides = array<i32>} : memref<1x18x16x384xbf16, #tpu.memory_space<vmem>>, vector<1x16x15x128xbf16>,
    %cst_40 = arith.constant 0.000000e+00 : bf16
    %15 = vector.broadcast %cst_40 : bf16 to vector<1x16x1x128xbf16>
    %c0_41 = arith.constant 0 : index
    %c1_42 = arith.constant 1 : index
    %c15 = arith.constant 15 : index
    %c256_43 = arith.constant 256 : index
    %16 = vector.load %arg9[%c0_41, %c1_42, %c15, %c256_43] : memref<1x18x16x384xbf16, #tpu.memory_space<vmem>>, vector<1x16x1x128xbf16>
    tpu.vector_store %arg9[%c0_41, %c1_42, %c15, %c256_43], %15 {strides = array<i32>} : memref<1x18x16x384xbf16, #tpu.memory_space<vmem>>, vector<1x16x1x128xbf16>,
    %cst_44 = arith.constant 0.000000e+00 : bf16
    %17 = vector.broadcast %cst_44 : bf16 to vector<1x1x16x384xbf16>
    %c0_45 = arith.constant 0 : index
    %c0_46 = arith.constant 0 : index
    %c0_47 = arith.constant 0 : index
    %c0_48 = arith.constant 0 : index
    %18 = vector.load %arg10[%c0_45, %c0_46, %c0_47, %c0_48] : memref<1x18x16x384xbf16, #tpu.memory_space<vmem>>, vector<1x1x16x384xbf16>
    tpu.vector_store %arg10[%c0_45, %c0_46, %c0_47, %c0_48], %17 {strides = array<i32>} : memref<1x18x16x384xbf16, #tpu.memory_space<vmem>>, vector<1x1x16x384xbf16>,
    %c0_49 = arith.constant 0 : index
    %c17_50 = arith.constant 17 : index
    %c0_51 = arith.constant 0 : index
    %c0_52 = arith.constant 0 : index
    %19 = vector.load %arg10[%c0_49, %c17_50, %c0_51, %c0_52] : memref<1x18x16x384xbf16, #tpu.memory_space<vmem>>, vector<1x1x16x384xbf16>
    tpu.vector_store %arg10[%c0_49, %c17_50, %c0_51, %c0_52], %17 {strides = array<i32>} : memref<1x18x16x384xbf16, #tpu.memory_space<vmem>>, vector<1x1x16x384xbf16>,
    %cst_53 = arith.constant 0.000000e+00 : f32
    %20 = vector.broadcast %cst_53 : f32 to vector<128x128xf32>
    %c0_54 = arith.constant 0 : index
    %c0_55 = arith.constant 0 : index
    %c0_56 = arith.constant 0 : index
    %c0_57 = arith.constant 0 : index
    %21 = vector.load %arg9[%c0_54, %c0_55, %c0_56, %c0_57] : memref<1x18x16x384xbf16, #tpu.memory_space<vmem>>, vector<1x8x16x384xbf16>
    %22 = vector.shape_cast %21 : vector<1x8x16x384xbf16> to vector<128x384xbf16>
    %c0_58 = arith.constant 0 : index
    %c0_59 = arith.constant 0 : index
    %c0_60 = arith.constant 0 : index
    %23 = vector.load %arg2[%c0_58, %c0_59, %c0_60] : memref<3x384x128xbf16, #tpu.memory_space<vmem>>, vector<1x384x128xbf16>
    %24 = vector.shape_cast %23 : vector<1x384x128xbf16> to vector<384x128xbf16>
    %cst_61 = arith.constant dense<0.000000e+00> : vector<128x128xf32>
    %25 = tpu.matmul %22, %24, %cst_61 {dimension_numbers = #tpu.dot_dimension_numbers<[1], [0], [0], [1], [0, 0, 1, 1], [], []>} : vector<128x384xbf16>, vector<384x128xbf16>, vector<128x128xf32> -> vector<128x128xf32>
    %26 = arith.addf %20, %25 : vector<128x128xf32>
    %c0_62 = arith.constant 0 : index
    %c1_63 = arith.constant 1 : index
    %c0_64 = arith.constant 0 : index
    %c0_65 = arith.constant 0 : index
    %27 = vector.load %arg9[%c0_62, %c1_63, %c0_64, %c0_65] : memref<1x18x16x384xbf16, #tpu.memory_space<vmem>>, vector<1x8x16x384xbf16>
    %28 = vector.shape_cast %27 : vector<1x8x16x384xbf16> to vector<128x384xbf16>
    %c1_66 = arith.constant 1 : index
    %c0_67 = arith.constant 0 : index
    %c0_68 = arith.constant 0 : index
    %29 = vector.load %arg2[%c1_66, %c0_67, %c0_68] : memref<3x384x128xbf16, #tpu.memory_space<vmem>>, vector<1x384x128xbf16>
    %30 = vector.shape_cast %29 : vector<1x384x128xbf16> to vector<384x128xbf16>
    %cst_69 = arith.constant dense<0.000000e+00> : vector<128x128xf32>
    %31 = tpu.matmul %28, %30, %cst_69 {dimension_numbers = #tpu.dot_dimension_numbers<[1], [0], [0], [1], [0, 0, 1, 1], [], []>} : vector<128x384xbf16>, vector<384x128xbf16>, vector<128x128xf32> -> vector<128x128xf32>
    %32 = arith.addf %26, %31 : vector<128x128xf32>
    %c0_70 = arith.constant 0 : index
    %c2 = arith.constant 2 : index
    %c0_71 = arith.constant 0 : index
    %c0_72 = arith.constant 0 : index
    %33 = vector.load %arg9[%c0_70, %c2, %c0_71, %c0_72] : memref<1x18x16x384xbf16, #tpu.memory_space<vmem>>, vector<1x8x16x384xbf16>
    %34 = vector.shape_cast %33 : vector<1x8x16x384xbf16> to vector<128x384xbf16>
    %c2_73 = arith.constant 2 : index
    %c0_74 = arith.constant 0 : index
    %c0_75 = arith.constant 0 : index
    %35 = vector.load %arg2[%c2_73, %c0_74, %c0_75] : memref<3x384x128xbf16, #tpu.memory_space<vmem>>, vector<1x384x128xbf16>
    %36 = vector.shape_cast %35 : vector<1x384x128xbf16> to vector<384x128xbf16>
    %cst_76 = arith.constant dense<0.000000e+00> : vector<128x128xf32>
    %37 = tpu.matmul %34, %36, %cst_76 {dimension_numbers = #tpu.dot_dimension_numbers<[1], [0], [0], [1], [0, 0, 1, 1], [], []>} : vector<128x384xbf16>, vector<384x128xbf16>, vector<128x128xf32> -> vector<128x128xf32>
    %38 = arith.addf %32, %37 : vector<128x128xf32>
    %39 = vector.broadcast %0 : vector<1x128xf32> to vector<128x128xf32>
    %40 = arith.mulf %38, %39 : vector<128x128xf32>
    %41 = vector.broadcast %1 : vector<1x128xf32> to vector<128x128xf32>
    %42 = arith.addf %40, %41 : vector<128x128xf32>
    %cst_77 = arith.constant 0.000000e+00 : f32
    %43 = vector.broadcast %cst_77 : f32 to vector<128x128xf32>
    %44 = arith.maximumf %42, %43 : vector<128x128xf32>
    %45 = arith.truncf %44 : vector<128x128xf32> to vector<128x128xbf16>
    %46 = vector.shape_cast %45 : vector<128x128xbf16> to vector<1x8x16x128xbf16>
    %c0_78 = arith.constant 0 : index
    %c1_79 = arith.constant 1 : index
    %c0_80 = arith.constant 0 : index
    %c128_81 = arith.constant 128 : index
    %47 = vector.load %arg10[%c0_78, %c1_79, %c0_80, %c128_81] : memref<1x18x16x384xbf16, #tpu.memory_space<vmem>>, vector<1x8x16x128xbf16>
    tpu.vector_store %arg10[%c0_78, %c1_79, %c0_80, %c128_81], %46 {strides = array<i32>} : memref<1x18x16x384xbf16, #tpu.memory_space<vmem>>, vector<1x8x16x128xbf16>,
    %48 = vector.extract_strided_slice %46 {offsets = [0, 0, 0, 0], sizes = [1, 8, 15, 128], strides = [1, 1, 1, 1]} : vector<1x8x16x128xbf16> to vector<1x8x15x128xbf16>
    %c0_82 = arith.constant 0 : index
    %c1_83 = arith.constant 1 : index
    %c1_84 = arith.constant 1 : index
    %c0_85 = arith.constant 0 : index
    %49 = vector.load %arg10[%c0_82, %c1_83, %c1_84, %c0_85] : memref<1x18x16x384xbf16, #tpu.memory_space<vmem>>, vector<1x8x15x128xbf16>
    tpu.vector_store %arg10[%c0_82, %c1_83, %c1_84, %c0_85], %48 {strides = array<i32>} : memref<1x18x16x384xbf16, #tpu.memory_space<vmem>>, vector<1x8x15x128xbf16>,
    %cst_86 = arith.constant 0.000000e+00 : bf16
    %50 = vector.broadcast %cst_86 : bf16 to vector<1x8x1x128xbf16>
    %c0_87 = arith.constant 0 : index
    %c1_88 = arith.constant 1 : index
    %c0_89 = arith.constant 0 : index
    %c0_90 = arith.constant 0 : index
    %51 = vector.load %arg10[%c0_87, %c1_88, %c0_89, %c0_90] : memref<1x18x16x384xbf16, #tpu.memory_space<vmem>>, vector<1x8x1x128xbf16>
    tpu.vector_store %arg10[%c0_87, %c1_88, %c0_89, %c0_90], %50 {strides = array<i32>} : memref<1x18x16x384xbf16, #tpu.memory_space<vmem>>, vector<1x8x1x128xbf16>,
    %52 = vector.extract_strided_slice %46 {offsets = [0, 0, 1, 0], sizes = [1, 8, 15, 128], strides = [1, 1, 1, 1]} : vector<1x8x16x128xbf16> to vector<1x8x15x128xbf16>
    %c0_91 = arith.constant 0 : index
    %c1_92 = arith.constant 1 : index
    %c0_93 = arith.constant 0 : index
    %c256_94 = arith.constant 256 : index
    %53 = vector.load %arg10[%c0_91, %c1_92, %c0_93, %c256_94] : memref<1x18x16x384xbf16, #tpu.memory_space<vmem>>, vector<1x8x15x128xbf16>
    tpu.vector_store %arg10[%c0_91, %c1_92, %c0_93, %c256_94], %52 {strides = array<i32>} : memref<1x18x16x384xbf16, #tpu.memory_space<vmem>>, vector<1x8x15x128xbf16>,
    %cst_95 = arith.constant 0.000000e+00 : bf16
    %54 = vector.broadcast %cst_95 : bf16 to vector<1x8x1x128xbf16>
    %c0_96 = arith.constant 0 : index
    %c1_97 = arith.constant 1 : index
    %c15_98 = arith.constant 15 : index
    %c256_99 = arith.constant 256 : index
    %55 = vector.load %arg10[%c0_96, %c1_97, %c15_98, %c256_99] : memref<1x18x16x384xbf16, #tpu.memory_space<vmem>>, vector<1x8x1x128xbf16>
    tpu.vector_store %arg10[%c0_96, %c1_97, %c15_98, %c256_99], %54 {strides = array<i32>} : memref<1x18x16x384xbf16, #tpu.memory_space<vmem>>, vector<1x8x1x128xbf16>,
    %cst_100 = arith.constant 0.000000e+00 : f32
    %56 = vector.broadcast %cst_100 : f32 to vector<128x128xf32>
    %c0_101 = arith.constant 0 : index
    %c8 = arith.constant 8 : index
    %c0_102 = arith.constant 0 : index
    %c0_103 = arith.constant 0 : index
    %57 = vector.load %arg9[%c0_101, %c8, %c0_102, %c0_103] : memref<1x18x16x384xbf16, #tpu.memory_space<vmem>>, vector<1x8x16x384xbf16>
    %58 = vector.shape_cast %57 : vector<1x8x16x384xbf16> to vector<128x384xbf16>
    %c0_104 = arith.constant 0 : index
    %c0_105 = arith.constant 0 : index
    %c0_106 = arith.constant 0 : index
    %59 = vector.load %arg2[%c0_104, %c0_105, %c0_106] : memref<3x384x128xbf16, #tpu.memory_space<vmem>>, vector<1x384x128xbf16>
    %60 = vector.shape_cast %59 : vector<1x384x128xbf16> to vector<384x128xbf16>
    %cst_107 = arith.constant dense<0.000000e+00> : vector<128x128xf32>
    %61 = tpu.matmul %58, %60, %cst_107 {dimension_numbers = #tpu.dot_dimension_numbers<[1], [0], [0], [1], [0, 0, 1, 1], [], []>} : vector<128x384xbf16>, vector<384x128xbf16>, vector<128x128xf32> -> vector<128x128xf32>
    %62 = arith.addf %56, %61 : vector<128x128xf32>
    %c0_108 = arith.constant 0 : index
    %c9 = arith.constant 9 : index
    %c0_109 = arith.constant 0 : index
    %c0_110 = arith.constant 0 : index
    %63 = vector.load %arg9[%c0_108, %c9, %c0_109, %c0_110] : memref<1x18x16x384xbf16, #tpu.memory_space<vmem>>, vector<1x8x16x384xbf16>
    %64 = vector.shape_cast %63 : vector<1x8x16x384xbf16> to vector<128x384xbf16>
    %c1_111 = arith.constant 1 : index
    %c0_112 = arith.constant 0 : index
    %c0_113 = arith.constant 0 : index
    %65 = vector.load %arg2[%c1_111, %c0_112, %c0_113] : memref<3x384x128xbf16, #tpu.memory_space<vmem>>, vector<1x384x128xbf16>
    %66 = vector.shape_cast %65 : vector<1x384x128xbf16> to vector<384x128xbf16>
    %cst_114 = arith.constant dense<0.000000e+00> : vector<128x128xf32>
    %67 = tpu.matmul %64, %66, %cst_114 {dimension_numbers = #tpu.dot_dimension_numbers<[1], [0], [0], [1], [0, 0, 1, 1], [], []>} : vector<128x384xbf16>, vector<384x128xbf16>, vector<128x128xf32> -> vector<128x128xf32>
    %68 = arith.addf %62, %67 : vector<128x128xf32>
    %c0_115 = arith.constant 0 : index
    %c10 = arith.constant 10 : index
    %c0_116 = arith.constant 0 : index
    %c0_117 = arith.constant 0 : index
    %69 = vector.load %arg9[%c0_115, %c10, %c0_116, %c0_117] : memref<1x18x16x384xbf16, #tpu.memory_space<vmem>>, vector<1x8x16x384xbf16>
    %70 = vector.shape_cast %69 : vector<1x8x16x384xbf16> to vector<128x384xbf16>
    %c2_118 = arith.constant 2 : index
    %c0_119 = arith.constant 0 : index
    %c0_120 = arith.constant 0 : index
    %71 = vector.load %arg2[%c2_118, %c0_119, %c0_120] : memref<3x384x128xbf16, #tpu.memory_space<vmem>>, vector<1x384x128xbf16>
    %72 = vector.shape_cast %71 : vector<1x384x128xbf16> to vector<384x128xbf16>
    %cst_121 = arith.constant dense<0.000000e+00> : vector<128x128xf32>
    %73 = tpu.matmul %70, %72, %cst_121 {dimension_numbers = #tpu.dot_dimension_numbers<[1], [0], [0], [1], [0, 0, 1, 1], [], []>} : vector<128x384xbf16>, vector<384x128xbf16>, vector<128x128xf32> -> vector<128x128xf32>
    %74 = arith.addf %68, %73 : vector<128x128xf32>
    %75 = vector.broadcast %0 : vector<1x128xf32> to vector<128x128xf32>
    %76 = arith.mulf %74, %75 : vector<128x128xf32>
    %77 = vector.broadcast %1 : vector<1x128xf32> to vector<128x128xf32>
    %78 = arith.addf %76, %77 : vector<128x128xf32>
    %cst_122 = arith.constant 0.000000e+00 : f32
    %79 = vector.broadcast %cst_122 : f32 to vector<128x128xf32>
    %80 = arith.maximumf %78, %79 : vector<128x128xf32>
    %81 = arith.truncf %80 : vector<128x128xf32> to vector<128x128xbf16>
    %82 = vector.shape_cast %81 : vector<128x128xbf16> to vector<1x8x16x128xbf16>
    %c0_123 = arith.constant 0 : index
    %c9_124 = arith.constant 9 : index
    %c0_125 = arith.constant 0 : index
    %c128_126 = arith.constant 128 : index
    %83 = vector.load %arg10[%c0_123, %c9_124, %c0_125, %c128_126] : memref<1x18x16x384xbf16, #tpu.memory_space<vmem>>, vector<1x8x16x128xbf16>
    tpu.vector_store %arg10[%c0_123, %c9_124, %c0_125, %c128_126], %82 {strides = array<i32>} : memref<1x18x16x384xbf16, #tpu.memory_space<vmem>>, vector<1x8x16x128xbf16>,
    %84 = vector.extract_strided_slice %82 {offsets = [0, 0, 0, 0], sizes = [1, 8, 15, 128], strides = [1, 1, 1, 1]} : vector<1x8x16x128xbf16> to vector<1x8x15x128xbf16>
    %c0_127 = arith.constant 0 : index
    %c9_128 = arith.constant 9 : index
    %c1_129 = arith.constant 1 : index
    %c0_130 = arith.constant 0 : index
    %85 = vector.load %arg10[%c0_127, %c9_128, %c1_129, %c0_130] : memref<1x18x16x384xbf16, #tpu.memory_space<vmem>>, vector<1x8x15x128xbf16>
    tpu.vector_store %arg10[%c0_127, %c9_128, %c1_129, %c0_130], %84 {strides = array<i32>} : memref<1x18x16x384xbf16, #tpu.memory_space<vmem>>, vector<1x8x15x128xbf16>,
    %cst_131 = arith.constant 0.000000e+00 : bf16
    %86 = vector.broadcast %cst_131 : bf16 to vector<1x8x1x128xbf16>
    %c0_132 = arith.constant 0 : index
    %c9_133 = arith.constant 9 : index
    %c0_134 = arith.constant 0 : index
    %c0_135 = arith.constant 0 : index
    %87 = vector.load %arg10[%c0_132, %c9_133, %c0_134, %c0_135] : memref<1x18x16x384xbf16, #tpu.memory_space<vmem>>, vector<1x8x1x128xbf16>
    tpu.vector_store %arg10[%c0_132, %c9_133, %c0_134, %c0_135], %86 {strides = array<i32>} : memref<1x18x16x384xbf16, #tpu.memory_space<vmem>>, vector<1x8x1x128xbf16>,
    %88 = vector.extract_strided_slice %82 {offsets = [0, 0, 1, 0], sizes = [1, 8, 15, 128], strides = [1, 1, 1, 1]} : vector<1x8x16x128xbf16> to vector<1x8x15x128xbf16>
    %c0_136 = arith.constant 0 : index
    %c9_137 = arith.constant 9 : index
    %c0_138 = arith.constant 0 : index
    %c256_139 = arith.constant 256 : index
    %89 = vector.load %arg10[%c0_136, %c9_137, %c0_138, %c256_139] : memref<1x18x16x384xbf16, #tpu.memory_space<vmem>>, vector<1x8x15x128xbf16>
    tpu.vector_store %arg10[%c0_136, %c9_137, %c0_138, %c256_139], %88 {strides = array<i32>} : memref<1x18x16x384xbf16, #tpu.memory_space<vmem>>, vector<1x8x15x128xbf16>,
    %cst_140 = arith.constant 0.000000e+00 : bf16
    %90 = vector.broadcast %cst_140 : bf16 to vector<1x8x1x128xbf16>
    %c0_141 = arith.constant 0 : index
    %c9_142 = arith.constant 9 : index
    %c15_143 = arith.constant 15 : index
    %c256_144 = arith.constant 256 : index
    %91 = vector.load %arg10[%c0_141, %c9_142, %c15_143, %c256_144] : memref<1x18x16x384xbf16, #tpu.memory_space<vmem>>, vector<1x8x1x128xbf16>
    tpu.vector_store %arg10[%c0_141, %c9_142, %c15_143, %c256_144], %90 {strides = array<i32>} : memref<1x18x16x384xbf16, #tpu.memory_space<vmem>>, vector<1x8x1x128xbf16>,
    %cst_145 = arith.constant 0.000000e+00 : f32
    %92 = vector.broadcast %cst_145 : f32 to vector<128x128xf32>
    %c0_146 = arith.constant 0 : index
    %c0_147 = arith.constant 0 : index
    %c0_148 = arith.constant 0 : index
    %c0_149 = arith.constant 0 : index
    %93 = vector.load %arg10[%c0_146, %c0_147, %c0_148, %c0_149] : memref<1x18x16x384xbf16, #tpu.memory_space<vmem>>, vector<1x8x16x384xbf16>
    %94 = vector.shape_cast %93 : vector<1x8x16x384xbf16> to vector<128x384xbf16>
    %c0_150 = arith.constant 0 : index
    %c0_151 = arith.constant 0 : index
    %c0_152 = arith.constant 0 : index
    %95 = vector.load %arg5[%c0_150, %c0_151, %c0_152] : memref<3x384x128xbf16, #tpu.memory_space<vmem>>, vector<1x384x128xbf16>
    %96 = vector.shape_cast %95 : vector<1x384x128xbf16> to vector<384x128xbf16>
    %cst_153 = arith.constant dense<0.000000e+00> : vector<128x128xf32>
    %97 = tpu.matmul %94, %96, %cst_153 {dimension_numbers = #tpu.dot_dimension_numbers<[1], [0], [0], [1], [0, 0, 1, 1], [], []>} : vector<128x384xbf16>, vector<384x128xbf16>, vector<128x128xf32> -> vector<128x128xf32>
    %98 = arith.addf %92, %97 : vector<128x128xf32>
    %c0_154 = arith.constant 0 : index
    %c1_155 = arith.constant 1 : index
    %c0_156 = arith.constant 0 : index
    %c0_157 = arith.constant 0 : index
    %99 = vector.load %arg10[%c0_154, %c1_155, %c0_156, %c0_157] : memref<1x18x16x384xbf16, #tpu.memory_space<vmem>>, vector<1x8x16x384xbf16>
    %100 = vector.shape_cast %99 : vector<1x8x16x384xbf16> to vector<128x384xbf16>
    %c1_158 = arith.constant 1 : index
    %c0_159 = arith.constant 0 : index
    %c0_160 = arith.constant 0 : index
    %101 = vector.load %arg5[%c1_158, %c0_159, %c0_160] : memref<3x384x128xbf16, #tpu.memory_space<vmem>>, vector<1x384x128xbf16>
    %102 = vector.shape_cast %101 : vector<1x384x128xbf16> to vector<384x128xbf16>
    %cst_161 = arith.constant dense<0.000000e+00> : vector<128x128xf32>
    %103 = tpu.matmul %100, %102, %cst_161 {dimension_numbers = #tpu.dot_dimension_numbers<[1], [0], [0], [1], [0, 0, 1, 1], [], []>} : vector<128x384xbf16>, vector<384x128xbf16>, vector<128x128xf32> -> vector<128x128xf32>
    %104 = arith.addf %98, %103 : vector<128x128xf32>
    %c0_162 = arith.constant 0 : index
    %c2_163 = arith.constant 2 : index
    %c0_164 = arith.constant 0 : index
    %c0_165 = arith.constant 0 : index
    %105 = vector.load %arg10[%c0_162, %c2_163, %c0_164, %c0_165] : memref<1x18x16x384xbf16, #tpu.memory_space<vmem>>, vector<1x8x16x384xbf16>
    %106 = vector.shape_cast %105 : vector<1x8x16x384xbf16> to vector<128x384xbf16>
    %c2_166 = arith.constant 2 : index
    %c0_167 = arith.constant 0 : index
    %c0_168 = arith.constant 0 : index
    %107 = vector.load %arg5[%c2_166, %c0_167, %c0_168] : memref<3x384x128xbf16, #tpu.memory_space<vmem>>, vector<1x384x128xbf16>
    %108 = vector.shape_cast %107 : vector<1x384x128xbf16> to vector<384x128xbf16>
    %cst_169 = arith.constant dense<0.000000e+00> : vector<128x128xf32>
    %109 = tpu.matmul %106, %108, %cst_169 {dimension_numbers = #tpu.dot_dimension_numbers<[1], [0], [0], [1], [0, 0, 1, 1], [], []>} : vector<128x384xbf16>, vector<384x128xbf16>, vector<128x128xf32> -> vector<128x128xf32>
    %110 = arith.addf %104, %109 : vector<128x128xf32>
    %111 = vector.broadcast %2 : vector<1x128xf32> to vector<128x128xf32>
    %112 = arith.mulf %110, %111 : vector<128x128xf32>
    %113 = vector.broadcast %3 : vector<1x128xf32> to vector<128x128xf32>
    %114 = arith.addf %112, %113 : vector<128x128xf32>
    %c0_170 = arith.constant 0 : index
    %c0_171 = arith.constant 0 : index
    %c0_172 = arith.constant 0 : index
    %c0_173 = arith.constant 0 : index
    %115 = vector.load %arg1[%c0_170, %c0_171, %c0_172, %c0_173] : memref<1x16x16x128xbf16, #tpu.memory_space<vmem>>, vector<1x8x16x128xbf16>
    %116 = vector.shape_cast %115 : vector<1x8x16x128xbf16> to vector<128x128xbf16>
    %117 = arith.extf %116 : vector<128x128xbf16> to vector<128x128xf32>
    %118 = arith.addf %114, %117 : vector<128x128xf32>
    %cst_174 = arith.constant 0.000000e+00 : f32
    %119 = vector.broadcast %cst_174 : f32 to vector<128x128xf32>
    %120 = arith.maximumf %118, %119 : vector<128x128xf32>
    %121 = vector.shape_cast %120 : vector<128x128xf32> to vector<1x8x16x128xf32>
    %122 = arith.truncf %121 : vector<1x8x16x128xf32> to vector<1x8x16x128xbf16>
    %c0_175 = arith.constant 0 : index
    %c0_176 = arith.constant 0 : index
    %c0_177 = arith.constant 0 : index
    %c0_178 = arith.constant 0 : index
    %123 = vector.load %arg8[%c0_175, %c0_176, %c0_177, %c0_178] : memref<1x16x16x128xbf16, #tpu.memory_space<vmem>>, vector<1x8x16x128xbf16>
    tpu.vector_store %arg8[%c0_175, %c0_176, %c0_177, %c0_178], %122 {strides = array<i32>} : memref<1x16x16x128xbf16, #tpu.memory_space<vmem>>, vector<1x8x16x128xbf16>,
    %cst_179 = arith.constant 0.000000e+00 : f32
    %124 = vector.broadcast %cst_179 : f32 to vector<128x128xf32>
    %c0_180 = arith.constant 0 : index
    %c8_181 = arith.constant 8 : index
    %c0_182 = arith.constant 0 : index
    %c0_183 = arith.constant 0 : index
    %125 = vector.load %arg10[%c0_180, %c8_181, %c0_182, %c0_183] : memref<1x18x16x384xbf16, #tpu.memory_space<vmem>>, vector<1x8x16x384xbf16>
    %126 = vector.shape_cast %125 : vector<1x8x16x384xbf16> to vector<128x384xbf16>
    %c0_184 = arith.constant 0 : index
    %c0_185 = arith.constant 0 : index
    %c0_186 = arith.constant 0 : index
    %127 = vector.load %arg5[%c0_184, %c0_185, %c0_186] : memref<3x384x128xbf16, #tpu.memory_space<vmem>>, vector<1x384x128xbf16>
    %128 = vector.shape_cast %127 : vector<1x384x128xbf16> to vector<384x128xbf16>
    %cst_187 = arith.constant dense<0.000000e+00> : vector<128x128xf32>
    %129 = tpu.matmul %126, %128, %cst_187 {dimension_numbers = #tpu.dot_dimension_numbers<[1], [0], [0], [1], [0, 0, 1, 1], [], []>} : vector<128x384xbf16>, vector<384x128xbf16>, vector<128x128xf32> -> vector<128x128xf32>
    %130 = arith.addf %124, %129 : vector<128x128xf32>
    %c0_188 = arith.constant 0 : index
    %c9_189 = arith.constant 9 : index
    %c0_190 = arith.constant 0 : index
    %c0_191 = arith.constant 0 : index
    %131 = vector.load %arg10[%c0_188, %c9_189, %c0_190, %c0_191] : memref<1x18x16x384xbf16, #tpu.memory_space<vmem>>, vector<1x8x16x384xbf16>
    %132 = vector.shape_cast %131 : vector<1x8x16x384xbf16> to vector<128x384xbf16>
    %c1_192 = arith.constant 1 : index
    %c0_193 = arith.constant 0 : index
    %c0_194 = arith.constant 0 : index
    %133 = vector.load %arg5[%c1_192, %c0_193, %c0_194] : memref<3x384x128xbf16, #tpu.memory_space<vmem>>, vector<1x384x128xbf16>
    %134 = vector.shape_cast %133 : vector<1x384x128xbf16> to vector<384x128xbf16>
    %cst_195 = arith.constant dense<0.000000e+00> : vector<128x128xf32>
    %135 = tpu.matmul %132, %134, %cst_195 {dimension_numbers = #tpu.dot_dimension_numbers<[1], [0], [0], [1], [0, 0, 1, 1], [], []>} : vector<128x384xbf16>, vector<384x128xbf16>, vector<128x128xf32> -> vector<128x128xf32>
    %136 = arith.addf %130, %135 : vector<128x128xf32>
    %c0_196 = arith.constant 0 : index
    %c10_197 = arith.constant 10 : index
    %c0_198 = arith.constant 0 : index
    %c0_199 = arith.constant 0 : index
    %137 = vector.load %arg10[%c0_196, %c10_197, %c0_198, %c0_199] : memref<1x18x16x384xbf16, #tpu.memory_space<vmem>>, vector<1x8x16x384xbf16>
    %138 = vector.shape_cast %137 : vector<1x8x16x384xbf16> to vector<128x384xbf16>
    %c2_200 = arith.constant 2 : index
    %c0_201 = arith.constant 0 : index
    %c0_202 = arith.constant 0 : index
    %139 = vector.load %arg5[%c2_200, %c0_201, %c0_202] : memref<3x384x128xbf16, #tpu.memory_space<vmem>>, vector<1x384x128xbf16>
    %140 = vector.shape_cast %139 : vector<1x384x128xbf16> to vector<384x128xbf16>
    %cst_203 = arith.constant dense<0.000000e+00> : vector<128x128xf32>
    %141 = tpu.matmul %138, %140, %cst_203 {dimension_numbers = #tpu.dot_dimension_numbers<[1], [0], [0], [1], [0, 0, 1, 1], [], []>} : vector<128x384xbf16>, vector<384x128xbf16>, vector<128x128xf32> -> vector<128x128xf32>
    %142 = arith.addf %136, %141 : vector<128x128xf32>
    %143 = vector.broadcast %2 : vector<1x128xf32> to vector<128x128xf32>
    %144 = arith.mulf %142, %143 : vector<128x128xf32>
    %145 = vector.broadcast %3 : vector<1x128xf32> to vector<128x128xf32>
    %146 = arith.addf %144, %145 : vector<128x128xf32>
    %c0_204 = arith.constant 0 : index
    %c8_205 = arith.constant 8 : index
    %c0_206 = arith.constant 0 : index
    %c0_207 = arith.constant 0 : index
    %147 = vector.load %arg1[%c0_204, %c8_205, %c0_206, %c0_207] : memref<1x16x16x128xbf16, #tpu.memory_space<vmem>>, vector<1x8x16x128xbf16>
    %148 = vector.shape_cast %147 : vector<1x8x16x128xbf16> to vector<128x128xbf16>
    %149 = arith.extf %148 : vector<128x128xbf16> to vector<128x128xf32>
    %150 = arith.addf %146, %149 : vector<128x128xf32>
    %cst_208 = arith.constant 0.000000e+00 : f32
    %151 = vector.broadcast %cst_208 : f32 to vector<128x128xf32>
    %152 = arith.maximumf %150, %151 : vector<128x128xf32>
    %153 = vector.shape_cast %152 : vector<128x128xf32> to vector<1x8x16x128xf32>
    %154 = arith.truncf %153 : vector<1x8x16x128xf32> to vector<1x8x16x128xbf16>
    %c0_209 = arith.constant 0 : index
    %c8_210 = arith.constant 8 : index
    %c0_211 = arith.constant 0 : index
    %c0_212 = arith.constant 0 : index
    %155 = vector.load %arg8[%c0_209, %c8_210, %c0_211, %c0_212] : memref<1x16x16x128xbf16, #tpu.memory_space<vmem>>, vector<1x8x16x128xbf16>
    tpu.vector_store %arg8[%c0_209, %c8_210, %c0_211, %c0_212], %154 {strides = array<i32>} : memref<1x16x16x128xbf16, #tpu.memory_space<vmem>>, vector<1x8x16x128xbf16>,
    return
  }
  func.func @transform_0(%arg0: i32) -> (i32, i32, i32, i32) {
    %c0_i32 = arith.constant 0 : i32
    %c0_i32_0 = arith.constant 0 : i32
    %c0_i32_1 = arith.constant 0 : i32
    %c0_i32_2 = arith.constant 0 : i32
    return %arg0, %c0_i32, %c0_i32_0, %c0_i32_1 : i32, i32, i32, i32
  }
  func.func @transform_1(%arg0: i32) -> (i32, i32, i32) {
    %c0_i32 = arith.constant 0 : i32
    %c0_i32_0 = arith.constant 0 : i32
    %c0_i32_1 = arith.constant 0 : i32
    %c0_i32_2 = arith.constant 0 : i32
    return %c0_i32, %c0_i32_0, %c0_i32_1 : i32, i32, i32
  }
  func.func @transform_2(%arg0: i32) -> (i32, i32) {
    %c0_i32 = arith.constant 0 : i32
    %c0_i32_0 = arith.constant 0 : i32
    %c0_i32_1 = arith.constant 0 : i32
    return %c0_i32, %c0_i32_0 : i32, i32
  }
  func.func @transform_3(%arg0: i32) -> (i32, i32) {
    %c0_i32 = arith.constant 0 : i32
    %c0_i32_0 = arith.constant 0 : i32
    %c0_i32_1 = arith.constant 0 : i32
    return %c0_i32, %c0_i32_0 : i32, i32
  }
  func.func @transform_4(%arg0: i32) -> (i32, i32, i32) {
    %c0_i32 = arith.constant 0 : i32
    %c0_i32_0 = arith.constant 0 : i32
    %c0_i32_1 = arith.constant 0 : i32
    %c0_i32_2 = arith.constant 0 : i32
    return %c0_i32, %c0_i32_0, %c0_i32_1 : i32, i32, i32
  }
  func.func @transform_5(%arg0: i32) -> (i32, i32) {
    %c0_i32 = arith.constant 0 : i32
    %c0_i32_0 = arith.constant 0 : i32
    %c0_i32_1 = arith.constant 0 : i32
    return %c0_i32, %c0_i32_0 : i32, i32
  }
  func.func @transform_6(%arg0: i32) -> (i32, i32) {
    %c0_i32 = arith.constant 0 : i32
    %c0_i32_0 = arith.constant 0 : i32
    %c0_i32_1 = arith.constant 0 : i32
    return %c0_i32, %c0_i32_0 : i32, i32
  }
  func.func @transform_7(%arg0: i32) -> (i32, i32, i32, i32) {
    %c0_i32 = arith.constant 0 : i32
    %c0_i32_0 = arith.constant 0 : i32
    %c0_i32_1 = arith.constant 0 : i32
    %c0_i32_2 = arith.constant 0 : i32
    return %arg0, %c0_i32, %c0_i32_0, %c0_i32_1 : i32, i32, i32, i32
  }
}

</mosaic_0001>

<bundles_post_ra>
// kernel: basic_block_forward.1
= control target key start
LH: loop header
LB: loop body
LE: loop exit
PB: predicated region body
PF: predicated region fallthrough
CT: control target
= control target key end

     0   :  { %s13737_s0 = inlined_call_operand.hbm [shape: bf16[2,16,16,128], index: 0, kind: input, shape index: {}]   ;;  %s13738_s1 = inlined_call_operand.hbm [shape: bf16[3,384,128], index: 1, kind: input, shape index: {}]   ;;  %s13739_s2 = inlined_call_operand.vmem [shape: f32[1,128], index: 2, kind: input, shape index: {}]   ;;  %s13740_s3 = inlined_call_operand.hbm [shape: f32[1,128], index: 3, kind: input, shape index: {}]   ;;  %s13741_s4 = inlined_call_operand.hbm [shape: bf16[3,384,128], index: 4, kind: input, shape index: {}]   ;;  %s13742_s5 = inlined_call_operand.vmem [shape: f32[1,128], index: 5, kind: input, shape index: {}]   ;;  %s13743_s6 = inlined_call_operand.hbm [shape: f32[1,128], index: 6, kind: input, shape index: {}]   ;;  %s13744_s7 = inlined_call_operand.hbm [shape: bf16[2,16,16,128], index: 7, kind: output, shape index: {}]  }
   0x1   :  { %13747 = sst [smem:[#allocation18_spill]] %s13738_s1 }
   0x2   :  { %12 = vsyncpa [#allocation5], 0 }
   0x3   :  { %14 = vsyncpa [#allocation5 + $0x1], 0 }
   0x4   :  { %15 = vsyncpa [#allocation8], 0 }
   0x5   :  { %16 = vsyncpa [#allocation11], 0 }
   0x6   :  { %17 = vsyncpa [#allocation6], 0 }
   0x7   :  { %19 = vsyncpa [#allocation6 + $0x1], 0  ;;  %s12174_s24 = smov 0   ;;  %s12176_s25 = smov 0  }
   0x8   :  { %s12178_s26 = smov 0   ;;  %s12180_s27 = smov 0  }
   0x9 LB: > { %s12195_s28 = sadd.s32 4294967295, %s12123_s27   ;;  %s8686_s29 = sadd.s32 4294967294, %s12123_s27   ;;  %s12123_s27 = sphi %s12180_s27, %s13773_s27   ;;  %s12119_s26 = sphi %s12178_s26, %s13772_s26   ;;  %s12115_s25 = sphi %s12176_s25, %s13771_s25   ;;  %s12111_s24 = sphi %s12174_s24, %s13770_s24  }
   0xa   : > { %p45_p0 = scmp.ne.s32.totalorder %s12115_s25, %s12111_s24  ;;  %p46_p1 = scmp.eq.s32.totalorder %s12195_s28, 0 }
   0xb   : > { %p195_p2 = scmp.eq.s32.totalorder %s12195_s28, 1  ;;  %p201_p3 = scmp.eq.s32.totalorder %s8686_s29, 1 }
   0xc   : > { %p12204_p4 = por %p46_p1, %p45_p0  ;;  %p8687_p5 = scmp.ge.s32.totalorder %s12123_s27, 1 }
   0xd   : > { %p12209_p6 = por %p201_p3, %p45_p0  ;;  %p208_p7 = scmp.lt.s32.totalorder %s12123_s27, 3 }
   0xe   : > { %s13750_s1 = sld [smem:[#allocation18_spill]]  ;;  %s12125_s13 = smov [#allocation7]  }
   0xf   : > { %p12217_p8 = pnand %p8687_p5, %p208_p7  ;;  %s221_s14 = sshll.u32 %s12125_s13, 4  ;;  %s222_s14 = int_to_ptr.vmem [resolvable:$true] %s221_s14 }
  0x10   : > { %s248_s18 = sshll.u32 %s13741_s4, 4  ;;  %s13745_s19 = smov 64   ;;  %s249_s18 = int_to_ptr.hbm [resolvable:$true] %s248_s18 }
  0x11   : > { %p11816_p9 = pneg %p12217_p8  ;;  %s13746_s20 = smov 4  }
  0x12   : > { %s12128_s21 = smov [#allocation10]   ;;  %s237_s9 = sshll.u32 %s13740_s3, 4  ;;  %s238_s9 = int_to_ptr.hbm [resolvable:$true] %s237_s9 }
  0x13   : > { %p12225_p10 = pnand %p11816_p9, %p46_p1  ;;  %s250_s22 = sshll.u32 %s12128_s21, 4  ;;  %s251_s22 = int_to_ptr.vmem [resolvable:$true] %s250_s22 }
  0x14   : > { %s219_s11 = sshll.u32 %s13750_s1, 4  ;;  %s266_s13 = sshll.u32 %s13743_s6, 4  ;;  %s220_s11 = int_to_ptr.hbm [resolvable:$true] %s219_s11  ;;  %s267_s13 = int_to_ptr.hbm [resolvable:$true] %s266_s13 }
  0x15   : > { %11819 = dma.hbm_to_vmem [thread:$0]  (!%p12225_p10), %s220_s11, 9216, %s222_s14, [#allocation8], %s13745_s19, %s13745_s19, %s13746_s20  }
  0x16   : > { %11825 = dma.hbm_to_vmem [thread:$0]  (!%p12225_p10), %s249_s18, 9216, %s251_s22, [#allocation11], %s13745_s19, %s13745_s19, %s13746_s20  }
  0x17   : > { %s12129_s14 = smov [#allocation9]   ;;  %s12130_s17 = smov [#allocation12]  }
  0x18   : > { %s239_s16 = sshll.u32 %s12129_s14, 4  ;;  %s268_s21 = sshll.u32 %s12130_s17, 4  ;;  %s240_s16 = int_to_ptr.vmem [resolvable:$true] %s239_s16  ;;  %s269_s21 = int_to_ptr.vmem [resolvable:$true] %s268_s21 }
  0x19   : > { %11822 = dma.hbm_to_vmem [thread:$0]  (!%p12225_p10), %s238_s9, 16, %s240_s16, [#allocation8]  }
  0x1a   : > { %11828 = dma.hbm_to_vmem [thread:$0]  (!%p12225_p10), %s267_s13, 16, %s269_s21, [#allocation11]  }
  0x1b   : > { %s12254_s18 = sadd.s32 1, %s12123_s27   ;;  %s32_s22 = sadd.s32 1, %s12119_s26 }
  0x1c   : > { %s29_s23 = ssub.s32 %s12123_s27, %s12254_s18  ;;  %p39_p12 = scmp.ne.s32.totalorder %s12119_s26, %s12115_s25 }
  0x1d   : > { %p30_p13 = scmp.eq.s32.totalorder %s29_s23, 0  ;;  %p40_p0 = scmp.eq.s32.totalorder %s12123_s27, 0 }
  0x1e   : > { %p12264_p3 = por %p195_p2, %p39_p12  ;;  %p11841_p5 = scmp.lt.s32.totalorder %s12123_s27, 2 }
  0x1f   : > { %s12270_s9 = scalar_select %p30_p13, %s12119_s26, %s32_s22  }
  0x20   : > { %p41_p7 = por %p40_p0, %p39_p12  ;;  %s279_s10 = sand.u32 1, %s12119_s26  }
  0x21   : > { %s8693_s15 = sshll.u32 %s279_s10, 7  ;;  %s11044_s11 = sshll.u32 %s12123_s27, 7 }
  0x22   : > { %s288_s16 = scalar_lea.hbm %s13737_s0, %s11044_s11  ;;  %s283_s17 = scalar_lea.vmem [#allocation4], %s8693_s15 }
  0x23   : > { %s291_s21 = sshll.u32 %s283_s17, 4  ;;  %s289_s23 = sshll.u32 %s288_s16, 4  ;;  %s292_s21 = int_to_ptr.vmem [resolvable:$true] %s291_s21  ;;  %s290_s23 = int_to_ptr.hbm [resolvable:$true] %s289_s23 }
  0x24   : > { %p12277_p2 = pnand %p11841_p5, %p41_p7  ;;  %s280_s22 = scalar_lea.sflag [#allocation5], %s279_s10 }
  0x25   : > { %s12019_s20 = sshra.s32 %s290_s23, 4  ;;  %s12026_s13 = scalar_lea.hbm %s13737_s0, 256  ;;  %s12020_s20 = int_to_ptr.hbm [resolvable:$true] %s12019_s20 }
  0x26   : > { %s12021_s1 = scalar_lea.hbm %s12020_s20, 128  ;;  %p12023_p10 = pneg %p12277_p2 }
  0x27   : > { %p12022_p9 = scmp.ne.s32.totalorder %s12020_s20, %s12021_s1  ;;  %p12027_p0 = scmp.lt.s32.totalorder %s12020_s20, %s13737_s0 }
  0x28   : > { %p12028_p5 = scmp.lt.s32.totalorder %s12026_s13, %s12021_s1 }
  0x29   : > { %p12024_p12 = pnand %p12023_p10, %p12022_p9 }
  0x2a   : > { %p12029_p7 = por %p12028_p5, %p12027_p0 }
  0x2b   : > { %p12025_p13 = pneg %p12024_p12 }
  0x2d   : > { %p12030_p11 = pnand %p12029_p7, %p12025_p13 }
  0x2f   : > { %12033 = shalt.err (!%p12030_p11)
}
  0x30   : > { %s13755_s10 = smov 4   ;;  %s13756_s17 = smov 64  }
  0x31   : > { %11832 = dma.hbm_to_vmem [thread:$0]  (!%p12277_p2), %s290_s23, 2048, %s292_s21, %s280_s22, %s13756_s17, %s13756_s17, %s13755_s10  }
  0x32   : > { %303 = sbr.rel (%p12217_p8) target bundleno = 1400 (0x578), region = 48  ;;  %s12297_s11 = sand.u32 (!%p12217_p8), 1, %s12115_s25  }
  0x33   : > { %s8697_s1 = sshll.u32 (!%p12217_p8), %s12297_s11, 7  ;;  %s306_s20 = scalar_lea.sflag (!%p12217_p8), [#allocation5], %s12297_s11 }
  0x34   : > { %s12303_s15 = scalar_lea.vmem (!%p12217_p8), [#allocation4], %s8697_s1 }
  0x37   : > { %12094 = dma.done.wait (%p12204_p4), %s306_s20, 2048  }
  0x38   : > { %12096 = vsyncadd (%p12204_p4), %s306_s20, 4294965248 }
  0x39   : > { %12098 = dma.done.wait (%p46_p1), [#allocation8], 9232  }
  0x3a   : > { %12100 = vsyncadd (%p46_p1), [#allocation8], 4294958064 }
  0x3b   : > { %12102 = dma.done.wait (%p46_p1), [#allocation11], 9232  }
  0x3c   : > { %12104 = vsyncadd (%p46_p1), [#allocation11], 4294958064  ;;  %v11124_v0 = vld [vmem:[#allocation7 + $0xf8] sm:$0xff]  ;;  %v11123_v4 = vld [vmem:[#allocation7 + $0xf0] sm:$0xff]  ;;  %v12131_v6 = vmov 0   ;;  %vm763_vm3 = vcmask 1043456  }
  0x3d   : > { %v11132_v1 = vld [vmem:[#allocation7 + $0x138] sm:$0xff]  ;;  %1809 = vmatpush.bf16.msra.mxu0 %v11124_v0  ;;  %v11131_v5 = vld [vmem:[#allocation7 + $0x130] sm:$0xff]  ;;  %366 = vst [vmem:[#allocation2] sm:$0xff] %v12131_v6  ;;  %v11122_v9 = vld [vmem:[#allocation7 + $0xe8] sm:$0xff]  ;;  %vm472_vm0 = vsmask.f32 256 }
  0x3e   : > { %v11140_v2 = vld [vmem:[#allocation7 + $0x178] sm:$0xff]  ;;  %1858 = vmatpush.bf16.msra.mxu1 %v11132_v1  ;;  %v11139_v7 = vld [vmem:[#allocation7 + $0x170] sm:$0xff]  ;;  %368 = vst [vmem:[#allocation2 + $0xc] sm:$0xff] %v12131_v6  ;;  %v11130_v10 = vld [vmem:[#allocation7 + $0x128] sm:$0xff]  ;;  %vm473_vm1 = vsmask.f32 4368 }
  0x3f   : > { %v11076_v3 = vld [vmem:[#allocation7 + $0x38] sm:$0xff]  ;;  %1907 = vmatpush.bf16.msra.mxu2 %v11140_v2  ;;  %v11075_v8 = vld [vmem:[#allocation7 + $0x30] sm:$0xff]  ;;  %367 = vst [vmem:[#allocation2 + $0x8] sm:$0xf] %v12131_v6  ;;  %v11138_v11 = vld [vmem:[#allocation7 + $0x168] sm:$0xff]  ;;  %vm830_vm5 = vcmask 1040384  }
  0x40   : > { %2228 = vmatpush.bf16.msra.mxu3 %v11076_v3  ;;  %369 = vst [vmem:[#allocation2 + $0x14] sm:$0xf] %v12131_v6  ;;  %v11074_v12 = vld [vmem:[#allocation7 + $0x28] sm:$0xff]  ;;  %vm764_vm2 = vsmask.f32 7938  ;;  %v11121_v13 = vld [vmem:[#allocation7 + $0xe0] sm:$0xff]  ;;  %vm12340_vm7 = vmor %vm472_vm0, %vm473_vm1 }
  0x41   : > { %1810 = vmatpush.bf16.msra.mxu0 %v11123_v4  ;;  %371 = vst [vmem:[#allocation2 + $0x198] sm:$0xff] %v12131_v6  ;;  %v11129_v14 = vld [vmem:[#allocation7 + $0x120] sm:$0xff]  ;;  %vm912_vm4 = vsmask.f32 3328  ;;  %v11120_v21 = vld [vmem:[#allocation7 + $0xd8] sm:$0xff]  ;;  %vm12333_vm6 = vmand %vm763_vm3, %vm764_vm2  ;;  %vm1316_vm10 = vcmask 1043459  }
  0x42   : > { %1859 = vmatpush.bf16.msra.mxu1 %v11131_v5  ;;  %372 = vst [vmem:[#allocation2 + $0x1a0] sm:$0xf] %v12131_v6  ;;  %v440_v15 = vld [vmem:[%s12303_s15] sm:$0xf]  ;;  %v441_v18 = vld [vmem:[%s12303_s15 + $0x4] sm:$0xf]  ;;  %vm12361_vm11 = vmand %vm763_vm3, %vm912_vm4 }
  0x43   : > { %1908 = vmatpush.bf16.msra.mxu2 %v11139_v7  ;;  %373 = vst [vmem:[#allocation2 + $0x1a4] sm:$0xff] %v12131_v6  ;;  %v11137_v16 = vld [vmem:[#allocation7 + $0x160] sm:$0xff]  ;;  %v476_v19 = vshrl.u32 %v440_v15, 16  ;;  %v479_v20 = vshll.u32 %v440_v15, 16  ;;  %v484_v22 = vshrl.u32 %v441_v18, 16  ;;  %v487_v23 = vshll.u32 %v441_v18, 16  ;;  %vm12369_vm12 = vmand %vm830_vm5, %vm472_vm0 }
  0x44   : > { %2229 = vmatpush.bf16.msra.mxu3 %v11075_v8  ;;  %374 = vst [vmem:[#allocation2 + $0x1ac] sm:$0xf] %v12131_v6  ;;  %v11073_v17 = vld [vmem:[#allocation7 + $0x20] sm:$0xff]  ;;  %v766_v24 = vld [vmem:[#allocation2 + $0x18] sm:$0xf]  ;;  %v11119_v41 = vld [vmem:[#allocation7 + $0xd0] sm:$0xff] }
  0x45   : > { %1811 = vmatpush.bf16.msra.mxu0 %v11122_v9  ;;  %1367 = vst [vmem:[#allocation3] sm:$0xff] %v12131_v6  ;;  %v375_v25 = vld [vmem:[%s12303_s15] sm:$0xf]  ;;  %v376_v26 = vld [vmem:[%s12303_s15 + $0x4] sm:$0xf]  ;;  %v11128_v27 = vld [vmem:[#allocation7 + $0x118] sm:$0xff] }
  0x46   : > { %1860 = vmatpush.bf16.msra.mxu1 %v11130_v10  ;;  %v478_v28 = vrot.slane %v476_v19, 7  ;;  %408 = vst [vmem:[#allocation2 + $0x1c] sm:$0xf] %v375_v25  ;;  %v880_v29 = vld [vmem:[%s12303_s15] sm:$0xf]  ;;  %v486_v30 = vrot.slane %v484_v22, 7 }
  0x47   : > { %1909 = vmatpush.bf16.msra.mxu2 %v11138_v11  ;;  %409 = vst [vmem:[#allocation2 + $0x28] sm:$0xf] %v376_v26  ;;  %v881_v32 = vld [vmem:[%s12303_s15 + $0x4] sm:$0xf]  ;;  %v916_v33 = vshrl.u32 %v880_v29, 16  ;;  %v11136_v34 = vld [vmem:[#allocation7 + $0x158] sm:$0xff] }
  0x48   : > { %2230 = vmatpush.bf16.msra.mxu3 %v11074_v12  ;;  %v11072_v35 = vld [vmem:[#allocation7 + $0x18] sm:$0xff]  ;;  %v481_v37 = vor.u32 %v479_v20, %v478_v28  ;;  %v482_v38 = vrot.slane %v478_v28, 4  ;;  %v919_v39 = vshll.u32 %v880_v29, 16  ;;  %v925_v40 = vshll.u32 %v881_v32, 16  ;;  %1369 = vst [vmem:[#allocation3 + $0xc] sm:$0xff] %v12131_v6  ;;  %v11127_v45 = vld [vmem:[#allocation7 + $0x110] sm:$0xff] }
  0x49   : > { %1812 = vmatpush.bf16.msra.mxu0 %v11121_v13  ;;  %v489_v42 = vor.u32 %v487_v23, %v486_v30  ;;  %vm913_vm8 = vsmask.f32 7440  ;;  %v918_v43 = vrot.slane %v916_v33, 4  ;;  %v929_v44 = vshrl.u32 %v881_v32, 16  ;;  %v11135_v46 = vld [vmem:[#allocation7 + $0x150] sm:$0xff]  ;;  %v11118_v58 = vld [vmem:[#allocation7 + $0xc8] sm:$0xff] }
  0x4a   : > { %1861 = vmatpush.bf16.msra.mxu1 %v11129_v14  ;;  %v767_v47 = vsel %vm12333_vm6, %v481_v37, %v766_v24  ;;  %v921_v48 = vrot.slane %v919_v39, 5  ;;  %v927_v49 = vrot.slane %v925_v40, 5  ;;  %1368 = vst [vmem:[#allocation3 + $0x8] sm:$0xf] %v12131_v6  ;;  %v11071_v50 = vld [vmem:[#allocation7 + $0x10] sm:$0xff]  ;;  %vm12354_vm9 = vmor %vm912_vm4, %vm913_vm8  ;;  %v11126_v63 = vld [vmem:[#allocation7 + $0x108] sm:$0xff] }
  0x4b   : > { %1910 = vmatpush.bf16.msra.mxu2 %v11137_v16  ;;  %v490_v51 = vsel %vm12340_vm7, %v482_v38, %v489_v42  ;;  %768 = vst [vmem:[#allocation2 + $0x18] sm:$0xf] %v767_v47  ;;  %v931_v52 = vrot.slane %v929_v44, 4  ;;  %v442_v53 = vld [vmem:[%s12303_s15 + $0x8] sm:$0xf]  ;;  %v11117_v14 = vld [vmem:[#allocation7 + $0xc0] sm:$0xff] }
  0x4c   : > { %2231 = vmatpush.bf16.msra.mxu3 %v11073_v17  ;;  %769 = vst [vmem:[#allocation2 + $0x24] sm:$0xf] %v490_v51  ;;  %v922_v54 = vor.u32 %v921_v48, %v918_v43  ;;  %v443_v55 = vld [vmem:[%s12303_s15 + $0xc] sm:$0xf]  ;;  %v492_v56 = vshrl.u32 %v442_v53, 16  ;;  %v495_v57 = vshll.u32 %v442_v53, 16 }
  0x4d   : > { %1813 = vmatpush.bf16.msra.mxu0 %v11120_v21  ;;  %v932_v60 = vor.u32 %v931_v52, %v927_v49  ;;  %1370 = vst [vmem:[#allocation3 + $0x14] sm:$0xf] %v12131_v6  ;;  %v500_v61 = vshrl.u32 %v443_v55, 16  ;;  %v503_v62 = vshll.u32 %v443_v55, 16  ;;  %v1253_v2 = vld [vmem:[#allocation2 + $0x2c] sm:$0xf] }
  0x4e   : > { %1862 = vmatpush.bf16.msra.mxu1 %v11128_v27  ;;  %v923_v0 = vrot.slane %v922_v54, 4  ;;  %1372 = vst [vmem:[#allocation3 + $0x198] sm:$0xff] %v12131_v6  ;;  %v494_v3 = vrot.slane %v492_v56, 7  ;;  %v770_v7 = vld [vmem:[#allocation2 + $0x30] sm:$0xf]  ;;  %v11134_v8 = vld [vmem:[#allocation7 + $0x148] sm:$0xff] }
  0x4f   : > { %1911 = vmatpush.bf16.msra.mxu2 %v11136_v34  ;;  %v933_v4 = vrot.slane %v932_v60, 4  ;;  %1373 = vst [vmem:[#allocation3 + $0x1a0] sm:$0xf] %v12131_v6  ;;  %v502_v5 = vrot.slane %v500_v61, 7  ;;  %v11070_v9 = vld [vmem:[#allocation7 + $0x8] sm:$0xff]  ;;  %v11125_v15 = vld [vmem:[#allocation7 + $0x100] sm:$0xff] }
  0x50   : > { %2232 = vmatpush.bf16.msra.mxu3 %v11072_v35  ;;  %v928_v11 = vsel %vm12354_vm9, %v923_v0, %v927_v49  ;;  %vm1317_vm13 = vsmask.f32 7950  ;;  %1374 = vst [vmem:[#allocation3 + $0x1a4] sm:$0xff] %v12131_v6  ;;  %v497_v12 = vor.u32 %v495_v57, %v494_v3  ;;  %v498_v13 = vrot.slane %v494_v3, 4  ;;  %v11093_v16 = vld [vmem:[#allocation2 + $0x1c] sm:$0xf] }
  0x51   : > { %1814 = vmatpush.bf16.msra.mxu0 %v11119_v41  ;;  %v8707_v17 = vld [vmem:[#allocation2 + $0x24] sm:$0xf0]  ;;  %1251 = vst [vmem:[#allocation2 + $0x20] sm:$0xf] %v928_v11  ;;  %v1254_v18 = vsel %vm12361_vm11, %v933_v4, %v1253_v2  ;;  %v505_v19 = vor.u32 %v503_v62, %v502_v5  ;;  %v883_v21 = vld [vmem:[%s12303_s15 + $0xc] sm:$0xf]  ;;  %vm12391_vm14 = vmand %vm1316_vm10, %vm1317_vm13 }
  0x52   : > { %1863 = vmatpush.bf16.msra.mxu1 %v11127_v45  ;;  %v882_v20 = vld [vmem:[%s12303_s15 + $0x8] sm:$0xf]  ;;  %v11133_v22 = vld [vmem:[#allocation7 + $0x140] sm:$0xff]  ;;  %v832_v24 = vld [vmem:[#allocation2 + $0x18] sm:$0x1]  ;;  %v771_v27 = vsel %vm12333_vm6, %v497_v12, %v770_v7  ;;  %v944_v34 = vshll.u32 %v883_v21, 16  ;;  %v8710_v43 = vor.u32 %v11093_v16, %v8707_v17 }
  0x53   : > { %1912 = vmatpush.bf16.msra.mxu2 %v11135_v46  ;;  %v11069_v23 = vld [vmem:[#allocation7] sm:$0xff]  ;;  %1255 = vst [vmem:[#allocation2 + $0x2c] sm:$0xf] %v1254_v18  ;;  %v11046_v26 = vld [vmem:[#allocation2 + $0x8] sm:$0xf0]  ;;  %v935_v28 = vshrl.u32 %v882_v20, 16  ;;  %v506_v32 = vsel %vm12340_vm7, %v498_v13, %v505_v19 }
  0x54   : > { %2233 = vmatpush.bf16.msra.mxu3 %v11071_v50  ;;  %v8897_v25 = vld [vmem:[#allocation2] sm:$0xf]  ;;  %v938_v29 = vshll.u32 %v882_v20, 16  ;;  %v833_v30 = vsel %vm12369_vm12, 0, %v832_v24  ;;  %1375 = vst [vmem:[#allocation3 + $0x1ac] sm:$0xf] %v12131_v6 }
  0x55   : > { %1815 = vmatpush.bf16.msra.mxu0 %v11118_v58  ;;  %v377_v33 = vld [vmem:[%s12303_s15 + $0x8] sm:$0xf]  ;;  %834 = vst [vmem:[#allocation2 + $0x18] sm:$0x1] %v833_v30  ;;  %v11172_v35 = vld [vmem:[#allocation7 + $0x1b8] sm:$0xff]  ;;  %v937_v37 = vrot.slane %v935_v28, 4  ;;  %v8898_v49 = vor.u32 %v11046_v26, %v8897_v25 }
  0x56   : > { %1864 = vmatpush.bf16.msra.mxu1 %v11126_v63  ;;  %v940_v38 = vrot.slane %v938_v29, 5  ;;  %v948_v39 = vshrl.u32 %v883_v21, 16  ;;  %v11180_v40 = vld [vmem:[#allocation7 + $0x1f8] sm:$0xff]  ;;  %772 = vst [vmem:[#allocation2 + $0x30] sm:$0xf] %v771_v27  ;;  %v946_v42 = vrot.slane %v944_v34, 5 }
  0x57   : > { %1913 = vmatpush.bf16.msra.mxu2 %v11134_v8  ;;  %v378_v41 = vld [vmem:[%s12303_s15 + $0xc] sm:$0xf]  ;;  %v11092_v44 = vld [vmem:[#allocation7 + $0xb8] sm:$0xff]  ;;  %773 = vst [vmem:[#allocation2 + $0x3c] sm:$0xf] %v506_v32  ;;  %v11171_v54 = vld [vmem:[#allocation7 + $0x1b0] sm:$0xff] }
  0x58   : > { %2234 = vmatpush.bf16.msra.mxu3 %v11070_v9  ;;  %v11084_v6 = vld [vmem:[#allocation7 + $0x78] sm:$0xff]  ;;  %v941_v45 = vor.u32 %v940_v38, %v937_v37  ;;  %v950_v46 = vrot.slane %v948_v39, 4  ;;  %v11094_v47 = vld [vmem:[#allocation2 + $0x20] sm:$0xf0]  ;;  %410 = vst [vmem:[#allocation2 + $0x34] sm:$0xf] %v377_v33 }
  0x59   : > { %1816 = vmatpush.bf16.msra.mxu0 %v11117_v14  ;;  %v1257_v50 = vld [vmem:[#allocation2 + $0x44] sm:$0xf]  ;;  %v444_v51 = vld [vmem:[%s12303_s15 + $0x10] sm:$0xf]  ;;  %411 = vst [vmem:[#allocation2 + $0x40] sm:$0xf] %v378_v41 }
  0x5a   : > { %1865 = vmatpush.bf16.msra.mxu1 %v11125_v15  ;;  %v942_v52 = vrot.slane %v941_v45, 4  ;;  %v951_v53 = vor.u32 %v950_v46, %v946_v42  ;;  %v508_v55 = vshrl.u32 %v444_v51, 16  ;;  %v1319_v56 = vld [vmem:[#allocation2 + $0x2c] sm:$0x8]  ;;  %v11179_v57 = vld [vmem:[#allocation7 + $0x1f0] sm:$0xff]  ;;  %v511_v60 = vshll.u32 %v444_v51, 16 }
  0x5b   : > { %1914 = vmatpush.bf16.msra.mxu2 %v11133_v22  ;;  %v11091_v58 = vld [vmem:[#allocation7 + $0xb0] sm:$0xff]  ;;  %v1320_v61 = vsel %vm12391_vm14, 0, %v1319_v56  ;;  %v774_v5 = vld [vmem:[#allocation2 + $0x48] sm:$0xf]  ;;  %v8713_v17 = vld [vmem:[#allocation2 + $0x20] sm:$0xf] }
  0x5c   : > { %2235 = vmatpush.bf16.msra.mxu3 %v11069_v23  ;;  %v947_v62 = vsel %vm12354_vm9, %v942_v52, %v946_v42  ;;  %v952_v63 = vrot.slane %v951_v53, 4  ;;  %v11083_v0 = vld [vmem:[#allocation7 + $0x70] sm:$0xff]  ;;  %v510_v3 = vrot.slane %v508_v55, 7  ;;  %v8705_v4 = vld [vmem:[#allocation2 + $0x18] sm:$0xf]  ;;  %v11170_v45 = vld [vmem:[#allocation7 + $0x1a8] sm:$0xff] }
  0x5d   : > { %1866 = vmatmul.bf16.vlgmr.msra.gmra.mxu1 %v8710_v43  ;;  %2277 = vmatpush.bf16.msrb.mxu0 %v11084_v6  ;;  %v445_v2 = vld [vmem:[%s12303_s15 + $0x14] sm:$0xf]  ;;  %1321 = vst [vmem:[#allocation2 + $0x2c] sm:$0x8] %v1320_v61  ;;  %v8706_v7 = vor.u32 %v11094_v47, %v8705_v4  ;;  %v835_v8 = vld [vmem:[#allocation2 + $0x30] sm:$0x1] }
  0x5e   : > { %2326 = vmatpush.bf16.msrb.mxu1 %v11092_v44  ;;  %1256 = vst [vmem:[#allocation2 + $0x38] sm:$0xf] %v947_v62  ;;  %v1258_v9 = vsel %vm12361_vm11, %v952_v63, %v1257_v50  ;;  %v513_v11 = vor.u32 %v511_v60, %v510_v3  ;;  %v836_v12 = vsel %vm12369_vm12, 0, %v835_v8  ;;  %v379_v13 = vld [vmem:[%s12303_s15 + $0x10] sm:$0xf]  ;;  %v516_v14 = vshrl.u32 %v445_v2, 16 }
  0x5f   : > { %2729 = vmatpush.bf16.msrb.mxu2 %v11172_v35  ;;  %2236 = vmatmul.bf16.vlgmr.msra.gmra.mxu3 %v8898_v49  ;;  %1259 = vst [vmem:[#allocation2 + $0x44] sm:$0xf] %v1258_v9  ;;  %v519_v15 = vshll.u32 %v445_v2, 16  ;;  %v380_v18 = vld [vmem:[%s12303_s15 + $0x14] sm:$0xf]  ;;  %v514_v19 = vrot.slane %v510_v3, 4 }
  0x60   : > { %2778 = vmatpush.bf16.msrb.mxu3 %v11180_v40  ;;  %1817 = vmatmul.bf16.vlgmr.msra.gmra.mxu0 %v8706_v7  ;;  %837 = vst [vmem:[#allocation2 + $0x30] sm:$0x1] %v836_v12  ;;  %v775_v16 = vsel %vm12333_vm6, %v513_v11, %v774_v5  ;;  %v518_v20 = vrot.slane %v516_v14, 7  ;;  %v884_v21 = vld [vmem:[%s12303_s15 + $0x10] sm:$0xf]  ;;  %v11178_v55 = vld [vmem:[#allocation7 + $0x1e8] sm:$0xff] }
  0x61   : > { %2278 = vmatpush.bf16.msrb.mxu0 %v11083_v0  ;;  %776 = vst [vmem:[#allocation2 + $0x48] sm:$0xf] %v775_v16  ;;  %v885_v22 = vld [vmem:[%s12303_s15 + $0x14] sm:$0xf]  ;;  %v954_v23 = vshrl.u32 %v884_v21, 16  ;;  %v957_v24 = vshll.u32 %v884_v21, 16 }
  0x62   : > { %2327 = vmatpush.bf16.msrb.mxu1 %v11091_v58  ;;  %412 = vst [vmem:[#allocation2 + $0x4c] sm:$0xf] %v379_v13  ;;  %v11049_v26 = vld [vmem:[#allocation2 + $0x20] sm:$0xf0]  ;;  %v521_v27 = vor.u32 %v519_v15, %v518_v20  ;;  %v963_v28 = vshll.u32 %v885_v22, 16  ;;  %v967_v29 = vshrl.u32 %v885_v22, 16 }
  0x63   : > { %2730 = vmatpush.bf16.msrb.mxu2 %v11171_v54  ;;  %413 = vst [vmem:[#allocation2 + $0x58] sm:$0xf] %v380_v18  ;;  %v11096_v32 = vld [vmem:[#allocation2 + $0x34] sm:$0xf]  ;;  %v8719_v33 = vld [vmem:[#allocation2 + $0x3c] sm:$0xf0] }
  0x64   : > { %2779 = vmatpush.bf16.msrb.mxu3 %v11179_v57  ;;  %v11095_v25 = vld [vmem:[#allocation2 + $0x28] sm:$0xf0]  ;;  %v956_v34 = vrot.slane %v954_v23, 4  ;;  %v959_v35 = vrot.slane %v957_v24, 5  ;;  %v8909_v38 = vld [vmem:[#allocation2 + $0x18] sm:$0xf]  ;;  %v522_v39 = vsel %vm12340_vm7, %v514_v19, %v521_v27  ;;  %v8722_v46 = vor.u32 %v11096_v32, %v8719_v33 }
  0x65   : > { %v8714_v30 = vor.u32 %v11095_v25, %v8713_v17  ;;  %v965_v40 = vrot.slane %v963_v28, 5  ;;  %v969_v41 = vrot.slane %v967_v29, 4  ;;  %v11097_v42 = vld [vmem:[#allocation2 + $0x38] sm:$0xf0]  ;;  %777 = vst [vmem:[#allocation2 + $0x54] sm:$0xf] %v522_v39  ;;  %v8910_v52 = vor.u32 %v11049_v26, %v8909_v38 }
  0x66   : > { %v1322_v37 = vld [vmem:[#allocation2 + $0x44] sm:$0x8]  ;;  %v960_v44 = vor.u32 %v959_v35, %v956_v34  ;;  %v1261_v6 = vld [vmem:[#allocation2 + $0x5c] sm:$0xf]  ;;  %v446_v50 = vld [vmem:[%s12303_s15 + $0x18] sm:$0xf] }
  0x67   : > { %1915 = vmatmul.bf16.vlgmr.msra.gmra.mxu2 %v8714_v30  ;;  %v1323_v43 = vsel %vm12391_vm14, 0, %v1322_v37  ;;  %v970_v49 = vor.u32 %v969_v41, %v965_v40  ;;  %v8717_v51 = vld [vmem:[#allocation2 + $0x30] sm:$0xf]  ;;  %v11090_v56 = vld [vmem:[#allocation7 + $0xa8] sm:$0xff]  ;;  %v447_v61 = vld [vmem:[%s12303_s15 + $0x1c] sm:$0xf] }
  0x68   : > { %1324 = vst [vmem:[#allocation2 + $0x44] sm:$0x8] %v1323_v43  ;;  %v838_v47 = vld [vmem:[#allocation2 + $0x48] sm:$0x1]  ;;  %v961_v54 = vrot.slane %v960_v44, 4  ;;  %2731 = vmatpush.bf16.msrb.mxu2 %v11170_v45  ;;  %2780 = vmatpush.bf16.msrb.mxu3 %v11178_v55  ;;  %v524_v62 = vshrl.u32 %v446_v50, 16  ;;  %v8718_v0 = vor.u32 %v11097_v42, %v8717_v51 }
  0x69   : > { %v839_v53 = vsel %vm12369_vm12, 0, %v838_v47  ;;  %v971_v57 = vrot.slane %v970_v49, 4  ;;  %v11082_v58 = vld [vmem:[#allocation7 + $0x68] sm:$0xff]  ;;  %2328 = vmatpush.bf16.msrb.mxu1 %v11090_v56  ;;  %v527_v63 = vshll.u32 %v446_v50, 16  ;;  %v532_v3 = vshrl.u32 %v447_v61, 16  ;;  %v11169_v45 = vld [vmem:[#allocation7 + $0x1a0] sm:$0xff] }
  0x6a   : > { %840 = vst [vmem:[#allocation2 + $0x48] sm:$0x1] %v839_v53  ;;  %v966_v60 = vsel %vm12354_vm9, %v961_v54, %v965_v40  ;;  %2279 = vmatpush.bf16.msrb.mxu0 %v11082_v58  ;;  %v535_v4 = vshll.u32 %v447_v61, 16  ;;  %v381_v5 = vld [vmem:[%s12303_s15 + $0x18] sm:$0xf]  ;;  %v526_v7 = vrot.slane %v524_v62, 7 }
  0x6b   : > { %1260 = vst [vmem:[#allocation2 + $0x50] sm:$0xf] %v966_v60  ;;  %v1262_v2 = vsel %vm12361_vm11, %v971_v57, %v1261_v6  ;;  %v382_v8 = vld [vmem:[%s12303_s15 + $0x1c] sm:$0xf]  ;;  %v534_v9 = vrot.slane %v532_v3, 7  ;;  %v11089_v47 = vld [vmem:[#allocation7 + $0xa0] sm:$0xff] }
  0x6c   : > { %1263 = vst [vmem:[#allocation2 + $0x5c] sm:$0xf] %v1262_v2  ;;  %v778_v11 = vld [vmem:[#allocation2 + $0x60] sm:$0xf]  ;;  %v8725_v12 = vld [vmem:[#allocation2 + $0x38] sm:$0xf]  ;;  %v529_v13 = vor.u32 %v527_v63, %v526_v7  ;;  %2732 = vmatpush.bf16.msrb.mxu2 %v11169_v45 }
  0x6d   : > { %1871 = vmatmul.bf16.gmra.mxu1 %v8722_v46  ;;  %414 = vst [vmem:[#allocation2 + $0x64] sm:$0xf] %v381_v5  ;;  %v530_v14 = vrot.slane %v526_v7, 4  ;;  %v537_v16 = vor.u32 %v535_v4, %v534_v9  ;;  %v886_v17 = vld [vmem:[%s12303_s15 + $0x18] sm:$0xf]  ;;  %v11177_v46 = vld [vmem:[#allocation7 + $0x1e0] sm:$0xff] }
  0x6e   : > { %415 = vst [vmem:[#allocation2 + $0x70] sm:$0xf] %v382_v8  ;;  %v887_v18 = vld [vmem:[%s12303_s15 + $0x1c] sm:$0xf]  ;;  %v779_v19 = vsel %vm12333_vm6, %v529_v13, %v778_v11  ;;  %v973_v20 = vshrl.u32 %v886_v17, 16  ;;  %v976_v21 = vshll.u32 %v886_v17, 16  ;;  %2781 = vmatpush.bf16.msrb.mxu3 %v11177_v46  ;;  %2329 = vmatpush.bf16.msrb.mxu1 %v11089_v47 }
  0x6f   : > { %2241 = vmatmul.bf16.gmra.mxu3 %v8910_v52  ;;  %v11098_v15 = vld [vmem:[#allocation2 + $0x40] sm:$0xf0]  ;;  %v982_v22 = vshll.u32 %v887_v18, 16  ;;  %v538_v23 = vsel %vm12340_vm7, %v530_v14, %v537_v16  ;;  %780 = vst [vmem:[#allocation2 + $0x60] sm:$0xf] %v779_v19  ;;  %v986_v24 = vshrl.u32 %v887_v18, 16 }
  0x70   : > { %1822 = vmatmul.bf16.gmra.mxu0 %v8718_v0  ;;  %v448_v25 = vld [vmem:[%s12303_s15 + $0x20] sm:$0xf]  ;;  %v8726_v26 = vor.u32 %v11098_v15, %v8725_v12  ;;  %781 = vst [vmem:[#allocation2 + $0x6c] sm:$0xf] %v538_v23  ;;  %v975_v27 = vrot.slane %v973_v20, 4  ;;  %v978_v28 = vrot.slane %v976_v21, 5 }
  0x71   : > { %v8921_v30 = vld [vmem:[#allocation2 + $0x30] sm:$0xf]  ;;  %v11052_v32 = vld [vmem:[#allocation2 + $0x38] sm:$0xf0]  ;;  %v984_v33 = vrot.slane %v982_v22, 5  ;;  %v988_v34 = vrot.slane %v986_v24, 4 }
  0x72   : > { %v11099_v35 = vld [vmem:[#allocation2 + $0x4c] sm:$0xf]  ;;  %v8731_v37 = vld [vmem:[#allocation2 + $0x54] sm:$0xf0]  ;;  %v979_v39 = vor.u32 %v978_v28, %v975_v27  ;;  %v540_v40 = vshrl.u32 %v448_v25, 16  ;;  %v543_v50 = vshll.u32 %v448_v25, 16  ;;  %v8922_v58 = vor.u32 %v11052_v32, %v8921_v30 }
  0x73   : > { %v1325_v29 = vld [vmem:[#allocation2 + $0x5c] sm:$0x8]  ;;  %v989_v41 = vor.u32 %v988_v34, %v984_v33  ;;  %v1265_v42 = vld [vmem:[#allocation2 + $0x74] sm:$0xf]  ;;  %v449_v43 = vld [vmem:[%s12303_s15 + $0x24] sm:$0xf]  ;;  %v8734_v51 = vor.u32 %v11099_v35, %v8731_v37 }
  0x74   : > { %v1326_v38 = vsel %vm12391_vm14, 0, %v1325_v29  ;;  %v11100_v44 = vld [vmem:[#allocation2 + $0x50] sm:$0xf0]  ;;  %v980_v6 = vrot.slane %v979_v39, 4  ;;  %v542_v49 = vrot.slane %v540_v40, 7  ;;  %v11081_v53 = vld [vmem:[#allocation7 + $0x60] sm:$0xff] }
  0x75   : > { %1327 = vst [vmem:[#allocation2 + $0x5c] sm:$0x8] %v1326_v38  ;;  %v990_v52 = vrot.slane %v989_v41, 4  ;;  %v548_v54 = vshrl.u32 %v449_v43, 16  ;;  %v551_v55 = vshll.u32 %v449_v43, 16  ;;  %2280 = vmatpush.bf16.msrb.mxu0 %v11081_v53  ;;  %s13504_s16 = scalar_lea.vmem [#allocation13], %s8697_s1 }
  0x76   : > { %v782_v56 = vld [vmem:[#allocation2 + $0x78] sm:$0xf]  ;;  %v8729_v57 = vld [vmem:[#allocation2 + $0x48] sm:$0xf]  ;;  %v841_v60 = vld [vmem:[#allocation2 + $0x60] sm:$0x1]  ;;  %v985_v61 = vsel %vm12354_vm9, %v980_v6, %v984_v33  ;;  %v545_v62 = vor.u32 %v543_v50, %v542_v49 }
  0x77   : > { %1920 = vmatmul.bf16.gmra.mxu2 %v8726_v26  ;;  %v888_v63 = vld [vmem:[%s12303_s15 + $0x20] sm:$0xf]  ;;  %v842_v0 = vsel %vm12369_vm12, 0, %v841_v60  ;;  %1264 = vst [vmem:[#allocation2 + $0x68] sm:$0xf] %v985_v61  ;;  %v1266_v2 = vsel %vm12361_vm11, %v990_v52, %v1265_v42  ;;  %v546_v3 = vrot.slane %v542_v49, 4  ;;  %v8730_v11 = vor.u32 %v11100_v44, %v8729_v57 }
  0x78   : > { %v550_v4 = vrot.slane %v548_v54, 7  ;;  %843 = vst [vmem:[#allocation2 + $0x60] sm:$0x1] %v842_v0  ;;  %v783_v5 = vsel %vm12333_vm6, %v545_v62, %v782_v56  ;;  %v889_v7 = vld [vmem:[%s12303_s15 + $0x24] sm:$0xf]  ;;  %v992_v8 = vshrl.u32 %v888_v63, 16 }
  0x79   : > { %v995_v9 = vshll.u32 %v888_v63, 16  ;;  %1267 = vst [vmem:[#allocation2 + $0x74] sm:$0xf] %v1266_v2  ;;  %v383_v13 = vld [vmem:[%s12303_s15 + $0x20] sm:$0xf]  ;;  %v1001_v20 = vshll.u32 %v889_v7, 16 }
  0x7a   : > { %v553_v12 = vor.u32 %v551_v55, %v550_v4  ;;  %784 = vst [vmem:[#allocation2 + $0x78] sm:$0xf] %v783_v5  ;;  %v384_v14 = vld [vmem:[%s12303_s15 + $0x24] sm:$0xf]  ;;  %v994_v15 = vrot.slane %v992_v8, 4  ;;  %v1005_v21 = vshrl.u32 %v889_v7, 16 }
  0x7b   : > { %v997_v16 = vrot.slane %v995_v9, 5  ;;  %v8737_v17 = vld [vmem:[#allocation2 + $0x50] sm:$0xf]  ;;  %416 = vst [vmem:[#allocation2 + $0x7c] sm:$0xf] %v383_v13  ;;  %v1003_v25 = vrot.slane %v1001_v20, 5 }
  0x7c   : > { %v11101_v18 = vld [vmem:[#allocation2 + $0x58] sm:$0xf0]  ;;  %v554_v19 = vsel %vm12340_vm7, %v546_v3, %v553_v12  ;;  %v450_v23 = vld [vmem:[%s12303_s15 + $0x28] sm:$0xf]  ;;  %v891_v24 = vld [vmem:[%s12303_s15 + $0x2c] sm:$0xf] }
  0x7d   : > { %1876 = vmatmul.bf16.gmra.mxu1 %v8734_v51  ;;  %785 = vst [vmem:[#allocation2 + $0x84] sm:$0xf] %v554_v19  ;;  %v998_v22 = vor.u32 %v997_v16, %v994_v15  ;;  %v1007_v26 = vrot.slane %v1005_v21, 4  ;;  %v556_v27 = vshrl.u32 %v450_v23, 16  ;;  %v559_v28 = vshll.u32 %v450_v23, 16  ;;  %v11168_v61 = vld [vmem:[#allocation7 + $0x198] sm:$0xff] }
  0x7e   : > { %417 = vst [vmem:[#allocation2 + $0x88] sm:$0xf] %v384_v14  ;;  %v1020_v30 = vshll.u32 %v891_v24, 16  ;;  %v1024_v32 = vshrl.u32 %v891_v24, 16  ;;  %v1269_v34 = vld [vmem:[#allocation2 + $0x8c] sm:$0xf]  ;;  %v8738_v38 = vor.u32 %v11101_v18, %v8737_v17  ;;  %2733 = vmatpush.bf16.msrb.mxu2 %v11168_v61 }
  0x7f   : > { %2246 = vmatmul.bf16.gmra.mxu3 %v8922_v58  ;;  %v999_v29 = vrot.slane %v998_v22, 4  ;;  %v1008_v33 = vor.u32 %v1007_v26, %v1003_v25  ;;  %v12451_v35 = vrot.slane %v556_v27, 7  ;;  %v786_v37 = vld [vmem:[#allocation2 + $0x90] sm:$0xf]  ;;  %v11102_v39 = vld [vmem:[#allocation2 + $0x64] sm:$0xf] }
  0x80   : > { %1827 = vmatmul.bf16.gmra.mxu0 %v8730_v11  ;;  %v1328_v40 = vld [vmem:[#allocation2 + $0x74] sm:$0x8]  ;;  %v890_v42 = vld [vmem:[%s12303_s15 + $0x28] sm:$0xf]  ;;  %v12456_v43 = vrot.slane %v1020_v30, 5  ;;  %v1026_v44 = vrot.slane %v1024_v32, 4 }
  0x81   : > { %v1004_v41 = vsel %vm12354_vm9, %v999_v29, %v1003_v25  ;;  %v1329_v6 = vsel %vm12391_vm14, 0, %v1328_v40  ;;  %v844_v45 = vld [vmem:[#allocation2 + $0x78] sm:$0x1]  ;;  %v1009_v46 = vrot.slane %v1008_v33, 4  ;;  %v561_v47 = vor.u32 %v559_v28, %v12451_v35  ;;  %v8743_v49 = vld [vmem:[#allocation2 + $0x6c] sm:$0xf0] }
  0x82   : > { %1268 = vst [vmem:[#allocation2 + $0x80] sm:$0xf] %v1004_v41  ;;  %v845_v50 = vsel %vm12369_vm12, 0, %v844_v45  ;;  %v1011_v51 = vshrl.u32 %v890_v42, 16  ;;  %v1027_v52 = vor.u32 %v1026_v44, %v12456_v43  ;;  %v8933_v53 = vld [vmem:[#allocation2 + $0x48] sm:$0xf]  ;;  %v8746_v60 = vor.u32 %v11102_v39, %v8743_v49 }
  0x83   : > { %1330 = vst [vmem:[#allocation2 + $0x74] sm:$0x8] %v1329_v6  ;;  %v11055_v54 = vld [vmem:[#allocation2 + $0x50] sm:$0xf0]  ;;  %v1270_v55 = vsel %vm12361_vm11, %v1009_v46, %v1269_v34  ;;  %v787_v56 = vsel %vm12333_vm6, %v561_v47, %v786_v37  ;;  %v8741_v57 = vld [vmem:[#allocation2 + $0x60] sm:$0xf] }
  0x84   : > { %846 = vst [vmem:[#allocation2 + $0x78] sm:$0x1] %v845_v50  ;;  %v11103_v58 = vld [vmem:[#allocation2 + $0x68] sm:$0xf0]  ;;  %v11176_v62 = vld [vmem:[#allocation7 + $0x1d8] sm:$0xff]  ;;  %v8934_v0 = vor.u32 %v11055_v54, %v8933_v53  ;;  %v1013_v4 = vrot.slane %v1011_v51, 4 }
  0x85   : > { %1271 = vst [vmem:[#allocation2 + $0x8c] sm:$0xf] %v1270_v55  ;;  %v11088_v63 = vld [vmem:[#allocation7 + $0x98] sm:$0xff]  ;;  %v451_v3 = vld [vmem:[%s12303_s15 + $0x2c] sm:$0xf]  ;;  %v1014_v5 = vshll.u32 %v890_v42, 16  ;;  %2782 = vmatpush.bf16.msrb.mxu3 %v11176_v62  ;;  %v8742_v14 = vor.u32 %v11103_v58, %v8741_v57 }
  0x86   : > { %788 = vst [vmem:[#allocation2 + $0x90] sm:$0xf] %v787_v56  ;;  %v11080_v2 = vld [vmem:[#allocation7 + $0x58] sm:$0xff]  ;;  %v1028_v7 = vrot.slane %v1027_v52, 4  ;;  %v564_v8 = vshrl.u32 %v451_v3, 16  ;;  %v567_v9 = vshll.u32 %v451_v3, 16  ;;  %2330 = vmatpush.bf16.msrb.mxu1 %v11088_v63 }
  0x87   : > { %1925 = vmatmul.bf16.gmra.mxu2 %v8738_v38  ;;  %v1273_v11 = vld [vmem:[#allocation2 + $0xa4] sm:$0xf]  ;;  %v893_v12 = vld [vmem:[%s12303_s15 + $0x34] sm:$0xf]  ;;  %2281 = vmatpush.bf16.msrb.mxu0 %v11080_v2  ;;  %v1016_v13 = vrot.slane %v1014_v5, 5  ;;  %v562_v15 = vrot.slane %v12451_v35, 4 }
  0x88   : > { %v566_v16 = vrot.slane %v564_v8, 7  ;;  %v385_v17 = vld [vmem:[%s12303_s15 + $0x28] sm:$0xf]  ;;  %v1274_v18 = vsel %vm12361_vm11, %v1028_v7, %v1273_v11  ;;  %v386_v19 = vld [vmem:[%s12303_s15 + $0x2c] sm:$0xf]  ;;  %v1039_v21 = vshll.u32 %v893_v12, 16 }
  0x89   : > { %418 = vst [vmem:[#allocation2 + $0x94] sm:$0xf] %v385_v17  ;;  %v1017_v20 = vor.u32 %v1016_v13, %v1013_v4  ;;  %v1043_v22 = vshrl.u32 %v893_v12, 16  ;;  %v8749_v23 = vld [vmem:[#allocation2 + $0x68] sm:$0xf]  ;;  %v11167_v61 = vld [vmem:[#allocation7 + $0x190] sm:$0xff] }
  0x8a   : > { %v11104_v24 = vld [vmem:[#allocation2 + $0x70] sm:$0xf0]  ;;  %v569_v26 = vor.u32 %v567_v9, %v566_v16  ;;  %419 = vst [vmem:[#allocation2 + $0xa0] sm:$0xf] %v386_v19  ;;  %v452_v27 = vld [vmem:[%s12303_s15 + $0x30] sm:$0xf]  ;;  %2734 = vmatpush.bf16.msrb.mxu2 %v11167_v61 }
  0x8b   : > { %v1018_v30 = vrot.slane %v1017_v20, 4  ;;  %1275 = vst [vmem:[#allocation2 + $0xa4] sm:$0xf] %v1274_v18  ;;  %v572_v34 = vshrl.u32 %v452_v27, 16  ;;  %v575_v35 = vshll.u32 %v452_v27, 16  ;;  %v12485_v38 = vrot.slane %v1039_v21, 5 }
  0x8c   : > { %v1331_v25 = vld [vmem:[#allocation2 + $0x8c] sm:$0x8]  ;;  %v570_v32 = vsel %vm12340_vm7, %v562_v15, %v569_v26  ;;  %v1045_v39 = vrot.slane %v1043_v22, 4  ;;  %v8750_v41 = vor.u32 %v11104_v24, %v8749_v23  ;;  %v11105_v42 = vld [vmem:[#allocation2 + $0x7c] sm:$0xf]  ;;  %v11175_v62 = vld [vmem:[#allocation7 + $0x1d0] sm:$0xff] }
  0x8d   : > { %1881 = vmatmul.bf16.gmra.mxu1 %v8746_v60  ;;  %v1332_v28 = vsel %vm12391_vm14, 0, %v1331_v25  ;;  %v847_v29 = vld [vmem:[#allocation2 + $0x90] sm:$0x1]  ;;  %789 = vst [vmem:[#allocation2 + $0x9c] sm:$0xf] %v570_v32  ;;  %v1023_v37 = vsel %vm12354_vm9, %v1018_v30, %v12456_v43  ;;  %v574_v40 = vrot.slane %v572_v34, 7  ;;  %2783 = vmatpush.bf16.msrb.mxu3 %v11175_v62 }
  0x8e   : > { %1333 = vst [vmem:[#allocation2 + $0x8c] sm:$0x8] %v1332_v28  ;;  %v848_v33 = vsel %vm12369_vm12, 0, %v847_v29  ;;  %v790_v44 = vld [vmem:[#allocation2 + $0xa8] sm:$0xf]  ;;  %v1046_v45 = vor.u32 %v1045_v39, %v12485_v38  ;;  %v11087_v2 = vld [vmem:[#allocation7 + $0x90] sm:$0xff] }
  0x8f   : > { %2251 = vmatmul.bf16.gmra.mxu3 %v8934_v0  ;;  %849 = vst [vmem:[#allocation2 + $0x90] sm:$0x1] %v848_v33  ;;  %v892_v6 = vld [vmem:[%s12303_s15 + $0x30] sm:$0xf]  ;;  %v8755_v46 = vld [vmem:[#allocation2 + $0x84] sm:$0xf0]  ;;  %v577_v50 = vor.u32 %v575_v35, %v574_v40  ;;  %2331 = vmatpush.bf16.msrb.mxu1 %v11087_v2 }
  0x90   : > { %1832 = vmatmul.bf16.gmra.mxu0 %v8742_v14  ;;  %1272 = vst [vmem:[#allocation2 + $0x98] sm:$0xf] %v1023_v37  ;;  %v8945_v47 = vld [vmem:[#allocation2 + $0x60] sm:$0xf]  ;;  %v11058_v49 = vld [vmem:[#allocation2 + $0x68] sm:$0xf0]  ;;  %v8758_v0 = vor.u32 %v11105_v42, %v8755_v46 }
  0x91   : > { %v453_v51 = vld [vmem:[%s12303_s15 + $0x34] sm:$0xf]  ;;  %v1030_v52 = vshrl.u32 %v892_v6, 16  ;;  %v1033_v53 = vshll.u32 %v892_v6, 16  ;;  %v1277_v43 = vld [vmem:[#allocation2 + $0xbc] sm:$0xf]  ;;  %v791_v56 = vsel %vm12333_vm6, %v577_v50, %v790_v44  ;;  %v8946_v5 = vor.u32 %v11058_v49, %v8945_v47 }
  0x92   : > { %v1334_v54 = vld [vmem:[#allocation2 + $0xa4] sm:$0x8]  ;;  %v580_v55 = vshrl.u32 %v453_v51, 16  ;;  %v1047_v57 = vrot.slane %v1046_v45, 4  ;;  %v8753_v63 = vld [vmem:[#allocation2 + $0x78] sm:$0xf] }
  0x93   : > { %v11106_v58 = vld [vmem:[#allocation2 + $0x80] sm:$0xf0]  ;;  %v1335_v60 = vsel %vm12391_vm14, 0, %v1334_v54  ;;  %v11079_v3 = vld [vmem:[#allocation7 + $0x50] sm:$0xff]  ;;  %v578_v7 = vrot.slane %v574_v40, 4  ;;  %v583_v9 = vshll.u32 %v453_v51, 16 }
  0x94   : > { %1336 = vst [vmem:[#allocation2 + $0xa4] sm:$0x8] %v1335_v60  ;;  %v1278_v4 = vsel %vm12361_vm11, %v1047_v57, %v1277_v43  ;;  %v582_v8 = vrot.slane %v580_v55, 7  ;;  %2282 = vmatpush.bf16.msrb.mxu0 %v11079_v3  ;;  %v1032_v11 = vrot.slane %v1030_v52, 4  ;;  %v1035_v12 = vrot.slane %v1033_v53, 5  ;;  %v11166_v55 = vld [vmem:[#allocation7 + $0x188] sm:$0xff] }
  0x95   : > { %792 = vst [vmem:[#allocation2 + $0xa8] sm:$0xf] %v791_v56  ;;  %v895_v14 = vld [vmem:[%s12303_s15 + $0x3c] sm:$0xf]  ;;  %v8754_v15 = vor.u32 %v11106_v58, %v8753_v63  ;;  %v387_v16 = vld [vmem:[%s12303_s15 + $0x30] sm:$0xf]  ;;  %2735 = vmatpush.bf16.msrb.mxu2 %v11166_v55 }
  0x96   : > { %1279 = vst [vmem:[#allocation2 + $0xbc] sm:$0xf] %v1278_v4  ;;  %v585_v13 = vor.u32 %v583_v9, %v582_v8  ;;  %v388_v17 = vld [vmem:[%s12303_s15 + $0x34] sm:$0xf]  ;;  %v1036_v18 = vor.u32 %v1035_v12, %v1032_v11  ;;  %v454_v19 = vld [vmem:[%s12303_s15 + $0x38] sm:$0xf] }
  0x97   : > { %1930 = vmatmul.bf16.gmra.mxu2 %v8750_v41  ;;  %420 = vst [vmem:[#allocation2 + $0xac] sm:$0xf] %v387_v16  ;;  %v588_v21 = vshrl.u32 %v454_v19, 16  ;;  %v1058_v22 = vshll.u32 %v895_v14, 16  ;;  %v1062_v23 = vshrl.u32 %v895_v14, 16  ;;  %v591_v27 = vshll.u32 %v454_v19, 16 }
  0x98   : > { %v586_v20 = vsel %vm12340_vm7, %v578_v7, %v585_v13  ;;  %v1037_v24 = vrot.slane %v1036_v18, 4  ;;  %v8761_v25 = vld [vmem:[#allocation2 + $0x80] sm:$0xf]  ;;  %421 = vst [vmem:[#allocation2 + $0xb8] sm:$0xf] %v388_v17  ;;  %v11174_v56 = vld [vmem:[#allocation7 + $0x1c8] sm:$0xff] }
  0x99   : > { %793 = vst [vmem:[#allocation2 + $0xb4] sm:$0xf] %v586_v20  ;;  %v590_v26 = vrot.slane %v588_v21, 7  ;;  %v11107_v28 = vld [vmem:[#allocation2 + $0x88] sm:$0xf0]  ;;  %v12505_v32 = vrot.slane %v1058_v22, 5  ;;  %2784 = vmatpush.bf16.msrb.mxu3 %v11174_v56 }
  0x9a   : > { %v1042_v30 = vsel %vm12354_vm9, %v1037_v24, %v12485_v38  ;;  %v1064_v33 = vrot.slane %v1062_v23, 4  ;;  %v794_v40 = vld [vmem:[#allocation2 + $0xc0] sm:$0xf]  ;;  %v8762_v42 = vor.u32 %v11107_v28, %v8761_v25  ;;  %v894_v44 = vld [vmem:[%s12303_s15 + $0x38] sm:$0xf]  ;;  %v11086_v57 = vld [vmem:[#allocation7 + $0x88] sm:$0xff] }
  0x9b   : > { %1276 = vst [vmem:[#allocation2 + $0xb0] sm:$0xf] %v1042_v30  ;;  %v593_v37 = vor.u32 %v591_v27, %v590_v26  ;;  %v11108_v6 = vld [vmem:[#allocation2 + $0x94] sm:$0xf]  ;;  %v8767_v45 = vld [vmem:[#allocation2 + $0x9c] sm:$0xf0]  ;;  %2332 = vmatpush.bf16.msrb.mxu1 %v11086_v57 }
  0x9c   : > { %v850_v29 = vld [vmem:[#allocation2 + $0xa8] sm:$0x1]  ;;  %v1065_v41 = vor.u32 %v1064_v33, %v12505_v32  ;;  %v8957_v46 = vld [vmem:[#allocation2 + $0x78] sm:$0xf]  ;;  %v455_v47 = vld [vmem:[%s12303_s15 + $0x3c] sm:$0xf]  ;;  %v8770_v54 = vor.u32 %v11108_v6, %v8767_v45 }
  0x9d   : > { %1886 = vmatmul.bf16.gmra.mxu1 %v8758_v0  ;;  %v851_v34 = vsel %vm12369_vm12, 0, %v850_v29  ;;  %v1337_v35 = vld [vmem:[#allocation2 + $0xbc] sm:$0x8]  ;;  %v795_v38 = vsel %vm12333_vm6, %v593_v37, %v794_v40  ;;  %v1281_v49 = vld [vmem:[#allocation2 + $0xd4] sm:$0xf]  ;;  %v596_v51 = vshrl.u32 %v455_v47, 16 }
  0x9e   : > { %852 = vst [vmem:[#allocation2 + $0xa8] sm:$0x1] %v851_v34  ;;  %v1338_v39 = vsel %vm12391_vm14, 0, %v1337_v35  ;;  %v11061_v50 = vld [vmem:[#allocation2 + $0x80] sm:$0xf0]  ;;  %v1049_v52 = vshrl.u32 %v894_v44, 16 }
  0x9f   : > { %2256 = vmatmul.bf16.gmra.mxu3 %v8946_v5  ;;  %1339 = vst [vmem:[#allocation2 + $0xbc] sm:$0x8] %v1338_v39  ;;  %v1052_v53 = vshll.u32 %v894_v44, 16  ;;  %v1066_v43 = vrot.slane %v1065_v41, 4  ;;  %v594_v58 = vrot.slane %v590_v26, 4  ;;  %v599_v60 = vshll.u32 %v455_v47, 16 }
  0xa0   : > { %1837 = vmatmul.bf16.gmra.mxu0 %v8754_v15  ;;  %796 = vst [vmem:[#allocation2 + $0xc0] sm:$0xf] %v795_v38  ;;  %v11078_v61 = vld [vmem:[#allocation7 + $0x48] sm:$0xff]  ;;  %v598_v62 = vrot.slane %v596_v51, 7  ;;  %v1051_v63 = vrot.slane %v1049_v52, 4  ;;  %v8958_v5 = vor.u32 %v11061_v50, %v8957_v46  ;;  %v11165_v27 = vld [vmem:[#allocation7 + $0x180] sm:$0xff] }
  0xa1   : > { %v1054_v0 = vrot.slane %v1052_v53, 5  ;;  %v1282_v2 = vsel %vm12361_vm11, %v1066_v43, %v1281_v49  ;;  %v8765_v3 = vld [vmem:[#allocation2 + $0x90] sm:$0xf]  ;;  %v11109_v4 = vld [vmem:[#allocation2 + $0x98] sm:$0xf0]  ;;  %2283 = vmatpush.bf16.msrb.mxu0 %v11078_v61  ;;  %v11173_v28 = vld [vmem:[#allocation7 + $0x1c0] sm:$0xff]  ;;  %2736 = vmatpush.bf16.msrb.mxu2 %v11165_v27 }
  0xa2   : > { %1283 = vst [vmem:[#allocation2 + $0xd4] sm:$0xf] %v1282_v2  ;;  %v601_v7 = vor.u32 %v599_v60, %v598_v62  ;;  %v8766_v9 = vor.u32 %v11109_v4, %v8765_v3  ;;  %v389_v13 = vld [vmem:[%s12303_s15 + $0x38] sm:$0xf]  ;;  %v390_v15 = vld [vmem:[%s12303_s15 + $0x3c] sm:$0xf]  ;;  %2785 = vmatpush.bf16.msrb.mxu3 %v11173_v28 }
  0xa3   : > { %v1055_v8 = vor.u32 %v1054_v0, %v1051_v63  ;;  %v8773_v17 = vld [vmem:[#allocation2 + $0x98] sm:$0xf]  ;;  %422 = vst [vmem:[#allocation2 + $0xc4] sm:$0xf] %v389_v13  ;;  %v11110_v19 = vld [vmem:[#allocation2 + $0xa0] sm:$0xf0] }
  0xa4   : > { %v602_v11 = vsel %vm12340_vm7, %v594_v58, %v601_v7  ;;  %423 = vst [vmem:[#allocation2 + $0xd0] sm:$0xf] %v390_v15  ;;  %v8774_v22 = vor.u32 %v11110_v19, %v8773_v17  ;;  %v11111_v23 = vld [vmem:[#allocation2 + $0xac] sm:$0xf]  ;;  %v8779_v24 = vld [vmem:[#allocation2 + $0xb4] sm:$0xf0] }
  0xa5   : > { %797 = vst [vmem:[#allocation2 + $0xcc] sm:$0xf] %v602_v11  ;;  %v1056_v16 = vrot.slane %v1055_v8, 4  ;;  %v8969_v25 = vld [vmem:[#allocation2 + $0x90] sm:$0xf]  ;;  %v8782_v29 = vor.u32 %v11111_v23, %v8779_v24  ;;  %v11085_v30 = vld [vmem:[#allocation7 + $0x80] sm:$0xff] }
  0xa6   : > { %v11064_v26 = vld [vmem:[#allocation2 + $0x98] sm:$0xf0]  ;;  %v8777_v33 = vld [vmem:[#allocation2 + $0xa8] sm:$0xf]  ;;  %v11112_v34 = vld [vmem:[#allocation2 + $0xb0] sm:$0xf0]  ;;  %2333 = vmatpush.bf16.msrb.mxu1 %v11085_v30 }
  0xa7   : > { %1935 = vmatmul.bf16.gmra.mxu2 %v8762_v42  ;;  %v853_v12 = vld [vmem:[#allocation2 + $0xc0] sm:$0x1]  ;;  %v1061_v18 = vsel %vm12354_vm9, %v1056_v16, %v12505_v32  ;;  %v8970_v35 = vor.u32 %v11064_v26, %v8969_v25  ;;  %v8778_v37 = vor.u32 %v11112_v34, %v8777_v33  ;;  %v8785_v39 = vld [vmem:[#allocation2 + $0xb0] sm:$0xf]  ;;  %v11113_v40 = vld [vmem:[#allocation2 + $0xb8] sm:$0xf0] }
  0xa8   : > { %v854_v14 = vsel %vm12369_vm12, 0, %v853_v12  ;;  %1280 = vst [vmem:[#allocation2 + $0xc8] sm:$0xf] %v1061_v18  ;;  %v11077_v32 = vld [vmem:[#allocation7 + $0x40] sm:$0xff]  ;;  %v8786_v41 = vor.u32 %v11113_v40, %v8785_v39  ;;  %v8981_v44 = vld [vmem:[#allocation2 + $0xa8] sm:$0xf] }
  0xa9   : > { %855 = vst [vmem:[#allocation2 + $0xc0] sm:$0x1] %v854_v14  ;;  %v1340_v20 = vld [vmem:[#allocation2 + $0xd4] sm:$0x8]  ;;  %2284 = vmatpush.bf16.msrb.mxu0 %v11077_v32  ;;  %v11276_v45 = vld [vmem:[#allocation7 + $0x138] sm:$0xff]  ;;  %v11274_v24 = vld [vmem:[#allocation7 + $0x128] sm:$0xff] }
  0xaa   : > { %v1341_v21 = vsel %vm12391_vm14, 0, %v1340_v20  ;;  %v11114_v42 = vld [vmem:[#allocation2 + $0xc4] sm:$0xf]  ;;  %v11067_v6 = vld [vmem:[#allocation2 + $0xb0] sm:$0xf0]  ;;  %v11284_v46 = vld [vmem:[#allocation7 + $0x178] sm:$0xff]  ;;  %3806 = vmatpush.bf16.msra.mxu2 %v11276_v45 }
  0xab   : > { %1342 = vst [vmem:[#allocation2 + $0xd4] sm:$0x8] %v1341_v21  ;;  %v8791_v38 = vld [vmem:[#allocation2 + $0xcc] sm:$0xf0]  ;;  %v8982_v51 = vor.u32 %v11067_v6, %v8981_v44  ;;  %3855 = vmatpush.bf16.msra.mxu3 %v11284_v46  ;;  %v11268_v53 = vld [vmem:[#allocation7 + $0xf8] sm:$0xff]  ;;  %v11282_v25 = vld [vmem:[#allocation7 + $0x168] sm:$0xff] }
  0xac   : > { %v8794_v47 = vor.u32 %v11114_v42, %v8791_v38  ;;  %v11115_v50 = vld [vmem:[#allocation2 + $0xc8] sm:$0xf0]  ;;  %v11188_v43 = vld [vmem:[#allocation7 + $0x238] sm:$0xff]  ;;  %3757 = vmatpush.bf16.msra.mxu1 %v11268_v53  ;;  %v8905_v57 = vld [vmem:[#allocation2 + $0x8] sm:$0xf]  ;;  %s11621_s1 = sshll.u32 %s12195_s28, 7 }
  0xad   : > { %1891 = vmatmul.bf16.gmra.mxu1 %v8770_v54  ;;  %2827 = vmatpush.bf16.msra.mxu0 %v11188_v43  ;;  %v11047_v58 = vld [vmem:[#allocation2 + $0x10] sm:$0xf0]  ;;  %v9091_v61 = vld [vmem:[#allocation2 + $0x3c] sm:$0xf0]  ;;  %v11045_v3 = vld [vmem:[#allocation2 + $0x4] sm:$0xf]  ;;  %s8571_s12 = scalar_lea.hbm %s13744_s7, %s11621_s1 }
  0xae   : > { %v11141_v60 = vld [vmem:[#allocation2 + $0x34] sm:$0xf]  ;;  %v8906_v0 = vor.u32 %v11047_v58, %v8905_v57  ;;  %v8899_v4 = vld [vmem:[#allocation2 + $0xc] sm:$0xf0]  ;;  %v11142_v14 = vld [vmem:[#allocation2 + $0x38] sm:$0xf0] }
  0xaf   : > { %2261 = vmatmul.bf16.gmra.mxu3 %v8958_v5  ;;  %v8797_v54 = vld [vmem:[#allocation2 + $0xc8] sm:$0xf]  ;;  %v11275_v62 = vld [vmem:[#allocation7 + $0x130] sm:$0xff]  ;;  %v9094_v5 = vor.u32 %v11141_v60, %v9091_v61  ;;  %v8902_v7 = vor.u32 %v11045_v3, %v8899_v4  ;;  %v8917_v19 = vld [vmem:[#allocation2 + $0x20] sm:$0xf]  ;;  %s8574_s19 = sshll.u32 %s8571_s12, 4  ;;  %s8575_s19 = int_to_ptr.hbm [resolvable:$true] %s8574_s19 }
  0xb0   : > { %1842 = vmatmul.bf16.gmra.mxu0 %v8766_v9  ;;  %v8789_v49 = vld [vmem:[#allocation2 + $0xc0] sm:$0xf]  ;;  %v11283_v63 = vld [vmem:[#allocation7 + $0x170] sm:$0xff]  ;;  %3807 = vmatpush.bf16.msra.mxu2 %v11275_v62  ;;  %v11050_v20 = vld [vmem:[#allocation2 + $0x28] sm:$0xf0]  ;;  %s8560_s28 = scalar_lea.sflag [#allocation6], %s12297_s11 }
  0xb1   : > { %v8790_v52 = vor.u32 %v11115_v50, %v8789_v49  ;;  %3856 = vmatpush.bf16.msra.mxu3 %v11283_v63  ;;  %v11267_v9 = vld [vmem:[#allocation7 + $0xf0] sm:$0xff]  ;;  %v9103_v23 = vld [vmem:[#allocation2 + $0x54] sm:$0xf0]  ;;  %v8918_v27 = vor.u32 %v11050_v20, %v8917_v19  ;;  %v8911_v30 = vld [vmem:[#allocation2 + $0x24] sm:$0xf0]  ;;  %s12063_s21 = sshra.s32 %s8575_s19, 4  ;;  %s12064_s21 = int_to_ptr.hbm [resolvable:$true] %s12063_s21 }
  0xb2   : > { %v11116_v55 = vld [vmem:[#allocation2 + $0xd0] sm:$0xf0]  ;;  %3758 = vmatpush.bf16.msra.mxu1 %v11267_v9  ;;  %v9089_v13 = vld [vmem:[#allocation2 + $0x30] sm:$0xf]  ;;  %v11266_v40 = vld [vmem:[#allocation7 + $0xe8] sm:$0xff]  ;;  %s12065_s23 = scalar_lea.hbm %s12064_s21, 128  ;;  %p12070_p11 = scmp.lt.s32.totalorder %s12064_s21, %s13744_s7 }
  0xb3   : > { %v8798_v56 = vor.u32 %v11116_v55, %v8797_v54  ;;  %v11187_v11 = vld [vmem:[#allocation7 + $0x230] sm:$0xff]  ;;  %v9090_v17 = vor.u32 %v11142_v14, %v9089_v13  ;;  %v9101_v38 = vld [vmem:[#allocation2 + $0x48] sm:$0xf]  ;;  %v11053_v53 = vld [vmem:[#allocation2 + $0x40] sm:$0xf0]  ;;  %p12066_p1 = scmp.ne.s32.totalorder %s12064_s21, %s12065_s23  ;;  %s12069_s14 = scalar_lea.hbm %s13744_s7, 256 }
  0xb4   : > { %2828 = vmatpush.bf16.msra.mxu0 %v11187_v11  ;;  %3808 = vmatpush.bf16.msra.mxu2 %v11274_v24  ;;  %v11145_v44 = vld [vmem:[#allocation2 + $0x50] sm:$0xf0]  ;;  %v11147_v54 = vld [vmem:[#allocation2 + $0x64] sm:$0xf]  ;;  %v9115_v55 = vld [vmem:[#allocation2 + $0x6c] sm:$0xf0]  ;;  %p12071_p2 = scmp.lt.s32.totalorder %s12069_s14, %s12065_s23 }
  0xb5   : > { %3857 = vmatpush.bf16.msra.mxu3 %v11282_v25  ;;  %v9102_v49 = vor.u32 %v11145_v44, %v9101_v38  ;;  %v11281_v57 = vld [vmem:[#allocation7 + $0x160] sm:$0xff]  ;;  %v11051_v62 = vld [vmem:[#allocation2 + $0x34] sm:$0xf]  ;;  %v11148_v13 = vld [vmem:[#allocation2 + $0x68] sm:$0xf0]  ;;  %p12067_p4 = pnand %p12066_p1, %p12264_p3 }
  0xb6   : > { %3759 = vmatpush.bf16.msra.mxu1 %v11266_v40  ;;  %v8923_v63 = vld [vmem:[#allocation2 + $0x3c] sm:$0xf0]  ;;  %v11150_v24 = vld [vmem:[#allocation2 + $0x7c] sm:$0xf]  ;;  %v9127_v25 = vld [vmem:[#allocation2 + $0x84] sm:$0xf0]  ;;  %p12072_p9 = por %p12071_p2, %p12070_p11 }
  0xb7   : > { %1940 = vmatmul.bf16.gmra.mxu2 %v8774_v22  ;;  %v11144_v22 = vld [vmem:[#allocation2 + $0x4c] sm:$0xf]  ;;  %v8926_v4 = vor.u32 %v11051_v62, %v8923_v63  ;;  %v11185_v9 = vld [vmem:[#allocation7 + $0x220] sm:$0xff]  ;;  %v11264_v38 = vld [vmem:[#allocation7 + $0xd8] sm:$0xff]  ;;  %p12068_p8 = pneg %p12067_p4 }
  0xb8   : > { %v9106_v32 = vor.u32 %v11144_v22, %v9103_v23  ;;  %v11056_v22 = vld [vmem:[#allocation2 + $0x58] sm:$0xf0]  ;;  %v11279_v62 = vld [vmem:[#allocation7 + $0x150] sm:$0xff] }
  0xb9   : > { %3858 = vmatpush.bf16.msra.mxu3 %v11281_v57  ;;  %v11184_v44 = vld [vmem:[#allocation7 + $0x218] sm:$0xff]  ;;  %p12073_p10 = pnand %p12072_p9, %p12068_p8 }
  0xbd   : > { %1896 = vmatmul.bf16.gmra.mxu1 %v8782_v29  ;;  %v11048_v29 = vld [vmem:[#allocation2 + $0x1c] sm:$0xf] }
  0xbf   : > { %2266 = vmatmul.bf16.gmra.mxu3 %v8970_v35  ;;  %v8914_v35 = vor.u32 %v11048_v29, %v8911_v30 }
  0xc0   : > { %1847 = vmatmul.bf16.gmra.mxu0 %v8778_v37 }
  0xc7   : > { %1945 = vmatmul.bf16.gmra.mxu2 %v8786_v41  ;;  %v11186_v41 = vld [vmem:[#allocation7 + $0x228] sm:$0xff] }
  0xc8   : > { %2829 = vmatpush.bf16.msra.mxu0 %v11186_v41 }
  0xcc   : > { %2830 = vmatpush.bf16.msra.mxu0 %v11185_v9 }
  0xcd   : > { %1901 = vmatmul.bf16.gmra.mxu1 %v8794_v47 }
  0xcf   : > { %2271 = vmatmul.bf16.gmra.mxu3 %v8982_v51 }
  0xd0   : > { %1852 = vmatmul.bf16.gmra.mxu0 %v8790_v52  ;;  %v8929_v52 = vld [vmem:[#allocation2 + $0x38] sm:$0xf] }
  0xd1   : > { %v8930_v60 = vor.u32 %v11053_v53, %v8929_v52  ;;  %2831 = vmatpush.bf16.msra.mxu0 %v11184_v44  ;;  %v457_v44 = vld [vmem:[%s12303_s15 + $0x44] sm:$0xf] }
  0xd7   : > { %1950 = vmatmul.bf16.gmra.mxu2 %v8798_v56  ;;  %v11273_v56 = vld [vmem:[#allocation7 + $0x120] sm:$0xff] }
  0xd8   : > { %3809 = vmatpush.bf16.msra.mxu2 %v11273_v56  ;;  %v11059_v56 = vld [vmem:[#allocation2 + $0x70] sm:$0xf0] }
  0xda   : > { %v1867_v2 = vpop.f32.mrf.mxu1 }
  0xdd   : > { %2334 = vmatmul.bf16.vlgmr.msrb.gmra.mxu1 %v8906_v0  ;;  %v1818_v8 = vpop.f32.mrf.mxu0  ;;  %v9118_v0 = vor.u32 %v11147_v54, %v9115_v55  ;;  %v8953_v55 = vld [vmem:[#allocation2 + $0x68] sm:$0xf] }
  0xde   : > { %v1868_v12 = vadd.f32 %v1867_v2, %v1818_v8  ;;  %v11265_v8 = vld [vmem:[#allocation7 + $0xe0] sm:$0xff] }
  0xdf   : > { %2786 = vmatmul.bf16.vlgmr.msrb.gmra.mxu3 %v9094_v5  ;;  %3760 = vmatpush.bf16.msra.mxu1 %v11265_v8 }
  0xe0   : > { %2285 = vmatmul.bf16.vlgmr.msrb.gmra.mxu0 %v8902_v7 }
  0xe2   : > { %v2237_v15 = vpop.f32.mrf.mxu3  ;;  %v1869_v16 = vpop.f32.mrf.mxu1 }
  0xe3   : > { %3761 = vmatpush.bf16.msra.mxu1 %v11264_v38  ;;  %v9151_v38 = vld [vmem:[#allocation2 + $0xb4] sm:$0xf0] }
  0xe5   : > { %v1820_v18 = vpop.f32.mrf.mxu0 }
  0xe6   : > { %v1870_v21 = vadd.f32 %v1869_v16, %v1820_v18 }
  0xe7   : > { %2737 = vmatmul.bf16.vlgmr.msrb.gmra.mxu2 %v9090_v17 }
  0xea   : > { %v2239_v26 = vpop.f32.mrf.mxu3  ;;  %v1872_v28 = vpop.f32.mrf.mxu1 }
  0xeb   : > { %v1916_v33 = vpop.f32.mrf.mxu2 }
  0xec   : > { %v1917_v34 = vadd.f32 %v1916_v33, %v1868_v12  ;;  %v9113_v12 = vld [vmem:[#allocation2 + $0x60] sm:$0xf]  ;;  %v8935_v33 = vld [vmem:[#allocation2 + $0x54] sm:$0xf0] }
  0xed   : > { %2339 = vmatmul.bf16.gmra.mxu1 %v8918_v27  ;;  %v1823_v39 = vpop.f32.mrf.mxu0  ;;  %v9114_v18 = vor.u32 %v11148_v13, %v9113_v12  ;;  %v11280_v27 = vld [vmem:[#allocation7 + $0x158] sm:$0xff]  ;;  %v456_v12 = vld [vmem:[%s12303_s15 + $0x40] sm:$0xf] }
  0xee   : > { %v12529_v37 = vadd.f32 %v2237_v15, %v1917_v34  ;;  %v1873_v42 = vadd.f32 %v1872_v28, %v1823_v39  ;;  %v9130_v34 = vor.u32 %v11150_v24, %v9127_v25  ;;  %3859 = vmatpush.bf16.msra.mxu3 %v11280_v27 }
  0xef   : > { %2791 = vmatmul.bf16.gmra.mxu3 %v9106_v32  ;;  %v11054_v32 = vld [vmem:[#allocation2 + $0x4c] sm:$0xf] }
  0xf0   : > { %2290 = vmatmul.bf16.gmra.mxu0 %v8914_v35  ;;  %v8938_v40 = vor.u32 %v11054_v32, %v8935_v33 }
  0xf2   : > { %v2242_v6 = vpop.f32.mrf.mxu3  ;;  %v1874_v45 = vpop.f32.mrf.mxu1  ;;  %3860 = vmatpush.bf16.msra.mxu3 %v11279_v62 }
  0xf3   : > { %v1918_v46 = vpop.f32.mrf.mxu2 }
  0xf4   : > { %v1919_v47 = vadd.f32 %v1918_v46, %v1870_v21  ;;  %v8941_v21 = vld [vmem:[#allocation2 + $0x50] sm:$0xf]  ;;  %v11151_v46 = vld [vmem:[#allocation2 + $0x80] sm:$0xf0] }
  0xf5   : > { %v1825_v51 = vpop.f32.mrf.mxu0  ;;  %v8942_v29 = vor.u32 %v11056_v22, %v8941_v21  ;;  %v607_v21 = vshll.u32 %v456_v12, 16  ;;  %v9137_v22 = vld [vmem:[#allocation2 + $0x90] sm:$0xf] }
  0xf6   : > { %v12531_v50 = vadd.f32 %v2239_v26, %v1919_v47  ;;  %v1875_v43 = vadd.f32 %v1874_v45, %v1825_v51  ;;  %v11272_v26 = vld [vmem:[#allocation7 + $0x118] sm:$0xff] }
  0xf7   : > { %2742 = vmatmul.bf16.gmra.mxu2 %v9102_v49  ;;  %v9125_v45 = vld [vmem:[#allocation2 + $0x78] sm:$0xf] }
  0xf8   : > { %3810 = vmatpush.bf16.msra.mxu2 %v11272_v26  ;;  %v9126_v53 = vor.u32 %v11151_v46, %v9125_v45  ;;  %v11278_v45 = vld [vmem:[#allocation7 + $0x148] sm:$0xff]  ;;  %v612_v46 = vshrl.u32 %v457_v44, 16 }
  0xf9   : > { %3861 = vmatpush.bf16.msra.mxu3 %v11278_v45 }
  0xfa   : > { %v2244_v58 = vpop.f32.mrf.mxu3  ;;  %v1877_v61 = vpop.f32.mrf.mxu1 }
  0xfb   : > { %v1921_v2 = vpop.f32.mrf.mxu2 }
  0xfc   : > { %v1922_v3 = vadd.f32 %v1921_v2, %v1873_v42 }
  0xfd   : > { %2344 = vmatmul.bf16.gmra.mxu1 %v8930_v60  ;;  %v1828_v7 = vpop.f32.mrf.mxu0  ;;  %v9139_v60 = vld [vmem:[#allocation2 + $0x9c] sm:$0xf0] }
  0xfe   : > { %v12533_v5 = vadd.f32 %v2242_v6, %v1922_v3  ;;  %v1878_v11 = vadd.f32 %v1877_v61, %v1828_v7  ;;  %v11271_v61 = vld [vmem:[#allocation7 + $0x110] sm:$0xff]  ;;  %v11057_v3 = vld [vmem:[#allocation2 + $0x64] sm:$0xf] }
  0xff   : > { %2796 = vmatmul.bf16.gmra.mxu3 %v9118_v0  ;;  %v8954_v0 = vor.u32 %v11059_v56, %v8953_v55  ;;  %3811 = vmatpush.bf16.msra.mxu2 %v11271_v61  ;;  %v614_v56 = vrot.slane %v612_v46, 7 }
 0x100   : > { %2295 = vmatmul.bf16.gmra.mxu0 %v8926_v4  ;;  %v8947_v4 = vld [vmem:[#allocation2 + $0x6c] sm:$0xf0] }
 0x102   : > { %v2247_v14 = vpop.f32.mrf.mxu3  ;;  %v1879_v15 = vpop.f32.mrf.mxu1 }
 0x103   : > { %v1923_v16 = vpop.f32.mrf.mxu2 }
 0x104   : > { %v1924_v17 = vadd.f32 %v1923_v16, %v1875_v43  ;;  %v11183_v16 = vld [vmem:[#allocation7 + $0x210] sm:$0xff] }
 0x105   : > { %v1830_v20 = vpop.f32.mrf.mxu0  ;;  %2832 = vmatpush.bf16.msra.mxu0 %v11183_v16 }
 0x106   : > { %v12535_v19 = vadd.f32 %v2244_v58, %v1924_v17  ;;  %v1880_v23 = vadd.f32 %v1879_v15, %v1830_v20  ;;  %v11153_v58 = vld [vmem:[#allocation2 + $0x94] sm:$0xf]  ;;  %v604_v17 = vshrl.u32 %v456_v12, 16 }
 0x107   : > { %2747 = vmatmul.bf16.gmra.mxu2 %v9114_v18  ;;  %v9142_v7 = vor.u32 %v11153_v58, %v9139_v60  ;;  %v11263_v15 = vld [vmem:[#allocation7 + $0xd0] sm:$0xff]  ;;  %v897_v60 = vld [vmem:[%s12303_s15 + $0x44] sm:$0xf] }
 0x108   : > { %3762 = vmatpush.bf16.msra.mxu1 %v11263_v15  ;;  %v606_v20 = vrot.slane %v604_v17, 7 }
 0x10a   : > { %v2249_v28 = vpop.f32.mrf.mxu3  ;;  %v1882_v30 = vpop.f32.mrf.mxu1  ;;  %v609_v26 = vor.u32 %v607_v21, %v606_v20  ;;  %v610_v58 = vrot.slane %v606_v20, 4  ;;  %v9149_v21 = vld [vmem:[#allocation2 + $0xa8] sm:$0xf] }
 0x10b   : > { %v1926_v35 = vpop.f32.mrf.mxu2 }
 0x10c   : > { %v1927_v39 = vadd.f32 %v1926_v35, %v1878_v11  ;;  %v8950_v11 = vor.u32 %v11057_v3, %v8947_v4  ;;  %v8965_v35 = vld [vmem:[#allocation2 + $0x80] sm:$0xf]  ;;  %v392_v4 = vld [vmem:[%s12303_s15 + $0x44] sm:$0xf] }
 0x10d   : > { %2349 = vmatmul.bf16.gmra.mxu1 %v8942_v29  ;;  %v1833_v42 = vpop.f32.mrf.mxu0  ;;  %v391_v3 = vld [vmem:[%s12303_s15 + $0x40] sm:$0xf]  ;;  %425 = vst [vmem:[#allocation2 + $0xe8] sm:$0xf] %v392_v4  ;;  %v458_v4 = vld [vmem:[%s12303_s15 + $0x48] sm:$0xf] }
 0x10e   : > { %v12537_v41 = vadd.f32 %v2247_v14, %v1927_v39  ;;  %v1883_v6 = vadd.f32 %v1882_v30, %v1833_v42  ;;  %v11062_v39 = vld [vmem:[#allocation2 + $0x88] sm:$0xf0]  ;;  %424 = vst [vmem:[#allocation2 + $0xdc] sm:$0xf] %v391_v3 }
 0x10f   : > { %2801 = vmatmul.bf16.gmra.mxu3 %v9130_v34  ;;  %v11156_v42 = vld [vmem:[#allocation2 + $0xac] sm:$0xf] }
 0x110   : > { %2300 = vmatmul.bf16.gmra.mxu0 %v8938_v40  ;;  %v9154_v55 = vor.u32 %v11156_v42, %v9151_v38  ;;  %v11065_v42 = vld [vmem:[#allocation2 + $0xa0] sm:$0xf0] }
 0x111   : > { %v11159_v38 = vld [vmem:[#allocation2 + $0xc4] sm:$0xf] }
 0x112   : > { %v2252_v47 = vpop.f32.mrf.mxu3  ;;  %v1884_v49 = vpop.f32.mrf.mxu1 }
 0x113   : > { %v1928_v51 = vpop.f32.mrf.mxu2 }
 0x114   : > { %v1929_v52 = vadd.f32 %v1928_v51, %v1880_v23  ;;  %v11154_v23 = vld [vmem:[#allocation2 + $0x98] sm:$0xf0]  ;;  %v615_v51 = vshll.u32 %v457_v44, 16 }
 0x115   : > { %v1835_v54 = vpop.f32.mrf.mxu0  ;;  %v9138_v30 = vor.u32 %v11154_v23, %v9137_v22  ;;  %v11157_v22 = vld [vmem:[#allocation2 + $0xb0] sm:$0xf0] }
 0x116   : > { %v12539_v43 = vadd.f32 %v2249_v28, %v1929_v52  ;;  %v1885_v57 = vadd.f32 %v1884_v49, %v1835_v54  ;;  %v798_v28 = vld [vmem:[#allocation2 + $0xd8] sm:$0xf]  ;;  %v8966_v49 = vor.u32 %v11062_v39, %v8965_v35  ;;  %v8959_v54 = vld [vmem:[#allocation2 + $0x84] sm:$0xf0]  ;;  %v617_v62 = vor.u32 %v615_v51, %v614_v56  ;;  %v8971_v56 = vld [vmem:[#allocation2 + $0x9c] sm:$0xf0] }
 0x117   : > { %2752 = vmatmul.bf16.gmra.mxu2 %v9126_v53  ;;  %v799_v32 = vsel %vm12333_vm6, %v609_v26, %v798_v28  ;;  %v11060_v53 = vld [vmem:[#allocation2 + $0x7c] sm:$0xf]  ;;  %v8977_v39 = vld [vmem:[#allocation2 + $0x98] sm:$0xf] }
 0x118   : > { %800 = vst [vmem:[#allocation2 + $0xd8] sm:$0xf] %v799_v32  ;;  %v618_v12 = vsel %vm12340_vm7, %v610_v58, %v617_v62 }
 0x119   : > { %801 = vst [vmem:[#allocation2 + $0xe4] sm:$0xf] %v618_v12  ;;  %v11181_v12 = vld [vmem:[#allocation7 + $0x200] sm:$0xff] }
 0x11a   : > { %v2254_v63 = vpop.f32.mrf.mxu3  ;;  %v1887_v2 = vpop.f32.mrf.mxu1 }
 0x11b   : > { %v1931_v8 = vpop.f32.mrf.mxu2 }
 0x11c   : > { %v1932_v9 = vadd.f32 %v1931_v8, %v1883_v6  ;;  %v11270_v6 = vld [vmem:[#allocation7 + $0x108] sm:$0xff] }
 0x11d   : > { %2354 = vmatmul.bf16.gmra.mxu1 %v8954_v0  ;;  %v1838_v14 = vpop.f32.mrf.mxu0  ;;  %3812 = vmatpush.bf16.msra.mxu2 %v11270_v6  ;;  %v1081_v0 = vshrl.u32 %v897_v60, 16  ;;  %v9163_v6 = vld [vmem:[#allocation2 + $0xcc] sm:$0xf0] }
 0x11e   : > { %v12542_v13 = vadd.f32 %v2252_v47, %v1932_v9  ;;  %v1888_v18 = vadd.f32 %v1887_v2, %v1838_v14  ;;  %v8962_v2 = vor.u32 %v11060_v53, %v8959_v54  ;;  %v11262_v9 = vld [vmem:[#allocation7 + $0xc8] sm:$0xff] }
 0x11f   : > { %2806 = vmatmul.bf16.gmra.mxu3 %v9142_v7  ;;  %v1083_v15 = vrot.slane %v1081_v0, 4  ;;  %v856_v17 = vld [vmem:[#allocation2 + $0xd8] sm:$0x1]  ;;  %3763 = vmatpush.bf16.msra.mxu1 %v11262_v9 }
 0x120   : > { %2305 = vmatmul.bf16.gmra.mxu0 %v8950_v11  ;;  %v11182_v11 = vld [vmem:[#allocation7 + $0x208] sm:$0xff] }
 0x121   : > { %2833 = vmatpush.bf16.msra.mxu0 %v11182_v11  ;;  %v11261_v11 = vld [vmem:[#allocation7 + $0xc0] sm:$0xff] }
 0x122   : > { %v2257_v24 = vpop.f32.mrf.mxu3  ;;  %v1889_v25 = vpop.f32.mrf.mxu1 }
 0x123   : > { %v1933_v27 = vpop.f32.mrf.mxu2  ;;  %3764 = vmatpush.bf16.msra.mxu1 %v11261_v11 }
 0x124   : > { %v1934_v29 = vadd.f32 %v1933_v27, %v1885_v57  ;;  %v1285_v27 = vld [vmem:[#allocation2 + $0xec] sm:$0xf] }
 0x125   : > { %v1840_v34 = vpop.f32.mrf.mxu0  ;;  %2834 = vmatpush.bf16.msra.mxu0 %v11181_v12 }
 0x126   : > { %v12546_v33 = vadd.f32 %v2254_v63, %v1934_v29  ;;  %v1890_v40 = vadd.f32 %v1889_v25, %v1840_v34  ;;  %v1077_v63 = vshll.u32 %v897_v60, 16  ;;  %v9150_v29 = vor.u32 %v11157_v22, %v9149_v21 }
 0x127   : > { %2757 = vmatmul.bf16.gmra.mxu2 %v9138_v30  ;;  %v896_v30 = vld [vmem:[%s12303_s15 + $0x40] sm:$0xf] }
 0x128   : > { %v12556_v14 = vrot.slane %v1077_v63, 5  ;;  %v1068_v45 = vshrl.u32 %v896_v30, 16  ;;  %v1071_v46 = vshll.u32 %v896_v30, 16 }
 0x12a   : > { %v2259_v47 = vpop.f32.mrf.mxu3  ;;  %v1892_v52 = vpop.f32.mrf.mxu1  ;;  %v1084_v20 = vor.u32 %v1083_v15, %v12556_v14  ;;  %v1070_v53 = vrot.slane %v1068_v45, 4  ;;  %v1073_v54 = vrot.slane %v1071_v46, 5  ;;  %v898_v45 = vld [vmem:[%s12303_s15 + $0x48] sm:$0xf] }
 0x12b   : > { %v1936_v57 = vpop.f32.mrf.mxu2 }
 0x12c   : > { %v1937_v61 = vadd.f32 %v1936_v57, %v1888_v18  ;;  %v857_v18 = vsel %vm12369_vm12, 0, %v856_v17  ;;  %v1085_v25 = vrot.slane %v1084_v20, 4  ;;  %v9166_v57 = vor.u32 %v11159_v38, %v9163_v6 }
 0x12d   : > { %2359 = vmatmul.bf16.gmra.mxu1 %v8966_v49  ;;  %v1843_v8 = vpop.f32.mrf.mxu0  ;;  %858 = vst [vmem:[#allocation2 + $0xd8] sm:$0x1] %v857_v18  ;;  %v11269_v49 = vld [vmem:[#allocation7 + $0x100] sm:$0xff]  ;;  %v1074_v60 = vor.u32 %v1073_v54, %v1070_v53  ;;  %v620_v17 = vshrl.u32 %v458_v4, 16  ;;  %v11162_v53 = vld [vmem:[#allocation2 + $0xdc] sm:$0xf] }
 0x12e   : > { %v12552_v7 = vadd.f32 %v2257_v24, %v1937_v61  ;;  %v1893_v16 = vadd.f32 %v1892_v52, %v1843_v8  ;;  %v1286_v32 = vsel %vm12361_vm11, %v1085_v25, %v1285_v27  ;;  %v8978_v52 = vor.u32 %v11065_v42, %v8977_v39  ;;  %3813 = vmatpush.bf16.msra.mxu2 %v11269_v49  ;;  %v899_v61 = vld [vmem:[%s12303_s15 + $0x4c] sm:$0xf]  ;;  %v9161_v25 = vld [vmem:[#allocation2 + $0xc0] sm:$0xf]  ;;  %v1289_v39 = vld [vmem:[#allocation2 + $0x104] sm:$0xf] }
 0x12f   : > { %2811 = vmatmul.bf16.gmra.mxu3 %v9154_v55  ;;  %1287 = vst [vmem:[#allocation2 + $0xec] sm:$0xf] %v1286_v32  ;;  %v11063_v55 = vld [vmem:[#allocation2 + $0x94] sm:$0xf]  ;;  %v1096_v63 = vshll.u32 %v899_v61, 16  ;;  %v1100_v0 = vshrl.u32 %v899_v61, 16 }
 0x130   : > { %2310 = vmatmul.bf16.gmra.mxu0 %v8962_v2  ;;  %v8974_v2 = vor.u32 %v11063_v55, %v8971_v56  ;;  %v1075_v3 = vrot.slane %v1074_v60, 4  ;;  %v802_v32 = vld [vmem:[#allocation2 + $0xf0] sm:$0xf]  ;;  %v9175_v55 = vld [vmem:[#allocation2 + $0xe4] sm:$0xf0]  ;;  %v1087_v60 = vshrl.u32 %v898_v45, 16 }
 0x131   : > { %v12570_v18 = vrot.slane %v1096_v63, 5  ;;  %v1102_v22 = vrot.slane %v1100_v0, 4  ;;  %v459_v56 = vld [vmem:[%s12303_s15 + $0x4c] sm:$0xf]  ;;  %v1090_v63 = vshll.u32 %v898_v45, 16 }
 0x132   : > { %v2262_v23 = vpop.f32.mrf.mxu3  ;;  %v1894_v24 = vpop.f32.mrf.mxu1  ;;  %v1089_v11 = vrot.slane %v1087_v60, 4 }
 0x133   : > { %v1938_v26 = vpop.f32.mrf.mxu2 }
 0x134   : > { %v1939_v28 = vadd.f32 %v1938_v26, %v1890_v40  ;;  %v11277_v40 = vld [vmem:[#allocation7 + $0x140] sm:$0xff]  ;;  %v11160_v26 = vld [vmem:[#allocation2 + $0xc8] sm:$0xf0] }
 0x135   : > { %v1845_v35 = vpop.f32.mrf.mxu0  ;;  %3862 = vmatpush.bf16.msra.mxu3 %v11277_v40  ;;  %v9162_v38 = vor.u32 %v11160_v26, %v9161_v25  ;;  %v8989_v40 = vld [vmem:[#allocation2 + $0xb0] sm:$0xf] }
 0x136   : > { %v12564_v34 = vadd.f32 %v2259_v47, %v1939_v28  ;;  %v1895_v44 = vadd.f32 %v1894_v24, %v1845_v35  ;;  %v1343_v15 = vld [vmem:[#allocation2 + $0xec] sm:$0x8]  ;;  %v623_v24 = vshll.u32 %v458_v4, 16  ;;  %v1103_v28 = vor.u32 %v1102_v22, %v12570_v18  ;;  %v11228_v22 = vld [vmem:[#allocation7 + $0x78] sm:$0xff] }
 0x137   : > { %2762 = vmatmul.bf16.gmra.mxu2 %v9150_v29  ;;  %v1344_v21 = vsel %vm12391_vm14, 0, %v1343_v15  ;;  %v9178_v4 = vor.u32 %v11162_v53, %v9175_v55  ;;  %4225 = vmatpush.bf16.msrb.mxu1 %v11228_v22 }
 0x138   : > { %1345 = vst [vmem:[#allocation2 + $0xec] sm:$0x8] %v1344_v21  ;;  %v1104_v35 = vrot.slane %v1103_v28, 4 }
 0x13a   : > { %v2264_v51 = vpop.f32.mrf.mxu3  ;;  %v1897_v47 = vpop.f32.mrf.mxu1  ;;  %v1290_v54 = vsel %vm12361_vm11, %v1104_v35, %v1289_v39  ;;  %v460_v35 = vld [vmem:[%s12303_s15 + $0x50] sm:$0xf] }
 0x13b   : > { %v1941_v58 = vpop.f32.mrf.mxu2  ;;  %1291 = vst [vmem:[#allocation2 + $0x104] sm:$0xf] %v1290_v54  ;;  %v639_v55 = vshll.u32 %v460_v35, 16 }
 0x13c   : > { %v1942_v62 = vadd.f32 %v1941_v58, %v1893_v16  ;;  %v1080_v16 = vsel %vm12354_vm9, %v1075_v3, %v12556_v14  ;;  %v628_v58 = vshrl.u32 %v459_v56, 16  ;;  %v8983_v3 = vld [vmem:[#allocation2 + $0xb4] sm:$0xf0] }
 0x13d   : > { %2364 = vmatmul.bf16.gmra.mxu1 %v8978_v52  ;;  %v1848_v9 = vpop.f32.mrf.mxu0  ;;  %1284 = vst [vmem:[#allocation2 + $0xe0] sm:$0xf] %v1080_v16  ;;  %v11068_v52 = vld [vmem:[#allocation2 + $0xb8] sm:$0xf0]  ;;  %v901_v16 = vld [vmem:[%s12303_s15 + $0x54] sm:$0xf] }
 0x13e   : > { %v12568_v8 = vadd.f32 %v2262_v23, %v1942_v62  ;;  %v1898_v20 = vadd.f32 %v1897_v47, %v1848_v9  ;;  %v12577_v23 = vrot.slane %v620_v17, 7  ;;  %v631_v62 = vshll.u32 %v459_v56, 16  ;;  %v9173_v56 = vld [vmem:[#allocation2 + $0xd8] sm:$0xf] }
 0x13f   : > { %2816 = vmatmul.bf16.gmra.mxu3 %v9166_v57  ;;  %v11316_v57 = vld [vmem:[#allocation7 + $0x1b8] sm:$0xff]  ;;  %v630_v9 = vrot.slane %v628_v58, 7  ;;  %v1092_v17 = vrot.slane %v1090_v63, 5  ;;  %v1115_v26 = vshll.u32 %v901_v16, 16  ;;  %v1119_v28 = vshrl.u32 %v901_v16, 16 }
 0x140   : > { %2315 = vmatmul.bf16.gmra.mxu0 %v8974_v2  ;;  %v625_v14 = vor.u32 %v623_v24, %v12577_v23  ;;  %v11066_v2 = vld [vmem:[#allocation2 + $0xac] sm:$0xf]  ;;  %4676 = vmatpush.bf16.msrb.mxu3 %v11316_v57  ;;  %v626_v15 = vrot.slane %v12577_v23, 4  ;;  %v11220_v24 = vld [vmem:[#allocation7 + $0x38] sm:$0xff] }
 0x141   : > { %v633_v25 = vor.u32 %v631_v62, %v630_v9  ;;  %4176 = vmatpush.bf16.msrb.mxu0 %v11220_v24  ;;  %v900_v9 = vld [vmem:[%s12303_s15 + $0x50] sm:$0xf]  ;;  %v461_v24 = vld [vmem:[%s12303_s15 + $0x54] sm:$0xf] }
 0x142   : > { %v2267_v27 = vpop.f32.mrf.mxu3  ;;  %v1899_v29 = vpop.f32.mrf.mxu1  ;;  %v803_v6 = vsel %vm12333_vm6, %v625_v14, %v802_v32  ;;  %v393_v14 = vld [vmem:[%s12303_s15 + $0x48] sm:$0xf]  ;;  %v1093_v32 = vor.u32 %v1092_v17, %v1089_v11  ;;  %v1346_v53 = vld [vmem:[#allocation2 + $0x104] sm:$0x8]  ;;  %v1109_v17 = vshll.u32 %v900_v9, 16 }
 0x143   : > { %v1943_v30 = vpop.f32.mrf.mxu2  ;;  %804 = vst [vmem:[#allocation2 + $0xf0] sm:$0xf] %v803_v6  ;;  %v634_v23 = vsel %vm12340_vm7, %v626_v15, %v633_v25  ;;  %v12602_v6 = vrot.slane %v1115_v26, 5  ;;  %v1347_v58 = vsel %vm12391_vm14, 0, %v1346_v53  ;;  %v1106_v15 = vshrl.u32 %v900_v9, 16 }
 0x144   : > { %v1944_v42 = vadd.f32 %v1943_v30, %v1895_v44  ;;  %v11236_v44 = vld [vmem:[#allocation7 + $0xb8] sm:$0xff]  ;;  %v394_v30 = vld [vmem:[%s12303_s15 + $0x4c] sm:$0xf]  ;;  %426 = vst [vmem:[#allocation2 + $0xf4] sm:$0xf] %v393_v14  ;;  %v1111_v14 = vrot.slane %v1109_v17, 5 }
 0x145   : > { %v1850_v49 = vpop.f32.mrf.mxu0  ;;  %4274 = vmatpush.bf16.msrb.mxu2 %v11236_v44  ;;  %805 = vst [vmem:[#allocation2 + $0xfc] sm:$0xf] %v634_v23  ;;  %v9289_v22 = vld [vmem:[#allocation2 + $0xe0] sm:$0xf]  ;;  %v1293_v25 = vld [vmem:[#allocation2 + $0x11c] sm:$0xf] }
 0x146   : > { %v12584_v46 = vadd.f32 %v2264_v51, %v1944_v42  ;;  %v12588_v47 = vadd.f32 %v1899_v29, %v1850_v49  ;;  %v8990_v51 = vor.u32 %v11068_v52, %v8989_v40  ;;  %v8986_v29 = vor.u32 %v11066_v2, %v8983_v3  ;;  %v11163_v49 = vld [vmem:[#allocation2 + $0xe0] sm:$0xf0]  ;;  %427 = vst [vmem:[#allocation2 + $0x100] sm:$0xf] %v394_v30  ;;  %v11235_v30 = vld [vmem:[#allocation7 + $0xb0] sm:$0xff] }
 0x147   : > { %2767 = vmatmul.bf16.gmra.mxu2 %v9162_v38  ;;  %v636_v38 = vshrl.u32 %v460_v35, 16  ;;  %v1094_v40 = vrot.slane %v1093_v32, 4  ;;  %v1121_v52 = vrot.slane %v1119_v28, 4  ;;  %1348 = vst [vmem:[#allocation2 + $0x104] sm:$0x8] %v1347_v58  ;;  %v9174_v3 = vor.u32 %v11163_v49, %v9173_v56  ;;  %v11315_v32 = vld [vmem:[#allocation7 + $0x1b0] sm:$0xff] }
 0x148   : > { %v644_v28 = vshrl.u32 %v461_v24, 16  ;;  %4677 = vmatpush.bf16.msrb.mxu3 %v11315_v32  ;;  %v903_v58 = vld [vmem:[%s12303_s15 + $0x5c] sm:$0xf]  ;;  %v396_v9 = vld [vmem:[%s12303_s15 + $0x54] sm:$0xf] }
 0x149   : > { %v12608_v54 = vrot.slane %v636_v38, 7  ;;  %v1099_v57 = vsel %vm12354_vm9, %v1094_v40, %v12570_v18  ;;  %v1122_v60 = vor.u32 %v1121_v52, %v12602_v6  ;;  %v11143_v40 = vld [vmem:[#allocation2 + $0x40] sm:$0xf0]  ;;  %4275 = vmatpush.bf16.msrb.mxu2 %v11235_v30  ;;  %429 = vst [vmem:[#allocation2 + $0x118] sm:$0xf] %v396_v9 }
 0x14a   : > { %v12591_v61 = vpop.f32.mrf.mxu3  ;;  %v1902_v0 = vpop.f32.mrf.mxu1  ;;  %1288 = vst [vmem:[#allocation2 + $0xf8] sm:$0xf] %v1099_v57  ;;  %v646_v23 = vrot.slane %v644_v28, 7 }
 0x14b   : > { %v1946_v12 = vpop.f32.mrf.mxu2  ;;  %v641_v62 = vor.u32 %v639_v55, %v12608_v54  ;;  %v1123_v11 = vrot.slane %v1122_v60, 4  ;;  %v642_v55 = vrot.slane %v12608_v54, 4  ;;  %v395_v54 = vld [vmem:[%s12303_s15 + $0x50] sm:$0xf] }
 0x14c   : > { %v1947_v21 = vadd.f32 %v1946_v12, %v1898_v20  ;;  %v859_v20 = vld [vmem:[#allocation2 + $0xf0] sm:$0x1]  ;;  %v11238_v12 = vld [vmem:[#allocation2 + $0xe0] sm:$0xf0]  ;;  %428 = vst [vmem:[#allocation2 + $0x10c] sm:$0xf] %v395_v54 }
 0x14d   : > { %2369 = vmatmul.bf16.gmra.mxu1 %v8990_v51  ;;  %v1853_v42 = vpop.f32.mrf.mxu0  ;;  %v1294_v35 = vsel %vm12361_vm11, %v1123_v11, %v1293_v25 }
 0x14e   : > { %v12598_v39 = vadd.f32 %v2267_v27, %v1947_v21  ;;  %v12604_v45 = vadd.f32 %v1902_v0, %v1853_v42  ;;  %v860_v27 = vsel %vm12369_vm12, 0, %v859_v20  ;;  %v806_v0 = vld [vmem:[#allocation2 + $0x108] sm:$0xf]  ;;  %v647_v20 = vshll.u32 %v461_v24, 16  ;;  %1295 = vst [vmem:[#allocation2 + $0x11c] sm:$0xf] %v1294_v35 }
 0x14f   : > { %2821 = vmatmul.bf16.gmra.mxu3 %v9178_v4  ;;  %861 = vst [vmem:[#allocation2 + $0xf0] sm:$0x1] %v860_v27  ;;  %v9281_v4 = vld [vmem:[#allocation2 + $0xd8] sm:$0xf]  ;;  %v807_v18 = vsel %vm12333_vm6, %v641_v62, %v806_v0  ;;  %v11219_v62 = vld [vmem:[#allocation7 + $0x30] sm:$0xff]  ;;  %v1134_v0 = vshll.u32 %v903_v58, 16 }
 0x150   : > { %2320 = vmatmul.bf16.gmra.mxu0 %v8986_v29  ;;  %808 = vst [vmem:[#allocation2 + $0x108] sm:$0xf] %v807_v18  ;;  %v1108_v29 = vrot.slane %v1106_v15, 4  ;;  %v9097_v27 = vld [vmem:[#allocation2 + $0x38] sm:$0xf]  ;;  %v649_v56 = vor.u32 %v647_v20, %v646_v23 }
 0x151   : > { %v12646_v15 = vrot.slane %v1134_v0, 5  ;;  %4177 = vmatpush.bf16.msrb.mxu0 %v11219_v62  ;;  %v810_v20 = vld [vmem:[#allocation2 + $0x120] sm:$0xf]  ;;  %v463_v62 = vld [vmem:[%s12303_s15 + $0x5c] sm:$0xf] }
 0x152   : > { %v12610_v44 = vpop.f32.mrf.mxu3  ;;  %v1904_v51 = vpop.f32.mrf.mxu1  ;;  %v1112_v38 = vor.u32 %v1111_v14, %v1108_v29  ;;  %v9283_v14 = vld [vmem:[#allocation2 + $0xe4] sm:$0xf0]  ;;  %v11242_v0 = vld [vmem:[#allocation2 + $0x100] sm:$0xf0] }
 0x153   : > { %v1948_v63 = vpop.f32.mrf.mxu2 }
 0x154   : > { %v1949_v2 = vadd.f32 %v1948_v63, %v12588_v47  ;;  %v11239_v47 = vld [vmem:[#allocation2 + $0xe8] sm:$0xf0]  ;;  %v1113_v57 = vrot.slane %v1112_v38, 4  ;;  %v1297_v38 = vld [vmem:[#allocation2 + $0x134] sm:$0xf] }
 0x155   : > { %v1855_v21 = vpop.f32.mrf.mxu0  ;;  %v9290_v52 = vor.u32 %v11239_v47, %v9289_v22  ;;  %v11237_v22 = vld [vmem:[#allocation2 + $0xdc] sm:$0xf] }
 0x156   : > { %v12624_v16 = vadd.f32 %v12591_v61, %v1949_v2  ;;  %v12627_v26 = vadd.f32 %v1904_v51, %v1855_v21  ;;  %v9282_v61 = vor.u32 %v11238_v12, %v9281_v4  ;;  %v11227_v51 = vld [vmem:[#allocation7 + $0x70] sm:$0xff]  ;;  %v1138_v2 = vshrl.u32 %v903_v58, 16  ;;  %v462_v12 = vld [vmem:[%s12303_s15 + $0x58] sm:$0xf] }
 0x157   : > { %2772 = vmatmul.bf16.gmra.mxu2 %v9174_v3  ;;  %v862_v63 = vld [vmem:[#allocation2 + $0x108] sm:$0x1]  ;;  %v9098_v3 = vor.u32 %v11143_v40, %v9097_v27  ;;  %v650_v4 = vsel %vm12340_vm7, %v642_v55, %v649_v56  ;;  %4226 = vmatpush.bf16.msrb.mxu1 %v11227_v51  ;;  %v1118_v24 = vsel %vm12354_vm9, %v1113_v57, %v12602_v6  ;;  %v652_v25 = vshrl.u32 %v462_v12, 16  ;;  %v902_v40 = vld [vmem:[%s12303_s15 + $0x58] sm:$0xf] }
 0x158   : > { %v863_v18 = vsel %vm12369_vm12, 0, %v862_v63  ;;  %809 = vst [vmem:[#allocation2 + $0x114] sm:$0xf] %v650_v4  ;;  %v1140_v17 = vrot.slane %v1138_v2, 4  ;;  %v655_v47 = vshll.u32 %v462_v12, 16  ;;  %v9286_v27 = vor.u32 %v11237_v22, %v9283_v14  ;;  %v11234_v4 = vld [vmem:[#allocation7 + $0xa8] sm:$0xff] }
 0x159   : > { %864 = vst [vmem:[#allocation2 + $0x108] sm:$0x1] %v863_v18  ;;  %v654_v32 = vrot.slane %v652_v25, 7  ;;  %v1125_v56 = vshrl.u32 %v902_v40, 16  ;;  %v1128_v57 = vshll.u32 %v902_v40, 16  ;;  %v660_v2 = vshrl.u32 %v463_v62, 16  ;;  %4276 = vmatpush.bf16.msrb.mxu2 %v11234_v4 }
 0x15a   : > { %v12631_v42 = vpop.f32.mrf.mxu3  ;;  %v2335_v49 = vpop.f32.mrf.mxu1  ;;  %v1141_v28 = vor.u32 %v1140_v17, %v12646_v15  ;;  %1292 = vst [vmem:[#allocation2 + $0x110] sm:$0xf] %v1118_v24  ;;  %v9293_v51 = vld [vmem:[#allocation2 + $0xf0] sm:$0xf]  ;;  %v9301_v63 = vld [vmem:[#allocation2 + $0xf8] sm:$0xf] }
 0x15b   : > { %v1951_v53 = vpop.f32.mrf.mxu2  ;;  %v657_v23 = vor.u32 %v655_v47, %v654_v32  ;;  %v11314_v18 = vld [vmem:[#allocation7 + $0x1a8] sm:$0xff]  ;;  %v1130_v54 = vrot.slane %v1128_v57, 5  ;;  %v662_v12 = vrot.slane %v660_v2, 7  ;;  %v663_v17 = vshll.u32 %v463_v62, 16  ;;  %v9109_v22 = vld [vmem:[#allocation2 + $0x50] sm:$0xf] }
 0x15c   : > { %v1952_v60 = vadd.f32 %v1951_v53, %v12604_v45  ;;  %v1142_v6 = vrot.slane %v1141_v28, 4  ;;  %v11241_v53 = vld [vmem:[#allocation2 + $0xf8] sm:$0xf0]  ;;  %v9302_v25 = vor.u32 %v11242_v0, %v9301_v63  ;;  %4678 = vmatpush.bf16.msrb.mxu3 %v11314_v18  ;;  %v658_v47 = vrot.slane %v654_v32, 4  ;;  %v905_v14 = vld [vmem:[%s12303_s15 + $0x64] sm:$0xf] }
 0x15d   : > { %3765 = vmatmul.bf16.vlgmr.msra.gmra.mxu1 %v9282_v61  ;;  %v2286_v45 = vpop.f32.mrf.mxu0  ;;  %v811_v55 = vsel %vm12333_vm6, %v657_v23, %v810_v20  ;;  %v11146_v24 = vld [vmem:[#allocation2 + $0x58] sm:$0xf0]  ;;  %v665_v28 = vor.u32 %v663_v17, %v662_v12  ;;  %v1153_v20 = vshll.u32 %v905_v14, 16  ;;  %v397_v40 = vld [vmem:[%s12303_s15 + $0x58] sm:$0xf] }
 0x15e   : > { %v12643_v11 = vadd.f32 %v12610_v44, %v1952_v60  ;;  %v2287_v21 = vadd.f32 %v2286_v45, %v12529_v37  ;;  %v1349_v44 = vld [vmem:[#allocation2 + $0x11c] sm:$0x8]  ;;  %812 = vst [vmem:[#allocation2 + $0x120] sm:$0xf] %v811_v55  ;;  %v464_v32 = vld [vmem:[%s12303_s15 + $0x60] sm:$0xf] }
 0x15f   : > { %3863 = vmatmul.bf16.vlgmr.msra.gmra.mxu3 %v9290_v52  ;;  %v1350_v37 = vsel %vm12391_vm14, 0, %v1349_v44  ;;  %v1298_v52 = vsel %vm12361_vm11, %v1142_v6, %v1297_v38  ;;  %v11218_v6 = vld [vmem:[#allocation7 + $0x28] sm:$0xff]  ;;  %v9110_v38 = vor.u32 %v11146_v24, %v9109_v22  ;;  %430 = vst [vmem:[#allocation2 + $0x124] sm:$0xf] %v397_v40  ;;  %v12686_v63 = vrot.slane %v1153_v20, 5 }
 0x160   : > { %v12653_v29 = vadd.f32 %v2335_v49, %v2287_v21  ;;  %2835 = vmatmul.bf16.vlgmr.msra.gmra.mxu0 %v9098_v3  ;;  %1351 = vst [vmem:[#allocation2 + $0x11c] sm:$0x8] %v1350_v37  ;;  %v1127_v3 = vrot.slane %v1125_v56, 4  ;;  %v11240_v56 = vld [vmem:[#allocation2 + $0xf4] sm:$0xf] }
 0x161   : > { %1299 = vst [vmem:[#allocation2 + $0x134] sm:$0xf] %v1298_v52  ;;  %v398_v52 = vld [vmem:[%s12303_s15 + $0x5c] sm:$0xf]  ;;  %4178 = vmatpush.bf16.msrb.mxu0 %v11218_v6  ;;  %v904_v22 = vld [vmem:[%s12303_s15 + $0x60] sm:$0xf] }
 0x162   : > { %v2787_v30 = vpop.f32.mrf.mxu3  ;;  %v2337_v35 = vpop.f32.mrf.mxu1  ;;  %431 = vst [vmem:[#allocation2 + $0x130] sm:$0xf] %v398_v52  ;;  %v9305_v24 = vld [vmem:[#allocation2 + $0x108] sm:$0xf]  ;;  %v1301_v20 = vld [vmem:[#allocation2 + $0x14c] sm:$0xf] }
 0x163   : > { %v1953_v61 = vpop.f32.mrf.mxu2 }
 0x164   : > { %v1954_v49 = vadd.f32 %v1953_v61, %v12627_v26 }
 0x165   : > { %v2288_v60 = vpop.f32.mrf.mxu0 }
 0x166   : > { %v12664_v58 = vadd.f32 %v12631_v42, %v1954_v49  ;;  %v2289_v26 = vadd.f32 %v2288_v60, %v12531_v50  ;;  %v9294_v42 = vor.u32 %v11241_v53, %v9293_v51  ;;  %v1131_v50 = vor.u32 %v1130_v54, %v1127_v3 }
 0x167   : > { %3814 = vmatmul.bf16.vlgmr.msra.gmra.mxu2 %v9286_v27  ;;  %v666_v49 = vsel %vm12340_vm7, %v658_v47, %v665_v28  ;;  %v865_v27 = vld [vmem:[#allocation2 + $0x120] sm:$0x1]  ;;  %v668_v60 = vshrl.u32 %v464_v32, 16  ;;  %v1157_v51 = vshrl.u32 %v905_v14, 16  ;;  %v1147_v47 = vshll.u32 %v904_v22, 16 }
 0x168   : > { %v12668_v9 = vadd.f32 %v2337_v35, %v2289_v26  ;;  %v11226_v35 = vld [vmem:[#allocation7 + $0x68] sm:$0xff]  ;;  %v1132_v61 = vrot.slane %v1131_v50, 4  ;;  %v1352_v23 = vld [vmem:[#allocation2 + $0x134] sm:$0x8]  ;;  %813 = vst [vmem:[#allocation2 + $0x12c] sm:$0xf] %v666_v49 }
 0x169   : > { %4227 = vmatpush.bf16.msrb.mxu1 %v11226_v35  ;;  %v1353_v62 = vsel %vm12391_vm14, 0, %v1352_v23  ;;  %v671_v26 = vshll.u32 %v464_v32, 16  ;;  %v670_v3 = vrot.slane %v668_v60, 7  ;;  %v1159_v4 = vrot.slane %v1157_v51, 4  ;;  %v9313_v14 = vld [vmem:[#allocation2 + $0x110] sm:$0xf] }
 0x16a   : > { %v2789_v45 = vpop.f32.mrf.mxu3  ;;  %v2340_v21 = vpop.f32.mrf.mxu1  ;;  %v1137_v57 = vsel %vm12354_vm9, %v1132_v61, %v12646_v15  ;;  %1354 = vst [vmem:[#allocation2 + $0x134] sm:$0x8] %v1353_v62  ;;  %v465_v35 = vld [vmem:[%s12303_s15 + $0x64] sm:$0xf]  ;;  %v11245_v61 = vld [vmem:[#allocation2 + $0x118] sm:$0xf0] }
 0x16b   : > { %v2738_v44 = vpop.f32.mrf.mxu2  ;;  %1296 = vst [vmem:[#allocation2 + $0x128] sm:$0xf] %v1137_v57  ;;  %v673_v54 = vor.u32 %v671_v26, %v670_v3  ;;  %v11313_v49 = vld [vmem:[#allocation7 + $0x1a0] sm:$0xff]  ;;  %v9121_v57 = vld [vmem:[#allocation2 + $0x68] sm:$0xf] }
 0x16c   : > { %v12671_v37 = vadd.f32 %v2787_v30, %v2738_v44  ;;  %v866_v30 = vsel %vm12369_vm12, 0, %v865_v27  ;;  %v1144_v44 = vshrl.u32 %v904_v22, 16  ;;  %v1149_v27 = vrot.slane %v1147_v47, 5  ;;  %v11149_v60 = vld [vmem:[#allocation2 + $0x70] sm:$0xf0]  ;;  %4679 = vmatpush.bf16.msrb.mxu3 %v11313_v49 }
 0x16d   : > { %3770 = vmatmul.bf16.gmra.mxu1 %v9294_v42  ;;  %v2291_v53 = vpop.f32.mrf.mxu0  ;;  %867 = vst [vmem:[#allocation2 + $0x120] sm:$0x1] %v866_v30  ;;  %v814_v42 = vld [vmem:[#allocation2 + $0x138] sm:$0xf]  ;;  %v400_v47 = vld [vmem:[%s12303_s15 + $0x64] sm:$0xf] }
 0x16e   : > { %v2292_v55 = vadd.f32 %v2291_v53, %v12533_v5  ;;  %v9295_v5 = vld [vmem:[#allocation2 + $0xfc] sm:$0xf0]  ;;  %v815_v50 = vsel %vm12333_vm6, %v673_v54, %v814_v42  ;;  %v1146_v23 = vrot.slane %v1144_v44, 4  ;;  %v9307_v49 = vld [vmem:[#allocation2 + $0x114] sm:$0xf0] }
 0x16f   : > { %3868 = vmatmul.bf16.gmra.mxu3 %v9302_v25  ;;  %v9298_v17 = vor.u32 %v11240_v56, %v9295_v5  ;;  %v11244_v25 = vld [vmem:[#allocation2 + $0x110] sm:$0xf0]  ;;  %816 = vst [vmem:[#allocation2 + $0x138] sm:$0xf] %v815_v50  ;;  %v674_v5 = vrot.slane %v670_v3, 4  ;;  %v11225_v54 = vld [vmem:[#allocation7 + $0x60] sm:$0xff] }
 0x170   : > { %v12688_v0 = vadd.f32 %v2340_v21, %v2292_v55  ;;  %2840 = vmatmul.bf16.gmra.mxu0 %v9110_v38  ;;  %v1160_v21 = vor.u32 %v1159_v4, %v12686_v63  ;;  %v11233_v38 = vld [vmem:[#allocation7 + $0xa0] sm:$0xff]  ;;  %v9306_v30 = vor.u32 %v11244_v25, %v9305_v24  ;;  %v679_v55 = vshll.u32 %v465_v35, 16  ;;  %4228 = vmatpush.bf16.msrb.mxu1 %v11225_v54 }
 0x171   : > { %4277 = vmatpush.bf16.msrb.mxu2 %v11233_v38  ;;  %v1150_v51 = vor.u32 %v1149_v27, %v1146_v23  ;;  %v11217_v42 = vld [vmem:[#allocation7 + $0x20] sm:$0xff]  ;;  %v9122_v24 = vor.u32 %v11149_v60, %v9121_v57  ;;  %v11243_v23 = vld [vmem:[#allocation2 + $0x10c] sm:$0xf]  ;;  %433 = vst [vmem:[#allocation2 + $0x148] sm:$0xf] %v400_v47 }
 0x172   : > { %v2792_v2 = vpop.f32.mrf.mxu3  ;;  %v2342_v18 = vpop.f32.mrf.mxu1  ;;  %v1161_v40 = vrot.slane %v1160_v21, 4  ;;  %v399_v44 = vld [vmem:[%s12303_s15 + $0x60] sm:$0xf]  ;;  %4179 = vmatpush.bf16.msrb.mxu0 %v11217_v42  ;;  %v818_v60 = vld [vmem:[#allocation2 + $0x150] sm:$0xf] }
 0x173   : > { %v2740_v15 = vpop.f32.mrf.mxu2  ;;  %432 = vst [vmem:[#allocation2 + $0x13c] sm:$0xf] %v399_v44  ;;  %v11312_v44 = vld [vmem:[#allocation7 + $0x198] sm:$0xff] }
 0x174   : > { %v12690_v12 = vadd.f32 %v2789_v45, %v2740_v15  ;;  %v676_v45 = vshrl.u32 %v465_v35, 16  ;;  %v1302_v62 = vsel %vm12361_vm11, %v1161_v40, %v1301_v20  ;;  %4680 = vmatpush.bf16.msrb.mxu3 %v11312_v44 }
 0x175   : > { %v2293_v28 = vpop.f32.mrf.mxu0  ;;  %1303 = vst [vmem:[#allocation2 + $0x14c] sm:$0xf] %v1302_v62  ;;  %v9310_v62 = vor.u32 %v11243_v23, %v9307_v49  ;;  %v11152_v23 = vld [vmem:[#allocation2 + $0x88] sm:$0xf0] }
 0x176   : > { %v2294_v6 = vadd.f32 %v2293_v28, %v12535_v19  ;;  %v678_v32 = vrot.slane %v676_v45, 7  ;;  %v9314_v19 = vor.u32 %v11245_v61, %v9313_v14  ;;  %v868_v50 = vld [vmem:[#allocation2 + $0x138] sm:$0x1]  ;;  %v466_v28 = vld [vmem:[%s12303_s15 + $0x68] sm:$0xf] }
 0x177   : > { %3819 = vmatmul.bf16.gmra.mxu2 %v9298_v17  ;;  %v1151_v17 = vrot.slane %v1150_v51, 4  ;;  %v684_v61 = vshrl.u32 %v466_v28, 16  ;;  %v687_v20 = vshll.u32 %v466_v28, 16 }
 0x178   : > { %v12698_v52 = vadd.f32 %v2342_v18, %v2294_v6  ;;  %v681_v4 = vor.u32 %v679_v55, %v678_v32  ;;  %v907_v18 = vld [vmem:[%s12303_s15 + $0x6c] sm:$0xf] }
 0x179   : > { %v1172_v22 = vshll.u32 %v907_v18, 16  ;;  %v1176_v21 = vshrl.u32 %v907_v18, 16  ;;  %v1156_v6 = vsel %vm12354_vm9, %v1151_v17, %v12686_v63  ;;  %v686_v40 = vrot.slane %v684_v61, 7  ;;  %v906_v18 = vld [vmem:[%s12303_s15 + $0x68] sm:$0xf] }
 0x17a   : > { %v2794_v53 = vpop.f32.mrf.mxu3  ;;  %v2345_v56 = vpop.f32.mrf.mxu1  ;;  %v682_v25 = vsel %vm12340_vm7, %v674_v5, %v681_v4  ;;  %1300 = vst [vmem:[#allocation2 + $0x140] sm:$0xf] %v1156_v6  ;;  %v11247_v5 = vld [vmem:[#allocation2 + $0x128] sm:$0xf0]  ;;  %v9325_v17 = vld [vmem:[#allocation2 + $0x128] sm:$0xf] }
 0x17b   : > { %v2743_v26 = vpop.f32.mrf.mxu2  ;;  %817 = vst [vmem:[#allocation2 + $0x144] sm:$0xf] %v682_v25  ;;  %v12712_v14 = vrot.slane %v1172_v22, 5  ;;  %v1178_v45 = vrot.slane %v1176_v21, 4  ;;  %v689_v57 = vor.u32 %v687_v20, %v686_v40  ;;  %v467_v22 = vld [vmem:[%s12303_s15 + $0x6c] sm:$0xf] }
 0x17c   : > { %v12703_v15 = vadd.f32 %v2792_v2, %v2743_v26  ;;  %v869_v2 = vsel %vm12369_vm12, 0, %v868_v50  ;;  %v1355_v32 = vld [vmem:[#allocation2 + $0x14c] sm:$0x8]  ;;  %v9317_v26 = vld [vmem:[#allocation2 + $0x120] sm:$0xf]  ;;  %v1163_v25 = vshrl.u32 %v906_v18, 16 }
 0x17d   : > { %3775 = vmatmul.bf16.gmra.mxu1 %v9306_v30  ;;  %v2296_v3 = vpop.f32.mrf.mxu0  ;;  %870 = vst [vmem:[#allocation2 + $0x138] sm:$0x1] %v869_v2  ;;  %v1356_v63 = vsel %vm12391_vm14, 0, %v1355_v32  ;;  %v819_v4 = vsel %vm12333_vm6, %v689_v57, %v818_v60  ;;  %v11232_v50 = vld [vmem:[#allocation7 + $0x98] sm:$0xff]  ;;  %v1166_v47 = vshll.u32 %v906_v18, 16  ;;  %v9318_v28 = vor.u32 %v11247_v5, %v9317_v26 }
 0x17e   : > { %v2297_v35 = vadd.f32 %v2296_v3, %v12537_v41  ;;  %v1179_v41 = vor.u32 %v1178_v45, %v12712_v14  ;;  %1357 = vst [vmem:[#allocation2 + $0x14c] sm:$0x8] %v1356_v63  ;;  %v695_v6 = vshll.u32 %v467_v22, 16  ;;  %v9133_v45 = vld [vmem:[#allocation2 + $0x80] sm:$0xf]  ;;  %4278 = vmatpush.bf16.msrb.mxu2 %v11232_v50  ;;  %v690_v32 = vrot.slane %v686_v40, 4 }
 0x17f   : > { %3873 = vmatmul.bf16.gmra.mxu3 %v9314_v19  ;;  %v1305_v19 = vld [vmem:[#allocation2 + $0x164] sm:$0xf]  ;;  %820 = vst [vmem:[#allocation2 + $0x150] sm:$0xf] %v819_v4  ;;  %v1168_v49 = vrot.slane %v1166_v47, 5  ;;  %v11224_v57 = vld [vmem:[#allocation7 + $0x58] sm:$0xff] }
 0x180   : > { %v12718_v38 = vadd.f32 %v2345_v56, %v2297_v35  ;;  %2845 = vmatmul.bf16.gmra.mxu0 %v9122_v24  ;;  %v1180_v56 = vrot.slane %v1179_v41, 4  ;;  %v11248_v24 = vld [vmem:[#allocation2 + $0x130] sm:$0xf0]  ;;  %v11216_v60 = vld [vmem:[#allocation7 + $0x18] sm:$0xff]  ;;  %v401_v4 = vld [vmem:[%s12303_s15 + $0x68] sm:$0xf]  ;;  %4229 = vmatpush.bf16.msrb.mxu1 %v11224_v57 }
 0x181   : > { %v9326_v20 = vor.u32 %v11248_v24, %v9325_v17  ;;  %v402_v18 = vld [vmem:[%s12303_s15 + $0x6c] sm:$0xf]  ;;  %4180 = vmatpush.bf16.msrb.mxu0 %v11216_v60  ;;  %434 = vst [vmem:[#allocation2 + $0x154] sm:$0xf] %v401_v4 }
 0x182   : > { %v2797_v27 = vpop.f32.mrf.mxu3  ;;  %v2347_v30 = vpop.f32.mrf.mxu1  ;;  %v1306_v54 = vsel %vm12361_vm11, %v1180_v56, %v1305_v19  ;;  %435 = vst [vmem:[#allocation2 + $0x160] sm:$0xf] %v402_v18 }
 0x183   : > { %v2745_v55 = vpop.f32.mrf.mxu2  ;;  %1307 = vst [vmem:[#allocation2 + $0x164] sm:$0xf] %v1306_v54 }
 0x184   : > { %v12723_v51 = vadd.f32 %v2794_v53, %v2745_v55  ;;  %v692_v53 = vshrl.u32 %v467_v22, 16 }
 0x185   : > { %v2298_v42 = vpop.f32.mrf.mxu0  ;;  %v11251_v18 = vld [vmem:[#allocation2 + $0x148] sm:$0xf0] }
 0x186   : > { %v2299_v21 = vadd.f32 %v2298_v42, %v12539_v43  ;;  %v694_v35 = vrot.slane %v692_v53, 7  ;;  %v1165_v43 = vrot.slane %v1163_v25, 4  ;;  %v871_v5 = vld [vmem:[#allocation2 + $0x150] sm:$0x1] }
 0x187   : > { %3824 = vmatmul.bf16.gmra.mxu2 %v9310_v62  ;;  %v9134_v62 = vor.u32 %v11152_v23, %v9133_v45 }
 0x188   : > { %v12732_v3 = vadd.f32 %v2347_v30, %v2299_v21  ;;  %v697_v55 = vor.u32 %v695_v6, %v694_v35  ;;  %v909_v30 = vld [vmem:[%s12303_s15 + $0x74] sm:$0xf]  ;;  %v1169_v56 = vor.u32 %v1168_v49, %v1165_v43  ;;  %v468_v21 = vld [vmem:[%s12303_s15 + $0x70] sm:$0xf]  ;;  %v822_v43 = vld [vmem:[#allocation2 + $0x168] sm:$0xf] }
 0x189   : > { %v1191_v19 = vshll.u32 %v909_v30, 16  ;;  %v700_v25 = vshrl.u32 %v468_v21, 16  ;;  %v703_v50 = vshll.u32 %v468_v21, 16  ;;  %v1195_v44 = vshrl.u32 %v909_v30, 16  ;;  %v9329_v30 = vld [vmem:[#allocation2 + $0x138] sm:$0xf] }
 0x18a   : > { %v2799_v2 = vpop.f32.mrf.mxu3  ;;  %v2350_v61 = vpop.f32.mrf.mxu1  ;;  %v698_v26 = vsel %vm12340_vm7, %v690_v32, %v697_v55  ;;  %v1170_v40 = vrot.slane %v1169_v56, 4  ;;  %v1358_v42 = vld [vmem:[#allocation2 + $0x164] sm:$0x8]  ;;  %v908_v32 = vld [vmem:[%s12303_s15 + $0x70] sm:$0xf] }
 0x18b   : > { %v2748_v41 = vpop.f32.mrf.mxu2  ;;  %821 = vst [vmem:[#allocation2 + $0x15c] sm:$0xf] %v698_v26  ;;  %v1359_v22 = vsel %vm12391_vm14, 0, %v1358_v42  ;;  %v12747_v24 = vrot.slane %v1191_v19, 5  ;;  %v702_v45 = vrot.slane %v700_v25, 7  ;;  %v1197_v23 = vrot.slane %v1195_v44, 4 }
 0x18c   : > { %v12735_v63 = vadd.f32 %v2797_v27, %v2748_v41  ;;  %v872_v27 = vsel %vm12369_vm12, 0, %v871_v5  ;;  %v1175_v53 = vsel %vm12354_vm9, %v1170_v40, %v12712_v14  ;;  %1360 = vst [vmem:[#allocation2 + $0x164] sm:$0x8] %v1359_v22  ;;  %v11250_v41 = vld [vmem:[#allocation2 + $0x140] sm:$0xf0]  ;;  %v1182_v57 = vshrl.u32 %v908_v32, 16 }
 0x18d   : > { %3780 = vmatmul.bf16.gmra.mxu1 %v9318_v28  ;;  %v2301_v54 = vpop.f32.mrf.mxu0  ;;  %873 = vst [vmem:[#allocation2 + $0x150] sm:$0x1] %v872_v27  ;;  %v9319_v28 = vld [vmem:[#allocation2 + $0x12c] sm:$0xf0]  ;;  %v1198_v55 = vor.u32 %v1197_v23, %v12747_v24  ;;  %v1185_v60 = vshll.u32 %v908_v32, 16  ;;  %v9330_v25 = vor.u32 %v11250_v41, %v9329_v30 }
 0x18e   : > { %v2302_v17 = vadd.f32 %v2301_v54, %v12542_v13  ;;  %v11246_v13 = vld [vmem:[#allocation2 + $0x124] sm:$0xf]  ;;  %1304 = vst [vmem:[#allocation2 + $0x158] sm:$0xf] %v1175_v53  ;;  %v1309_v56 = vld [vmem:[#allocation2 + $0x17c] sm:$0xf] }
 0x18f   : > { %3878 = vmatmul.bf16.gmra.mxu3 %v9326_v20  ;;  %v9322_v49 = vor.u32 %v11246_v13, %v9319_v28  ;;  %v469_v26 = vld [vmem:[%s12303_s15 + $0x74] sm:$0xf]  ;;  %v1199_v4 = vrot.slane %v1198_v55, 4  ;;  %v1184_v27 = vrot.slane %v1182_v57, 4  ;;  %v9145_v13 = vld [vmem:[#allocation2 + $0x98] sm:$0xf] }
 0x190   : > { %v12752_v47 = vadd.f32 %v2350_v61, %v2302_v17  ;;  %2850 = vmatmul.bf16.gmra.mxu0 %v9134_v62  ;;  %v705_v61 = vor.u32 %v703_v50, %v702_v45  ;;  %v9337_v62 = vld [vmem:[#allocation2 + $0x140] sm:$0xf]  ;;  %v708_v54 = vshrl.u32 %v469_v26, 16  ;;  %v11231_v40 = vld [vmem:[#allocation7 + $0x90] sm:$0xff]  ;;  %v1187_v17 = vrot.slane %v1185_v60, 5 }
 0x191   : > { %v11311_v42 = vld [vmem:[#allocation7 + $0x190] sm:$0xff]  ;;  %v1310_v22 = vsel %vm12361_vm11, %v1199_v4, %v1309_v56  ;;  %v711_v44 = vshll.u32 %v469_v26, 16  ;;  %v11155_v28 = vld [vmem:[#allocation2 + $0xa0] sm:$0xf0]  ;;  %v9338_v23 = vor.u32 %v11251_v18, %v9337_v62  ;;  %4279 = vmatpush.bf16.msrb.mxu2 %v11231_v40 }
 0x192   : > { %v2802_v35 = vpop.f32.mrf.mxu3  ;;  %v2352_v6 = vpop.f32.mrf.mxu1  ;;  %v823_v5 = vsel %vm12333_vm6, %v705_v61, %v822_v43  ;;  %v710_v50 = vrot.slane %v708_v54, 7  ;;  %1311 = vst [vmem:[#allocation2 + $0x17c] sm:$0xf] %v1310_v22  ;;  %4681 = vmatpush.bf16.msrb.mxu3 %v11311_v42  ;;  %v911_v61 = vld [vmem:[%s12303_s15 + $0x7c] sm:$0xf]  ;;  %v11223_v41 = vld [vmem:[#allocation7 + $0x50] sm:$0xff]  ;;  %v9146_v56 = vor.u32 %v11155_v28, %v9145_v13 }
 0x193   : > { %v2750_v20 = vpop.f32.mrf.mxu2  ;;  %824 = vst [vmem:[#allocation2 + $0x168] sm:$0xf] %v823_v5  ;;  %v11215_v55 = vld [vmem:[#allocation7 + $0x10] sm:$0xff]  ;;  %v1210_v57 = vshll.u32 %v911_v61, 16  ;;  %v1214_v60 = vshrl.u32 %v911_v61, 16  ;;  %4230 = vmatpush.bf16.msrb.mxu1 %v11223_v41 }
 0x194   : > { %v12754_v14 = vadd.f32 %v2799_v2, %v2750_v20  ;;  %v1188_v20 = vor.u32 %v1187_v17, %v1184_v27  ;;  %v403_v62 = vld [vmem:[%s12303_s15 + $0x70] sm:$0xf]  ;;  %v404_v26 = vld [vmem:[%s12303_s15 + $0x74] sm:$0xf]  ;;  %v470_v5 = vld [vmem:[%s12303_s15 + $0x78] sm:$0xf]  ;;  %4181 = vmatpush.bf16.msrb.mxu0 %v11215_v55 }
 0x195   : > { %v2303_v19 = vpop.f32.mrf.mxu0  ;;  %v11249_v54 = vld [vmem:[#allocation2 + $0x13c] sm:$0xf]  ;;  %436 = vst [vmem:[#allocation2 + $0x16c] sm:$0xf] %v403_v62  ;;  %v1216_v42 = vrot.slane %v1214_v60, 4 }
 0x196   : > { %v2304_v2 = vadd.f32 %v2303_v19, %v12546_v33  ;;  %v1189_v30 = vrot.slane %v1188_v20, 4  ;;  %437 = vst [vmem:[#allocation2 + $0x178] sm:$0xf] %v404_v26  ;;  %v910_v41 = vld [vmem:[%s12303_s15 + $0x78] sm:$0xf] }
 0x197   : > { %3829 = vmatmul.bf16.gmra.mxu2 %v9322_v49  ;;  %v706_v49 = vrot.slane %v702_v45, 4  ;;  %v1204_v60 = vshll.u32 %v910_v41, 16  ;;  %v471_v62 = vld [vmem:[%s12303_s15 + $0x7c] sm:$0xf]  ;;  %v1313_v26 = vld [vmem:[#allocation2 + $0x194] sm:$0xf] }
 0x198   : > { %v12764_v21 = vadd.f32 %v2352_v6, %v2304_v2  ;;  %v713_v6 = vor.u32 %v711_v44, %v710_v50  ;;  %v12774_v2 = vrot.slane %v1210_v57, 5  ;;  %v1194_v40 = vsel %vm12354_vm9, %v1189_v30, %v12747_v24  ;;  %v9341_v30 = vld [vmem:[#allocation2 + $0x150] sm:$0xf] }
 0x199   : > { %v1361_v17 = vld [vmem:[#allocation2 + $0x17c] sm:$0x8]  ;;  %1308 = vst [vmem:[#allocation2 + $0x170] sm:$0xf] %v1194_v40  ;;  %v1201_v57 = vshrl.u32 %v910_v41, 16  ;;  %v11222_v41 = vld [vmem:[#allocation7 + $0x48] sm:$0xff] }
 0x19a   : > { %v2804_v53 = vpop.f32.mrf.mxu3  ;;  %v2355_v33 = vpop.f32.mrf.mxu1  ;;  %v714_v19 = vsel %vm12340_vm7, %v706_v49, %v713_v6  ;;  %v874_v45 = vld [vmem:[#allocation2 + $0x168] sm:$0x1]  ;;  %v1362_v13 = vsel %vm12391_vm14, 0, %v1361_v17  ;;  %v1217_v28 = vor.u32 %v1216_v42, %v12774_v2  ;;  %v11253_v6 = vld [vmem:[#allocation2 + $0x158] sm:$0xf0]  ;;  %4231 = vmatpush.bf16.msrb.mxu1 %v11222_v41 }
 0x19b   : > { %v2753_v43 = vpop.f32.mrf.mxu2  ;;  %825 = vst [vmem:[#allocation2 + $0x174] sm:$0xf] %v714_v19  ;;  %v875_v27 = vsel %vm12369_vm12, 0, %v874_v45  ;;  %v9349_v19 = vld [vmem:[#allocation2 + $0x158] sm:$0xf]  ;;  %v1203_v45 = vrot.slane %v1201_v57, 4  ;;  %v9342_v17 = vor.u32 %v11253_v6, %v9341_v30 }
 0x19c   : > { %v12767_v32 = vadd.f32 %v2802_v35, %v2753_v43  ;;  %v716_v35 = vshrl.u32 %v470_v5, 16  ;;  %876 = vst [vmem:[#allocation2 + $0x168] sm:$0x1] %v875_v27  ;;  %v826_v43 = vld [vmem:[#allocation2 + $0x180] sm:$0xf]  ;;  %v1218_v55 = vrot.slane %v1217_v28, 4 }
 0x19d   : > { %3785 = vmatmul.bf16.gmra.mxu1 %v9330_v25  ;;  %v2306_v4 = vpop.f32.mrf.mxu0  ;;  %v719_v25 = vshll.u32 %v470_v5, 16  ;;  %1363 = vst [vmem:[#allocation2 + $0x17c] sm:$0x8] %v1362_v13  ;;  %v9157_v28 = vld [vmem:[#allocation2 + $0xb0] sm:$0xf]  ;;  %v11214_v6 = vld [vmem:[#allocation7 + $0x8] sm:$0xff] }
 0x19e   : > { %v2307_v18 = vadd.f32 %v2306_v4, %v12552_v7  ;;  %v12782_v22 = vrot.slane %v716_v35, 7  ;;  %v9331_v7 = vld [vmem:[#allocation2 + $0x144] sm:$0xf0]  ;;  %v11254_v4 = vld [vmem:[#allocation2 + $0x160] sm:$0xf0]  ;;  %v1206_v35 = vrot.slane %v1204_v60, 5  ;;  %v1314_v27 = vsel %vm12361_vm11, %v1218_v55, %v1313_v26  ;;  %4182 = vmatpush.bf16.msrb.mxu0 %v11214_v6 }
 0x19f   : > { %3883 = vmatmul.bf16.gmra.mxu3 %v9338_v23  ;;  %v9334_v49 = vor.u32 %v11249_v54, %v9331_v7  ;;  %v11310_v54 = vld [vmem:[#allocation7 + $0x188] sm:$0xff]  ;;  %v727_v7 = vshll.u32 %v471_v62, 16  ;;  %1315 = vst [vmem:[#allocation2 + $0x194] sm:$0xf] %v1314_v27 }
 0x1a0   : > { %v12784_v50 = vadd.f32 %v2355_v33, %v2307_v18  ;;  %2855 = vmatmul.bf16.gmra.mxu0 %v9146_v56  ;;  %v721_v24 = vor.u32 %v719_v25, %v12782_v22  ;;  %v11230_v18 = vld [vmem:[#allocation7 + $0x88] sm:$0xff]  ;;  %4682 = vmatpush.bf16.msrb.mxu3 %v11310_v54 }
 0x1a1   : > { %4280 = vmatpush.bf16.msrb.mxu2 %v11230_v18  ;;  %v9169_v6 = vld [vmem:[#allocation2 + $0xc8] sm:$0xf] }
 0x1a2   : > { %v2807_v44 = vpop.f32.mrf.mxu3  ;;  %v2357_v23 = vpop.f32.mrf.mxu1  ;;  %v827_v61 = vsel %vm12333_vm6, %v721_v24, %v826_v43  ;;  %v9350_v24 = vor.u32 %v11254_v4, %v9349_v19  ;;  %v405_v19 = vld [vmem:[%s12303_s15 + $0x78] sm:$0xf] }
 0x1a3   : > { %v2755_v20 = vpop.f32.mrf.mxu2  ;;  %828 = vst [vmem:[#allocation2 + $0x180] sm:$0xf] %v827_v61 }
 0x1a4   : > { %v12790_v33 = vadd.f32 %v2804_v53, %v2755_v20  ;;  %v724_v53 = vshrl.u32 %v471_v62, 16  ;;  %v1207_v20 = vor.u32 %v1206_v35, %v1203_v45  ;;  %438 = vst [vmem:[#allocation2 + $0x184] sm:$0xf] %v405_v19  ;;  %v9343_v45 = vld [vmem:[#allocation2 + $0x15c] sm:$0xf0] }
 0x1a5   : > { %v2308_v56 = vpop.f32.mrf.mxu0 }
 0x1a6   : > { %v2309_v5 = vadd.f32 %v2308_v56, %v12564_v34  ;;  %v726_v25 = vrot.slane %v724_v53, 7  ;;  %v11158_v34 = vld [vmem:[#allocation2 + $0xb8] sm:$0xf0]  ;;  %v1208_v30 = vrot.slane %v1207_v20, 4  ;;  %v1364_v4 = vld [vmem:[#allocation2 + $0x194] sm:$0x8] }
 0x1a7   : > { %3834 = vmatmul.bf16.gmra.mxu2 %v9334_v49  ;;  %v722_v49 = vrot.slane %v12782_v22, 4  ;;  %v9158_v57 = vor.u32 %v11158_v34, %v9157_v28  ;;  %v406_v22 = vld [vmem:[%s12303_s15 + $0x7c] sm:$0xf]  ;;  %v1365_v18 = vsel %vm12391_vm14, 0, %v1364_v4  ;;  %v9361_v28 = vld [vmem:[#allocation2 + $0x170] sm:$0xf] }
 0x1a8   : > { %v12799_v40 = vadd.f32 %v2357_v23, %v2309_v5  ;;  %v729_v61 = vor.u32 %v727_v7, %v726_v25  ;;  %v1213_v26 = vsel %vm12354_vm9, %v1208_v30, %v12774_v2  ;;  %v11252_v5 = vld [vmem:[#allocation2 + $0x154] sm:$0xf]  ;;  %439 = vst [vmem:[#allocation2 + $0x190] sm:$0xf] %v406_v22  ;;  %v9353_v25 = vld [vmem:[#allocation2 + $0x168] sm:$0xf] }
 0x1a9   : > { %1312 = vst [vmem:[#allocation2 + $0x188] sm:$0xf] %v1213_v26  ;;  %v11256_v7 = vld [vmem:[#allocation2 + $0x170] sm:$0xf0]  ;;  %v11257_v34 = vld [vmem:[#allocation2 + $0x178] sm:$0xf0] }
 0x1aa   : > { %v2809_v42 = vpop.f32.mrf.mxu3  ;;  %v2360_v13 = vpop.f32.mrf.mxu1  ;;  %v877_v55 = vld [vmem:[#allocation2 + $0x180] sm:$0x1]  ;;  %v730_v60 = vsel %vm12340_vm7, %v722_v49, %v729_v61  ;;  %1366 = vst [vmem:[#allocation2 + $0x194] sm:$0x8] %v1365_v18  ;;  %v9354_v61 = vor.u32 %v11256_v7, %v9353_v25  ;;  %v9355_v26 = vld [vmem:[#allocation2 + $0x174] sm:$0xf0] }
 0x1ab   : > { %v2758_v43 = vpop.f32.mrf.mxu2  ;;  %v878_v56 = vsel %vm12369_vm12, 0, %v877_v55  ;;  %829 = vst [vmem:[#allocation2 + $0x18c] sm:$0xf] %v730_v60  ;;  %v11309_v20 = vld [vmem:[#allocation7 + $0x180] sm:$0xff]  ;;  %v11161_v55 = vld [vmem:[#allocation2 + $0xd0] sm:$0xf0] }
 0x1ac   : > { %v12802_v23 = vadd.f32 %v2807_v44, %v2758_v43  ;;  %879 = vst [vmem:[#allocation2 + $0x180] sm:$0x1] %v878_v56  ;;  %4683 = vmatpush.bf16.msrb.mxu3 %v11309_v20  ;;  %v11221_v60 = vld [vmem:[#allocation7 + $0x40] sm:$0xff]  ;;  %v9170_v56 = vor.u32 %v11161_v55, %v9169_v6  ;;  %v11164_v20 = vld [vmem:[#allocation2 + $0xe8] sm:$0xf0] }
 0x1ad   : > { %3790 = vmatmul.bf16.gmra.mxu1 %v9342_v17  ;;  %v2311_v62 = vpop.f32.mrf.mxu0  ;;  %v9346_v17 = vor.u32 %v11252_v5, %v9343_v45 }
 0x1ae   : > { %v2312_v44 = vadd.f32 %v2311_v62, %v12568_v8  ;;  %4232 = vmatpush.bf16.msrb.mxu1 %v11221_v60 }
 0x1af   : > { %3888 = vmatmul.bf16.gmra.mxu3 %v9350_v24  ;;  %v11229_v24 = vld [vmem:[#allocation7 + $0x80] sm:$0xff]  ;;  %v9367_v60 = vld [vmem:[#allocation2 + $0x18c] sm:$0xf0] }
 0x1b0   : > { %v12814_v53 = vadd.f32 %v2360_v13, %v2312_v44  ;;  %2860 = vmatmul.bf16.gmra.mxu0 %v9158_v57  ;;  %4281 = vmatpush.bf16.msrb.mxu2 %v11229_v24  ;;  %v11255_v44 = vld [vmem:[#allocation2 + $0x16c] sm:$0xf]  ;;  %v9373_v25 = vld [vmem:[#allocation2 + $0x188] sm:$0xf]  ;;  %v9181_v24 = vld [vmem:[#allocation2 + $0xe0] sm:$0xf] }
 0x1b1   : > { %v9358_v18 = vor.u32 %v11255_v44, %v9355_v26  ;;  %v11260_v7 = vld [vmem:[#allocation2 + $0x190] sm:$0xf0]  ;;  %v9182_v6 = vor.u32 %v11164_v20, %v9181_v24  ;;  %v11420_v24 = vld [vmem:[#allocation10 + $0x138] sm:$0xff] }
 0x1b2   : > { %v2812_v35 = vpop.f32.mrf.mxu3  ;;  %v2362_v54 = vpop.f32.mrf.mxu1  ;;  %5746 = vmatpush.bf16.msra.mxu3 %v11420_v24  ;;  %v9485_v24 = vld [vmem:[#allocation2 + $0xd8] sm:$0xf] }
 0x1b3   : > { %v2760_v8 = vpop.f32.mrf.mxu2 }
 0x1b4   : > { %v12818_v27 = vadd.f32 %v2809_v42, %v2760_v8  ;;  %v9362_v42 = vor.u32 %v11257_v34, %v9361_v28  ;;  %v9365_v8 = vld [vmem:[#allocation2 + $0x180] sm:$0xf] }
 0x1b5   : > { %v2313_v2 = vpop.f32.mrf.mxu0 }
 0x1b6   : > { %v2314_v13 = vadd.f32 %v2313_v2, %v12584_v46  ;;  %v11213_v46 = vld [vmem:[#allocation7] sm:$0xff] }
 0x1b7   : > { %3839 = vmatmul.bf16.gmra.mxu2 %v9346_v17  ;;  %4183 = vmatpush.bf16.msrb.mxu0 %v11213_v46  ;;  %v11259_v17 = vld [vmem:[#allocation2 + $0x188] sm:$0xf0] }
 0x1b8   : > { %v12821_v43 = vadd.f32 %v2362_v54, %v2314_v13  ;;  %v9366_v28 = vor.u32 %v11259_v17, %v9365_v8 }
 0x1ba   : > { %v2814_v49 = vpop.f32.mrf.mxu3  ;;  %v2365_v41 = vpop.f32.mrf.mxu1 }
 0x1bb   : > { %v2763_v30 = vpop.f32.mrf.mxu2 }
 0x1bc   : > { %v12823_v57 = vadd.f32 %v2812_v35, %v2763_v30  ;;  %v11258_v30 = vld [vmem:[#allocation2 + $0x184] sm:$0xf] }
 0x1bd   : > { %3795 = vmatmul.bf16.gmra.mxu1 %v9354_v61  ;;  %v2316_v19 = vpop.f32.mrf.mxu0  ;;  %v9374_v61 = vor.u32 %v11260_v7, %v9373_v25  ;;  %v9370_v44 = vor.u32 %v11258_v30, %v9367_v60  ;;  %v9473_v25 = vld [vmem:[#allocation2 + $0xc0] sm:$0xf]  ;;  %v11190_v7 = vld [vmem:[#allocation2 + $0xc8] sm:$0xf0]  ;;  %v9481_v30 = vld [vmem:[#allocation2 + $0xc8] sm:$0xf] }
 0x1be   : > { %v2317_v62 = vadd.f32 %v2316_v19, %v12598_v39  ;;  %v11191_v60 = vld [vmem:[#allocation2 + $0xd0] sm:$0xf0] }
 0x1bf   : > { %3893 = vmatmul.bf16.gmra.mxu3 %v9362_v42 }
 0x1c0   : > { %v12826_v22 = vadd.f32 %v2365_v41, %v2317_v62  ;;  %2865 = vmatmul.bf16.gmra.mxu0 %v9170_v56 }
 0x1c2   : > { %v2817_v5 = vpop.f32.mrf.mxu3  ;;  %v2367_v4 = vpop.f32.mrf.mxu1 }
 0x1c3   : > { %v2765_v45 = vpop.f32.mrf.mxu2 }
 0x1c4   : > { %v12828_v35 = vadd.f32 %v2814_v49, %v2765_v45 }
 0x1c5   : > { %v2318_v54 = vpop.f32.mrf.mxu0 }
 0x1c6   : > { %v2319_v2 = vadd.f32 %v2318_v54, %v12624_v16  ;;  %v11286_v54 = vld [vmem:[#allocation2 + $0xf8] sm:$0xf0] }
 0x1c7   : > { %3844 = vmatmul.bf16.gmra.mxu2 %v9358_v18  ;;  %v9665_v18 = vld [vmem:[#allocation2 + $0xf0] sm:$0xf] }
 0x1c8   : > { %v12831_v39 = vadd.f32 %v2367_v4, %v2319_v2  ;;  %v9475_v4 = vld [vmem:[#allocation2 + $0xcc] sm:$0xf0] }
 0x1ca   : > { %v2819_v13 = vpop.f32.mrf.mxu3  ;;  %v2370_v34 = vpop.f32.mrf.mxu1 }
 0x1cb   : > { %v2768_v41 = vpop.f32.mrf.mxu2 }
 0x1cc   : > { %v12833_v49 = vadd.f32 %v2817_v5, %v2768_v41  ;;  %v11189_v5 = vld [vmem:[#allocation2 + $0xc4] sm:$0xf] }
 0x1cd   : > { %3800 = vmatmul.bf16.gmra.mxu1 %v9366_v28  ;;  %v2321_v55 = vpop.f32.mrf.mxu0  ;;  %v9478_v17 = vor.u32 %v11189_v5, %v9475_v4  ;;  %v9666_v28 = vor.u32 %v11286_v54, %v9665_v18  ;;  %v11332_v4 = vld [vmem:[#allocation7 + $0x238] sm:$0xff]  ;;  %v9487_v54 = vld [vmem:[#allocation2 + $0xe4] sm:$0xf0] }
 0x1ce   : > { %v2322_v16 = vadd.f32 %v2321_v55, %v12643_v11  ;;  %4774 = vmatpush.bf16.msra.mxu1 %v11332_v4  ;;  %v11411_v4 = vld [vmem:[#allocation10 + $0xf0] sm:$0xff] }
 0x1cf   : > { %3898 = vmatmul.bf16.gmra.mxu3 %v9374_v61  ;;  %v9474_v61 = vor.u32 %v11190_v7, %v9473_v25  ;;  %v9677_v7 = vld [vmem:[#allocation2 + $0x108] sm:$0xf] }
 0x1d0   : > { %v12836_v42 = vadd.f32 %v2370_v34, %v2322_v16  ;;  %2870 = vmatmul.bf16.gmra.mxu0 %v9182_v6  ;;  %v12849_v6 = vld [vmem:[%s13739_s2] ss:$0 sm:$0xff] }
 0x1d1   : > { %v12852_v16 = vld [vmem:[#allocation9] ss:$0 sm:$0xff] }
 0x1d2   : > { %v2822_v46 = vpop.f32.mrf.mxu3  ;;  %v2372_v56 = vpop.f32.mrf.mxu1 }
 0x1d3   : > { %v2770_v19 = vpop.f32.mrf.mxu2 }
 0x1d4   : > { %v12838_v62 = vadd.f32 %v2819_v13, %v2770_v19  ;;  %v11412_v13 = vld [vmem:[#allocation10 + $0xf8] sm:$0xff] }
 0x1d5   : > { %v2323_v26 = vpop.f32.mrf.mxu0  ;;  %5697 = vmatpush.bf16.msra.mxu2 %v11412_v13 }
 0x1d6   : > { %v2324_v45 = vadd.f32 %v2323_v26, %v12664_v58  ;;  %v9482_v26 = vor.u32 %v11191_v60, %v9481_v30 }
 0x1d7   : > { %3849 = vmatmul.bf16.gmra.mxu2 %v9370_v44 }
 0x1d8   : > { %v12841_v11 = vadd.f32 %v2372_v56, %v2324_v45  ;;  %v11324_v45 = vld [vmem:[#allocation7 + $0x1f8] sm:$0xff] }
 0x1d9   : > { %4725 = vmatpush.bf16.msra.mxu0 %v11324_v45  ;;  %5698 = vmatpush.bf16.msra.mxu2 %v11411_v4 }
 0x1da   : > { %v2824_v8 = vpop.f32.mrf.mxu3  ;;  %v3766_v2 = vpop.f32.mrf.mxu1 }
 0x1db   : > { %v2773_v34 = vpop.f32.mrf.mxu2 }
 0x1dc   : > { %v12843_v20 = vadd.f32 %v2822_v46, %v2773_v34 }
 0x1dd   : > { %4233 = vmatmul.bf16.vlgmr.msrb.gmra.mxu1 %v9478_v17  ;;  %v2836_v58 = vpop.f32.mrf.mxu0 }
 0x1de   : > { %v2837_v41 = vadd.f32 %v2836_v58, %v12671_v37 }
 0x1df   : > { %4684 = vmatmul.bf16.vlgmr.msrb.gmra.mxu3 %v9666_v28  ;;  %v11289_v28 = vld [vmem:[#allocation2 + $0x110] sm:$0xf0] }
 0x1e0   : > { %v2876_v55 = vadd.f32 %v2837_v41, %v12653_v29  ;;  %4184 = vmatmul.bf16.vlgmr.msrb.gmra.mxu0 %v9474_v61  ;;  %v11192_v29 = vld [vmem:[#allocation2 + $0xdc] sm:$0xf]  ;;  %v11193_v61 = vld [vmem:[#allocation2 + $0xe0] sm:$0xf0] }
 0x1e1   : > { %v9490_v58 = vor.u32 %v11192_v29, %v9487_v54  ;;  %v3123_v29 = vld [vmem:[#allocation3 + $0x18] sm:$0xf] }
 0x1e2   : > { %v3864_v46 = vpop.f32.mrf.mxu3  ;;  %v12854_v56 = vpop.f32.mrf.mxu1  ;;  %v2895_v44 = vmul.f32 %v12849_v6, %v2876_v55  ;;  %v9678_v55 = vor.u32 %v11289_v28, %v9677_v7 }
 0x1e3   : > { %v2775_v19 = vpop.f32.mrf.mxu2 }
 0x1e4   : > { %v12857_v37 = vadd.f32 %v2824_v8, %v2775_v19  ;;  %v2914_v5 = vadd.f32 %v12852_v16, %v2895_v44 }
 0x1e5   : > { %v2838_v18 = vpop.f32.mrf.mxu0 }
 0x1e6   : > { %v2930_v17 = vmax.f32 %v2914_v5, 0.0  ;;  %v2839_v25 = vadd.f32 %v2838_v18, %v12690_v12  ;;  %v9486_v5 = vor.u32 %v11193_v61, %v9485_v24  ;;  %v9493_v61 = vld [vmem:[#allocation2 + $0xe0] sm:$0xf] }
 0x1e7   : > { %4282 = vmatmul.bf16.vlgmr.msrb.gmra.mxu2 %v9482_v26  ;;  %v11419_v26 = vld [vmem:[#allocation10 + $0x130] sm:$0xff] }
 0x1e8   : > { %v2946_v34 = vpack.c.bf16 %v2930_v17, %v2930_v17  ;;  %v2877_v8 = vadd.f32 %v2839_v25, %v12668_v9  ;;  %5747 = vmatpush.bf16.msra.mxu3 %v11419_v26 }
 0x1ea   : > { %v3866_v13 = vpop.f32.mrf.mxu3  ;;  %v12862_v41 = vpop.f32.mrf.mxu1  ;;  %2963 = vst [vmem:[#allocation3 + $0x1c] sm:$0xf] %v2946_v34  ;;  %v2980_v30 = vshrl.u32 %v2946_v34, 16  ;;  %v2983_v60 = vshll.u32 %v2946_v34, 16  ;;  %v2896_v12 = vmul.f32 %v12849_v6, %v2877_v8 }
 0x1eb   : > { %v3815_v19 = vpop.f32.mrf.mxu2 }
 0x1ec   : > { %v3816_v44 = vadd.f32 %v3815_v19, %v3766_v2  ;;  %v2982_v45 = vrot.slane %v2980_v30, 7  ;;  %v3179_v18 = vrot.slane %v2980_v30, 4  ;;  %v3180_v9 = vrot.slane %v2983_v60, 5  ;;  %v11194_v30 = vld [vmem:[#allocation2 + $0xe8] sm:$0xf0] }
 0x1ed   : > { %v2915_v17 = vadd.f32 %v12852_v16, %v2896_v12  ;;  %4238 = vmatmul.bf16.gmra.mxu1 %v9490_v58  ;;  %v2841_v25 = vpop.f32.mrf.mxu0  ;;  %v9494_v4 = vor.u32 %v11194_v30, %v9493_v61  ;;  %v9689_v61 = vld [vmem:[#allocation2 + $0x120] sm:$0xf]  ;;  %v11292_v30 = vld [vmem:[#allocation2 + $0x128] sm:$0xf0] }
 0x1ee   : > { %v12866_v54 = vadd.f32 %v3864_v46, %v3816_v44  ;;  %v2985_v7 = vor.u32 %v2983_v60, %v2982_v45  ;;  %v2842_v2 = vadd.f32 %v2841_v25, %v12703_v15  ;;  %v3181_v8 = vor.u32 %v3180_v9, %v3179_v18 }
 0x1ef   : > { %4689 = vmatmul.bf16.gmra.mxu3 %v9678_v55  ;;  %v2931_v28 = vmax.f32 %v2915_v17, 0.0  ;;  %v11195_v17 = vld [vmem:[#allocation2 + $0xf4] sm:$0xf] }
 0x1f0   : > { %v3124_v34 = vsel %vm12333_vm6, %v2985_v7, %v3123_v29  ;;  %4189 = vmatmul.bf16.gmra.mxu0 %v9486_v5  ;;  %v2878_v46 = vadd.f32 %v2842_v2, %v12688_v0  ;;  %v3182_v26 = vrot.slane %v3181_v8, 4  ;;  %v2986_v29 = vrot.slane %v2982_v45, 4  ;;  %v11323_v2 = vld [vmem:[#allocation7 + $0x1f0] sm:$0xff] }
 0x1f1   : > { %v2947_v24 = vpack.c.bf16 %v2931_v28, %v2931_v28  ;;  %3125 = vst [vmem:[#allocation3 + $0x18] sm:$0xf] %v3124_v34  ;;  %v11331_v28 = vld [vmem:[#allocation7 + $0x230] sm:$0xff]  ;;  %v9499_v34 = vld [vmem:[#allocation2 + $0xfc] sm:$0xf0]  ;;  %4726 = vmatpush.bf16.msra.mxu0 %v11323_v2 }
 0x1f2   : > { %v12871_v58 = vpop.f32.mrf.mxu3  ;;  %v12874_v55 = vpop.f32.mrf.mxu1  ;;  %v2897_v44 = vmul.f32 %v12849_v6, %v2878_v46  ;;  %4775 = vmatpush.bf16.msra.mxu1 %v11331_v28  ;;  %v11410_v28 = vld [vmem:[#allocation10 + $0xe8] sm:$0xff] }
 0x1f3   : > { %2964 = vst [vmem:[#allocation3 + $0x28] sm:$0xf] %v2947_v24  ;;  %v2988_v60 = vshrl.u32 %v2947_v24, 16  ;;  %v2991_v19 = vshll.u32 %v2947_v24, 16  ;;  %v3817_v12 = vpop.f32.mrf.mxu2  ;;  %v11418_v2 = vld [vmem:[#allocation10 + $0x128] sm:$0xff]  ;;  %5699 = vmatpush.bf16.msra.mxu2 %v11410_v28 }
 0x1f4   : > { %v3818_v15 = vadd.f32 %v3817_v12, %v12854_v56  ;;  %v2916_v0 = vadd.f32 %v12852_v16, %v2897_v44  ;;  %5748 = vmatpush.bf16.msra.mxu3 %v11418_v2 }
 0x1f5   : > { %v2990_v5 = vrot.slane %v2988_v60, 7  ;;  %v3183_v18 = vrot.slane %v2991_v19, 5  ;;  %v3185_v9 = vrot.slane %v2988_v60, 4  ;;  %v2843_v7 = vpop.f32.mrf.mxu0  ;;  %v3268_v60 = vld [vmem:[#allocation3 + $0x2c] sm:$0xf] }
 0x1f6   : > { %v12878_v25 = vadd.f32 %v3866_v13, %v3818_v15  ;;  %v2844_v8 = vadd.f32 %v2843_v7, %v12723_v51  ;;  %v2932_v45 = vmax.f32 %v2916_v0, 0.0  ;;  %v9690_v0 = vor.u32 %v11292_v30, %v9689_v61 }
 0x1f7   : > { %v2993_v24 = vor.u32 %v2991_v19, %v2990_v5  ;;  %v3184_v56 = vsel %vm12354_vm9, %v3182_v26, %v3183_v18  ;;  %v3186_v46 = vor.u32 %v3185_v9, %v3183_v18  ;;  %4287 = vmatmul.bf16.gmra.mxu2 %v9494_v4  ;;  %v9497_v26 = vld [vmem:[#allocation2 + $0xf0] sm:$0xf]  ;;  %v9502_v5 = vor.u32 %v11195_v17, %v9499_v34  ;;  %v11196_v4 = vld [vmem:[#allocation2 + $0xf8] sm:$0xf0] }
 0x1f8   : > { %3267 = vst [vmem:[#allocation3 + $0x20] sm:$0xf] %v3184_v56  ;;  %v3155_v13 = vld [vmem:[#allocation3 + $0x18] sm:$0x1]  ;;  %v2879_v19 = vadd.f32 %v2844_v8, %v12698_v52  ;;  %v2948_v18 = vpack.c.bf16 %v2932_v45, %v2932_v45 }
 0x1f9   : > { %v2994_v12 = vsel %vm12340_vm7, %v2986_v29, %v2993_v24  ;;  %v3187_v15 = vrot.slane %v3186_v46, 4  ;;  %v3156_v51 = vsel %vm12369_vm12, 0, %v3155_v13  ;;  %v9498_v46 = vor.u32 %v11196_v4, %v9497_v26  ;;  %v3127_v13 = vld [vmem:[#allocation3 + $0x30] sm:$0xf] }
 0x1fa   : > { %v3871_v44 = vpop.f32.mrf.mxu3  ;;  %3126 = vst [vmem:[#allocation3 + $0x24] sm:$0xf] %v2994_v12  ;;  %v12889_v9 = vpop.f32.mrf.mxu1  ;;  %v2898_v52 = vmul.f32 %v12849_v6, %v2879_v19  ;;  %v2996_v17 = vshrl.u32 %v2948_v18, 16  ;;  %v2999_v34 = vshll.u32 %v2948_v18, 16 }
 0x1fb   : > { %3157 = vst [vmem:[#allocation3 + $0x18] sm:$0x1] %v3156_v51  ;;  %v3269_v29 = vsel %vm12361_vm11, %v3187_v15, %v3268_v60  ;;  %v3820_v7 = vpop.f32.mrf.mxu2 }
 0x1fc   : > { %3270 = vst [vmem:[#allocation3 + $0x2c] sm:$0xf] %v3269_v29  ;;  %v3821_v24 = vadd.f32 %v3820_v7, %v12862_v41  ;;  %v2917_v56 = vadd.f32 %v12852_v16, %v2898_v52  ;;  %v2998_v8 = vrot.slane %v2996_v17, 7  ;;  %v3188_v61 = vrot.slane %v2996_v17, 4 }
 0x1fd   : > { %2965 = vst [vmem:[#allocation3 + $0x34] sm:$0xf] %v2948_v18  ;;  %4243 = vmatmul.bf16.gmra.mxu1 %v9502_v5  ;;  %v3189_v30 = vrot.slane %v2999_v34, 5  ;;  %v2846_v45 = vpop.f32.mrf.mxu0  ;;  %v9505_v5 = vld [vmem:[#allocation2 + $0xf8] sm:$0xf] }
 0x1fe   : > { %v12897_v60 = vadd.f32 %v12871_v58, %v3821_v24  ;;  %v2933_v12 = vmax.f32 %v2917_v56, 0.0  ;;  %v2847_v15 = vadd.f32 %v2846_v45, %v12735_v63  ;;  %v3001_v41 = vor.u32 %v2999_v34, %v2998_v8  ;;  %v11197_v18 = vld [vmem:[#allocation2 + $0x100] sm:$0xf0]  ;;  %v11198_v24 = vld [vmem:[#allocation2 + $0x10c] sm:$0xf] }
 0x1ff   : > { %4694 = vmatmul.bf16.gmra.mxu3 %v9690_v0  ;;  %v3190_v19 = vor.u32 %v3189_v30, %v3188_v61  ;;  %v9506_v34 = vor.u32 %v11197_v18, %v9505_v5  ;;  %v3002_v45 = vrot.slane %v2998_v8, 4  ;;  %v9701_v5 = vld [vmem:[#allocation2 + $0x138] sm:$0xf]  ;;  %v11295_v18 = vld [vmem:[#allocation2 + $0x140] sm:$0xf0] }
 0x200   : > { %v2949_v51 = vpack.c.bf16 %v2933_v12, %v2933_v12  ;;  %v2880_v26 = vadd.f32 %v2847_v15, %v12718_v38  ;;  %4194 = vmatmul.bf16.gmra.mxu0 %v9498_v46  ;;  %v3128_v58 = vsel %vm12333_vm6, %v3001_v41, %v3127_v13  ;;  %v11330_v15 = vld [vmem:[#allocation7 + $0x228] sm:$0xff] }
 0x201   : > { %3129 = vst [vmem:[#allocation3 + $0x30] sm:$0xf] %v3128_v58  ;;  %v3191_v2 = vrot.slane %v3190_v19, 4  ;;  %v11322_v41 = vld [vmem:[#allocation7 + $0x1e8] sm:$0xff]  ;;  %4776 = vmatpush.bf16.msra.mxu1 %v11330_v15 }
 0x202   : > { %v12901_v4 = vpop.f32.mrf.mxu3  ;;  %v12905_v29 = vpop.f32.mrf.mxu1  ;;  %v3004_v7 = vshrl.u32 %v2949_v51, 16  ;;  %v3007_v63 = vshll.u32 %v2949_v51, 16  ;;  %v2899_v28 = vmul.f32 %v12849_v6, %v2880_v26  ;;  %2966 = vst [vmem:[#allocation3 + $0x40] sm:$0xf] %v2949_v51  ;;  %v9511_v26 = vld [vmem:[#allocation2 + $0x114] sm:$0xf0]  ;;  %4727 = vmatpush.bf16.msra.mxu0 %v11322_v41 }
 0x203   : > { %v3299_v0 = vld [vmem:[#allocation3 + $0x2c] sm:$0x8]  ;;  %v3822_v52 = vpop.f32.mrf.mxu2  ;;  %v11409_v15 = vld [vmem:[#allocation10 + $0xe0] sm:$0xff] }
 0x204   : > { %v3300_v38 = vsel %vm12391_vm14, 0, %v3299_v0  ;;  %v3823_v17 = vadd.f32 %v3822_v52, %v12874_v55  ;;  %v3006_v56 = vrot.slane %v3004_v7, 7  ;;  %v3192_v46 = vrot.slane %v3007_v63, 5  ;;  %v3272_v0 = vld [vmem:[#allocation3 + $0x44] sm:$0xf]  ;;  %v11417_v41 = vld [vmem:[#allocation10 + $0x120] sm:$0xff]  ;;  %5700 = vmatpush.bf16.msra.mxu2 %v11409_v15 }
 0x205   : > { %3301 = vst [vmem:[#allocation3 + $0x2c] sm:$0x8] %v3300_v38  ;;  %v3194_v61 = vrot.slane %v3004_v7, 4  ;;  %v2918_v30 = vadd.f32 %v12852_v16, %v2899_v28  ;;  %v2848_v12 = vpop.f32.mrf.mxu0  ;;  %v9509_v28 = vld [vmem:[#allocation2 + $0x108] sm:$0xf]  ;;  %v9514_v38 = vor.u32 %v11198_v24, %v9511_v26  ;;  %5749 = vmatpush.bf16.msra.mxu3 %v11417_v41  ;;  %v11329_v41 = vld [vmem:[#allocation7 + $0x220] sm:$0xff] }
 0x206   : > { %v12912_v13 = vadd.f32 %v3871_v44, %v3823_v17  ;;  %v3009_v58 = vor.u32 %v3007_v63, %v3006_v56  ;;  %v3193_v19 = vsel %vm12354_vm9, %v3191_v2, %v3192_v46  ;;  %v2849_v7 = vadd.f32 %v2848_v12, %v12754_v14  ;;  %4777 = vmatpush.bf16.msra.mxu1 %v11329_v41 }
 0x207   : > { %v3195_v55 = vor.u32 %v3194_v61, %v3192_v46  ;;  %v2934_v51 = vmax.f32 %v2918_v30, 0.0  ;;  %3271 = vst [vmem:[#allocation3 + $0x38] sm:$0xf] %v3193_v19  ;;  %4292 = vmatmul.bf16.gmra.mxu2 %v9506_v34  ;;  %v11199_v34 = vld [vmem:[#allocation2 + $0x110] sm:$0xf0]  ;;  %v9702_v46 = vor.u32 %v11295_v18, %v9701_v5 }
 0x208   : > { %v3010_v44 = vsel %vm12340_vm7, %v3002_v45, %v3009_v58  ;;  %v3158_v2 = vld [vmem:[#allocation3 + $0x30] sm:$0x1]  ;;  %v2881_v17 = vadd.f32 %v2849_v7, %v12732_v3 }
 0x209   : > { %v3196_v8 = vrot.slane %v3195_v55, 4  ;;  %v2950_v52 = vpack.c.bf16 %v2934_v51, %v2934_v51  ;;  %3130 = vst [vmem:[#allocation3 + $0x3c] sm:$0xf] %v3010_v44  ;;  %v3159_v14 = vsel %vm12369_vm12, 0, %v3158_v2  ;;  %v9510_v55 = vor.u32 %v11199_v34, %v9509_v28  ;;  %v3131_v51 = vld [vmem:[#allocation3 + $0x48] sm:$0xf] }
 0x20a   : > { %v12919_v63 = vpop.f32.mrf.mxu3  ;;  %v12922_v56 = vpop.f32.mrf.mxu1  ;;  %3160 = vst [vmem:[#allocation3 + $0x30] sm:$0x1] %v3159_v14  ;;  %v2900_v3 = vmul.f32 %v12849_v6, %v2881_v17 }
 0x20b   : > { %v3273_v61 = vsel %vm12361_vm11, %v3196_v8, %v3272_v0  ;;  %2967 = vst [vmem:[#allocation3 + $0x4c] sm:$0xf] %v2950_v52  ;;  %v3012_v30 = vshrl.u32 %v2950_v52, 16  ;;  %v3015_v45 = vshll.u32 %v2950_v52, 16  ;;  %v3825_v12 = vpop.f32.mrf.mxu2 }
 0x20c   : > { %v3826_v24 = vadd.f32 %v3825_v12, %v12889_v9  ;;  %3274 = vst [vmem:[#allocation3 + $0x44] sm:$0xf] %v3273_v61  ;;  %v2919_v18 = vadd.f32 %v12852_v16, %v2900_v3 }
 0x20d   : > { %v12930_v26 = vrot.slane %v3012_v30, 7  ;;  %v3197_v58 = vrot.slane %v3012_v30, 4  ;;  %v3198_v19 = vrot.slane %v3015_v45, 5  ;;  %4248 = vmatmul.bf16.gmra.mxu1 %v9514_v38  ;;  %v2851_v0 = vpop.f32.mrf.mxu0  ;;  %v9517_v38 = vld [vmem:[#allocation2 + $0x110] sm:$0xf] }
 0x20e   : > { %v12933_v5 = vadd.f32 %v12901_v4, %v3826_v24  ;;  %v2852_v7 = vadd.f32 %v2851_v0, %v12767_v32  ;;  %v2935_v44 = vmax.f32 %v2919_v18, 0.0  ;;  %v11200_v4 = vld [vmem:[#allocation2 + $0x118] sm:$0xf0] }
 0x20f   : > { %4699 = vmatmul.bf16.gmra.mxu3 %v9702_v46  ;;  %v3017_v9 = vor.u32 %v3015_v45, %v12930_v26  ;;  %v3199_v52 = vor.u32 %v3198_v19, %v3197_v58  ;;  %v9518_v12 = vor.u32 %v11200_v4, %v9517_v38  ;;  %v11321_v58 = vld [vmem:[#allocation7 + $0x1e0] sm:$0xff]  ;;  %v9523_v19 = vld [vmem:[#allocation2 + $0x12c] sm:$0xf0] }
 0x210   : > { %v2882_v28 = vadd.f32 %v2852_v7, %v12752_v47  ;;  %4199 = vmatmul.bf16.gmra.mxu0 %v9510_v55  ;;  %v2951_v17 = vpack.c.bf16 %v2935_v44, %v2935_v44  ;;  %v11201_v47 = vld [vmem:[#allocation2 + $0x124] sm:$0xf]  ;;  %v9713_v44 = vld [vmem:[#allocation2 + $0x150] sm:$0xf] }
 0x211   : > { %v3132_v8 = vsel %vm12333_vm6, %v3017_v9, %v3131_v51  ;;  %v3200_v24 = vrot.slane %v3199_v52, 4  ;;  %4728 = vmatpush.bf16.msra.mxu0 %v11321_v58  ;;  %v3018_v52 = vrot.slane %v12930_v26, 4 }
 0x212   : > { %v12941_v2 = vpop.f32.mrf.mxu3  ;;  %3133 = vst [vmem:[#allocation3 + $0x48] sm:$0xf] %v3132_v8  ;;  %v12943_v34 = vpop.f32.mrf.mxu1  ;;  %v2901_v32 = vmul.f32 %v12849_v6, %v2882_v28  ;;  %v3020_v61 = vshrl.u32 %v2951_v17, 16  ;;  %v3023_v30 = vshll.u32 %v2951_v17, 16  ;;  %v11298_v8 = vld [vmem:[#allocation2 + $0x158] sm:$0xf0] }
 0x213   : > { %v3827_v46 = vpop.f32.mrf.mxu2  ;;  %v3302_v14 = vld [vmem:[#allocation3 + $0x44] sm:$0x8]  ;;  %2968 = vst [vmem:[#allocation3 + $0x58] sm:$0xf] %v2951_v17  ;;  %v3276_v17 = vld [vmem:[#allocation3 + $0x5c] sm:$0xf] }
 0x214   : > { %v3828_v45 = vadd.f32 %v3827_v46, %v12905_v29  ;;  %v3303_v15 = vsel %vm12391_vm14, 0, %v3302_v14  ;;  %v2920_v3 = vadd.f32 %v12852_v16, %v2901_v32  ;;  %v3022_v55 = vrot.slane %v3020_v61, 7  ;;  %v9521_v46 = vld [vmem:[#allocation2 + $0x120] sm:$0xf] }
 0x215   : > { %3304 = vst [vmem:[#allocation3 + $0x44] sm:$0x8] %v3303_v15  ;;  %v3201_v51 = vrot.slane %v3023_v30, 5  ;;  %v3203_v18 = vrot.slane %v3020_v61, 4  ;;  %v2853_v9 = vpop.f32.mrf.mxu0  ;;  %v11202_v61 = vld [vmem:[#allocation2 + $0x128] sm:$0xf0] }
 0x216   : > { %v12951_v0 = vadd.f32 %v12919_v63, %v3828_v45  ;;  %v2936_v29 = vmax.f32 %v2920_v3, 0.0  ;;  %v2854_v7 = vadd.f32 %v2853_v9, %v12790_v33  ;;  %v3025_v28 = vor.u32 %v3023_v30, %v3022_v55 }
 0x217   : > { %v3202_v38 = vsel %vm12354_vm9, %v3200_v24, %v3201_v51  ;;  %v3204_v4 = vor.u32 %v3203_v18, %v3201_v51  ;;  %4297 = vmatmul.bf16.gmra.mxu2 %v9518_v12  ;;  %v9526_v45 = vor.u32 %v11201_v47, %v9523_v19  ;;  %v9714_v3 = vor.u32 %v11298_v8, %v9713_v44  ;;  %v11408_v51 = vld [vmem:[#allocation10 + $0xd8] sm:$0xff]  ;;  %v3135_v8 = vld [vmem:[#allocation3 + $0x60] sm:$0xf] }
 0x218   : > { %3275 = vst [vmem:[#allocation3 + $0x50] sm:$0xf] %v3202_v38  ;;  %v2952_v32 = vpack.c.bf16 %v2936_v29, %v2936_v29  ;;  %v2883_v14 = vadd.f32 %v2854_v7, %v12764_v21  ;;  %v3026_v26 = vsel %vm12340_vm7, %v3018_v52, %v3025_v28  ;;  %v9522_v19 = vor.u32 %v11202_v61, %v9521_v46  ;;  %v11416_v18 = vld [vmem:[#allocation10 + $0x118] sm:$0xff] }
 0x219   : > { %v3161_v63 = vld [vmem:[#allocation3 + $0x48] sm:$0x1]  ;;  %v3205_v30 = vrot.slane %v3204_v4, 4  ;;  %3134 = vst [vmem:[#allocation3 + $0x54] sm:$0xf] %v3026_v26  ;;  %5701 = vmatpush.bf16.msra.mxu2 %v11408_v51  ;;  %5750 = vmatpush.bf16.msra.mxu3 %v11416_v18 }
 0x21a   : > { %v3881_v33 = vpop.f32.mrf.mxu3  ;;  %v3162_v15 = vsel %vm12369_vm12, 0, %v3161_v63  ;;  %v12962_v24 = vpop.f32.mrf.mxu1  ;;  %v3028_v12 = vshrl.u32 %v2952_v32, 16  ;;  %v3031_v41 = vshll.u32 %v2952_v32, 16  ;;  %v2902_v55 = vmul.f32 %v12849_v6, %v2883_v14  ;;  %2969 = vst [vmem:[#allocation3 + $0x64] sm:$0xf] %v2952_v32 }
 0x21b   : > { %3163 = vst [vmem:[#allocation3 + $0x48] sm:$0x1] %v3162_v15  ;;  %v3830_v58 = vpop.f32.mrf.mxu2  ;;  %v3277_v21 = vsel %vm12361_vm11, %v3205_v30, %v3276_v17  ;;  %v9529_v14 = vld [vmem:[#allocation2 + $0x128] sm:$0xf]  ;;  %v11203_v32 = vld [vmem:[#allocation2 + $0x130] sm:$0xf0] }
 0x21c   : > { %v3831_v47 = vadd.f32 %v3830_v58, %v12922_v56  ;;  %3278 = vst [vmem:[#allocation3 + $0x5c] sm:$0xf] %v3277_v21  ;;  %v3030_v9 = vrot.slane %v3028_v12, 7  ;;  %v3206_v29 = vrot.slane %v3028_v12, 4  ;;  %v3207_v7 = vrot.slane %v3031_v41, 5 }
 0x21d   : > { %v2921_v44 = vadd.f32 %v12852_v16, %v2902_v55  ;;  %4253 = vmatmul.bf16.gmra.mxu1 %v9526_v45  ;;  %v2856_v28 = vpop.f32.mrf.mxu0  ;;  %v9530_v58 = vor.u32 %v11203_v32, %v9529_v14  ;;  %v11204_v55 = vld [vmem:[#allocation2 + $0x13c] sm:$0xf]  ;;  %v9535_v51 = vld [vmem:[#allocation2 + $0x144] sm:$0xf0] }
 0x21e   : > { %v12970_v52 = vadd.f32 %v12941_v2, %v3831_v47  ;;  %v3033_v38 = vor.u32 %v3031_v41, %v3030_v9  ;;  %v3208_v4 = vor.u32 %v3207_v7, %v3206_v29  ;;  %v2857_v17 = vadd.f32 %v2856_v28, %v12802_v23 }
 0x21f   : > { %4704 = vmatmul.bf16.gmra.mxu3 %v9714_v3  ;;  %v2937_v56 = vmax.f32 %v2921_v44, 0.0  ;;  %v3034_v18 = vrot.slane %v3030_v9, 4 }
 0x220   : > { %v3136_v46 = vsel %vm12333_vm6, %v3033_v38, %v3135_v8  ;;  %4204 = vmatmul.bf16.gmra.mxu0 %v9522_v19  ;;  %v2884_v2 = vadd.f32 %v2857_v17, %v12784_v50  ;;  %v3209_v23 = vrot.slane %v3208_v4, 4  ;;  %v11328_v8 = vld [vmem:[#allocation7 + $0x218] sm:$0xff]  ;;  %v9725_v17 = vld [vmem:[#allocation2 + $0x168] sm:$0xf] }
 0x221   : > { %v2953_v63 = vpack.c.bf16 %v2937_v56, %v2937_v56  ;;  %3137 = vst [vmem:[#allocation3 + $0x60] sm:$0xf] %v3136_v46  ;;  %v11301_v46 = vld [vmem:[#allocation2 + $0x170] sm:$0xf0]  ;;  %4778 = vmatpush.bf16.msra.mxu1 %v11328_v8 }
 0x222   : > { %v12975_v61 = vpop.f32.mrf.mxu3  ;;  %v12978_v45 = vpop.f32.mrf.mxu1  ;;  %v2903_v41 = vmul.f32 %v12849_v6, %v2884_v2 }
 0x223   : > { %2970 = vst [vmem:[#allocation3 + $0x70] sm:$0xf] %v2953_v63  ;;  %v3036_v15 = vshrl.u32 %v2953_v63, 16  ;;  %v3039_v26 = vshll.u32 %v2953_v63, 16  ;;  %v3832_v30 = vpop.f32.mrf.mxu2  ;;  %v3305_v3 = vld [vmem:[#allocation3 + $0x5c] sm:$0x8] }
 0x224   : > { %v3833_v12 = vadd.f32 %v3832_v30, %v12943_v34  ;;  %v3306_v21 = vsel %vm12391_vm14, 0, %v3305_v3  ;;  %v2922_v7 = vadd.f32 %v12852_v16, %v2903_v41  ;;  %v11320_v34 = vld [vmem:[#allocation7 + $0x1d8] sm:$0xff]  ;;  %v3280_v63 = vld [vmem:[#allocation3 + $0x74] sm:$0xf]  ;;  %v9538_v30 = vor.u32 %v11204_v55, %v9535_v51 }
 0x225   : > { %v3038_v47 = vrot.slane %v3036_v15, 7  ;;  %v3210_v19 = vrot.slane %v3039_v26, 5  ;;  %v3212_v50 = vrot.slane %v3036_v15, 4  ;;  %3307 = vst [vmem:[#allocation3 + $0x5c] sm:$0x8] %v3306_v21  ;;  %v2858_v44 = vpop.f32.mrf.mxu0  ;;  %4729 = vmatpush.bf16.msra.mxu0 %v11320_v34  ;;  %v9726_v41 = vor.u32 %v11301_v46, %v9725_v17 }
 0x226   : > { %v12984_v29 = vadd.f32 %v3881_v33, %v3833_v12  ;;  %v2859_v4 = vadd.f32 %v2858_v44, %v12818_v27  ;;  %v2938_v14 = vmax.f32 %v2922_v7, 0.0  ;;  %v11205_v12 = vld [vmem:[#allocation2 + $0x140] sm:$0xf0] }
 0x227   : > { %v3041_v28 = vor.u32 %v3039_v26, %v3038_v47  ;;  %v3211_v38 = vsel %vm12354_vm9, %v3209_v23, %v3210_v19  ;;  %v3213_v56 = vor.u32 %v3212_v50, %v3210_v19  ;;  %4302 = vmatmul.bf16.gmra.mxu2 %v9530_v58  ;;  %v9533_v26 = vld [vmem:[#allocation2 + $0x138] sm:$0xf] }
 0x228   : > { %3279 = vst [vmem:[#allocation3 + $0x68] sm:$0xf] %v3211_v38  ;;  %v3164_v33 = vld [vmem:[#allocation3 + $0x60] sm:$0x1]  ;;  %v2885_v2 = vadd.f32 %v2859_v4, %v12799_v40  ;;  %v2954_v3 = vpack.c.bf16 %v2938_v14, %v2938_v14  ;;  %v11407_v47 = vld [vmem:[#allocation10 + $0xd0] sm:$0xff]  ;;  %v9534_v7 = vor.u32 %v11205_v12, %v9533_v26 }
 0x229   : > { %v3042_v9 = vsel %vm12340_vm7, %v3034_v18, %v3041_v28  ;;  %v3214_v32 = vrot.slane %v3213_v56, 4  ;;  %v3165_v27 = vsel %vm12369_vm12, 0, %v3164_v33  ;;  %v11415_v19 = vld [vmem:[#allocation10 + $0x110] sm:$0xff]  ;;  %5702 = vmatpush.bf16.msra.mxu2 %v11407_v47  ;;  %v3139_v56 = vld [vmem:[#allocation3 + $0x78] sm:$0xf] }
 0x22a   : > { %v3886_v15 = vpop.f32.mrf.mxu3  ;;  %3138 = vst [vmem:[#allocation3 + $0x6c] sm:$0xf] %v3042_v9  ;;  %v12995_v23 = vpop.f32.mrf.mxu1  ;;  %v2904_v40 = vmul.f32 %v12849_v6, %v2885_v2  ;;  %v3044_v55 = vshrl.u32 %v2954_v3, 16  ;;  %v3047_v50 = vshll.u32 %v2954_v3, 16  ;;  %5751 = vmatpush.bf16.msra.mxu3 %v11415_v19  ;;  %v9541_v33 = vld [vmem:[#allocation2 + $0x140] sm:$0xf] }
 0x22b   : > { %3166 = vst [vmem:[#allocation3 + $0x60] sm:$0x1] %v3165_v27  ;;  %v3281_v58 = vsel %vm12361_vm11, %v3214_v32, %v3280_v63  ;;  %v3835_v21 = vpop.f32.mrf.mxu2  ;;  %v11206_v9 = vld [vmem:[#allocation2 + $0x148] sm:$0xf0] }
 0x22c   : > { %3282 = vst [vmem:[#allocation3 + $0x74] sm:$0xf] %v3281_v58  ;;  %v3836_v51 = vadd.f32 %v3835_v21, %v12962_v24  ;;  %v2923_v18 = vadd.f32 %v12852_v16, %v2904_v40  ;;  %v3046_v44 = vrot.slane %v3044_v55, 7  ;;  %v3215_v8 = vrot.slane %v3044_v55, 4  ;;  %v11207_v21 = vld [vmem:[#allocation2 + $0x154] sm:$0xf] }
 0x22d   : > { %2971 = vst [vmem:[#allocation3 + $0x7c] sm:$0xf] %v2954_v3  ;;  %4258 = vmatmul.bf16.gmra.mxu1 %v9538_v30  ;;  %v3216_v34 = vrot.slane %v3047_v50, 5  ;;  %v2861_v38 = vpop.f32.mrf.mxu0  ;;  %v9542_v58 = vor.u32 %v11206_v9, %v9541_v33  ;;  %v9545_v9 = vld [vmem:[#allocation2 + $0x150] sm:$0xf] }
 0x22e   : > { %v13003_v28 = vadd.f32 %v12975_v61, %v3836_v51  ;;  %v2939_v4 = vmax.f32 %v2923_v18, 0.0  ;;  %v2862_v17 = vadd.f32 %v2861_v38, %v12823_v57  ;;  %v3049_v24 = vor.u32 %v3047_v50, %v3046_v44  ;;  %v11434_v1 = vld [vmem:[#allocation3 + $0x58] sm:$0xf0] }
 0x22f   : > { %4709 = vmatmul.bf16.gmra.mxu3 %v9726_v41  ;;  %v3217_v46 = vor.u32 %v3216_v34, %v3215_v8  ;;  %v3050_v50 = vrot.slane %v3046_v44, 4  ;;  %v11319_v8 = vld [vmem:[#allocation7 + $0x1d0] sm:$0xff]  ;;  %v9547_v34 = vld [vmem:[#allocation2 + $0x15c] sm:$0xf0] }
 0x230   : > { %v2955_v63 = vpack.c.bf16 %v2939_v4, %v2939_v4  ;;  %v2886_v14 = vadd.f32 %v2862_v17, %v12814_v53  ;;  %4209 = vmatmul.bf16.gmra.mxu0 %v9534_v7  ;;  %v3140_v61 = vsel %vm12333_vm6, %v3049_v24, %v3139_v56  ;;  %v11327_v7 = vld [vmem:[#allocation7 + $0x210] sm:$0xff]  ;;  %v9737_v17 = vld [vmem:[#allocation2 + $0x180] sm:$0xf]  ;;  %v11304_v24 = vld [vmem:[#allocation2 + $0x188] sm:$0xf0] }
 0x231   : > { %3141 = vst [vmem:[#allocation3 + $0x78] sm:$0xf] %v3140_v61  ;;  %v3218_v12 = vrot.slane %v3217_v46, 4  ;;  %v3284_v46 = vld [vmem:[#allocation3 + $0x8c] sm:$0xf]  ;;  %4779 = vmatpush.bf16.msra.mxu1 %v11327_v7  ;;  %4730 = vmatpush.bf16.msra.mxu0 %v11319_v8  ;;  %v9550_v61 = vor.u32 %v11207_v21, %v9547_v34 }
 0x232   : > { %v13007_v32 = vpop.f32.mrf.mxu3  ;;  %v13011_v2 = vpop.f32.mrf.mxu1  ;;  %v3052_v30 = vshrl.u32 %v2955_v63, 16  ;;  %v3055_v57 = vshll.u32 %v2955_v63, 16  ;;  %v2905_v3 = vmul.f32 %v12849_v6, %v2886_v14  ;;  %2972 = vst [vmem:[#allocation3 + $0x88] sm:$0xf] %v2955_v63  ;;  %v3143_v7 = vld [vmem:[#allocation3 + $0x90] sm:$0xf] }
 0x233   : > { %v3308_v26 = vld [vmem:[#allocation3 + $0x74] sm:$0x8]  ;;  %v3837_v27 = vpop.f32.mrf.mxu2 }
 0x234   : > { %v3309_v53 = vsel %vm12391_vm14, 0, %v3308_v26  ;;  %v3838_v41 = vadd.f32 %v3837_v27, %v12978_v45  ;;  %v3054_v40 = vrot.slane %v3052_v30, 7  ;;  %v3219_v47 = vrot.slane %v3055_v57, 5  ;;  %v11208_v27 = vld [vmem:[#allocation2 + $0x158] sm:$0xf0] }
 0x235   : > { %3310 = vst [vmem:[#allocation3 + $0x74] sm:$0x8] %v3309_v53  ;;  %v3221_v19 = vrot.slane %v3052_v30, 4  ;;  %v2924_v55 = vadd.f32 %v12852_v16, %v2905_v3  ;;  %v2863_v18 = vpop.f32.mrf.mxu0  ;;  %v9738_v3 = vor.u32 %v11304_v24, %v9737_v17 }
 0x236   : > { %v13018_v51 = vadd.f32 %v3886_v15, %v3838_v41  ;;  %v3057_v38 = vor.u32 %v3055_v57, %v3054_v40  ;;  %v3220_v56 = vsel %vm12354_vm9, %v3218_v12, %v3219_v47  ;;  %v2864_v63 = vadd.f32 %v2863_v18, %v12828_v35  ;;  %v11406_v40 = vld [vmem:[#allocation10 + $0xc8] sm:$0xff] }
 0x237   : > { %v3222_v45 = vor.u32 %v3221_v19, %v3219_v47  ;;  %v2940_v4 = vmax.f32 %v2924_v55, 0.0  ;;  %3283 = vst [vmem:[#allocation3 + $0x80] sm:$0xf] %v3220_v56  ;;  %4307 = vmatmul.bf16.gmra.mxu2 %v9542_v58  ;;  %v11414_v47 = vld [vmem:[#allocation10 + $0x108] sm:$0xff]  ;;  %v9546_v18 = vor.u32 %v11208_v27, %v9545_v9  ;;  %v11325_v27 = vld [vmem:[#allocation7 + $0x200] sm:$0xff] }
 0x238   : > { %v3058_v15 = vsel %vm12340_vm7, %v3050_v50, %v3057_v38  ;;  %v3167_v26 = vld [vmem:[#allocation3 + $0x78] sm:$0x1]  ;;  %v2887_v30 = vadd.f32 %v2864_v63, %v12821_v43  ;;  %5703 = vmatpush.bf16.msra.mxu2 %v11406_v40  ;;  %5752 = vmatpush.bf16.msra.mxu3 %v11414_v47 }
 0x239   : > { %v3223_v44 = vrot.slane %v3222_v45, 4  ;;  %v2956_v14 = vpack.c.bf16 %v2940_v4, %v2940_v4  ;;  %3142 = vst [vmem:[#allocation3 + $0x84] sm:$0xf] %v3058_v15  ;;  %v3168_v35 = vsel %vm12369_vm12, 0, %v3167_v26  ;;  %v11326_v45 = vld [vmem:[#allocation7 + $0x208] sm:$0xff] }
 0x23a   : > { %v13025_v33 = vpop.f32.mrf.mxu3  ;;  %v13028_v57 = vpop.f32.mrf.mxu1  ;;  %3169 = vst [vmem:[#allocation3 + $0x78] sm:$0x1] %v3168_v35  ;;  %v2906_v43 = vmul.f32 %v12849_v6, %v2887_v30  ;;  %v11318_v4 = vld [vmem:[#allocation7 + $0x1c8] sm:$0xff]  ;;  %v11209_v15 = vld [vmem:[#allocation2 + $0x160] sm:$0xf0]  ;;  %4780 = vmatpush.bf16.msra.mxu1 %v11326_v45 }
 0x23b   : > { %v3285_v53 = vsel %vm12361_vm11, %v3223_v44, %v3284_v46  ;;  %2973 = vst [vmem:[#allocation3 + $0x94] sm:$0xf] %v2956_v14  ;;  %v3060_v12 = vshrl.u32 %v2956_v14, 16  ;;  %v3063_v41 = vshll.u32 %v2956_v14, 16  ;;  %v3840_v58 = vpop.f32.mrf.mxu2  ;;  %4731 = vmatpush.bf16.msra.mxu0 %v11318_v4  ;;  %v11405_v26 = vld [vmem:[#allocation10 + $0xc0] sm:$0xff] }
 0x23c   : > { %v3841_v21 = vadd.f32 %v3840_v58, %v12995_v23  ;;  %3286 = vst [vmem:[#allocation3 + $0x8c] sm:$0xf] %v3285_v53  ;;  %v2925_v34 = vadd.f32 %v12852_v16, %v2906_v43  ;;  %v11413_v30 = vld [vmem:[#allocation10 + $0x100] sm:$0xff]  ;;  %v9559_v43 = vld [vmem:[#allocation2 + $0x174] sm:$0xf0]  ;;  %5704 = vmatpush.bf16.msra.mxu2 %v11405_v26 }
 0x23d   : > { %v13036_v19 = vrot.slane %v3060_v12, 7  ;;  %v3224_v55 = vrot.slane %v3060_v12, 4  ;;  %v3225_v50 = vrot.slane %v3063_v41, 5  ;;  %4263 = vmatmul.bf16.gmra.mxu1 %v9550_v61  ;;  %v2866_v38 = vpop.f32.mrf.mxu0  ;;  %5753 = vmatpush.bf16.msra.mxu3 %v11413_v30 }
 0x23e   : > { %v13039_v8 = vadd.f32 %v13007_v32, %v3841_v21  ;;  %v2867_v56 = vadd.f32 %v2866_v38, %v12833_v49  ;;  %v2941_v17 = vmax.f32 %v2925_v34, 0.0  ;;  %v9553_v32 = vld [vmem:[#allocation2 + $0x158] sm:$0xf]  ;;  %4781 = vmatpush.bf16.msra.mxu1 %v11325_v27 }
 0x23f   : > { %4714 = vmatmul.bf16.gmra.mxu3 %v9738_v3  ;;  %v3065_v23 = vor.u32 %v3063_v41, %v13036_v19  ;;  %v3226_v46 = vor.u32 %v3225_v50, %v3224_v55  ;;  %v9554_v12 = vor.u32 %v11209_v15, %v9553_v32  ;;  %v11210_v41 = vld [vmem:[#allocation2 + $0x16c] sm:$0xf]  ;;  %v9749_v38 = vld [vmem:[#allocation2 + $0x198] sm:$0xf] }
 0x240   : > { %v2888_v63 = vadd.f32 %v2867_v56, %v12826_v22  ;;  %4214 = vmatmul.bf16.gmra.mxu0 %v9546_v18  ;;  %v2957_v14 = vpack.c.bf16 %v2941_v17, %v2941_v17  ;;  %v3288_v17 = vld [vmem:[#allocation3 + $0xa4] sm:$0xf]  ;;  %v9562_v15 = vor.u32 %v11210_v41, %v9559_v43 }
 0x241   : > { %v3144_v24 = vsel %vm12333_vm6, %v3065_v23, %v3143_v7  ;;  %v3227_v40 = vrot.slane %v3226_v46, 4  ;;  %v11307_v23 = vld [vmem:[#allocation2 + $0x1a0] sm:$0xf0] }
 0x242   : > { %v13047_v44 = vpop.f32.mrf.mxu3  ;;  %3145 = vst [vmem:[#allocation3 + $0x90] sm:$0xf] %v3144_v24  ;;  %v13049_v9 = vpop.f32.mrf.mxu1  ;;  %v2907_v61 = vmul.f32 %v12849_v6, %v2888_v63  ;;  %v3068_v22 = vshrl.u32 %v2957_v14, 16  ;;  %v3071_v35 = vshll.u32 %v2957_v14, 16  ;;  %v11317_v6 = vld [vmem:[#allocation7 + $0x1c0] sm:$0xff]  ;;  %v9750_v26 = vor.u32 %v11307_v23, %v9749_v38 }
 0x243   : > { %v3842_v49 = vpop.f32.mrf.mxu2  ;;  %v3311_v3 = vld [vmem:[#allocation3 + $0x8c] sm:$0x8]  ;;  %2974 = vst [vmem:[#allocation3 + $0xa0] sm:$0xf] %v2957_v14  ;;  %4732 = vmatpush.bf16.msra.mxu0 %v11317_v6  ;;  %v9557_v24 = vld [vmem:[#allocation2 + $0x168] sm:$0xf] }
 0x244   : > { %v3843_v53 = vadd.f32 %v3842_v49, %v13011_v2  ;;  %v3312_v58 = vsel %vm12391_vm14, 0, %v3311_v3  ;;  %v2926_v21 = vadd.f32 %v12852_v16, %v2907_v61  ;;  %v3070_v47 = vrot.slane %v3068_v22, 7  ;;  %v3147_v6 = vld [vmem:[#allocation3 + $0xa8] sm:$0xf]  ;;  %v9565_v23 = vld [vmem:[#allocation2 + $0x170] sm:$0xf] }
 0x245   : > { %3313 = vst [vmem:[#allocation3 + $0x8c] sm:$0x8] %v3312_v58  ;;  %v3228_v55 = vrot.slane %v3071_v35, 5  ;;  %v3230_v50 = vrot.slane %v3068_v22, 4  ;;  %v2868_v2 = vpop.f32.mrf.mxu0  ;;  %v3066_v16 = vrot.slane %v13036_v19, 4 }
 0x246   : > { %v13057_v18 = vadd.f32 %v13025_v33, %v3843_v53  ;;  %v2942_v7 = vmax.f32 %v2926_v21, 0.0  ;;  %v2869_v34 = vadd.f32 %v2868_v2, %v12838_v62  ;;  %v3073_v56 = vor.u32 %v3071_v35, %v3070_v47  ;;  %v11211_v62 = vld [vmem:[#allocation2 + $0x170] sm:$0xf0]  ;;  %v13079_v21 = vld [vmem:[#allocation9] ss:$0 sm:$0xff] }
 0x247   : > { %v3229_v45 = vsel %vm12354_vm9, %v3227_v40, %v3228_v55  ;;  %v3231_v4 = vor.u32 %v3230_v50, %v3228_v55  ;;  %4312 = vmatmul.bf16.gmra.mxu2 %v9554_v12  ;;  %v9558_v12 = vor.u32 %v11211_v62, %v9557_v24 }
 0x248   : > { %3287 = vst [vmem:[#allocation3 + $0x98] sm:$0xf] %v3229_v45  ;;  %v2958_v46 = vpack.c.bf16 %v2942_v7, %v2942_v7  ;;  %v2889_v63 = vadd.f32 %v2869_v34, %v12831_v39  ;;  %v3074_v19 = vsel %vm12340_vm7, %v3066_v16, %v3073_v56  ;;  %v13073_v39 = vld [vmem:[%s13739_s2] ss:$0 sm:$0xff]  ;;  %v11212_v16 = vld [vmem:[#allocation2 + $0x178] sm:$0xf0] }
 0x249   : > { %v3170_v33 = vld [vmem:[#allocation3 + $0x90] sm:$0x1]  ;;  %v3232_v49 = vrot.slane %v3231_v4, 4  ;;  %3146 = vst [vmem:[#allocation3 + $0x9c] sm:$0xf] %v3074_v19  ;;  %v9566_v62 = vor.u32 %v11212_v16, %v9565_v23  ;;  %v11379_v16 = vld [vmem:[#allocation10 + $0xb0] sm:$0xff] }
 0x24a   : > { %v3896_v32 = vpop.f32.mrf.mxu3  ;;  %v3171_v14 = vsel %vm12369_vm12, 0, %v3170_v33  ;;  %v13068_v61 = vpop.f32.mrf.mxu1  ;;  %v3076_v30 = vshrl.u32 %v2958_v46, 16  ;;  %v3079_v27 = vshll.u32 %v2958_v46, 16  ;;  %v2908_v22 = vmul.f32 %v13073_v39, %v2889_v63  ;;  %2975 = vst [vmem:[#allocation3 + $0xac] sm:$0xf] %v2958_v46 }
 0x24b   : > { %3172 = vst [vmem:[#allocation3 + $0x90] sm:$0x1] %v3171_v14  ;;  %v3845_v3 = vpop.f32.mrf.mxu2  ;;  %v3289_v35 = vsel %vm12361_vm11, %v3232_v49, %v3288_v17 }
 0x24c   : > { %v3846_v53 = vadd.f32 %v3845_v3, %v13028_v57  ;;  %3290 = vst [vmem:[#allocation3 + $0xa4] sm:$0xf] %v3289_v35  ;;  %v3078_v41 = vrot.slane %v3076_v30, 7  ;;  %v3233_v58 = vrot.slane %v3076_v30, 4  ;;  %v3234_v40 = vrot.slane %v3079_v27, 5  ;;  %v11372_v35 = vld [vmem:[#allocation10 + $0x78] sm:$0xff] }
 0x24d   : > { %v2927_v43 = vadd.f32 %v13079_v21, %v2908_v22  ;;  %4268 = vmatmul.bf16.gmra.mxu1 %v9562_v15  ;;  %v2871_v55 = vpop.f32.mrf.mxu0  ;;  %v9673_v15 = vld [vmem:[#allocation2 + $0xf8] sm:$0xf]  ;;  %6165 = vmatpush.bf16.msrb.mxu2 %v11372_v35 }
 0x24e   : > { %v13083_v47 = vadd.f32 %v13047_v44, %v3846_v53  ;;  %v3081_v50 = vor.u32 %v3079_v27, %v3078_v41  ;;  %v3235_v57 = vor.u32 %v3234_v40, %v3233_v58  ;;  %v2872_v7 = vadd.f32 %v2871_v55, %v12843_v20  ;;  %v11364_v53 = vld [vmem:[#allocation10 + $0x38] sm:$0xff] }
 0x24f   : > { %4719 = vmatmul.bf16.gmra.mxu3 %v9750_v26  ;;  %v2943_v2 = vmax.f32 %v2927_v43, 0.0  ;;  %v11287_v26 = vld [vmem:[#allocation2 + $0x100] sm:$0xf0]  ;;  %v3082_v30 = vrot.slane %v3078_v41, 4  ;;  %v3292_v43 = vld [vmem:[#allocation3 + $0xbc] sm:$0xf]  ;;  %6116 = vmatpush.bf16.msrb.mxu1 %v11364_v53 }
 0x250   : > { %v3148_v34 = vsel %vm12333_vm6, %v3081_v50, %v3147_v6  ;;  %4219 = vmatmul.bf16.gmra.mxu0 %v9558_v12  ;;  %v2890_v44 = vadd.f32 %v2872_v7, %v12836_v42  ;;  %v3236_v20 = vrot.slane %v3235_v57, 4  ;;  %v9859_v55 = vld [vmem:[#allocation3 + $0x24] sm:$0xf0]  ;;  %v9674_v23 = vor.u32 %v11287_v26, %v9673_v15 }
 0x251   : > { %v2959_v38 = vpack.c.bf16 %v2943_v2, %v2943_v2  ;;  %3149 = vst [vmem:[#allocation3 + $0xa8] sm:$0xf] %v3148_v34  ;;  %v11428_v50 = vld [vmem:[#allocation10 + $0x178] sm:$0xff] }
 0x252   : > { %v13088_v56 = vpop.f32.mrf.mxu3  ;;  %v13091_v45 = vpop.f32.mrf.mxu1  ;;  %v2909_v63 = vmul.f32 %v13073_v39, %v2890_v44  ;;  %5795 = vmatpush.bf16.msrb.mxu0 %v11428_v50 }
 0x253   : > { %2976 = vst [vmem:[#allocation3 + $0xb8] sm:$0xf] %v2959_v38  ;;  %v3084_v4 = vshrl.u32 %v2959_v38, 16  ;;  %v3087_v17 = vshll.u32 %v2959_v38, 16  ;;  %v3847_v24 = vpop.f32.mrf.mxu2  ;;  %v3314_v33 = vld [vmem:[#allocation3 + $0xa4] sm:$0x8] }
 0x254   : > { %v3848_v46 = vadd.f32 %v3847_v24, %v13049_v9  ;;  %v3315_v14 = vsel %vm12391_vm14, 0, %v3314_v33  ;;  %v2928_v3 = vadd.f32 %v13079_v21, %v2909_v63  ;;  %v11380_v9 = vld [vmem:[#allocation10 + $0xb8] sm:$0xff] }
 0x255   : > { %v3086_v19 = vrot.slane %v3084_v4, 7  ;;  %v3237_v49 = vrot.slane %v3087_v17, 5  ;;  %v3239_v42 = vrot.slane %v3084_v4, 4  ;;  %3316 = vst [vmem:[#allocation3 + $0xa4] sm:$0x8] %v3315_v14  ;;  %v2873_v22 = vpop.f32.mrf.mxu0  ;;  %6214 = vmatpush.bf16.msrb.mxu3 %v11380_v9 }
 0x256   : > { %v13097_v27 = vadd.f32 %v3896_v32, %v3848_v46  ;;  %v2874_v6 = vadd.f32 %v2873_v22, %v12857_v37  ;;  %v2944_v41 = vmax.f32 %v2928_v3, 0.0  ;;  %v11285_v32 = vld [vmem:[#allocation2 + $0xf4] sm:$0xf]  ;;  %v9667_v24 = vld [vmem:[#allocation2 + $0xfc] sm:$0xf0] }
 0x257   : > { %v3089_v12 = vor.u32 %v3087_v17, %v3086_v19  ;;  %v3238_v58 = vsel %vm12354_vm9, %v3236_v20, %v3237_v49  ;;  %v3240_v40 = vor.u32 %v3239_v42, %v3237_v49  ;;  %4317 = vmatmul.bf16.gmra.mxu2 %v9566_v62  ;;  %v11371_v37 = vld [vmem:[#allocation10 + $0x70] sm:$0xff]  ;;  %v11381_v46 = vld [vmem:[#allocation3 + $0x1c] sm:$0xf]  ;;  %v9670_v26 = vor.u32 %v11285_v32, %v9667_v24 }
 0x258   : > { %3291 = vst [vmem:[#allocation3 + $0xb0] sm:$0xf] %v3238_v58  ;;  %v3173_v2 = vld [vmem:[#allocation3 + $0xa8] sm:$0x1]  ;;  %v2891_v34 = vadd.f32 %v2874_v6, %v12841_v11  ;;  %v2960_v4 = vpack.c.bf16 %v2944_v41, %v2944_v41  ;;  %v9862_v14 = vor.u32 %v11381_v46, %v9859_v55  ;;  %6166 = vmatpush.bf16.msrb.mxu2 %v11371_v37  ;;  %v11382_v41 = vld [vmem:[#allocation3 + $0x20] sm:$0xf0] }
 0x259   : > { %v3090_v57 = vsel %vm12340_vm7, %v3082_v30, %v3089_v12  ;;  %v3241_v7 = vrot.slane %v3240_v40, 4  ;;  %v3174_v44 = vsel %vm12369_vm12, 0, %v3173_v2  ;;  %6215 = vmatpush.bf16.msrb.mxu3 %v11379_v16  ;;  %v11363_v19 = vld [vmem:[#allocation10 + $0x30] sm:$0xff]  ;;  %v11290_v46 = vld [vmem:[#allocation2 + $0x118] sm:$0xf0] }
 0x25a   : > { %v13106_v38 = vpop.f32.mrf.mxu3  ;;  %3150 = vst [vmem:[#allocation3 + $0xb4] sm:$0xf] %v3090_v57  ;;  %v4234_v17 = vpop.f32.mrf.mxu1  ;;  %v2910_v20 = vmul.f32 %v13073_v39, %v2891_v34  ;;  %v3092_v63 = vshrl.u32 %v2960_v4, 16  ;;  %v3095_v62 = vshll.u32 %v2960_v4, 16  ;;  %v11427_v49 = vld [vmem:[#allocation10 + $0x170] sm:$0xff]  ;;  %6117 = vmatpush.bf16.msrb.mxu1 %v11363_v19  ;;  %v11370_v19 = vld [vmem:[#allocation10 + $0x68] sm:$0xff] }
 0x25b   : > { %3175 = vst [vmem:[#allocation3 + $0xa8] sm:$0x1] %v3174_v44  ;;  %v3293_v33 = vsel %vm12361_vm11, %v3241_v7, %v3292_v43  ;;  %v3850_v11 = vpop.f32.mrf.mxu2  ;;  %5796 = vmatpush.bf16.msrb.mxu0 %v11427_v49  ;;  %v11378_v49 = vld [vmem:[#allocation10 + $0xa8] sm:$0xff] }
 0x25c   : > { %3294 = vst [vmem:[#allocation3 + $0xbc] sm:$0xf] %v3293_v33  ;;  %v3851_v15 = vadd.f32 %v3850_v11, %v13068_v61  ;;  %v2929_v42 = vadd.f32 %v13079_v21, %v2910_v20  ;;  %v3094_v30 = vrot.slane %v3092_v63, 7  ;;  %v3242_v3 = vrot.slane %v3092_v63, 4  ;;  %v3151_v61 = vld [vmem:[#allocation3 + $0xc0] sm:$0xf]  ;;  %6167 = vmatpush.bf16.msrb.mxu2 %v11370_v19 }
 0x25d   : > { %2977 = vst [vmem:[#allocation3 + $0xc4] sm:$0xf] %v2960_v4  ;;  %4782 = vmatmul.bf16.vlgmr.msra.gmra.mxu1 %v9674_v23  ;;  %v3243_v22 = vrot.slane %v3095_v62, 5  ;;  %v4185_v9 = vpop.f32.mrf.mxu0  ;;  %v9685_v20 = vld [vmem:[#allocation2 + $0x110] sm:$0xf]  ;;  %6216 = vmatpush.bf16.msrb.mxu3 %v11378_v49 }
 0x25e   : > { %v13116_v35 = vadd.f32 %v13088_v56, %v3851_v15  ;;  %v2945_v53 = vmax.f32 %v2929_v42, 0.0  ;;  %v4186_v12 = vadd.f32 %v4185_v9, %v12866_v54  ;;  %v3097_v58 = vor.u32 %v3095_v62, %v3094_v30  ;;  %v9857_v56 = vld [vmem:[#allocation3 + $0x18] sm:$0xf]  ;;  %v9871_v9 = vld [vmem:[#allocation3 + $0x3c] sm:$0xf0] }
 0x25f   : > { %5754 = vmatmul.bf16.vlgmr.msra.gmra.mxu3 %v9862_v14  ;;  %v3244_v40 = vor.u32 %v3243_v22, %v3242_v3  ;;  %v9858_v33 = vor.u32 %v11382_v41, %v9857_v56  ;;  %v3296_v14 = vld [vmem:[#allocation3 + $0xd4] sm:$0xf]  ;;  %v11288_v3 = vld [vmem:[#allocation2 + $0x10c] sm:$0xf]  ;;  %v9686_v22 = vor.u32 %v11290_v46, %v9685_v20  ;;  %v9697_v20 = vld [vmem:[#allocation2 + $0x128] sm:$0xf] }
 0x260   : > { %v2961_v43 = vpack.c.bf16 %v2945_v53, %v2945_v53  ;;  %v4235_v6 = vadd.f32 %v4234_v17, %v4186_v12  ;;  %4733 = vmatmul.bf16.vlgmr.msra.gmra.mxu0 %v9670_v26  ;;  %v3152_v50 = vsel %vm12333_vm6, %v3097_v58, %v3151_v61  ;;  %v3098_v17 = vrot.slane %v3094_v30, 4  ;;  %v9679_v12 = vld [vmem:[#allocation2 + $0x114] sm:$0xf0]  ;;  %v11362_v41 = vld [vmem:[#allocation10 + $0x28] sm:$0xff] }
 0x261   : > { %3153 = vst [vmem:[#allocation3 + $0xc0] sm:$0xf] %v3152_v50  ;;  %v3245_v37 = vrot.slane %v3244_v40, 4  ;;  %6118 = vmatpush.bf16.msrb.mxu1 %v11362_v41  ;;  %v9883_v19 = vld [vmem:[#allocation3 + $0x54] sm:$0xf0] }
 0x262   : > { %v13119_v55 = vpop.f32.mrf.mxu3  ;;  %v4236_v32 = vpop.f32.mrf.mxu1  ;;  %v3100_v57 = vshrl.u32 %v2961_v43, 16  ;;  %v3103_v7 = vshll.u32 %v2961_v43, 16  ;;  %2978 = vst [vmem:[#allocation3 + $0xd0] sm:$0xf] %v2961_v43  ;;  %v11384_v43 = vld [vmem:[#allocation3 + $0x34] sm:$0xf] }
 0x263   : > { %v3317_v2 = vld [vmem:[#allocation3 + $0xbc] sm:$0x8]  ;;  %v3852_v34 = vpop.f32.mrf.mxu2  ;;  %v9874_v56 = vor.u32 %v11384_v43, %v9871_v9  ;;  %v9881_v41 = vld [vmem:[#allocation3 + $0x48] sm:$0xf] }
 0x264   : > { %v3318_v54 = vsel %vm12391_vm14, 0, %v3317_v2  ;;  %v3853_v23 = vadd.f32 %v3852_v34, %v13091_v45  ;;  %v3102_v16 = vrot.slane %v3100_v57, 7  ;;  %v3246_v44 = vrot.slane %v3103_v7, 5 }
 0x265   : > { %3319 = vst [vmem:[#allocation3 + $0xbc] sm:$0x8] %v3318_v54  ;;  %v3248_v4 = vrot.slane %v3100_v57, 4  ;;  %v4187_v11 = vpop.f32.mrf.mxu0  ;;  %v9682_v2 = vor.u32 %v11288_v3, %v9679_v12  ;;  %v11387_v3 = vld [vmem:[#allocation3 + $0x4c] sm:$0xf] }
 0x266   : > { %v13127_v24 = vadd.f32 %v13106_v38, %v3853_v23  ;;  %v3105_v63 = vor.u32 %v3103_v7, %v3102_v16  ;;  %v3247_v62 = vsel %vm12354_vm9, %v3245_v37, %v3246_v44  ;;  %v4188_v45 = vadd.f32 %v4187_v11, %v12878_v25  ;;  %v11385_v16 = vld [vmem:[#allocation3 + $0x38] sm:$0xf0] }
 0x267   : > { %v3249_v15 = vor.u32 %v3248_v4, %v3246_v44  ;;  %3295 = vst [vmem:[#allocation3 + $0xc8] sm:$0xf] %v3247_v62  ;;  %5705 = vmatmul.bf16.vlgmr.msra.gmra.mxu2 %v9858_v33  ;;  %v11377_v62 = vld [vmem:[#allocation10 + $0xa0] sm:$0xff]  ;;  %v9886_v9 = vor.u32 %v11387_v3, %v9883_v19 }
 0x268   : > { %v3106_v38 = vsel %vm12340_vm7, %v3098_v17, %v3105_v63  ;;  %v4237_v26 = vadd.f32 %v4236_v32, %v4188_v45  ;;  %v3176_v61 = vld [vmem:[#allocation3 + $0xc0] sm:$0x1]  ;;  %v11369_v63 = vld [vmem:[#allocation10 + $0x60] sm:$0xff]  ;;  %6217 = vmatpush.bf16.msrb.mxu3 %v11377_v62 }
 0x269   : > { %v3250_v42 = vrot.slane %v3249_v15, 4  ;;  %3154 = vst [vmem:[#allocation3 + $0xcc] sm:$0xf] %v3106_v38  ;;  %v3177_v25 = vsel %vm12369_vm12, 0, %v3176_v61  ;;  %v11426_v32 = vld [vmem:[#allocation10 + $0x168] sm:$0xff]  ;;  %6168 = vmatpush.bf16.msrb.mxu2 %v11369_v63  ;;  %v11361_v61 = vld [vmem:[#allocation10 + $0x20] sm:$0xff] }
 0x26a   : > { %v13134_v30 = vpop.f32.mrf.mxu3  ;;  %v4239_v53 = vpop.f32.mrf.mxu1  ;;  %3178 = vst [vmem:[#allocation3 + $0xc0] sm:$0x1] %v3177_v25  ;;  %5797 = vmatpush.bf16.msrb.mxu0 %v11426_v32  ;;  %v11291_v38 = vld [vmem:[#allocation2 + $0x124] sm:$0xf]  ;;  %6119 = vmatpush.bf16.msrb.mxu1 %v11361_v61  ;;  %v11390_v63 = vld [vmem:[#allocation3 + $0x64] sm:$0xf] }
 0x26b   : > { %v3297_v58 = vsel %vm12361_vm11, %v3250_v42, %v3296_v14  ;;  %v4283_v40 = vpop.f32.mrf.mxu2  ;;  %v9691_v42 = vld [vmem:[#allocation2 + $0x12c] sm:$0xf0]  ;;  %v11388_v32 = vld [vmem:[#allocation3 + $0x50] sm:$0xf0] }
 0x26c   : > { %v13140_v50 = vadd.f32 %v4283_v40, %v4235_v6  ;;  %3298 = vst [vmem:[#allocation3 + $0xd4] sm:$0xf] %v3297_v58  ;;  %v9869_v6 = vld [vmem:[#allocation3 + $0x30] sm:$0xf]  ;;  %v9893_v61 = vld [vmem:[#allocation3 + $0x60] sm:$0xf] }
 0x26d   : > { %4787 = vmatmul.bf16.gmra.mxu1 %v9686_v22  ;;  %v4190_v57 = vpop.f32.mrf.mxu0  ;;  %v9870_v33 = vor.u32 %v11385_v16, %v9869_v6  ;;  %v11368_v6 = vld [vmem:[#allocation10 + $0x58] sm:$0xff] }
 0x26e   : > { %v4191_v7 = vadd.f32 %v4190_v57, %v12897_v60  ;;  %v11293_v60 = vld [vmem:[#allocation2 + $0x130] sm:$0xf0]  ;;  %v9882_v57 = vor.u32 %v11388_v32, %v9881_v41  ;;  %6169 = vmatpush.bf16.msrb.mxu2 %v11368_v6  ;;  %v9715_v6 = vld [vmem:[#allocation2 + $0x15c] sm:$0xf0] }
 0x26f   : > { %5759 = vmatmul.bf16.gmra.mxu3 %v9874_v56  ;;  %v9698_v14 = vor.u32 %v11293_v60, %v9697_v20  ;;  %v11294_v20 = vld [vmem:[#allocation2 + $0x13c] sm:$0xf]  ;;  %v9703_v60 = vld [vmem:[#allocation2 + $0x144] sm:$0xf0]  ;;  %v11367_v41 = vld [vmem:[#allocation10 + $0x50] sm:$0xff] }
 0x270   : > { %v4240_v34 = vadd.f32 %v4239_v53, %v4191_v7  ;;  %4738 = vmatmul.bf16.gmra.mxu0 %v9682_v2  ;;  %v9694_v53 = vor.u32 %v11291_v38, %v9691_v42  ;;  %v9706_v19 = vor.u32 %v11294_v20, %v9703_v60 }
 0x272   : > { %v13143_v54 = vpop.f32.mrf.mxu3  ;;  %v4241_v23 = vpop.f32.mrf.mxu1  ;;  %6170 = vmatpush.bf16.msrb.mxu2 %v11367_v41 }
 0x273   : > { %v4285_v37 = vpop.f32.mrf.mxu2  ;;  %v3320_v44 = vld [vmem:[#allocation3 + $0xd4] sm:$0x8] }
 0x274   : > { %v13145_v4 = vadd.f32 %v4285_v37, %v4237_v26  ;;  %v3321_v17 = vsel %vm12391_vm14, 0, %v3320_v44 }
 0x275   : > { %3322 = vst [vmem:[#allocation3 + $0xd4] sm:$0x8] %v3321_v17  ;;  %v4192_v11 = vpop.f32.mrf.mxu0 }
 0x276   : > { %v4193_v46 = vadd.f32 %v4192_v11, %v12912_v13  ;;  %v11425_v13 = vld [vmem:[#allocation10 + $0x160] sm:$0xff] }
 0x277   : > { %5710 = vmatmul.bf16.gmra.mxu2 %v9870_v33  ;;  %5798 = vmatpush.bf16.msrb.mxu0 %v11425_v13  ;;  %v9895_v33 = vld [vmem:[#allocation3 + $0x6c] sm:$0xf0]  ;;  %v11391_v13 = vld [vmem:[#allocation3 + $0x68] sm:$0xf0] }
 0x278   : > { %v4242_v15 = vadd.f32 %v4241_v23, %v4193_v46  ;;  %v11296_v23 = vld [vmem:[#allocation2 + $0x148] sm:$0xf0] }
 0x27a   : > { %v13150_v45 = vpop.f32.mrf.mxu3  ;;  %v4244_v49 = vpop.f32.mrf.mxu1 }
 0x27b   : > { %v4288_v26 = vpop.f32.mrf.mxu2 }
 0x27c   : > { %v13152_v22 = vadd.f32 %v4288_v26, %v4240_v34  ;;  %v9709_v34 = vld [vmem:[#allocation2 + $0x140] sm:$0xf] }
 0x27d   : > { %4792 = vmatmul.bf16.gmra.mxu1 %v9698_v14  ;;  %v4195_v12 = vpop.f32.mrf.mxu0  ;;  %v9710_v17 = vor.u32 %v11296_v23, %v9709_v34  ;;  %v11360_v14 = vld [vmem:[#allocation10 + $0x18] sm:$0xff] }
 0x27e   : > { %v4196_v25 = vadd.f32 %v4195_v12, %v12933_v5  ;;  %v11376_v5 = vld [vmem:[#allocation10 + $0x98] sm:$0xff]  ;;  %6120 = vmatpush.bf16.msrb.mxu1 %v11360_v14  ;;  %v9894_v12 = vor.u32 %v11391_v13, %v9893_v61 }
 0x27f   : > { %5764 = vmatmul.bf16.gmra.mxu3 %v9886_v9  ;;  %v9907_v34 = vld [vmem:[#allocation3 + $0x84] sm:$0xf0]  ;;  %v11302_v61 = vld [vmem:[#allocation2 + $0x178] sm:$0xf0] }
 0x280   : > { %v4245_v58 = vadd.f32 %v4244_v49, %v4196_v25  ;;  %4743 = vmatmul.bf16.gmra.mxu0 %v9694_v53  ;;  %6218 = vmatpush.bf16.msrb.mxu3 %v11376_v5 }
 0x282   : > { %v13155_v40 = vpop.f32.mrf.mxu3  ;;  %v4246_v43 = vpop.f32.mrf.mxu1 }
 0x283   : > { %v4290_v56 = vpop.f32.mrf.mxu2 }
 0x284   : > { %v13157_v2 = vadd.f32 %v4290_v56, %v4242_v15  ;;  %v9898_v15 = vor.u32 %v11390_v63, %v9895_v33 }
 0x285   : > { %v4197_v7 = vpop.f32.mrf.mxu0 }
 0x286   : > { %v4198_v37 = vadd.f32 %v4197_v7, %v12951_v0  ;;  %v11424_v0 = vld [vmem:[#allocation10 + $0x158] sm:$0xff] }
 0x287   : > { %5715 = vmatmul.bf16.gmra.mxu2 %v9882_v57  ;;  %5799 = vmatpush.bf16.msrb.mxu0 %v11424_v0 }
 0x288   : > { %v4247_v16 = vadd.f32 %v4246_v43, %v4198_v37  ;;  %v11299_v43 = vld [vmem:[#allocation2 + $0x160] sm:$0xf0]  ;;  %v11297_v37 = vld [vmem:[#allocation2 + $0x154] sm:$0xf] }
 0x289   : > { %v9718_v20 = vor.u32 %v11297_v37, %v9715_v6  ;;  %v11358_v6 = vld [vmem:[#allocation10 + $0x8] sm:$0xff] }
 0x28a   : > { %v13160_v44 = vpop.f32.mrf.mxu3  ;;  %v4249_v11 = vpop.f32.mrf.mxu1 }
 0x28b   : > { %v4293_v46 = vpop.f32.mrf.mxu2 }
 0x28c   : > { %v13162_v62 = vadd.f32 %v4293_v46, %v4245_v58  ;;  %v9721_v58 = vld [vmem:[#allocation2 + $0x158] sm:$0xf] }
 0x28d   : > { %4797 = vmatmul.bf16.gmra.mxu1 %v9710_v17  ;;  %v4200_v49 = vpop.f32.mrf.mxu0  ;;  %v9722_v7 = vor.u32 %v11299_v43, %v9721_v58 }
 0x28e   : > { %v4201_v38 = vadd.f32 %v4200_v49, %v12970_v52  ;;  %v11375_v52 = vld [vmem:[#allocation10 + $0x90] sm:$0xff] }
 0x28f   : > { %5769 = vmatmul.bf16.gmra.mxu3 %v9898_v15  ;;  %v11394_v49 = vld [vmem:[#allocation3 + $0x80] sm:$0xf0] }
 0x290   : > { %v4250_v42 = vadd.f32 %v4249_v11, %v4201_v38  ;;  %4748 = vmatmul.bf16.gmra.mxu0 %v9706_v19  ;;  %6219 = vmatpush.bf16.msrb.mxu3 %v11375_v52  ;;  %v11359_v11 = vld [vmem:[#allocation10 + $0x10] sm:$0xff]  ;;  %v9905_v19 = vld [vmem:[#allocation3 + $0x78] sm:$0xf]  ;;  %v11300_v52 = vld [vmem:[#allocation2 + $0x16c] sm:$0xf] }
 0x291   : > { %6121 = vmatpush.bf16.msrb.mxu1 %v11359_v11 }
 0x292   : > { %v13165_v26 = vpop.f32.mrf.mxu3  ;;  %v4251_v3 = vpop.f32.mrf.mxu1 }
 0x293   : > { %v4295_v9 = vpop.f32.mrf.mxu2 }
 0x294   : > { %v13167_v53 = vadd.f32 %v4295_v9, %v4247_v16  ;;  %v11393_v16 = vld [vmem:[#allocation3 + $0x7c] sm:$0xf]  ;;  %v9733_v9 = vld [vmem:[#allocation2 + $0x170] sm:$0xf] }
 0x295   : > { %v4202_v25 = vpop.f32.mrf.mxu0  ;;  %v9910_v33 = vor.u32 %v11393_v16, %v9907_v34  ;;  %v9734_v43 = vor.u32 %v11302_v61, %v9733_v9  ;;  %v11396_v34 = vld [vmem:[#allocation3 + $0x94] sm:$0xf]  ;;  %6122 = vmatpush.bf16.msrb.mxu1 %v11358_v6 }
 0x296   : > { %v4203_v56 = vadd.f32 %v4202_v25, %v12984_v29  ;;  %v11423_v29 = vld [vmem:[#allocation10 + $0x150] sm:$0xff]  ;;  %v11365_v9 = vld [vmem:[#allocation10 + $0x40] sm:$0xff] }
 0x297   : > { %5720 = vmatmul.bf16.gmra.mxu2 %v9894_v12  ;;  %5800 = vmatpush.bf16.msrb.mxu0 %v11423_v29  ;;  %v11366_v12 = vld [vmem:[#allocation10 + $0x48] sm:$0xff] }
 0x298   : > { %v4252_v32 = vadd.f32 %v4251_v3, %v4203_v56  ;;  %v9919_v56 = vld [vmem:[#allocation3 + $0x9c] sm:$0xf0]  ;;  %6171 = vmatpush.bf16.msrb.mxu2 %v11366_v12 }
 0x299   : > { %v9922_v37 = vor.u32 %v11396_v34, %v9919_v56  ;;  %v11303_v56 = vld [vmem:[#allocation2 + $0x184] sm:$0xf] }
 0x29a   : > { %v13170_v57 = vpop.f32.mrf.mxu3  ;;  %v4254_v23 = vpop.f32.mrf.mxu1  ;;  %v11357_v34 = vld [vmem:[#allocation10] sm:$0xff] }
 0x29b   : > { %v4298_v5 = vpop.f32.mrf.mxu2  ;;  %6123 = vmatpush.bf16.msrb.mxu1 %v11357_v34 }
 0x29c   : > { %v13172_v17 = vadd.f32 %v4298_v5, %v4250_v42  ;;  %v9906_v42 = vor.u32 %v11394_v49, %v9905_v19  ;;  %v9745_v49 = vld [vmem:[#allocation2 + $0x188] sm:$0xf]  ;;  %6172 = vmatpush.bf16.msrb.mxu2 %v11365_v9 }
 0x29d   : > { %4802 = vmatmul.bf16.gmra.mxu1 %v9722_v7  ;;  %v4205_v60 = vpop.f32.mrf.mxu0  ;;  %v9727_v7 = vld [vmem:[#allocation2 + $0x174] sm:$0xf0] }
 0x29e   : > { %v4206_v46 = vadd.f32 %v4205_v60, %v13003_v28  ;;  %v11374_v28 = vld [vmem:[#allocation10 + $0x88] sm:$0xff]  ;;  %v9730_v5 = vor.u32 %v11300_v52, %v9727_v7  ;;  %v11399_v52 = vld [vmem:[#allocation3 + $0xac] sm:$0xf] }
 0x29f   : > { %5774 = vmatmul.bf16.gmra.mxu3 %v9910_v33 }
 0x2a0   : > { %v4255_v63 = vadd.f32 %v4254_v23, %v4206_v46  ;;  %4753 = vmatmul.bf16.gmra.mxu0 %v9718_v20  ;;  %6220 = vmatpush.bf16.msrb.mxu3 %v11374_v28  ;;  %v9917_v46 = vld [vmem:[#allocation3 + $0x90] sm:$0xf]  ;;  %v9931_v28 = vld [vmem:[#allocation3 + $0xb4] sm:$0xf0] }
 0x2a2   : > { %v13175_v15 = vpop.f32.mrf.mxu3  ;;  %v4256_v14 = vpop.f32.mrf.mxu1 }
 0x2a3   : > { %v4300_v0 = vpop.f32.mrf.mxu2 }
 0x2a4   : > { %v13177_v38 = vadd.f32 %v4300_v0, %v4252_v32 }
 0x2a5   : > { %v4207_v3 = vpop.f32.mrf.mxu0 }
 0x2a6   : > { %v4208_v13 = vadd.f32 %v4207_v3, %v13018_v51  ;;  %v11422_v51 = vld [vmem:[#allocation10 + $0x148] sm:$0xff] }
 0x2a7   : > { %5725 = vmatmul.bf16.gmra.mxu2 %v9906_v42  ;;  %5801 = vmatpush.bf16.msrb.mxu0 %v11422_v51  ;;  %v11305_v42 = vld [vmem:[#allocation2 + $0x190] sm:$0xf0] }
 0x2a8   : > { %v4257_v25 = vadd.f32 %v4256_v14, %v4208_v13  ;;  %v9746_v12 = vor.u32 %v11305_v42, %v9745_v49  ;;  %v11308_v49 = vld [vmem:[#allocation2 + $0x1a8] sm:$0xf0] }
 0x2aa   : > { %v13180_v58 = vpop.f32.mrf.mxu3  ;;  %v4259_v41 = vpop.f32.mrf.mxu1 }
 0x2ab   : > { %v4303_v32 = vpop.f32.mrf.mxu2 }
 0x2ac   : > { %v13182_v23 = vadd.f32 %v4303_v32, %v4255_v63  ;;  %v11397_v63 = vld [vmem:[#allocation3 + $0x98] sm:$0xf0]  ;;  %v9934_v32 = vor.u32 %v11399_v52, %v9931_v28  ;;  %v11306_v28 = vld [vmem:[#allocation2 + $0x19c] sm:$0xf] }
 0x2ad   : > { %4807 = vmatmul.bf16.gmra.mxu1 %v9734_v43  ;;  %v4210_v16 = vpop.f32.mrf.mxu0  ;;  %v9918_v0 = vor.u32 %v11397_v63, %v9917_v46 }
 0x2ae   : > { %v4211_v33 = vadd.f32 %v4210_v16, %v13039_v8  ;;  %v11373_v8 = vld [vmem:[#allocation10 + $0x80] sm:$0xff] }
 0x2af   : > { %5779 = vmatmul.bf16.gmra.mxu3 %v9922_v37 }
 0x2b0   : > { %v4260_v11 = vadd.f32 %v4259_v41, %v4211_v33  ;;  %4758 = vmatmul.bf16.gmra.mxu0 %v9730_v5  ;;  %v9739_v41 = vld [vmem:[#allocation2 + $0x18c] sm:$0xf0]  ;;  %6221 = vmatpush.bf16.msrb.mxu3 %v11373_v8  ;;  %v9943_v8 = vld [vmem:[#allocation3 + $0xcc] sm:$0xf0] }
 0x2b1   : > { %v9742_v37 = vor.u32 %v11303_v56, %v9739_v41  ;;  %v11402_v41 = vld [vmem:[#allocation3 + $0xc4] sm:$0xf] }
 0x2b2   : > { %v13185_v29 = vpop.f32.mrf.mxu3  ;;  %v4261_v20 = vpop.f32.mrf.mxu1 }
 0x2b3   : > { %v4305_v60 = vpop.f32.mrf.mxu2 }
 0x2b4   : > { %v13187_v14 = vadd.f32 %v4305_v60, %v4257_v25  ;;  %v9929_v60 = vld [vmem:[#allocation3 + $0xa8] sm:$0xf] }
 0x2b5   : > { %v4212_v19 = vpop.f32.mrf.mxu0 }
 0x2b6   : > { %v4213_v3 = vadd.f32 %v4212_v19, %v13057_v18  ;;  %v11421_v18 = vld [vmem:[#allocation10 + $0x140] sm:$0xff] }
 0x2b7   : > { %5730 = vmatmul.bf16.gmra.mxu2 %v9918_v0  ;;  %5802 = vmatpush.bf16.msrb.mxu0 %v11421_v18  ;;  %v9757_v19 = vld [vmem:[#allocation2 + $0x1a0] sm:$0xf] }
 0x2b8   : > { %v4262_v61 = vadd.f32 %v4261_v20, %v4213_v3  ;;  %v9758_v9 = vor.u32 %v11308_v49, %v9757_v19  ;;  %v10057_v19 = vld [vmem:[#allocation3 + $0x8] sm:$0xf]  ;;  %v11335_v49 = vld [vmem:[#allocation3 + $0x10] sm:$0xf0] }
 0x2ba   : > { %v13190_v13 = vpop.f32.mrf.mxu3  ;;  %v4264_v43 = vpop.f32.mrf.mxu1 }
 0x2bb   : > { %v4308_v25 = vpop.f32.mrf.mxu2 }
 0x2bc   : > { %v13192_v7 = vadd.f32 %v4308_v25, %v4260_v11  ;;  %v11400_v11 = vld [vmem:[#allocation3 + $0xb0] sm:$0xf0] }
 0x2bd   : > { %4812 = vmatmul.bf16.gmra.mxu1 %v9746_v12  ;;  %v4215_v6 = vpop.f32.mrf.mxu0  ;;  %v9930_v63 = vor.u32 %v11400_v11, %v9929_v60  ;;  %v10049_v11 = vld [vmem:[#allocation3] sm:$0xf] }
 0x2be   : > { %v4216_v51 = vadd.f32 %v4215_v6, %v13083_v47 }
 0x2bf   : > { %5784 = vmatmul.bf16.gmra.mxu3 %v9934_v32 }
 0x2c0   : > { %v4265_v5 = vadd.f32 %v4264_v43, %v4216_v51  ;;  %4763 = vmatmul.bf16.gmra.mxu0 %v9742_v37  ;;  %v9751_v43 = vld [vmem:[#allocation2 + $0x1a4] sm:$0xf0]  ;;  %v9941_v51 = vld [vmem:[#allocation3 + $0xc0] sm:$0xf] }
 0x2c1   : > { %v9754_v52 = vor.u32 %v11306_v28, %v9751_v43 }
 0x2c2   : > { %v13195_v16 = vpop.f32.mrf.mxu3  ;;  %v4266_v33 = vpop.f32.mrf.mxu1 }
 0x2c3   : > { %v4310_v20 = vpop.f32.mrf.mxu2 }
 0x2c4   : > { %v13197_v46 = vadd.f32 %v4310_v20, %v4262_v61  ;;  %v9946_v61 = vor.u32 %v11402_v41, %v9943_v8  ;;  %v11556_v41 = vld [vmem:[#allocation10 + $0xf8] sm:$0xff] }
 0x2c5   : > { %v4217_v0 = vpop.f32.mrf.mxu0  ;;  %7347 = vmatpush.bf16.msra.mxu3 %v11556_v41 }
 0x2c6   : > { %v4218_v42 = vadd.f32 %v4217_v0, %v13097_v27 }
 0x2c7   : > { %5735 = vmatmul.bf16.gmra.mxu2 %v9930_v63  ;;  %v11334_v63 = vld [vmem:[#allocation3 + $0x8] sm:$0xf0] }
 0x2c8   : > { %v4267_v3 = vadd.f32 %v4266_v33, %v4218_v42  ;;  %v11403_v33 = vld [vmem:[#allocation3 + $0xc8] sm:$0xf0] }
 0x2c9   : > { %v9942_v60 = vor.u32 %v11403_v33, %v9941_v51 }
 0x2ca   : > { %v13200_v47 = vpop.f32.mrf.mxu3  ;;  %v4269_v12 = vpop.f32.mrf.mxu1 }
 0x2cb   : > { %v4313_v56 = vpop.f32.mrf.mxu2 }
 0x2cc   : > { %v13202_v25 = vadd.f32 %v4313_v56, %v4265_v5  ;;  %v11476_v56 = vld [vmem:[#allocation10 + $0x238] sm:$0xff] }
 0x2cd   : > { %4817 = vmatmul.bf16.gmra.mxu1 %v9758_v9  ;;  %v4220_v32 = vpop.f32.mrf.mxu0  ;;  %v10050_v9 = vor.u32 %v11334_v63, %v10049_v11  ;;  %6715 = vmatpush.bf16.msra.mxu2 %v11476_v56 }
 0x2ce   : > { %v4221_v27 = vadd.f32 %v4220_v32, %v13116_v35 }
 0x2cf   : > { %5789 = vmatmul.bf16.gmra.mxu3 %v9946_v61 }
 0x2d0   : > { %v4270_v34 = vadd.f32 %v4269_v12, %v4221_v27  ;;  %4768 = vmatmul.bf16.gmra.mxu0 %v9754_v52  ;;  %v10058_v12 = vor.u32 %v11335_v49, %v10057_v19  ;;  %v9865_v52 = vld [vmem:[#allocation3 + $0x20] sm:$0xf]  ;;  %v11468_v49 = vld [vmem:[#allocation10 + $0x1f8] sm:$0xff] }
 0x2d1   : > { %6666 = vmatpush.bf16.msra.mxu1 %v11468_v49 }
 0x2d2   : > { %v13205_v18 = vpop.f32.mrf.mxu3  ;;  %v4271_v37 = vpop.f32.mrf.mxu1 }
 0x2d3   : > { %v4315_v6 = vpop.f32.mrf.mxu2 }
 0x2d4   : > { %v13207_v20 = vadd.f32 %v4315_v6, %v4267_v3  ;;  %v11383_v3 = vld [vmem:[#allocation3 + $0x28] sm:$0xf0]  ;;  %v10051_v6 = vld [vmem:[#allocation3 + $0xc] sm:$0xf0] }
 0x2d5   : > { %v4222_v5 = vpop.f32.mrf.mxu0  ;;  %v9866_v32 = vor.u32 %v11383_v3, %v9865_v52 }
 0x2d6   : > { %v4223_v0 = vadd.f32 %v4222_v5, %v13127_v24 }
 0x2d7   : > { %5740 = vmatmul.bf16.gmra.mxu2 %v9942_v60 }
 0x2d8   : > { %v4272_v35 = vadd.f32 %v4271_v37, %v4223_v0  ;;  %v11333_v37 = vld [vmem:[#allocation3 + $0x4] sm:$0xf] }
 0x2d9   : > { %v10054_v11 = vor.u32 %v11333_v37, %v10051_v6 }
 0x2da   : > { %v13210_v42 = vpop.f32.mrf.mxu3  ;;  %v4783_v8 = vpop.f32.mrf.mxu1 }
 0x2db   : > { %v4318_v28 = vpop.f32.mrf.mxu2 }
 0x2dc   : > { %v13212_v43 = vadd.f32 %v4318_v28, %v4270_v34 }
 0x2dd   : > { %6124 = vmatmul.bf16.vlgmr.msrb.gmra.mxu1 %v10050_v9  ;;  %v4734_v61 = vpop.f32.mrf.mxu0  ;;  %v11460_v9 = vld [vmem:[#allocation10 + $0x1b8] sm:$0xff] }
 0x2de   : > { %v4735_v24 = vadd.f32 %v4734_v61, %v13119_v55  ;;  %6617 = vmatpush.bf16.msra.mxu0 %v11460_v9 }
 0x2df   : > { %6222 = vmatmul.bf16.vlgmr.msrb.gmra.mxu3 %v10058_v12  ;;  %v11337_v12 = vld [vmem:[#allocation3 + $0x20] sm:$0xf0] }
 0x2e0   : > { %v4784_v27 = vadd.f32 %v4783_v8, %v4735_v24  ;;  %5803 = vmatmul.bf16.vlgmr.msrb.gmra.mxu0 %v9866_v32  ;;  %v10061_v8 = vld [vmem:[#allocation3 + $0x18] sm:$0xf]  ;;  %v11386_v24 = vld [vmem:[#allocation3 + $0x40] sm:$0xf0] }
 0x2e1   : > { %v10062_v32 = vor.u32 %v11337_v12, %v10061_v8 }
 0x2e2   : > { %v5755_v51 = vpop.f32.mrf.mxu3  ;;  %v4785_v33 = vpop.f32.mrf.mxu1  ;;  %v4823_v60 = vadd.f32 %v4784_v27, %v13140_v50  ;;  %v10069_v27 = vld [vmem:[#allocation3 + $0x20] sm:$0xf] }
 0x2e3   : > { %v4320_v34 = vpop.f32.mrf.mxu2 }
 0x2e4   : > { %v13216_v5 = vadd.f32 %v4320_v34, %v4272_v35  ;;  %v4839_v63 = vmul.f32 %v13073_v39, %v4823_v60  ;;  %v11338_v35 = vld [vmem:[#allocation3 + $0x28] sm:$0xf0]  ;;  %v9877_v60 = vld [vmem:[#allocation3 + $0x38] sm:$0xf] }
 0x2e5   : > { %v4736_v0 = vpop.f32.mrf.mxu0  ;;  %v10070_v37 = vor.u32 %v11338_v35, %v10069_v27  ;;  %v10063_v27 = vld [vmem:[#allocation3 + $0x24] sm:$0xf0] }
 0x2e6   : > { %v4855_v55 = vadd.f32 %v13079_v21, %v4839_v63  ;;  %v4737_v19 = vadd.f32 %v4736_v0, %v13134_v30  ;;  %v9878_v63 = vor.u32 %v11386_v24, %v9877_v60  ;;  %v11475_v0 = vld [vmem:[#allocation10 + $0x230] sm:$0xff] }
 0x2e7   : > { %6173 = vmatmul.bf16.vlgmr.msrb.gmra.mxu2 %v10054_v11 }
 0x2e8   : > { %v4871_v28 = vmax.f32 %v4855_v55, 0.0  ;;  %v4786_v3 = vadd.f32 %v4785_v33, %v4737_v19  ;;  %v11555_v55 = vld [vmem:[#allocation10 + $0xf0] sm:$0xff]  ;;  %6716 = vmatpush.bf16.msra.mxu2 %v11475_v0 }
 0x2e9   : > { %7348 = vmatpush.bf16.msra.mxu3 %v11555_v55 }
 0x2ea   : > { %v5757_v50 = vpop.f32.mrf.mxu3  ;;  %v4788_v56 = vpop.f32.mrf.mxu1  ;;  %v4887_v41 = vpack.c.bf16 %v4871_v28, %v4871_v28  ;;  %v4824_v52 = vadd.f32 %v4786_v3, %v13145_v4 }
 0x2eb   : > { %v5706_v61 = vpop.f32.mrf.mxu2 }
 0x2ec   : > { %v13222_v30 = vadd.f32 %v5755_v51, %v5706_v61  ;;  %4904 = vst [vmem:[#allocation3 + $0xdc] sm:$0xf] %v4887_v41  ;;  %v4921_v6 = vshrl.u32 %v4887_v41, 16  ;;  %v4924_v34 = vshll.u32 %v4887_v41, 16  ;;  %v4840_v33 = vmul.f32 %v13073_v39, %v4824_v52  ;;  %v5064_v51 = vld [vmem:[#allocation3 + $0xd8] sm:$0xf] }
 0x2ed   : > { %6129 = vmatmul.bf16.gmra.mxu1 %v10062_v32  ;;  %v4739_v11 = vpop.f32.mrf.mxu0 }
 0x2ee   : > { %v4923_v19 = vrot.slane %v4921_v6, 7  ;;  %v5120_v4 = vrot.slane %v4921_v6, 4  ;;  %v5121_v49 = vrot.slane %v4924_v34, 5  ;;  %v4856_v9 = vadd.f32 %v13079_v21, %v4840_v33  ;;  %v11336_v33 = vld [vmem:[#allocation3 + $0x1c] sm:$0xf] }
 0x2ef   : > { %6227 = vmatmul.bf16.gmra.mxu3 %v10070_v37  ;;  %v4740_v8 = vadd.f32 %v4739_v11, %v13143_v54 }
 0x2f0   : > { %v4926_v12 = vor.u32 %v4924_v34, %v4923_v19  ;;  %v4872_v28 = vmax.f32 %v4856_v9, 0.0  ;;  %5808 = vmatmul.bf16.gmra.mxu0 %v9878_v63  ;;  %v5122_v35 = vor.u32 %v5121_v49, %v5120_v4  ;;  %v11340_v9 = vld [vmem:[#allocation3 + $0x38] sm:$0xf0] }
 0x2f1   : > { %v4789_v41 = vadd.f32 %v4788_v56, %v4740_v8  ;;  %v10066_v56 = vor.u32 %v11336_v33, %v10063_v27  ;;  %v11459_v8 = vld [vmem:[#allocation10 + $0x1b0] sm:$0xff] }
 0x2f2   : > { %v5760_v3 = vpop.f32.mrf.mxu3  ;;  %v4790_v61 = vpop.f32.mrf.mxu1  ;;  %v5065_v52 = vsel %vm12333_vm6, %v4926_v12, %v5064_v51  ;;  %v4888_v24 = vpack.c.bf16 %v4872_v28, %v4872_v28  ;;  %v5123_v60 = vrot.slane %v5122_v35, 4  ;;  %v4927_v51 = vrot.slane %v4923_v19, 4  ;;  %v10073_v12 = vld [vmem:[#allocation3 + $0x30] sm:$0xf]  ;;  %6618 = vmatpush.bf16.msra.mxu0 %v11459_v8 }
 0x2f3   : > { %v5708_v32 = vpop.f32.mrf.mxu2  ;;  %5066 = vst [vmem:[#allocation3 + $0xd8] sm:$0xf] %v5065_v52  ;;  %v4825_v54 = vadd.f32 %v4789_v41, %v13152_v22  ;;  %v11467_v22 = vld [vmem:[#allocation10 + $0x1f0] sm:$0xff]  ;;  %v10074_v33 = vor.u32 %v11340_v9, %v10073_v12  ;;  %v11554_v9 = vld [vmem:[#allocation10 + $0xe8] sm:$0xff]  ;;  %v13252_v8 = vld [vmem:[#allocation9] ss:$0 sm:$0xff] }
 0x2f4   : > { %v13229_v37 = vadd.f32 %v5757_v50, %v5708_v32  ;;  %4905 = vst [vmem:[#allocation3 + $0xe8] sm:$0xf] %v4888_v24  ;;  %v4929_v6 = vshrl.u32 %v4888_v24, 16  ;;  %v4932_v34 = vshll.u32 %v4888_v24, 16  ;;  %v11341_v24 = vld [vmem:[#allocation3 + $0x40] sm:$0xf0]  ;;  %6667 = vmatpush.bf16.msra.mxu1 %v11467_v22  ;;  %7349 = vmatpush.bf16.msra.mxu3 %v11554_v9 }
 0x2f5   : > { %v4841_v11 = vmul.f32 %v13073_v39, %v4825_v54  ;;  %v4741_v63 = vpop.f32.mrf.mxu0  ;;  %v5209_v32 = vld [vmem:[#allocation3 + $0xec] sm:$0xf]  ;;  %v9889_v22 = vld [vmem:[#allocation3 + $0x50] sm:$0xf] }
 0x2f6   : > { %v4931_v0 = vrot.slane %v4929_v6, 7  ;;  %v5124_v55 = vrot.slane %v4932_v34, 5  ;;  %v5126_v4 = vrot.slane %v4929_v6, 4  ;;  %v4742_v49 = vadd.f32 %v4741_v63, %v13150_v45  ;;  %v11389_v63 = vld [vmem:[#allocation3 + $0x58] sm:$0xf0] }
 0x2f7   : > { %v4857_v50 = vadd.f32 %v13079_v21, %v4841_v11  ;;  %6178 = vmatmul.bf16.gmra.mxu2 %v10066_v56 }
 0x2f8   : > { %v4934_v28 = vor.u32 %v4932_v34, %v4931_v0  ;;  %v5125_v35 = vsel %vm12354_vm9, %v5123_v60, %v5124_v55  ;;  %v5127_v39 = vor.u32 %v5126_v4, %v5124_v55  ;;  %v4791_v41 = vadd.f32 %v4790_v61, %v4742_v49  ;;  %v10081_v60 = vld [vmem:[#allocation3 + $0x38] sm:$0xf]  ;;  %v13249_v4 = vld [vmem:[%s13739_s2] ss:$0 sm:$0xff] }
 0x2f9   : > { %5208 = vst [vmem:[#allocation3 + $0xe0] sm:$0xf] %v5125_v35  ;;  %v4873_v27 = vmax.f32 %v4857_v50, 0.0  ;;  %v10082_v0 = vor.u32 %v11341_v24, %v10081_v60  ;;  %v11474_v49 = vld [vmem:[#allocation10 + $0x228] sm:$0xff]  ;;  %v9890_v35 = vor.u32 %v11389_v63, %v9889_v22 }
 0x2fa   : > { %v5762_v52 = vpop.f32.mrf.mxu3  ;;  %v4793_v45 = vpop.f32.mrf.mxu1  ;;  %v5096_v19 = vld [vmem:[#allocation3 + $0xd8] sm:$0x1]  ;;  %v4935_v21 = vsel %vm12340_vm7, %v4927_v51, %v4934_v28  ;;  %v5128_v54 = vrot.slane %v5127_v39, 4  ;;  %v4826_v34 = vadd.f32 %v4791_v41, %v13157_v2  ;;  %6717 = vmatpush.bf16.msra.mxu2 %v11474_v49 }
 0x2fb   : > { %v5711_v6 = vpop.f32.mrf.mxu2  ;;  %v5097_v61 = vsel %vm12369_vm12, 0, %v5096_v19  ;;  %5067 = vst [vmem:[#allocation3 + $0xe4] sm:$0xf] %v4935_v21  ;;  %v4889_v11 = vpack.c.bf16 %v4873_v27, %v4873_v27 }
 0x2fc   : > { %v13242_v56 = vadd.f32 %v5760_v3, %v5711_v6  ;;  %5098 = vst [vmem:[#allocation3 + $0xd8] sm:$0x1] %v5097_v61  ;;  %v5210_v55 = vsel %vm12361_vm11, %v5128_v54, %v5209_v32  ;;  %v4842_v2 = vmul.f32 %v13249_v4, %v4826_v34  ;;  %v5068_v32 = vld [vmem:[#allocation3 + $0xf0] sm:$0xf] }
 0x2fd   : > { %6134 = vmatmul.bf16.gmra.mxu1 %v10074_v33  ;;  %5211 = vst [vmem:[#allocation3 + $0xec] sm:$0xf] %v5210_v55  ;;  %v4937_v51 = vshrl.u32 %v4889_v11, 16  ;;  %v4940_v3 = vshll.u32 %v4889_v11, 16  ;;  %v4744_v50 = vpop.f32.mrf.mxu0 }
 0x2fe   : > { %4906 = vst [vmem:[#allocation3 + $0xf4] sm:$0xf] %v4889_v11  ;;  %v4858_v12 = vadd.f32 %v13252_v8, %v4842_v2  ;;  %v4745_v28 = vadd.f32 %v4744_v50, %v13155_v40  ;;  %v10075_v11 = vld [vmem:[#allocation3 + $0x3c] sm:$0xf0]  ;;  %v10085_v50 = vld [vmem:[#allocation3 + $0x48] sm:$0xf] }
 0x2ff   : > { %6232 = vmatmul.bf16.gmra.mxu3 %v10082_v0  ;;  %v4939_v39 = vrot.slane %v4937_v51, 7  ;;  %v5129_v41 = vrot.slane %v4937_v51, 4  ;;  %v5130_v24 = vrot.slane %v4940_v3, 5  ;;  %v11339_v0 = vld [vmem:[#allocation3 + $0x34] sm:$0xf] }
 0x300   : > { %v4874_v27 = vmax.f32 %v4858_v12, 0.0  ;;  %v4794_v19 = vadd.f32 %v4793_v45, %v4745_v28  ;;  %5813 = vmatmul.bf16.gmra.mxu0 %v9890_v35 }
 0x301   : > { %v4942_v54 = vor.u32 %v4940_v3, %v4939_v39  ;;  %v5131_v6 = vor.u32 %v5130_v24, %v5129_v41  ;;  %v10078_v3 = vor.u32 %v11339_v0, %v10075_v11  ;;  %v4943_v35 = vrot.slane %v4939_v39, 4  ;;  %v11466_v24 = vld [vmem:[#allocation10 + $0x1e8] sm:$0xff]  ;;  %v5213_v11 = vld [vmem:[#allocation3 + $0x104] sm:$0xf] }
 0x302   : > { %v5765_v21 = vpop.f32.mrf.mxu3  ;;  %v4795_v34 = vpop.f32.mrf.mxu1  ;;  %v4890_v33 = vpack.c.bf16 %v4874_v27, %v4874_v27  ;;  %v4827_v61 = vadd.f32 %v4794_v19, %v13162_v62  ;;  %v11343_v27 = vld [vmem:[#allocation3 + $0x50] sm:$0xf0]  ;;  %6668 = vmatpush.bf16.msra.mxu1 %v11466_v24 }
 0x303   : > { %v5713_v60 = vpop.f32.mrf.mxu2  ;;  %v5069_v40 = vsel %vm12333_vm6, %v4942_v54, %v5068_v32  ;;  %v5132_v51 = vrot.slane %v5131_v6, 4  ;;  %v11458_v32 = vld [vmem:[#allocation10 + $0x1a8] sm:$0xff] }
 0x304   : > { %v13259_v63 = vadd.f32 %v5762_v52, %v5713_v60  ;;  %v5240_v55 = vld [vmem:[#allocation3 + $0xec] sm:$0x8]  ;;  %5070 = vst [vmem:[#allocation3 + $0xf0] sm:$0xf] %v5069_v40  ;;  %v4945_v2 = vshrl.u32 %v4890_v33, 16  ;;  %v4948_v45 = vshll.u32 %v4890_v33, 16  ;;  %v4843_v49 = vmul.f32 %v13249_v4, %v4827_v61  ;;  %6619 = vmatpush.bf16.msra.mxu0 %v11458_v32 }
 0x305   : > { %v5241_v9 = vsel %vm12391_vm14, 0, %v5240_v55  ;;  %4907 = vst [vmem:[#allocation3 + $0x100] sm:$0xf] %v4890_v33  ;;  %v4746_v62 = vpop.f32.mrf.mxu0  ;;  %v11344_v61 = vld [vmem:[#allocation3 + $0x58] sm:$0xf0] }
 0x306   : > { %5242 = vst [vmem:[#allocation3 + $0xec] sm:$0x8] %v5241_v9  ;;  %v4947_v22 = vrot.slane %v4945_v2, 7  ;;  %v5133_v12 = vrot.slane %v4948_v45, 5  ;;  %v5135_v52 = vrot.slane %v4945_v2, 4  ;;  %v4859_v28 = vadd.f32 %v13252_v8, %v4843_v49 }
 0x307   : > { %6183 = vmatmul.bf16.gmra.mxu2 %v10078_v3  ;;  %v4747_v41 = vadd.f32 %v4746_v62, %v13160_v44  ;;  %v10093_v49 = vld [vmem:[#allocation3 + $0x50] sm:$0xf]  ;;  %v11392_v62 = vld [vmem:[#allocation3 + $0x70] sm:$0xf0] }
 0x308   : > { %v4950_v19 = vor.u32 %v4948_v45, %v4947_v22  ;;  %v5134_v54 = vsel %vm12354_vm9, %v5132_v51, %v5133_v12  ;;  %v5136_v6 = vor.u32 %v5135_v52, %v5133_v12  ;;  %v4875_v33 = vmax.f32 %v4859_v28, 0.0 }
 0x309   : > { %5212 = vst [vmem:[#allocation3 + $0xf8] sm:$0xf] %v5134_v54  ;;  %v4796_v40 = vadd.f32 %v4795_v34, %v4747_v41  ;;  %v10086_v45 = vor.u32 %v11343_v27, %v10085_v50  ;;  %v10094_v22 = vor.u32 %v11344_v61, %v10093_v49  ;;  %v11473_v50 = vld [vmem:[#allocation10 + $0x220] sm:$0xff]  ;;  %v9901_v41 = vld [vmem:[#allocation3 + $0x68] sm:$0xf] }
 0x30a   : > { %v5767_v60 = vpop.f32.mrf.mxu3  ;;  %v4798_v39 = vpop.f32.mrf.mxu1  ;;  %v4951_v44 = vsel %vm12340_vm7, %v4943_v35, %v4950_v19  ;;  %v5137_v0 = vrot.slane %v5136_v6, 4  ;;  %v4891_v55 = vpack.c.bf16 %v4875_v33, %v4875_v33  ;;  %v9902_v27 = vor.u32 %v11392_v62, %v9901_v41  ;;  %6718 = vmatpush.bf16.msra.mxu2 %v11473_v50  ;;  %v5072_v19 = vld [vmem:[#allocation3 + $0x108] sm:$0xf]  ;;  %v10097_v50 = vld [vmem:[#allocation3 + $0x60] sm:$0xf] }
 0x30b   : > { %v5716_v2 = vpop.f32.mrf.mxu2  ;;  %v5099_v9 = vld [vmem:[#allocation3 + $0xf0] sm:$0x1]  ;;  %5071 = vst [vmem:[#allocation3 + $0xfc] sm:$0xf] %v4951_v44  ;;  %v4828_v3 = vadd.f32 %v4796_v40, %v13167_v53  ;;  %v11553_v53 = vld [vmem:[#allocation10 + $0xe0] sm:$0xff] }
 0x30c   : > { %v13270_v51 = vadd.f32 %v5765_v21, %v5716_v2  ;;  %v5100_v34 = vsel %vm12369_vm12, 0, %v5099_v9  ;;  %v5214_v12 = vsel %vm12361_vm11, %v5137_v0, %v5213_v11  ;;  %4908 = vst [vmem:[#allocation3 + $0x10c] sm:$0xf] %v4891_v55  ;;  %v4953_v52 = vshrl.u32 %v4891_v55, 16  ;;  %7350 = vmatpush.bf16.msra.mxu3 %v11553_v53  ;;  %v11457_v53 = vld [vmem:[#allocation10 + $0x1a0] sm:$0xff] }
 0x30d   : > { %v4956_v28 = vshll.u32 %v4891_v55, 16  ;;  %6139 = vmatmul.bf16.gmra.mxu1 %v10086_v45  ;;  %5101 = vst [vmem:[#allocation3 + $0xf0] sm:$0x1] %v5100_v34  ;;  %v4844_v35 = vmul.f32 %v13249_v4, %v4828_v3  ;;  %v4749_v21 = vpop.f32.mrf.mxu0  ;;  %v10087_v45 = vld [vmem:[#allocation3 + $0x54] sm:$0xf0]  ;;  %6620 = vmatpush.bf16.msra.mxu0 %v11457_v53 }
 0x30e   : > { %5215 = vst [vmem:[#allocation3 + $0x104] sm:$0xf] %v5214_v12  ;;  %v13278_v24 = vrot.slane %v4953_v52, 7  ;;  %v4750_v32 = vadd.f32 %v4749_v21, %v13165_v26  ;;  %v5138_v54 = vrot.slane %v4953_v52, 4  ;;  %v9913_v53 = vld [vmem:[#allocation3 + $0x80] sm:$0xf] }
 0x30f   : > { %6237 = vmatmul.bf16.gmra.mxu3 %v10094_v22  ;;  %v5139_v6 = vrot.slane %v4956_v28, 5  ;;  %v4860_v33 = vadd.f32 %v13252_v8, %v4844_v35  ;;  %v11342_v22 = vld [vmem:[#allocation3 + $0x4c] sm:$0xf] }
 0x310   : > { %v4958_v61 = vor.u32 %v4956_v28, %v13278_v24  ;;  %v4799_v11 = vadd.f32 %v4798_v39, %v4750_v32  ;;  %5818 = vmatmul.bf16.gmra.mxu0 %v9902_v27  ;;  %v10090_v52 = vor.u32 %v11342_v22, %v10087_v45  ;;  %v11346_v35 = vld [vmem:[#allocation3 + $0x68] sm:$0xf0]  ;;  %v11347_v32 = vld [vmem:[#allocation3 + $0x70] sm:$0xf0] }
 0x311   : > { %v4876_v44 = vmax.f32 %v4860_v33, 0.0  ;;  %v5140_v49 = vor.u32 %v5139_v6, %v5138_v54  ;;  %v11395_v45 = vld [vmem:[#allocation3 + $0x88] sm:$0xf0] }
 0x312   : > { %v5770_v40 = vpop.f32.mrf.mxu3  ;;  %v4800_v0 = vpop.f32.mrf.mxu1  ;;  %v5073_v55 = vsel %vm12333_vm6, %v4958_v61, %v5072_v19  ;;  %v4829_v26 = vadd.f32 %v4799_v11, %v13172_v17 }
 0x313   : > { %v5718_v2 = vpop.f32.mrf.mxu2  ;;  %5074 = vst [vmem:[#allocation3 + $0x108] sm:$0xf] %v5073_v55  ;;  %v4892_v9 = vpack.c.bf16 %v4876_v44, %v4876_v44  ;;  %v5141_v27 = vrot.slane %v5140_v49, 4  ;;  %v4959_v44 = vrot.slane %v13278_v24, 4 }
 0x314   : > { %v13286_v3 = vadd.f32 %v5767_v60, %v5718_v2  ;;  %v4845_v62 = vmul.f32 %v13249_v4, %v4829_v26  ;;  %v11465_v60 = vld [vmem:[#allocation10 + $0x1e0] sm:$0xff] }
 0x315   : > { %v5243_v39 = vld [vmem:[#allocation3 + $0x104] sm:$0x8]  ;;  %4909 = vst [vmem:[#allocation3 + $0x118] sm:$0xf] %v4892_v9  ;;  %v4961_v34 = vshrl.u32 %v4892_v9, 16  ;;  %v4964_v12 = vshll.u32 %v4892_v9, 16  ;;  %v4751_v28 = vpop.f32.mrf.mxu0  ;;  %6669 = vmatpush.bf16.msra.mxu1 %v11465_v60 }
 0x316   : > { %v5244_v17 = vsel %vm12391_vm14, 0, %v5243_v39  ;;  %v4861_v21 = vadd.f32 %v13252_v8, %v4845_v62  ;;  %v4752_v41 = vadd.f32 %v4751_v28, %v13170_v57  ;;  %v10105_v9 = vld [vmem:[#allocation3 + $0x68] sm:$0xf]  ;;  %v5217_v62 = vld [vmem:[#allocation3 + $0x11c] sm:$0xf] }
 0x317   : > { %5245 = vst [vmem:[#allocation3 + $0x104] sm:$0x8] %v5244_v17  ;;  %v4963_v19 = vrot.slane %v4961_v34, 7  ;;  %v5142_v54 = vrot.slane %v4964_v12, 5  ;;  %v5144_v6 = vrot.slane %v4961_v34, 4  ;;  %6188 = vmatmul.bf16.gmra.mxu2 %v10090_v52  ;;  %v10098_v34 = vor.u32 %v11346_v35, %v10097_v50 }
 0x318   : > { %v4877_v33 = vmax.f32 %v4861_v21, 0.0  ;;  %v4801_v61 = vadd.f32 %v4800_v0, %v4752_v41  ;;  %v10106_v52 = vor.u32 %v11347_v32, %v10105_v9  ;;  %v9914_v35 = vor.u32 %v11395_v45, %v9913_v53  ;;  %v11472_v32 = vld [vmem:[#allocation10 + $0x218] sm:$0xff] }
 0x319   : > { %v4966_v55 = vor.u32 %v4964_v12, %v4963_v19  ;;  %v5143_v57 = vsel %vm12354_vm9, %v5141_v27, %v5142_v54  ;;  %v5145_v2 = vor.u32 %v5144_v6, %v5142_v54  ;;  %v11552_v27 = vld [vmem:[#allocation10 + $0xd8] sm:$0xff]  ;;  %6719 = vmatpush.bf16.msra.mxu2 %v11472_v32 }
 0x31a   : > { %v5772_v11 = vpop.f32.mrf.mxu3  ;;  %v4803_v26 = vpop.f32.mrf.mxu1  ;;  %v5102_v49 = vld [vmem:[#allocation3 + $0x108] sm:$0x1]  ;;  %5216 = vst [vmem:[#allocation3 + $0x110] sm:$0xf] %v5143_v57  ;;  %v4893_v22 = vpack.c.bf16 %v4877_v33, %v4877_v33  ;;  %v4830_v0 = vadd.f32 %v4801_v61, %v13177_v38  ;;  %v5076_v33 = vld [vmem:[#allocation3 + $0x120] sm:$0xf]  ;;  %7351 = vmatpush.bf16.msra.mxu3 %v11552_v27 }
 0x31b   : > { %v5721_v39 = vpop.f32.mrf.mxu2  ;;  %v5103_v24 = vsel %vm12369_vm12, 0, %v5102_v49  ;;  %v4967_v12 = vsel %vm12340_vm7, %v4959_v44, %v4966_v55  ;;  %v5146_v28 = vrot.slane %v5145_v2, 4  ;;  %v11464_v27 = vld [vmem:[#allocation10 + $0x1d8] sm:$0xff] }
 0x31c   : > { %v13301_v17 = vadd.f32 %v5770_v40, %v5721_v39  ;;  %5104 = vst [vmem:[#allocation3 + $0x108] sm:$0x1] %v5103_v24  ;;  %v4969_v21 = vshrl.u32 %v4893_v22, 16  ;;  %v4972_v41 = vshll.u32 %v4893_v22, 16  ;;  %v4846_v60 = vmul.f32 %v13249_v4, %v4830_v0  ;;  %v10099_v0 = vld [vmem:[#allocation3 + $0x6c] sm:$0xf0]  ;;  %6670 = vmatpush.bf16.msra.mxu1 %v11464_v27 }
 0x31d   : > { %6144 = vmatmul.bf16.gmra.mxu1 %v10098_v34  ;;  %5075 = vst [vmem:[#allocation3 + $0x114] sm:$0xf] %v4967_v12  ;;  %v5218_v38 = vsel %vm12361_vm11, %v5146_v28, %v5217_v62  ;;  %v4754_v50 = vpop.f32.mrf.mxu0  ;;  %v11345_v24 = vld [vmem:[#allocation3 + $0x64] sm:$0xf] }
 0x31e   : > { %5219 = vst [vmem:[#allocation3 + $0x11c] sm:$0xf] %v5218_v38  ;;  %v4971_v19 = vrot.slane %v4969_v21, 7  ;;  %v5147_v40 = vrot.slane %v4969_v21, 4  ;;  %v5148_v54 = vrot.slane %v4972_v41, 5  ;;  %v4862_v6 = vadd.f32 %v13252_v8, %v4846_v60 }
 0x31f   : > { %6242 = vmatmul.bf16.gmra.mxu3 %v10106_v52  ;;  %4910 = vst [vmem:[#allocation3 + $0x124] sm:$0xf] %v4893_v22  ;;  %v4755_v61 = vadd.f32 %v4754_v50, %v13175_v15  ;;  %v10102_v21 = vor.u32 %v11345_v24, %v10099_v0  ;;  %v11349_v60 = vld [vmem:[#allocation3 + $0x80] sm:$0xf0] }
 0x320   : > { %v4974_v44 = vor.u32 %v4972_v41, %v4971_v19  ;;  %v4878_v55 = vmax.f32 %v4862_v6, 0.0  ;;  %5823 = vmatmul.bf16.gmra.mxu0 %v9914_v35  ;;  %v5149_v2 = vor.u32 %v5148_v54, %v5147_v40  ;;  %v10109_v35 = vld [vmem:[#allocation3 + $0x78] sm:$0xf]  ;;  %v11456_v40 = vld [vmem:[#allocation10 + $0x198] sm:$0xff]  ;;  %v4975_v6 = vrot.slane %v4971_v19, 4 }
 0x321   : > { %v4804_v45 = vadd.f32 %v4803_v26, %v4755_v61  ;;  %v11350_v54 = vld [vmem:[#allocation3 + $0x88] sm:$0xf0]  ;;  %6621 = vmatpush.bf16.msra.mxu0 %v11456_v40 }
 0x322   : > { %v5775_v57 = vpop.f32.mrf.mxu3  ;;  %v4805_v9 = vpop.f32.mrf.mxu1  ;;  %v5077_v49 = vsel %vm12333_vm6, %v4974_v44, %v5076_v33  ;;  %v4894_v62 = vpack.c.bf16 %v4878_v55, %v4878_v55  ;;  %v5150_v28 = vrot.slane %v5149_v2, 4  ;;  %v10117_v2 = vld [vmem:[#allocation3 + $0x80] sm:$0xf] }
 0x323   : > { %v5723_v39 = vpop.f32.mrf.mxu2  ;;  %5078 = vst [vmem:[#allocation3 + $0x120] sm:$0xf] %v5077_v49  ;;  %v4831_v15 = vadd.f32 %v4804_v45, %v13182_v23  ;;  %v5221_v45 = vld [vmem:[#allocation3 + $0x134] sm:$0xf] }
 0x324   : > { %v13310_v22 = vadd.f32 %v5772_v11, %v5723_v39  ;;  %4911 = vst [vmem:[#allocation3 + $0x130] sm:$0xf] %v4894_v62  ;;  %v4977_v34 = vshrl.u32 %v4894_v62, 16  ;;  %v4980_v52 = vshll.u32 %v4894_v62, 16 }
 0x325   : > { %v5246_v12 = vld [vmem:[#allocation3 + $0x11c] sm:$0x8]  ;;  %v4847_v26 = vmul.f32 %v13249_v4, %v4831_v15  ;;  %v4756_v41 = vpop.f32.mrf.mxu0 }
 0x326   : > { %v5247_v53 = vsel %vm12391_vm14, 0, %v5246_v12  ;;  %v4979_v38 = vrot.slane %v4977_v34, 7  ;;  %v5151_v50 = vrot.slane %v4980_v52, 5  ;;  %v5153_v11 = vrot.slane %v4977_v34, 4 }
 0x327   : > { %5248 = vst [vmem:[#allocation3 + $0x11c] sm:$0x8] %v5247_v53  ;;  %v4863_v23 = vadd.f32 %v13252_v8, %v4847_v26  ;;  %6193 = vmatmul.bf16.gmra.mxu2 %v10102_v21  ;;  %v4757_v32 = vadd.f32 %v4756_v41, %v13180_v58  ;;  %v10110_v34 = vor.u32 %v11349_v60, %v10109_v35  ;;  %v11398_v26 = vld [vmem:[#allocation3 + $0xa0] sm:$0xf0]  ;;  %v9925_v35 = vld [vmem:[#allocation3 + $0x98] sm:$0xf] }
 0x328   : > { %v4982_v33 = vor.u32 %v4980_v52, %v4979_v38  ;;  %v5152_v61 = vsel %vm12354_vm9, %v5150_v28, %v5151_v50  ;;  %v5154_v44 = vor.u32 %v5153_v11, %v5151_v50  ;;  %v10118_v52 = vor.u32 %v11350_v54, %v10117_v2  ;;  %v11471_v41 = vld [vmem:[#allocation10 + $0x210] sm:$0xff]  ;;  %v5080_v54 = vld [vmem:[#allocation3 + $0x138] sm:$0xf] }
 0x329   : > { %5220 = vst [vmem:[#allocation3 + $0x128] sm:$0xf] %v5152_v61  ;;  %v4879_v49 = vmax.f32 %v4863_v23, 0.0  ;;  %v4806_v62 = vadd.f32 %v4805_v9, %v4757_v32  ;;  %v11551_v53 = vld [vmem:[#allocation10 + $0xd0] sm:$0xff]  ;;  %6720 = vmatpush.bf16.msra.mxu2 %v11471_v41 }
 0x32a   : > { %v5777_v55 = vpop.f32.mrf.mxu3  ;;  %v4808_v39 = vpop.f32.mrf.mxu1  ;;  %v5105_v0 = vld [vmem:[#allocation3 + $0x120] sm:$0x1]  ;;  %v4983_v58 = vsel %vm12340_vm7, %v4975_v6, %v4982_v33  ;;  %v5155_v15 = vrot.slane %v5154_v44, 4  ;;  %7352 = vmatpush.bf16.msra.mxu3 %v11551_v53  ;;  %v11455_v41 = vld [vmem:[#allocation10 + $0x190] sm:$0xff]  ;;  %v10121_v53 = vld [vmem:[#allocation3 + $0x90] sm:$0xf] }
 0x32b   : > { %v5726_v19 = vpop.f32.mrf.mxu2  ;;  %v5106_v24 = vsel %vm12369_vm12, 0, %v5105_v0  ;;  %5079 = vst [vmem:[#allocation3 + $0x12c] sm:$0xf] %v4983_v58  ;;  %v4895_v12 = vpack.c.bf16 %v4879_v49, %v4879_v49  ;;  %v4832_v9 = vadd.f32 %v4806_v62, %v13187_v14  ;;  %v9926_v14 = vor.u32 %v11398_v26, %v9925_v35  ;;  %v10111_v62 = vld [vmem:[#allocation3 + $0x84] sm:$0xf0]  ;;  %6622 = vmatpush.bf16.msra.mxu0 %v11455_v41 }
 0x32c   : > { %v13324_v28 = vadd.f32 %v5775_v57, %v5726_v19  ;;  %5107 = vst [vmem:[#allocation3 + $0x120] sm:$0x1] %v5106_v24  ;;  %v5222_v21 = vsel %vm12361_vm11, %v5155_v15, %v5221_v45  ;;  %v11352_v35 = vld [vmem:[#allocation3 + $0x98] sm:$0xf0] }
 0x32d   : > { %6149 = vmatmul.bf16.gmra.mxu1 %v10110_v34  ;;  %5223 = vst [vmem:[#allocation3 + $0x134] sm:$0xf] %v5222_v21  ;;  %v4985_v60 = vshrl.u32 %v4895_v12, 16  ;;  %v4988_v38 = vshll.u32 %v4895_v12, 16  ;;  %v4848_v50 = vmul.f32 %v13249_v4, %v4832_v9  ;;  %v4759_v11 = vpop.f32.mrf.mxu0  ;;  %v11348_v34 = vld [vmem:[#allocation3 + $0x7c] sm:$0xf] }
 0x32e   : > { %4912 = vst [vmem:[#allocation3 + $0x13c] sm:$0xf] %v4895_v12  ;;  %v4760_v57 = vadd.f32 %v4759_v11, %v13185_v29 }
 0x32f   : > { %6247 = vmatmul.bf16.gmra.mxu3 %v10118_v52  ;;  %v4987_v23 = vrot.slane %v4985_v60, 7  ;;  %v5156_v32 = vrot.slane %v4985_v60, 4  ;;  %v5157_v27 = vrot.slane %v4988_v38, 5  ;;  %v4864_v40 = vadd.f32 %v13252_v8, %v4848_v50 }
 0x330   : > { %v4809_v6 = vadd.f32 %v4808_v39, %v4760_v57  ;;  %5828 = vmatmul.bf16.gmra.mxu0 %v9926_v14 }
 0x331   : > { %v4990_v61 = vor.u32 %v4988_v38, %v4987_v23  ;;  %v4880_v44 = vmax.f32 %v4864_v40, 0.0  ;;  %v5158_v0 = vor.u32 %v5157_v27, %v5156_v32  ;;  %v11353_v27 = vld [vmem:[#allocation3 + $0xa0] sm:$0xf0]  ;;  %v4991_v40 = vrot.slane %v4987_v23, 4 }
 0x332   : > { %v5780_v33 = vpop.f32.mrf.mxu3  ;;  %v4810_v2 = vpop.f32.mrf.mxu1  ;;  %v4833_v49 = vadd.f32 %v4809_v6, %v13192_v7  ;;  %v10114_v7 = vor.u32 %v11348_v34, %v10111_v62  ;;  %v9937_v34 = vld [vmem:[#allocation3 + $0xb0] sm:$0xf] }
 0x333   : > { %v5728_v45 = vpop.f32.mrf.mxu2  ;;  %v5081_v29 = vsel %vm12333_vm6, %v4990_v61, %v5080_v54  ;;  %v4896_v58 = vpack.c.bf16 %v4880_v44, %v4880_v44  ;;  %v5159_v60 = vrot.slane %v5158_v0, 4  ;;  %v10129_v44 = vld [vmem:[#allocation3 + $0x98] sm:$0xf]  ;;  %v11401_v0 = vld [vmem:[#allocation3 + $0xb8] sm:$0xf0] }
 0x334   : > { %v13335_v15 = vadd.f32 %v5777_v55, %v5728_v45  ;;  %v5249_v19 = vld [vmem:[#allocation3 + $0x134] sm:$0x8]  ;;  %5082 = vst [vmem:[#allocation3 + $0x138] sm:$0xf] %v5081_v29  ;;  %v4849_v39 = vmul.f32 %v13249_v4, %v4833_v49  ;;  %v11463_v55 = vld [vmem:[#allocation10 + $0x1d0] sm:$0xff] }
 0x335   : > { %v5250_v52 = vsel %vm12391_vm14, 0, %v5249_v19  ;;  %4913 = vst [vmem:[#allocation3 + $0x148] sm:$0xf] %v4896_v58  ;;  %v4993_v24 = vshrl.u32 %v4896_v58, 16  ;;  %v4996_v12 = vshll.u32 %v4896_v58, 16  ;;  %v4761_v9 = vpop.f32.mrf.mxu0  ;;  %6671 = vmatpush.bf16.msra.mxu1 %v11463_v55  ;;  %v11550_v55 = vld [vmem:[#allocation10 + $0xc8] sm:$0xff] }
 0x336   : > { %5251 = vst [vmem:[#allocation3 + $0x134] sm:$0x8] %v5250_v52  ;;  %v4865_v26 = vadd.f32 %v13252_v8, %v4849_v39  ;;  %v4762_v21 = vadd.f32 %v4761_v9, %v13190_v13  ;;  %v5225_v45 = vld [vmem:[#allocation3 + $0x14c] sm:$0xf]  ;;  %v10130_v52 = vor.u32 %v11353_v27, %v10129_v44  ;;  %7353 = vmatpush.bf16.msra.mxu3 %v11550_v55 }
 0x337   : > { %v4995_v38 = vrot.slane %v4993_v24, 7  ;;  %v5160_v50 = vrot.slane %v4996_v12, 5  ;;  %v5162_v11 = vrot.slane %v4993_v24, 4  ;;  %6198 = vmatmul.bf16.gmra.mxu2 %v10114_v7 }
 0x338   : > { %v4881_v57 = vmax.f32 %v4865_v26, 0.0  ;;  %v4811_v14 = vadd.f32 %v4810_v2, %v4762_v21  ;;  %v10122_v2 = vor.u32 %v11352_v35, %v10121_v53  ;;  %v9938_v21 = vor.u32 %v11401_v0, %v9937_v34  ;;  %v11351_v0 = vld [vmem:[#allocation3 + $0x94] sm:$0xf]  ;;  %v11462_v34 = vld [vmem:[#allocation10 + $0x1c8] sm:$0xff] }
 0x339   : > { %v4998_v54 = vor.u32 %v4996_v12, %v4995_v38  ;;  %v5161_v13 = vsel %vm12354_vm9, %v5159_v60, %v5160_v50  ;;  %v5163_v6 = vor.u32 %v5162_v11, %v5160_v50  ;;  %v5084_v50 = vld [vmem:[#allocation3 + $0x150] sm:$0xf]  ;;  %6672 = vmatpush.bf16.msra.mxu1 %v11462_v34 }
 0x33a   : > { %v5782_v32 = vpop.f32.mrf.mxu3  ;;  %v4813_v61 = vpop.f32.mrf.mxu1  ;;  %5224 = vst [vmem:[#allocation3 + $0x140] sm:$0xf] %v5161_v13  ;;  %v4897_v49 = vpack.c.bf16 %v4881_v57, %v4881_v57  ;;  %v4834_v29 = vadd.f32 %v4811_v14, %v13197_v46 }
 0x33b   : > { %v5731_v62 = vpop.f32.mrf.mxu2  ;;  %v5108_v58 = vld [vmem:[#allocation3 + $0x138] sm:$0x1]  ;;  %v4999_v19 = vsel %vm12340_vm7, %v4991_v40, %v4998_v54  ;;  %v5164_v23 = vrot.slane %v5163_v6, 4 }
 0x33c   : > { %v13347_v39 = vadd.f32 %v5780_v33, %v5731_v62  ;;  %v5109_v24 = vsel %vm12369_vm12, 0, %v5108_v58  ;;  %5083 = vst [vmem:[#allocation3 + $0x144] sm:$0xf] %v4999_v19  ;;  %v5001_v12 = vshrl.u32 %v4897_v49, 16  ;;  %v5004_v7 = vshll.u32 %v4897_v49, 16  ;;  %v11470_v33 = vld [vmem:[#allocation10 + $0x208] sm:$0xff] }
 0x33d   : > { %v4850_v9 = vmul.f32 %v13249_v4, %v4834_v29  ;;  %6154 = vmatmul.bf16.gmra.mxu1 %v10122_v2  ;;  %5110 = vst [vmem:[#allocation3 + $0x138] sm:$0x1] %v5109_v24  ;;  %v5226_v46 = vsel %vm12361_vm11, %v5164_v23, %v5225_v45  ;;  %v4764_v26 = vpop.f32.mrf.mxu0  ;;  %6721 = vmatpush.bf16.msra.mxu2 %v11470_v33  ;;  %v10123_v45 = vld [vmem:[#allocation3 + $0x9c] sm:$0xf0] }
 0x33e   : > { %5227 = vst [vmem:[#allocation3 + $0x14c] sm:$0xf] %v5226_v46  ;;  %v13354_v41 = vrot.slane %v5001_v12, 7  ;;  %v5165_v53 = vrot.slane %v5001_v12, 4  ;;  %v5166_v60 = vrot.slane %v5004_v7, 5  ;;  %v4765_v11 = vadd.f32 %v4764_v26, %v13195_v16 }
 0x33f   : > { %6252 = vmatmul.bf16.gmra.mxu3 %v10130_v52  ;;  %v4866_v38 = vadd.f32 %v13252_v8, %v4850_v9  ;;  %4914 = vst [vmem:[#allocation3 + $0x154] sm:$0xf] %v4897_v49  ;;  %v10126_v19 = vor.u32 %v11351_v0, %v10123_v45  ;;  %v11454_v52 = vld [vmem:[#allocation10 + $0x188] sm:$0xff]  ;;  %v11355_v9 = vld [vmem:[#allocation3 + $0xb0] sm:$0xf0] }
 0x340   : > { %v5006_v35 = vor.u32 %v5004_v7, %v13354_v41  ;;  %5833 = vmatmul.bf16.gmra.mxu0 %v9938_v21  ;;  %v5167_v27 = vor.u32 %v5166_v60, %v5165_v53  ;;  %v4814_v40 = vadd.f32 %v4813_v61, %v4765_v11  ;;  %v10133_v26 = vld [vmem:[#allocation3 + $0xa8] sm:$0xf]  ;;  %v11356_v21 = vld [vmem:[#allocation3 + $0xb8] sm:$0xf0]  ;;  %v5007_v33 = vrot.slane %v13354_v41, 4 }
 0x341   : > { %v4882_v57 = vmax.f32 %v4866_v38, 0.0  ;;  %v5229_v38 = vld [vmem:[#allocation3 + $0x164] sm:$0xf]  ;;  %6623 = vmatpush.bf16.msra.mxu0 %v11454_v52  ;;  %v10141_v11 = vld [vmem:[#allocation3 + $0xb0] sm:$0xf] }
 0x342   : > { %v5785_v14 = vpop.f32.mrf.mxu3  ;;  %v4815_v54 = vpop.f32.mrf.mxu1  ;;  %v5085_v13 = vsel %vm12333_vm6, %v5006_v35, %v5084_v50  ;;  %v4835_v16 = vadd.f32 %v4814_v40, %v13202_v25  ;;  %v5168_v58 = vrot.slane %v5167_v27, 4  ;;  %v11469_v40 = vld [vmem:[#allocation10 + $0x200] sm:$0xff] }
 0x343   : > { %v4898_v6 = vpack.c.bf16 %v4882_v57, %v4882_v57  ;;  %v5733_v44 = vpop.f32.mrf.mxu2  ;;  %5086 = vst [vmem:[#allocation3 + $0x150] sm:$0xf] %v5085_v13  ;;  %v11461_v13 = vld [vmem:[#allocation10 + $0x1c0] sm:$0xff]  ;;  %6722 = vmatpush.bf16.msra.mxu2 %v11469_v40 }
 0x344   : > { %v13361_v49 = vadd.f32 %v5782_v32, %v5733_v44  ;;  %v4851_v61 = vmul.f32 %v13249_v4, %v4835_v16  ;;  %v10134_v16 = vor.u32 %v11355_v9, %v10133_v26  ;;  %6673 = vmatpush.bf16.msra.mxu1 %v11461_v13  ;;  %v11354_v13 = vld [vmem:[#allocation3 + $0xac] sm:$0xf] }
 0x345   : > { %4915 = vst [vmem:[#allocation3 + $0x160] sm:$0xf] %v4898_v6  ;;  %v5009_v62 = vshrl.u32 %v4898_v6, 16  ;;  %v5012_v29 = vshll.u32 %v4898_v6, 16  ;;  %v5252_v2 = vld [vmem:[#allocation3 + $0x14c] sm:$0x8]  ;;  %v4766_v23 = vpop.f32.mrf.mxu0 }
 0x346   : > { %v5253_v24 = vsel %vm12391_vm14, 0, %v5252_v2  ;;  %v4867_v25 = vadd.f32 %v13252_v8, %v4851_v61  ;;  %v4767_v46 = vadd.f32 %v4766_v23, %v13200_v47  ;;  %v11549_v47 = vld [vmem:[#allocation10 + $0xc0] sm:$0xff] }
 0x347   : > { %v5011_v12 = vrot.slane %v5009_v62, 7  ;;  %v5169_v32 = vrot.slane %v5012_v29, 5  ;;  %v5171_v7 = vrot.slane %v5009_v62, 4  ;;  %5254 = vst [vmem:[#allocation3 + $0x14c] sm:$0x8] %v5253_v24  ;;  %6203 = vmatmul.bf16.gmra.mxu2 %v10126_v19  ;;  %v10142_v62 = vor.u32 %v11356_v21, %v10141_v11  ;;  %7354 = vmatpush.bf16.msra.mxu3 %v11549_v47 }
 0x348   : > { %v4883_v35 = vmax.f32 %v4867_v25, 0.0  ;;  %v4816_v57 = vadd.f32 %v4815_v54, %v4767_v46  ;;  %v11404_v61 = vld [vmem:[#allocation3 + $0xd0] sm:$0xf0]  ;;  %v5088_v46 = vld [vmem:[#allocation3 + $0x168] sm:$0xf] }
 0x349   : > { %v5014_v55 = vor.u32 %v5012_v29, %v5011_v12  ;;  %v5170_v53 = vsel %vm12354_vm9, %v5168_v58, %v5169_v32  ;;  %v5172_v60 = vor.u32 %v5171_v7, %v5169_v32  ;;  %v11453_v29 = vld [vmem:[#allocation10 + $0x180] sm:$0xff]  ;;  %v9949_v12 = vld [vmem:[#allocation3 + $0xc8] sm:$0xf] }
 0x34a   : > { %v5787_v50 = vpop.f32.mrf.mxu3  ;;  %5228 = vst [vmem:[#allocation3 + $0x158] sm:$0xf] %v5170_v53  ;;  %v4818_v27 = vpop.f32.mrf.mxu1  ;;  %v5111_v6 = vld [vmem:[#allocation3 + $0x150] sm:$0x1]  ;;  %v4899_v2 = vpack.c.bf16 %v4883_v35, %v4883_v35  ;;  %v4836_v54 = vadd.f32 %v4816_v57, %v13207_v20  ;;  %6624 = vmatpush.bf16.msra.mxu0 %v11453_v29 }
 0x34b   : > { %v5015_v41 = vsel %vm12340_vm7, %v5007_v33, %v5014_v55  ;;  %v5173_v44 = vrot.slane %v5172_v60, 4  ;;  %v5736_v45 = vpop.f32.mrf.mxu2  ;;  %v5112_v0 = vsel %vm12369_vm12, 0, %v5111_v6  ;;  %v11508_v29 = vld [vmem:[#allocation10 + $0x38] sm:$0xff] }
 0x34c   : > { %5087 = vst [vmem:[#allocation3 + $0x15c] sm:$0xf] %v5015_v41  ;;  %v13376_v58 = vadd.f32 %v5785_v14, %v5736_v45  ;;  %v5017_v23 = vshrl.u32 %v4899_v2, 16  ;;  %v5020_v34 = vshll.u32 %v4899_v2, 16  ;;  %v4852_v52 = vmul.f32 %v13249_v4, %v4836_v54  ;;  %7766 = vmatpush.bf16.msrb.mxu2 %v11508_v29 }
 0x34d   : > { %5113 = vst [vmem:[#allocation3 + $0x150] sm:$0x1] %v5112_v0  ;;  %v5230_v19 = vsel %vm12361_vm11, %v5173_v44, %v5229_v38  ;;  %6159 = vmatmul.bf16.gmra.mxu1 %v10134_v16  ;;  %v4769_v24 = vpop.f32.mrf.mxu0  ;;  %v9950_v14 = vor.u32 %v11404_v61, %v9949_v12  ;;  %v10243_v16 = vld [vmem:[#allocation3 + $0x3c] sm:$0xf0]  ;;  %v11516_v0 = vld [vmem:[#allocation10 + $0x78] sm:$0xff] }
 0x34e   : > { %5231 = vst [vmem:[#allocation3 + $0x164] sm:$0xf] %v5230_v19  ;;  %v4770_v20 = vadd.f32 %v4769_v24, %v13205_v18  ;;  %v13383_v32 = vrot.slane %v5017_v23, 7  ;;  %v5174_v7 = vrot.slane %v5017_v23, 4  ;;  %v5175_v9 = vrot.slane %v5020_v34, 5  ;;  %7815 = vmatpush.bf16.msrb.mxu3 %v11516_v0 }
 0x34f   : > { %6257 = vmatmul.bf16.gmra.mxu3 %v10142_v62  ;;  %4916 = vst [vmem:[#allocation3 + $0x16c] sm:$0xf] %v4899_v2  ;;  %v4868_v25 = vadd.f32 %v13252_v8, %v4852_v52  ;;  %v10135_v18 = vld [vmem:[#allocation3 + $0xb4] sm:$0xf0]  ;;  %v11572_v2 = vld [vmem:[#allocation10 + $0x178] sm:$0xff] }
 0x350   : > { %v4819_v26 = vadd.f32 %v4818_v27, %v4770_v20  ;;  %5838 = vmatmul.bf16.gmra.mxu0 %v9950_v14  ;;  %v5022_v33 = vor.u32 %v5020_v34, %v13383_v32  ;;  %v5176_v35 = vor.u32 %v5175_v9, %v5174_v7  ;;  %v11564_v34 = vld [vmem:[#allocation10 + $0x138] sm:$0xff]  ;;  %v10433_v14 = vld [vmem:[#allocation3 + $0xd8] sm:$0xf]  ;;  %v11526_v7 = vld [vmem:[#allocation3 + $0xe0] sm:$0xf0]  ;;  %7445 = vmatpush.bf16.msrb.mxu1 %v11572_v2 }
 0x351   : > { %v4884_v55 = vmax.f32 %v4868_v25, 0.0  ;;  %v10241_v20 = vld [vmem:[#allocation3 + $0x30] sm:$0xf]  ;;  %7396 = vmatpush.bf16.msrb.mxu0 %v11564_v34 }
 0x352   : > { %v5790_v21 = vpop.f32.mrf.mxu3  ;;  %v4820_v53 = vpop.f32.mrf.mxu1  ;;  %v4837_v38 = vadd.f32 %v4819_v26, %v13212_v43  ;;  %v5089_v11 = vsel %vm12333_vm6, %v5022_v33, %v5088_v46  ;;  %v10138_v43 = vor.u32 %v11354_v13, %v10135_v18  ;;  %v5177_v54 = vrot.slane %v5176_v35, 4  ;;  %v11430_v33 = vld [vmem:[#allocation3 + $0x38] sm:$0xf0]  ;;  %v11515_v35 = vld [vmem:[#allocation10 + $0x70] sm:$0xff]  ;;  %v11896_v2 = vld [vmem:[#allocation9] ss:$0 sm:$0xff] }
 0x353   : > { %v5738_v60 = vpop.f32.mrf.mxu2  ;;  %v4900_v57 = vpack.c.bf16 %v4884_v55, %v4884_v55  ;;  %5090 = vst [vmem:[#allocation3 + $0x168] sm:$0xf] %v5089_v11  ;;  %v11429_v55 = vld [vmem:[#allocation3 + $0x34] sm:$0xf]  ;;  %v10434_v13 = vor.u32 %v11526_v7, %v10433_v14  ;;  %7816 = vmatpush.bf16.msrb.mxu3 %v11515_v35  ;;  %v11506_v35 = vld [vmem:[#allocation10 + $0x28] sm:$0xff] }
 0x354   : > { %v13390_v40 = vadd.f32 %v5787_v50, %v5738_v60  ;;  %v4853_v27 = vmul.f32 %v13249_v4, %v4837_v38  ;;  %v10246_v11 = vor.u32 %v11429_v55, %v10243_v16  ;;  %v10242_v16 = vor.u32 %v11430_v33, %v10241_v20 }
 0x355   : > { %v5255_v47 = vld [vmem:[#allocation3 + $0x164] sm:$0x8]  ;;  %4917 = vst [vmem:[#allocation3 + $0x178] sm:$0xf] %v4900_v57  ;;  %v5025_v41 = vshrl.u32 %v4900_v57, 16  ;;  %v5028_v44 = vshll.u32 %v4900_v57, 16  ;;  %v4771_v45 = vpop.f32.mrf.mxu0 }
 0x356   : > { %v5256_v6 = vsel %vm12391_vm14, 0, %v5255_v47  ;;  %v4869_v62 = vadd.f32 %v13252_v8, %v4853_v27  ;;  %v4772_v50 = vadd.f32 %v4771_v45, %v13210_v42  ;;  %v11507_v8 = vld [vmem:[#allocation10 + $0x30] sm:$0xff]  ;;  %v5023_v42 = vrot.slane %v13383_v32, 4 }
 0x357   : > { %5257 = vst [vmem:[#allocation3 + $0x164] sm:$0x8] %v5256_v6  ;;  %v5027_v61 = vrot.slane %v5025_v41, 7  ;;  %v5178_v19 = vrot.slane %v5028_v44, 5  ;;  %v5180_v23 = vrot.slane %v5025_v41, 4  ;;  %6208 = vmatmul.bf16.gmra.mxu2 %v10138_v43 }
 0x358   : > { %v4885_v52 = vmax.f32 %v4869_v62, 0.0  ;;  %v4821_v24 = vadd.f32 %v4820_v53, %v4772_v50  ;;  %v5233_v53 = vld [vmem:[#allocation3 + $0x17c] sm:$0xf]  ;;  %7767 = vmatpush.bf16.msrb.mxu2 %v11507_v8  ;;  %v11563_v62 = vld [vmem:[#allocation10 + $0x130] sm:$0xff] }
 0x359   : > { %v5030_v9 = vor.u32 %v5028_v44, %v5027_v61  ;;  %v5179_v25 = vsel %vm12354_vm9, %v5177_v54, %v5178_v19  ;;  %v5181_v46 = vor.u32 %v5180_v23, %v5178_v19  ;;  %7397 = vmatpush.bf16.msrb.mxu0 %v11563_v62 }
 0x35a   : > { %v13397_v12 = vpop.f32.mrf.mxu3  ;;  %v6125_v26 = vpop.f32.mrf.mxu1  ;;  %5232 = vst [vmem:[#allocation3 + $0x170] sm:$0xf] %v5179_v25  ;;  %v4901_v60 = vpack.c.bf16 %v4885_v52, %v4885_v52  ;;  %v4838_v18 = vadd.f32 %v4821_v24, %v13216_v5  ;;  %v5114_v57 = vld [vmem:[#allocation3 + $0x168] sm:$0x1] }
 0x35b   : > { %v5741_v38 = vpop.f32.mrf.mxu2  ;;  %v5031_v32 = vsel %vm12340_vm7, %v5023_v42, %v5030_v9  ;;  %v5182_v47 = vrot.slane %v5181_v46, 4  ;;  %v5115_v6 = vsel %vm12369_vm12, 0, %v5114_v57  ;;  %v11431_v42 = vld [vmem:[#allocation3 + $0x40] sm:$0xf0]  ;;  %v10249_v46 = vld [vmem:[#allocation3 + $0x38] sm:$0xf] }
 0x35c   : > { %v13405_v27 = vadd.f32 %v5790_v21, %v5741_v38  ;;  %5091 = vst [vmem:[#allocation3 + $0x174] sm:$0xf] %v5031_v32  ;;  %v5033_v41 = vshrl.u32 %v4901_v60, 16  ;;  %v5036_v44 = vshll.u32 %v4901_v60, 16  ;;  %v4854_v43 = vmul.f32 %v13249_v4, %v4838_v18  ;;  %v11571_v21 = vld [vmem:[#allocation10 + $0x170] sm:$0xff]  ;;  %v11514_v57 = vld [vmem:[#allocation10 + $0x68] sm:$0xff]  ;;  %7768 = vmatpush.bf16.msrb.mxu2 %v11506_v35 }
 0x35d   : > { %6674 = vmatmul.bf16.vlgmr.msra.gmra.mxu1 %v10246_v11  ;;  %5116 = vst [vmem:[#allocation3 + $0x168] sm:$0x1] %v5115_v6  ;;  %v5234_v5 = vsel %vm12361_vm11, %v5182_v47, %v5233_v53  ;;  %v5804_v45 = vpop.f32.mrf.mxu0  ;;  %v5092_v4 = vld [vmem:[#allocation3 + $0x180] sm:$0xf]  ;;  %v10250_v53 = vor.u32 %v11431_v42, %v10249_v46  ;;  %7817 = vmatpush.bf16.msrb.mxu3 %v11514_v57  ;;  %v10261_v46 = vld [vmem:[#allocation3 + $0x50] sm:$0xf] }
 0x35e   : > { %5235 = vst [vmem:[#allocation3 + $0x17c] sm:$0xf] %v5234_v5  ;;  %v5035_v50 = vrot.slane %v5033_v41, 7  ;;  %v5183_v29 = vrot.slane %v5033_v41, 4  ;;  %v5184_v0 = vrot.slane %v5036_v44, 5  ;;  %v4870_v54 = vadd.f32 %v11896_v2, %v4854_v43  ;;  %7446 = vmatpush.bf16.msrb.mxu1 %v11571_v21 }
 0x35f   : > { %7355 = vmatmul.bf16.vlgmr.msra.gmra.mxu3 %v10434_v13  ;;  %4918 = vst [vmem:[#allocation3 + $0x184] sm:$0xf] %v4901_v60  ;;  %v5805_v61 = vadd.f32 %v5804_v45, %v13222_v30  ;;  %v11529_v43 = vld [vmem:[#allocation3 + $0xf8] sm:$0xf0]  ;;  %v5237_v5 = vld [vmem:[#allocation3 + $0x194] sm:$0xf] }
 0x360   : > { %v5038_v19 = vor.u32 %v5036_v44, %v5035_v50  ;;  %v4886_v23 = vmax.f32 %v4870_v54, 0.0  ;;  %6625 = vmatmul.bf16.vlgmr.msra.gmra.mxu0 %v10242_v16  ;;  %v5185_v52 = vor.u32 %v5184_v0, %v5183_v29  ;;  %v5039_v32 = vrot.slane %v5035_v50, 4  ;;  %v10445_v44 = vld [vmem:[#allocation3 + $0xf0] sm:$0xf]  ;;  %v11432_v21 = vld [vmem:[#allocation3 + $0x4c] sm:$0xf] }
 0x361   : > { %v6126_v24 = vadd.f32 %v6125_v26, %v5805_v61  ;;  %v10253_v0 = vld [vmem:[#allocation3 + $0x48] sm:$0xf]  ;;  %v10446_v61 = vor.u32 %v11529_v43, %v10445_v44  ;;  %v11435_v57 = vld [vmem:[#allocation3 + $0x64] sm:$0xf]  ;;  %v11569_v43 = vld [vmem:[#allocation10 + $0x160] sm:$0xff] }
 0x362   : > { %v6223_v34 = vpop.f32.mrf.mxu3  ;;  %v6127_v20 = vpop.f32.mrf.mxu1  ;;  %v5093_v14 = vsel %vm12333_vm6, %v5038_v19, %v5092_v4  ;;  %v4902_v7 = vpack.c.bf16 %v4886_v23, %v4886_v23  ;;  %v5186_v55 = vrot.slane %v5185_v52, 4  ;;  %v11433_v4 = vld [vmem:[#allocation3 + $0x50] sm:$0xf0]  ;;  %v11570_v52 = vld [vmem:[#allocation10 + $0x168] sm:$0xff] }
 0x363   : > { %v5743_v8 = vpop.f32.mrf.mxu2  ;;  %5094 = vst [vmem:[#allocation3 + $0x180] sm:$0xf] %v5093_v14  ;;  %v10254_v10 = vor.u32 %v11433_v4, %v10253_v0  ;;  %7447 = vmatpush.bf16.msrb.mxu1 %v11570_v52 }
 0x364   : > { %v13416_v9 = vadd.f32 %v13397_v12, %v5743_v8  ;;  %4919 = vst [vmem:[#allocation3 + $0x190] sm:$0xf] %v4902_v7  ;;  %v5041_v30 = vshrl.u32 %v4902_v7, 16  ;;  %v5044_v25 = vshll.u32 %v4902_v7, 16  ;;  %v10255_v12 = vld [vmem:[#allocation3 + $0x54] sm:$0xf0] }
 0x365   : > { %v5258_v33 = vld [vmem:[#allocation3 + $0x17c] sm:$0x8]  ;;  %v5806_v60 = vpop.f32.mrf.mxu0  ;;  %v10258_v59 = vor.u32 %v11432_v21, %v10255_v12  ;;  %v11532_v12 = vld [vmem:[#allocation3 + $0x110] sm:$0xf0] }
 0x366   : > { %v5259_v26 = vsel %vm12391_vm14, 0, %v5258_v33  ;;  %v5043_v31 = vrot.slane %v5041_v30, 7  ;;  %v5187_v38 = vrot.slane %v5044_v25, 5  ;;  %v5189_v18 = vrot.slane %v5041_v30, 4 }
 0x367   : > { %5260 = vst [vmem:[#allocation3 + $0x17c] sm:$0x8] %v5259_v26  ;;  %6723 = vmatmul.bf16.vlgmr.msra.gmra.mxu2 %v10250_v53  ;;  %v5807_v11 = vadd.f32 %v5806_v60, %v13229_v37  ;;  %v10267_v60 = vld [vmem:[#allocation3 + $0x6c] sm:$0xf0]  ;;  %7448 = vmatpush.bf16.msrb.mxu1 %v11569_v43  ;;  %v10481_v43 = vld [vmem:[#allocation3 + $0x138] sm:$0xf] }
 0x368   : > { %v5046_v47 = vor.u32 %v5044_v25, %v5043_v31  ;;  %v5188_v13 = vsel %vm12354_vm9, %v5186_v55, %v5187_v38  ;;  %v5190_v6 = vor.u32 %v5189_v18, %v5187_v38  ;;  %v10262_v55 = vor.u32 %v11434_v1, %v10261_v46  ;;  %v11505_v26 = vld [vmem:[#allocation10 + $0x20] sm:$0xff] }
 0x369   : > { %5236 = vst [vmem:[#allocation3 + $0x188] sm:$0xf] %v5188_v13  ;;  %v6128_v45 = vadd.f32 %v6127_v20, %v5807_v11  ;;  %v11562_v20 = vld [vmem:[#allocation10 + $0x128] sm:$0xff]  ;;  %v11513_v31 = vld [vmem:[#allocation10 + $0x60] sm:$0xff]  ;;  %v10457_v11 = vld [vmem:[#allocation3 + $0x108] sm:$0xf]  ;;  %7769 = vmatpush.bf16.msrb.mxu2 %v11505_v26 }
 0x36a   : > { %v6225_v41 = vpop.f32.mrf.mxu3  ;;  %v6130_v16 = vpop.f32.mrf.mxu1  ;;  %v5117_v37 = vld [vmem:[#allocation3 + $0x180] sm:$0x1]  ;;  %v5047_v62 = vsel %vm12340_vm7, %v5039_v32, %v5046_v47  ;;  %v5191_v50 = vrot.slane %v5190_v6, 4  ;;  %7398 = vmatpush.bf16.msrb.mxu0 %v11562_v20  ;;  %7818 = vmatpush.bf16.msrb.mxu3 %v11513_v31  ;;  %v10270_v32 = vor.u32 %v11435_v57, %v10267_v60  ;;  %v11436_v6 = vld [vmem:[#allocation3 + $0x68] sm:$0xf0] }
 0x36b   : > { %v6174_v29 = vpop.f32.mrf.mxu2  ;;  %v5118_v2 = vsel %vm12369_vm12, 0, %v5117_v37  ;;  %5095 = vst [vmem:[#allocation3 + $0x18c] sm:$0xf] %v5047_v62  ;;  %v10265_v13 = vld [vmem:[#allocation3 + $0x60] sm:$0xf] }
 0x36c   : > { %v6175_v54 = vadd.f32 %v6174_v29, %v6126_v24  ;;  %5119 = vst [vmem:[#allocation3 + $0x180] sm:$0x1] %v5118_v2  ;;  %v5238_v19 = vsel %vm12361_vm11, %v5191_v50, %v5237_v5  ;;  %v11561_v5 = vld [vmem:[#allocation10 + $0x120] sm:$0xff] }
 0x36d   : > { %6679 = vmatmul.bf16.gmra.mxu1 %v10258_v59  ;;  %5239 = vst [vmem:[#allocation3 + $0x194] sm:$0xf] %v5238_v19  ;;  %v5809_v36 = vpop.f32.mrf.mxu0  ;;  %v11437_v29 = vld [vmem:[#allocation3 + $0x70] sm:$0xf0]  ;;  %v10273_v59 = vld [vmem:[#allocation3 + $0x68] sm:$0xf] }
 0x36e   : > { %v13429_v23 = vadd.f32 %v6223_v34, %v6175_v54  ;;  %v5810_v14 = vadd.f32 %v5809_v36, %v13242_v56  ;;  %7399 = vmatpush.bf16.msrb.mxu0 %v11561_v5  ;;  %v10274_v54 = vor.u32 %v11437_v29, %v10273_v59  ;;  %v10279_v19 = vld [vmem:[#allocation3 + $0x84] sm:$0xf0]  ;;  %v11538_v5 = vld [vmem:[#allocation3 + $0x140] sm:$0xf0]  ;;  %v11442_v29 = vld [vmem:[#allocation3 + $0x98] sm:$0xf0] }
 0x36f   : > { %7360 = vmatmul.bf16.gmra.mxu3 %v10446_v61  ;;  %v11512_v36 = vld [vmem:[#allocation10 + $0x58] sm:$0xff] }
 0x370   : > { %v6131_v24 = vadd.f32 %v6130_v16, %v5810_v14  ;;  %6630 = vmatmul.bf16.gmra.mxu0 %v10254_v10  ;;  %v10266_v16 = vor.u32 %v11436_v6, %v10265_v13  ;;  %v10469_v14 = vld [vmem:[#allocation3 + $0x120] sm:$0xf]  ;;  %v11535_v10 = vld [vmem:[#allocation3 + $0x128] sm:$0xf0]  ;;  %7819 = vmatpush.bf16.msrb.mxu3 %v11512_v36 }
 0x371   : > { %v10470_v46 = vor.u32 %v11535_v10, %v10469_v14  ;;  %v10291_v13 = vld [vmem:[#allocation3 + $0x9c] sm:$0xf0]  ;;  %v11443_v14 = vld [vmem:[#allocation3 + $0xa0] sm:$0xf0] }
 0x372   : > { %v6228_v7 = vpop.f32.mrf.mxu3  ;;  %v6132_v8 = vpop.f32.mrf.mxu1  ;;  %v11511_v6 = vld [vmem:[#allocation10 + $0x50] sm:$0xff] }
 0x373   : > { %v6176_v42 = vpop.f32.mrf.mxu2 }
 0x374   : > { %v6177_v30 = vadd.f32 %v6176_v42, %v6128_v45  ;;  %v5261_v25 = vld [vmem:[#allocation3 + $0x194] sm:$0x8]  ;;  %7820 = vmatpush.bf16.msrb.mxu3 %v11511_v6 }
 0x375   : > { %v5262_v34 = vsel %vm12391_vm14, 0, %v5261_v25  ;;  %v5811_v53 = vpop.f32.mrf.mxu0  ;;  %v11439_v25 = vld [vmem:[#allocation3 + $0x80] sm:$0xf0] }
 0x376   : > { %v13434_v33 = vadd.f32 %v6225_v41, %v6177_v30  ;;  %5263 = vst [vmem:[#allocation3 + $0x194] sm:$0x8] %v5262_v34  ;;  %v5812_v56 = vadd.f32 %v5811_v53, %v13259_v63  ;;  %v10458_v41 = vor.u32 %v11532_v12, %v10457_v11  ;;  %v10277_v30 = vld [vmem:[#allocation3 + $0x78] sm:$0xf]  ;;  %v11560_v53 = vld [vmem:[#allocation10 + $0x118] sm:$0xff] }
 0x377   : > { %6728 = vmatmul.bf16.gmra.mxu2 %v10262_v55  ;;  %v11568_v55 = vld [vmem:[#allocation10 + $0x158] sm:$0xff]  ;;  %v10278_v60 = vor.u32 %v11439_v25, %v10277_v30  ;;  %7400 = vmatpush.bf16.msrb.mxu0 %v11560_v53  ;;  %v10303_v30 = vld [vmem:[#allocation3 + $0xb4] sm:$0xf0]  ;;  %v11541_v53 = vld [vmem:[#allocation3 + $0x158] sm:$0xf0] }
 0x378   : > { %v6133_v38 = vadd.f32 %v6132_v8, %v5812_v56  ;;  %7449 = vmatpush.bf16.msrb.mxu1 %v11568_v55  ;;  %v11440_v11 = vld [vmem:[#allocation3 + $0x88] sm:$0xf0]  ;;  %v11510_v25 = vld [vmem:[#allocation10 + $0x48] sm:$0xff]  ;;  %v10493_v55 = vld [vmem:[#allocation3 + $0x150] sm:$0xf] }
 0x379   : > { %7821 = vmatpush.bf16.msrb.mxu3 %v11510_v25 }
 0x37a   : > { %v6230_v18 = vpop.f32.mrf.mxu3  ;;  %v6135_v35 = vpop.f32.mrf.mxu1 }
 0x37b   : > { %v6179_v48 = vpop.f32.mrf.mxu2 }
 0x37c   : > { %v6180_v47 = vadd.f32 %v6179_v48, %v6131_v24 }
 0x37d   : > { %6684 = vmatmul.bf16.gmra.mxu1 %v10270_v32  ;;  %v5814_v44 = vpop.f32.mrf.mxu0 }
 0x37e   : > { %v13437_v63 = vadd.f32 %v6228_v7, %v6180_v47  ;;  %v5815_v45 = vadd.f32 %v5814_v44, %v13270_v51  ;;  %v11504_v51 = vld [vmem:[#allocation10 + $0x18] sm:$0xff]  ;;  %v11438_v7 = vld [vmem:[#allocation3 + $0x7c] sm:$0xf] }
 0x37f   : > { %7365 = vmatmul.bf16.gmra.mxu3 %v10458_v41  ;;  %7770 = vmatpush.bf16.msrb.mxu2 %v11504_v51  ;;  %v10282_v42 = vor.u32 %v11438_v7, %v10279_v19 }
 0x380   : > { %v6136_v21 = vadd.f32 %v6135_v35, %v5815_v45  ;;  %6635 = vmatmul.bf16.gmra.mxu0 %v10266_v16  ;;  %v10285_v35 = vld [vmem:[#allocation3 + $0x80] sm:$0xf]  ;;  %v11441_v16 = vld [vmem:[#allocation3 + $0x94] sm:$0xf] }
 0x381   : > { %v10286_v48 = vor.u32 %v11440_v11, %v10285_v35  ;;  %v11445_v11 = vld [vmem:[#allocation3 + $0xb0] sm:$0xf0] }
 0x382   : > { %v6233_v37 = vpop.f32.mrf.mxu3  ;;  %v6137_v62 = vpop.f32.mrf.mxu1 }
 0x383   : > { %v6181_v50 = vpop.f32.mrf.mxu2 }
 0x384   : > { %v6182_v0 = vadd.f32 %v6181_v50, %v6133_v38  ;;  %v10289_v50 = vld [vmem:[#allocation3 + $0x90] sm:$0xf] }
 0x385   : > { %v5816_v4 = vpop.f32.mrf.mxu0  ;;  %v10290_v19 = vor.u32 %v11442_v29, %v10289_v50  ;;  %v10315_v50 = vld [vmem:[#allocation3 + $0xcc] sm:$0xf0] }
 0x386   : > { %v13440_v2 = vadd.f32 %v6230_v18, %v6182_v0  ;;  %v5817_v61 = vadd.f32 %v5816_v4, %v13286_v3  ;;  %v10482_v0 = vor.u32 %v11538_v5, %v10481_v43  ;;  %v11559_v4 = vld [vmem:[#allocation10 + $0x110] sm:$0xff]  ;;  %v11446_v43 = vld [vmem:[#allocation3 + $0xb8] sm:$0xf0]  ;;  %v11509_v29 = vld [vmem:[#allocation10 + $0x40] sm:$0xff] }
 0x387   : > { %6733 = vmatmul.bf16.gmra.mxu2 %v10274_v54  ;;  %v11567_v54 = vld [vmem:[#allocation10 + $0x150] sm:$0xff]  ;;  %7401 = vmatpush.bf16.msrb.mxu0 %v11559_v4  ;;  %v11544_v4 = vld [vmem:[#allocation3 + $0x170] sm:$0xf0] }
 0x388   : > { %v6138_v52 = vadd.f32 %v6137_v62, %v5817_v61  ;;  %7450 = vmatpush.bf16.msrb.mxu1 %v11567_v54  ;;  %v10505_v54 = vld [vmem:[#allocation3 + $0x168] sm:$0xf]  ;;  %7822 = vmatpush.bf16.msrb.mxu3 %v11509_v29 }
 0x38a   : > { %v6235_v20 = vpop.f32.mrf.mxu3  ;;  %v6140_v24 = vpop.f32.mrf.mxu1 }
 0x38b   : > { %v6184_v8 = vpop.f32.mrf.mxu2 }
 0x38c   : > { %v6185_v1 = vadd.f32 %v6184_v8, %v6136_v21 }
 0x38d   : > { %6689 = vmatmul.bf16.gmra.mxu1 %v10282_v42  ;;  %v5819_v34 = vpop.f32.mrf.mxu0 }
 0x38e   : > { %v13443_v3 = vadd.f32 %v6233_v37, %v6185_v1  ;;  %v5820_v56 = vadd.f32 %v5819_v34, %v13301_v17  ;;  %v11503_v17 = vld [vmem:[#allocation10 + $0x10] sm:$0xff]  ;;  %v10294_v37 = vor.u32 %v11441_v16, %v10291_v13 }
 0x38f   : > { %7370 = vmatmul.bf16.gmra.mxu3 %v10470_v46  ;;  %7771 = vmatpush.bf16.msrb.mxu2 %v11503_v17 }
 0x390   : > { %v6141_v26 = vadd.f32 %v6140_v24, %v5820_v56  ;;  %6640 = vmatmul.bf16.gmra.mxu0 %v10278_v60  ;;  %v10297_v24 = vld [vmem:[#allocation3 + $0x98] sm:$0xf]  ;;  %v11444_v60 = vld [vmem:[#allocation3 + $0xac] sm:$0xf] }
 0x391   : > { %v10298_v8 = vor.u32 %v11443_v14, %v10297_v24  ;;  %v11448_v14 = vld [vmem:[#allocation3 + $0xc8] sm:$0xf0] }
 0x392   : > { %v6238_v31 = vpop.f32.mrf.mxu3  ;;  %v6142_v38 = vpop.f32.mrf.mxu1 }
 0x393   : > { %v6186_v18 = vpop.f32.mrf.mxu2 }
 0x394   : > { %v6187_v12 = vadd.f32 %v6186_v18, %v6138_v52  ;;  %v10301_v18 = vld [vmem:[#allocation3 + $0xa8] sm:$0xf] }
 0x395   : > { %v5821_v32 = vpop.f32.mrf.mxu0  ;;  %v10302_v13 = vor.u32 %v11445_v11, %v10301_v18  ;;  %v10327_v18 = vld [vmem:[#allocation3 + $0xe4] sm:$0xf0] }
 0x396   : > { %v13446_v57 = vadd.f32 %v6235_v20, %v6187_v12  ;;  %v5822_v47 = vadd.f32 %v5821_v32, %v13310_v22  ;;  %v10494_v12 = vor.u32 %v11541_v53, %v10493_v55  ;;  %v11558_v32 = vld [vmem:[#allocation10 + $0x108] sm:$0xff]  ;;  %v11449_v55 = vld [vmem:[#allocation3 + $0xd0] sm:$0xf0]  ;;  %v11620_v11 = vld [vmem:[#allocation10 + $0x238] sm:$0xff] }
 0x397   : > { %6738 = vmatmul.bf16.gmra.mxu2 %v10286_v48  ;;  %v11566_v48 = vld [vmem:[#allocation10 + $0x148] sm:$0xff]  ;;  %7402 = vmatpush.bf16.msrb.mxu0 %v11558_v32  ;;  %v11547_v32 = vld [vmem:[#allocation3 + $0x188] sm:$0xf0] }
 0x398   : > { %v6143_v41 = vadd.f32 %v6142_v38, %v5822_v47  ;;  %7451 = vmatpush.bf16.msrb.mxu1 %v11566_v48  ;;  %v10517_v48 = vld [vmem:[#allocation3 + $0x180] sm:$0xf]  ;;  %8364 = vmatpush.bf16.msra.mxu3 %v11620_v11  ;;  %v11478_v11 = vld [vmem:[#allocation3 + $0xc8] sm:$0xf0] }
 0x39a   : > { %v6240_v44 = vpop.f32.mrf.mxu3  ;;  %v6145_v45 = vpop.f32.mrf.mxu1 }
 0x39b   : > { %v6189_v21 = vpop.f32.mrf.mxu2 }
 0x39c   : > { %v6190_v62 = vadd.f32 %v6189_v21, %v6141_v26 }
 0x39d   : > { %6694 = vmatmul.bf16.gmra.mxu1 %v10294_v37  ;;  %v5824_v59 = vpop.f32.mrf.mxu0 }
 0x39e   : > { %v13449_v22 = vadd.f32 %v6238_v31, %v6190_v62  ;;  %v5825_v61 = vadd.f32 %v5824_v59, %v13324_v28  ;;  %v11502_v28 = vld [vmem:[#allocation10 + $0x8] sm:$0xff]  ;;  %v10306_v31 = vor.u32 %v11444_v60, %v10303_v30 }
 0x39f   : > { %7375 = vmatmul.bf16.gmra.mxu3 %v10482_v0  ;;  %7772 = vmatpush.bf16.msrb.mxu2 %v11502_v28 }
 0x3a0   : > { %v6146_v51 = vadd.f32 %v6145_v45, %v5825_v61  ;;  %6645 = vmatmul.bf16.gmra.mxu0 %v10290_v19  ;;  %v10309_v45 = vld [vmem:[#allocation3 + $0xb0] sm:$0xf]  ;;  %v11447_v19 = vld [vmem:[#allocation3 + $0xc4] sm:$0xf] }
 0x3a1   : > { %v10310_v21 = vor.u32 %v11446_v43, %v10309_v45  ;;  %v11451_v43 = vld [vmem:[#allocation3 + $0xe0] sm:$0xf0] }
 0x3a2   : > { %v6243_v36 = vpop.f32.mrf.mxu3  ;;  %v6147_v52 = vpop.f32.mrf.mxu1 }
 0x3a3   : > { %v6191_v20 = vpop.f32.mrf.mxu2 }
 0x3a4   : > { %v6192_v10 = vadd.f32 %v6191_v20, %v6143_v41  ;;  %v10313_v20 = vld [vmem:[#allocation3 + $0xc0] sm:$0xf] }
 0x3a5   : > { %v5826_v42 = vpop.f32.mrf.mxu0  ;;  %v10314_v30 = vor.u32 %v11448_v14, %v10313_v20  ;;  %v11527_v20 = vld [vmem:[#allocation3 + $0xe8] sm:$0xf0] }
 0x3a6   : > { %v13452_v7 = vadd.f32 %v6240_v44, %v6192_v10  ;;  %v5827_v1 = vadd.f32 %v5826_v42, %v13335_v15  ;;  %v10506_v10 = vor.u32 %v11544_v4, %v10505_v54  ;;  %v11557_v42 = vld [vmem:[#allocation10 + $0x100] sm:$0xff]  ;;  %v10333_v54 = vld [vmem:[#allocation3 + $0xe0] sm:$0xf] }
 0x3a7   : > { %6743 = vmatmul.bf16.gmra.mxu2 %v10298_v8  ;;  %v11565_v8 = vld [vmem:[#allocation10 + $0x140] sm:$0xff]  ;;  %7403 = vmatpush.bf16.msrb.mxu0 %v11557_v42 }
 0x3a8   : > { %v6148_v46 = vadd.f32 %v6147_v52, %v5827_v1  ;;  %7452 = vmatpush.bf16.msrb.mxu1 %v11565_v8  ;;  %v10441_v8 = vld [vmem:[#allocation3 + $0xe0] sm:$0xf] }
 0x3aa   : > { %v6245_v34 = vpop.f32.mrf.mxu3  ;;  %v6150_v56 = vpop.f32.mrf.mxu1 }
 0x3ab   : > { %v6194_v26 = vpop.f32.mrf.mxu2 }
 0x3ac   : > { %v6195_v38 = vadd.f32 %v6194_v26, %v6146_v51 }
 0x3ad   : > { %6699 = vmatmul.bf16.gmra.mxu1 %v10306_v31  ;;  %v5829_v35 = vpop.f32.mrf.mxu0 }
 0x3ae   : > { %v13455_v15 = vadd.f32 %v6243_v36, %v6195_v38  ;;  %v5830_v47 = vadd.f32 %v5829_v35, %v13347_v39  ;;  %v11501_v39 = vld [vmem:[#allocation10] sm:$0xff]  ;;  %v10318_v36 = vor.u32 %v11447_v19, %v10315_v50 }
 0x3af   : > { %7380 = vmatmul.bf16.gmra.mxu3 %v10494_v12  ;;  %7773 = vmatpush.bf16.msrb.mxu2 %v11501_v39 }
 0x3b0   : > { %v6151_v17 = vadd.f32 %v6150_v56, %v5830_v47  ;;  %6650 = vmatmul.bf16.gmra.mxu0 %v10302_v13  ;;  %v10321_v56 = vld [vmem:[#allocation3 + $0xc8] sm:$0xf]  ;;  %v11450_v13 = vld [vmem:[#allocation3 + $0xdc] sm:$0xf] }
 0x3b1   : > { %v10322_v26 = vor.u32 %v11449_v55, %v10321_v56 }
 0x3b2   : > { %v6248_v6 = vpop.f32.mrf.mxu3  ;;  %v6152_v41 = vpop.f32.mrf.mxu1 }
 0x3b3   : > { %v6196_v44 = vpop.f32.mrf.mxu2 }
 0x3b4   : > { %v6197_v5 = vadd.f32 %v6196_v44, %v6148_v46  ;;  %v10325_v44 = vld [vmem:[#allocation3 + $0xd8] sm:$0xf] }
 0x3b5   : > { %v5831_v37 = vpop.f32.mrf.mxu0 }
 0x3b6   : > { %v13458_v16 = vadd.f32 %v6245_v34, %v6197_v5  ;;  %v5832_v62 = vadd.f32 %v5831_v37, %v13361_v49  ;;  %v10518_v5 = vor.u32 %v11547_v32, %v10517_v48  ;;  %v10326_v37 = vor.u32 %v11451_v43, %v10325_v44 }
 0x3b7   : > { %6748 = vmatmul.bf16.gmra.mxu2 %v10310_v21 }
 0x3b8   : > { %v6153_v0 = vadd.f32 %v6152_v41, %v5832_v62 }
 0x3ba   : > { %v6250_v59 = vpop.f32.mrf.mxu3  ;;  %v6155_v61 = vpop.f32.mrf.mxu1 }
 0x3bb   : > { %v6199_v51 = vpop.f32.mrf.mxu2 }
 0x3bc   : > { %v6200_v52 = vadd.f32 %v6199_v51, %v6151_v17  ;;  %v11604_v51 = vld [vmem:[#allocation10 + $0x1b8] sm:$0xff] }
 0x3bd   : > { %6704 = vmatmul.bf16.gmra.mxu1 %v10318_v36  ;;  %v5834_v24 = vpop.f32.mrf.mxu0  ;;  %v11524_v36 = vld [vmem:[#allocation10 + $0xb8] sm:$0xff] }
 0x3be   : > { %v13461_v49 = vadd.f32 %v6248_v6, %v6200_v52  ;;  %v5835_v1 = vadd.f32 %v5834_v24, %v13376_v58  ;;  %v11612_v58 = vld [vmem:[#allocation10 + $0x1f8] sm:$0xff]  ;;  %v10330_v6 = vor.u32 %v11450_v13, %v10327_v18  ;;  %8266 = vmatpush.bf16.msra.mxu1 %v11604_v51  ;;  %7864 = vmatpush.bf16.msra.mxu0 %v11524_v36  ;;  %v11523_v13 = vld [vmem:[#allocation10 + $0xb0] sm:$0xff]  ;;  %v13490_v36 = vld [vmem:[#allocation12] ss:$0 sm:$0xff] }
 0x3bf   : > { %7385 = vmatmul.bf16.gmra.mxu3 %v10506_v10  ;;  %8315 = vmatpush.bf16.msra.mxu2 %v11612_v58  ;;  %v10627_v10 = vld [vmem:[#allocation3 + $0xcc] sm:$0xf0]  ;;  %v10625_v58 = vld [vmem:[#allocation3 + $0xc0] sm:$0xf] }
 0x3c0   : > { %v6156_v28 = vadd.f32 %v6155_v61, %v5835_v1  ;;  %6655 = vmatmul.bf16.gmra.mxu0 %v10314_v30  ;;  %v10442_v1 = vor.u32 %v11527_v20, %v10441_v8  ;;  %v11477_v30 = vld [vmem:[#allocation3 + $0xc4] sm:$0xf]  ;;  %v10626_v48 = vor.u32 %v11478_v11, %v10625_v58 }
 0x3c1   : > { %v11481_v8 = vld [vmem:[#allocation3 + $0xe0] sm:$0xf0] }
 0x3c2   : > { %v6253_v25 = vpop.f32.mrf.mxu3  ;;  %v6157_v46 = vpop.f32.mrf.mxu1  ;;  %7865 = vmatpush.bf16.msra.mxu0 %v11523_v13  ;;  %v11483_v13 = vld [vmem:[#allocation3 + $0xf4] sm:$0xf] }
 0x3c3   : > { %v6201_v34 = vpop.f32.mrf.mxu2 }
 0x3c4   : > { %v6202_v53 = vadd.f32 %v6201_v34, %v6153_v0  ;;  %v11452_v0 = vld [vmem:[#allocation3 + $0xe8] sm:$0xf0] }
 0x3c5   : > { %v5836_v31 = vpop.f32.mrf.mxu0  ;;  %v10334_v61 = vor.u32 %v11452_v0, %v10333_v54  ;;  %v13485_v0 = vld [vmem:[%s13742_s5] ss:$0 sm:$0xff]  ;;  %v11528_v54 = vld [vmem:[#allocation3 + $0xf4] sm:$0xf] }
 0x3c6   : > { %v13464_v60 = vadd.f32 %v6250_v59, %v6202_v53  ;;  %v5837_v38 = vadd.f32 %v5836_v31, %v13390_v40  ;;  %v11611_v31 = vld [vmem:[#allocation10 + $0x1f0] sm:$0xff] }
 0x3c7   : > { %6753 = vmatmul.bf16.gmra.mxu2 %v10322_v26 }
 0x3c8   : > { %v6158_v12 = vadd.f32 %v6157_v46, %v5837_v38  ;;  %v10630_v46 = vor.u32 %v11477_v30, %v10627_v10  ;;  %v11619_v38 = vld [vmem:[#allocation10 + $0x230] sm:$0xff]  ;;  %8316 = vmatpush.bf16.msra.mxu2 %v11611_v31  ;;  %v11533_v31 = vld [vmem:[#allocation3 + $0x118] sm:$0xf0] }
 0x3c9   : > { %8365 = vmatpush.bf16.msra.mxu3 %v11619_v38 }
 0x3ca   : > { %v6255_v35 = vpop.f32.mrf.mxu3  ;;  %v6160_v47 = vpop.f32.mrf.mxu1 }
 0x3cb   : > { %v6204_v17 = vpop.f32.mrf.mxu2 }
 0x3cc   : > { %v6205_v41 = vadd.f32 %v6204_v17, %v6156_v28  ;;  %v11530_v17 = vld [vmem:[#allocation3 + $0x100] sm:$0xf0] }
 0x3cd   : > { %6709 = vmatmul.bf16.gmra.mxu1 %v10330_v6  ;;  %v5839_v45 = vpop.f32.mrf.mxu0 }
 0x3ce   : > { %v13467_v40 = vadd.f32 %v6253_v25, %v6205_v41  ;;  %v5840_v21 = vadd.f32 %v5839_v45, %v13405_v27  ;;  %v10435_v25 = vld [vmem:[#allocation3 + $0xe4] sm:$0xf0] }
 0x3cf   : > { %7390 = vmatmul.bf16.gmra.mxu3 %v10518_v5  ;;  %v10639_v41 = vld [vmem:[#allocation3 + $0xe4] sm:$0xf0]  ;;  %v10453_v5 = vld [vmem:[#allocation3 + $0xf8] sm:$0xf] }
 0x3d0   : > { %v6161_v62 = vadd.f32 %v6160_v47, %v5840_v21  ;;  %6660 = vmatmul.bf16.gmra.mxu0 %v10326_v37  ;;  %v11603_v47 = vld [vmem:[#allocation10 + $0x1b0] sm:$0xff]  ;;  %v10454_v21 = vor.u32 %v11530_v17, %v10453_v5  ;;  %v11480_v37 = vld [vmem:[#allocation3 + $0xdc] sm:$0xf] }
 0x3d1   : > { %8267 = vmatpush.bf16.msra.mxu1 %v11603_v47 }
 0x3d2   : > { %v6258_v50 = vpop.f32.mrf.mxu3  ;;  %v6162_v39 = vpop.f32.mrf.mxu1 }
 0x3d3   : > { %v6206_v29 = vpop.f32.mrf.mxu2 }
 0x3d4   : > { %v6207_v59 = vadd.f32 %v6206_v29, %v6158_v12 }
 0x3d5   : > { %v5841_v19 = vpop.f32.mrf.mxu0 }
 0x3d6   : > { %v13470_v4 = vadd.f32 %v6255_v35, %v6207_v59  ;;  %v5842_v52 = vadd.f32 %v5841_v19, %v13416_v9  ;;  %v11525_v9 = vld [vmem:[#allocation3 + $0xdc] sm:$0xf] }
 0x3d7   : > { %6758 = vmatmul.bf16.gmra.mxu2 %v10334_v61  ;;  %v10438_v53 = vor.u32 %v11525_v9, %v10435_v25  ;;  %v11522_v9 = vld [vmem:[#allocation10 + $0xa8] sm:$0xff] }
 0x3d8   : > { %v6163_v27 = vadd.f32 %v6162_v39, %v5842_v52  ;;  %v10642_v39 = vor.u32 %v11480_v37, %v10639_v41  ;;  %7866 = vmatpush.bf16.msra.mxu0 %v11522_v9 }
 0x3da   : > { %v6260_v14 = vpop.f32.mrf.mxu3  ;;  %v6675_v24 = vpop.f32.mrf.mxu1 }
 0x3db   : > { %v6209_v42 = vpop.f32.mrf.mxu2 }
 0x3dc   : > { %v6210_v28 = vadd.f32 %v6209_v42, %v6161_v62 }
 0x3dd   : > { %7453 = vmatmul.bf16.vlgmr.msrb.gmra.mxu1 %v10442_v1  ;;  %v6626_v55 = vpop.f32.mrf.mxu0 }
 0x3de   : > { %v13473_v34 = vadd.f32 %v6258_v50, %v6210_v28  ;;  %v6676_v44 = vadd.f32 %v6675_v24, %v6626_v55  ;;  %v10447_v50 = vld [vmem:[#allocation3 + $0xfc] sm:$0xf0]  ;;  %v10637_v24 = vld [vmem:[#allocation3 + $0xd8] sm:$0xf] }
 0x3df   : > { %7823 = vmatmul.bf16.vlgmr.msrb.gmra.mxu3 %v10630_v46  ;;  %v10450_v61 = vor.u32 %v11528_v54, %v10447_v50  ;;  %v10638_v25 = vor.u32 %v11481_v8, %v10637_v24  ;;  %v11602_v55 = vld [vmem:[#allocation10 + $0x1a8] sm:$0xff]  ;;  %v11531_v50 = vld [vmem:[#allocation3 + $0x10c] sm:$0xf] }
 0x3e0   : > { %7404 = vmatmul.bf16.vlgmr.msrb.gmra.mxu0 %v10438_v53  ;;  %8268 = vmatpush.bf16.msra.mxu1 %v11602_v55  ;;  %v11536_v55 = vld [vmem:[#allocation3 + $0x130] sm:$0xf0] }
 0x3e2   : > { %v13475_v56 = vpop.f32.mrf.mxu3  ;;  %v6677_v26 = vpop.f32.mrf.mxu1 }
 0x3e3   : > { %v6211_v18 = vpop.f32.mrf.mxu2 }
 0x3e4   : > { %v6212_v12 = vadd.f32 %v6211_v18, %v6163_v27  ;;  %v11610_v27 = vld [vmem:[#allocation10 + $0x1e8] sm:$0xff] }
 0x3e5   : > { %v6628_v32 = vpop.f32.mrf.mxu0  ;;  %8317 = vmatpush.bf16.msra.mxu2 %v11610_v27  ;;  %v10651_v18 = vld [vmem:[#allocation3 + $0xfc] sm:$0xf0] }
 0x3e6   : > { %v13477_v35 = vadd.f32 %v6260_v14, %v6212_v12  ;;  %v6678_v52 = vadd.f32 %v6677_v26, %v6628_v32  ;;  %v11623_v14 = vld [vmem:[%s12303_s15] sm:$0xff]   ;;  %v10654_v5 = vor.u32 %v11483_v13, %v10651_v18 }
 0x3e7   : > { %7774 = vmatmul.bf16.vlgmr.msrb.gmra.mxu2 %v10626_v48  ;;  %v11624_v30 = vunpack.c.l.bf16 %v11623_v14  ;;  %v11625_v26 = vunpack.c.h.bf16 %v11623_v14  ;;  %v11484_v14 = vld [vmem:[#allocation3 + $0xf8] sm:$0xf0]  ;;  %v10471_v13 = vld [vmem:[#allocation3 + $0x12c] sm:$0xf0] }
 0x3ea   : > { %v13479_v6 = vpop.f32.mrf.mxu3  ;;  %v6680_v43 = vpop.f32.mrf.mxu1 }
 0x3eb   : > { %v6724_v45 = vpop.f32.mrf.mxu2 }
 0x3ec   : > { %v6725_v62 = vadd.f32 %v6724_v45, %v6676_v44  ;;  %v10459_v44 = vld [vmem:[#allocation3 + $0x114] sm:$0xf0] }
 0x3ed   : > { %7458 = vmatmul.bf16.gmra.mxu1 %v10454_v21  ;;  %v6631_v59 = vpop.f32.mrf.mxu0 }
 0x3ee   : > { %v6764_v29 = vadd.f32 %v6725_v62, %v13429_v23  ;;  %v11618_v23 = vld [vmem:[#allocation10 + $0x228] sm:$0xff]  ;;  %v6681_v12 = vadd.f32 %v6680_v43, %v6631_v59  ;;  %v10462_v43 = vor.u32 %v11531_v50, %v10459_v44 }
 0x3ef   : > { %7828 = vmatmul.bf16.gmra.mxu3 %v10642_v39 }
 0x3f0   : > { %7409 = vmatmul.bf16.gmra.mxu0 %v10450_v61  ;;  %v6783_v51 = vmul.f32 %v13485_v0, %v6764_v29  ;;  %8366 = vmatpush.bf16.msra.mxu3 %v11618_v23  ;;  %v10649_v23 = vld [vmem:[#allocation3 + $0xf0] sm:$0xf] }
 0x3f2   : > { %v13487_v19 = vpop.f32.mrf.mxu3  ;;  %v6682_v20 = vpop.f32.mrf.mxu1  ;;  %v6802_v1 = vadd.f32 %v13490_v36, %v6783_v51  ;;  %v11609_v51 = vld [vmem:[#allocation10 + $0x1e0] sm:$0xff] }
 0x3f3   : > { %v6726_v10 = vpop.f32.mrf.mxu2  ;;  %8318 = vmatpush.bf16.msra.mxu2 %v11609_v51  ;;  %v11767_v51 = vld [vmem:[%s12303_s15 + $0x10] sm:$0xff]  }
 0x3f4   : > { %v6727_v42 = vadd.f32 %v6726_v10, %v6678_v52  ;;  %v6850_v58 = vadd.f32 %v11624_v30, %v6802_v1  ;;  %v11617_v52 = vld [vmem:[#allocation10 + $0x220] sm:$0xff]  ;;  %v10650_v1 = vor.u32 %v11484_v14, %v10649_v23  ;;  %v11632_v14 = vunpack.c.l.bf16 %v11767_v51 }
 0x3f5   : > { %v6633_v46 = vpop.f32.mrf.mxu0  ;;  %8367 = vmatpush.bf16.msra.mxu3 %v11617_v52 }
 0x3f6   : > { %v6765_v28 = vadd.f32 %v6727_v42, %v13434_v33  ;;  %v10465_v33 = vld [vmem:[#allocation3 + $0x110] sm:$0xf]  ;;  %v6866_v45 = vmax.f32 %v6850_v58, 0.0  ;;  %v6683_v54 = vadd.f32 %v6682_v20, %v6633_v46 }
 0x3f7   : > { %7779 = vmatmul.bf16.gmra.mxu2 %v10638_v25  ;;  %v10466_v47 = vor.u32 %v11533_v31, %v10465_v33  ;;  %v11521_v25 = vld [vmem:[#allocation10 + $0xa0] sm:$0xff]  ;;  %v11486_v33 = vld [vmem:[#allocation3 + $0x10c] sm:$0xf] }
 0x3f8   : > { %v6784_v53 = vmul.f32 %v13485_v0, %v6765_v28  ;;  %v11601_v28 = vld [vmem:[#allocation10 + $0x1a0] sm:$0xff]  ;;  %7867 = vmatpush.bf16.msra.mxu0 %v11521_v25 }
 0x3f9   : > { %8269 = vmatpush.bf16.msra.mxu1 %v11601_v28  ;;  %v11539_v28 = vld [vmem:[#allocation3 + $0x148] sm:$0xf0] }
 0x3fa   : > { %v13496_v38 = vpop.f32.mrf.mxu3  ;;  %v6803_v11 = vadd.f32 %v13490_v36, %v6784_v53  ;;  %v6685_v48 = vpop.f32.mrf.mxu1  ;;  %v10663_v53 = vld [vmem:[#allocation3 + $0x114] sm:$0xf0] }
 0x3fb   : > { %v6729_v32 = vpop.f32.mrf.mxu2 }
 0x3fc   : > { %v6851_v17 = vadd.f32 %v11625_v26, %v6803_v11  ;;  %v6730_v41 = vadd.f32 %v6729_v32, %v6681_v12 }
 0x3fd   : > { %7463 = vmatmul.bf16.gmra.mxu1 %v10466_v47  ;;  %v6636_v62 = vpop.f32.mrf.mxu0 }
 0x3fe   : > { %v6867_v21 = vmax.f32 %v6851_v17, 0.0  ;;  %v6766_v37 = vadd.f32 %v6730_v41, %v13437_v63  ;;  %v11766_v63 = vld [vmem:[%s12303_s15 + $0x8] sm:$0xff]   ;;  %v6686_v18 = vadd.f32 %v6685_v48, %v6636_v62  ;;  %v10666_v17 = vor.u32 %v11486_v33, %v10663_v53  ;;  %v10483_v33 = vld [vmem:[#allocation3 + $0x144] sm:$0xf0] }
 0x3ff   : > { %7833 = vmatmul.bf16.gmra.mxu3 %v10654_v5  ;;  %v11628_v8 = vunpack.c.l.bf16 %v11766_v63  ;;  %v11629_v46 = vunpack.c.h.bf16 %v11766_v63  ;;  %v10661_v63 = vld [vmem:[#allocation3 + $0x108] sm:$0xf] }
 0x400   : > { %v11657_v39 = vpack.c.bf16 %v6867_v21, %v6866_v45  ;;  %7414 = vmatmul.bf16.gmra.mxu0 %v10462_v43  ;;  %v6785_v59 = vmul.f32 %v13485_v0, %v6766_v37  ;;  %v11534_v21 = vld [vmem:[#allocation3 + $0x124] sm:$0xf] }
 0x401   : > { %v10474_v48 = vor.u32 %v11534_v21, %v10471_v13 }
 0x402   : > { %v13500_v29 = vpop.f32.mrf.mxu3  ;;  %11658 = vst [vmem:[%s13504_s16] sm:$0xff] %v11657_v39   ;;  %v6687_v61 = vpop.f32.mrf.mxu1  ;;  %v6804_v24 = vadd.f32 %v13490_v36, %v6785_v59  ;;  %v11608_v59 = vld [vmem:[#allocation10 + $0x1d8] sm:$0xff] }
 0x403   : > { %v6731_v27 = vpop.f32.mrf.mxu2  ;;  %8319 = vmatpush.bf16.msra.mxu2 %v11608_v59  ;;  %v11768_v59 = vld [vmem:[%s12303_s15 + $0x18] sm:$0xff]  }
 0x404   : > { %v6732_v10 = vadd.f32 %v6731_v27, %v6683_v54  ;;  %v6852_v26 = vadd.f32 %v11628_v8, %v6804_v24  ;;  %v11616_v54 = vld [vmem:[#allocation10 + $0x218] sm:$0xff]  ;;  %v11487_v27 = vld [vmem:[#allocation3 + $0x110] sm:$0xf0] }
 0x405   : > { %v6638_v30 = vpop.f32.mrf.mxu0  ;;  %8368 = vmatpush.bf16.msra.mxu3 %v11616_v54  ;;  %v10662_v24 = vor.u32 %v11487_v27, %v10661_v63  ;;  %v11636_v27 = vunpack.c.l.bf16 %v11768_v59 }
 0x406   : > { %v6767_v42 = vadd.f32 %v6732_v10, %v13440_v2  ;;  %v10477_v2 = vld [vmem:[#allocation3 + $0x128] sm:$0xf]  ;;  %v6868_v41 = vmax.f32 %v6852_v26, 0.0  ;;  %v6688_v43 = vadd.f32 %v6687_v61, %v6638_v30  ;;  %v11633_v30 = vunpack.c.h.bf16 %v11767_v51  ;;  %v10673_v51 = vld [vmem:[#allocation3 + $0x120] sm:$0xf] }
 0x407   : > { %7784 = vmatmul.bf16.gmra.mxu2 %v10650_v1  ;;  %v10478_v12 = vor.u32 %v11536_v55, %v10477_v2  ;;  %v11520_v1 = vld [vmem:[#allocation10 + $0x98] sm:$0xff]  ;;  %v11489_v2 = vld [vmem:[#allocation3 + $0x124] sm:$0xf] }
 0x408   : > { %v6786_v20 = vmul.f32 %v13485_v0, %v6767_v42  ;;  %v11600_v42 = vld [vmem:[#allocation10 + $0x198] sm:$0xff]  ;;  %7868 = vmatpush.bf16.msra.mxu0 %v11520_v1 }
 0x409   : > { %8270 = vmatpush.bf16.msra.mxu1 %v11600_v42  ;;  %v11542_v42 = vld [vmem:[#allocation3 + $0x160] sm:$0xf0] }
 0x40a   : > { %v13512_v9 = vpop.f32.mrf.mxu3  ;;  %v6805_v31 = vadd.f32 %v13490_v36, %v6786_v20  ;;  %v6690_v58 = vpop.f32.mrf.mxu1  ;;  %v10675_v20 = vld [vmem:[#allocation3 + $0x12c] sm:$0xf0] }
 0x40b   : > { %v6734_v11 = vpop.f32.mrf.mxu2 }
 0x40c   : > { %v6853_v32 = vadd.f32 %v11629_v46, %v6805_v31  ;;  %v6735_v47 = vadd.f32 %v6734_v11, %v6686_v18 }
 0x40d   : > { %7468 = vmatmul.bf16.gmra.mxu1 %v10478_v12  ;;  %v6641_v45 = vpop.f32.mrf.mxu0 }
 0x40e   : > { %v6869_v44 = vmax.f32 %v6853_v32, 0.0  ;;  %v6768_v5 = vadd.f32 %v6735_v47, %v13443_v3  ;;  %v6691_v53 = vadd.f32 %v6690_v58, %v6641_v45  ;;  %v10678_v32 = vor.u32 %v11489_v2, %v10675_v20  ;;  %v10495_v2 = vld [vmem:[#allocation3 + $0x15c] sm:$0xf0] }
 0x40f   : > { %7838 = vmatmul.bf16.gmra.mxu3 %v10666_v17 }
 0x410   : > { %v11662_v37 = vpack.c.bf16 %v6869_v44, %v6868_v41  ;;  %7419 = vmatmul.bf16.gmra.mxu0 %v10474_v48  ;;  %v6787_v50 = vmul.f32 %v13485_v0, %v6768_v5  ;;  %v11537_v44 = vld [vmem:[#allocation3 + $0x13c] sm:$0xf] }
 0x411   : > { %v10486_v58 = vor.u32 %v11537_v44, %v10483_v33 }
 0x412   : > { %v13516_v62 = vpop.f32.mrf.mxu3  ;;  %11773 = vst [vmem:[%s13504_s16 + $0x8] sm:$0xff] %v11662_v37   ;;  %v6692_v39 = vpop.f32.mrf.mxu1  ;;  %v6806_v23 = vadd.f32 %v13490_v36, %v6787_v50  ;;  %v11607_v50 = vld [vmem:[#allocation10 + $0x1d0] sm:$0xff] }
 0x413   : > { %v6736_v52 = vpop.f32.mrf.mxu2  ;;  %8320 = vmatpush.bf16.msra.mxu2 %v11607_v50  ;;  %v11769_v50 = vld [vmem:[%s12303_s15 + $0x20] sm:$0xff]  }
 0x414   : > { %v6737_v3 = vadd.f32 %v6736_v52, %v6688_v43  ;;  %v6854_v46 = vadd.f32 %v11632_v14, %v6806_v23  ;;  %v11615_v43 = vld [vmem:[#allocation10 + $0x210] sm:$0xff]  ;;  %v11490_v52 = vld [vmem:[#allocation3 + $0x128] sm:$0xf0] }
 0x415   : > { %v6643_v8 = vpop.f32.mrf.mxu0  ;;  %8369 = vmatpush.bf16.msra.mxu3 %v11615_v43  ;;  %v10674_v23 = vor.u32 %v11490_v52, %v10673_v51  ;;  %v11640_v52 = vunpack.c.l.bf16 %v11769_v50 }
 0x416   : > { %v6769_v10 = vadd.f32 %v6737_v3, %v13446_v57  ;;  %v10489_v57 = vld [vmem:[#allocation3 + $0x140] sm:$0xf]  ;;  %v6870_v47 = vmax.f32 %v6854_v46, 0.0  ;;  %v6693_v48 = vadd.f32 %v6692_v39, %v6643_v8  ;;  %v11637_v8 = vunpack.c.h.bf16 %v11768_v59  ;;  %v10685_v59 = vld [vmem:[#allocation3 + $0x138] sm:$0xf] }
 0x417   : > { %7789 = vmatmul.bf16.gmra.mxu2 %v10662_v24  ;;  %v10490_v18 = vor.u32 %v11539_v28, %v10489_v57  ;;  %v11519_v24 = vld [vmem:[#allocation10 + $0x90] sm:$0xff]  ;;  %v11492_v57 = vld [vmem:[#allocation3 + $0x13c] sm:$0xf] }
 0x418   : > { %v6788_v61 = vmul.f32 %v13485_v0, %v6769_v10  ;;  %v11599_v10 = vld [vmem:[#allocation10 + $0x190] sm:$0xff]  ;;  %7869 = vmatpush.bf16.msra.mxu0 %v11519_v24 }
 0x419   : > { %8271 = vmatpush.bf16.msra.mxu1 %v11599_v10  ;;  %v11545_v10 = vld [vmem:[#allocation3 + $0x178] sm:$0xf0] }
 0x41a   : > { %v13524_v25 = vpop.f32.mrf.mxu3  ;;  %v6807_v55 = vadd.f32 %v13490_v36, %v6788_v61  ;;  %v6695_v26 = vpop.f32.mrf.mxu1  ;;  %v10687_v61 = vld [vmem:[#allocation3 + $0x144] sm:$0xf0] }
 0x41b   : > { %v6739_v31 = vpop.f32.mrf.mxu2 }
 0x41c   : > { %v6855_v11 = vadd.f32 %v11633_v30, %v6807_v55  ;;  %v6740_v12 = vadd.f32 %v6739_v31, %v6691_v53 }
 0x41d   : > { %7473 = vmatmul.bf16.gmra.mxu1 %v10490_v18  ;;  %v6646_v41 = vpop.f32.mrf.mxu0 }
 0x41e   : > { %v6871_v13 = vmax.f32 %v6855_v11, 0.0  ;;  %v6770_v17 = vadd.f32 %v6740_v12, %v13449_v22  ;;  %v6696_v20 = vadd.f32 %v6695_v26, %v6646_v41  ;;  %v10690_v11 = vor.u32 %v11492_v57, %v10687_v61  ;;  %v10507_v57 = vld [vmem:[#allocation3 + $0x174] sm:$0xf0] }
 0x41f   : > { %7843 = vmatmul.bf16.gmra.mxu3 %v10678_v32 }
 0x420   : > { %v11667_v5 = vpack.c.bf16 %v6871_v13, %v6870_v47  ;;  %7424 = vmatmul.bf16.gmra.mxu0 %v10486_v58  ;;  %v6789_v21 = vmul.f32 %v13485_v0, %v6770_v17  ;;  %v11540_v13 = vld [vmem:[#allocation3 + $0x154] sm:$0xf] }
 0x421   : > { %v10498_v26 = vor.u32 %v11540_v13, %v10495_v2 }
 0x422   : > { %v13528_v45 = vpop.f32.mrf.mxu3  ;;  %11774 = vst [vmem:[%s13504_s16 + $0x10] sm:$0xff] %v11667_v5   ;;  %v6697_v37 = vpop.f32.mrf.mxu1  ;;  %v6808_v63 = vadd.f32 %v13490_v36, %v6789_v21  ;;  %v11606_v21 = vld [vmem:[#allocation10 + $0x1c8] sm:$0xff] }
 0x423   : > { %v6741_v54 = vpop.f32.mrf.mxu2  ;;  %8321 = vmatpush.bf16.msra.mxu2 %v11606_v21  ;;  %v11770_v21 = vld [vmem:[%s12303_s15 + $0x28] sm:$0xff]  }
 0x424   : > { %v6742_v22 = vadd.f32 %v6741_v54, %v6693_v48  ;;  %v6856_v30 = vadd.f32 %v11636_v27, %v6808_v63  ;;  %v11614_v48 = vld [vmem:[#allocation10 + $0x208] sm:$0xff]  ;;  %v11493_v54 = vld [vmem:[#allocation3 + $0x140] sm:$0xf0] }
 0x425   : > { %v6648_v14 = vpop.f32.mrf.mxu0  ;;  %8370 = vmatpush.bf16.msra.mxu3 %v11614_v48  ;;  %v10686_v63 = vor.u32 %v11493_v54, %v10685_v59  ;;  %v11644_v54 = vunpack.c.l.bf16 %v11770_v21 }
 0x426   : > { %v6771_v3 = vadd.f32 %v6742_v22, %v13452_v7  ;;  %v10501_v7 = vld [vmem:[#allocation3 + $0x158] sm:$0xf]  ;;  %v6872_v12 = vmax.f32 %v6856_v30, 0.0  ;;  %v6698_v58 = vadd.f32 %v6697_v37, %v6648_v14  ;;  %v11641_v14 = vunpack.c.h.bf16 %v11769_v50  ;;  %v10697_v50 = vld [vmem:[#allocation3 + $0x150] sm:$0xf] }
 0x427   : > { %7794 = vmatmul.bf16.gmra.mxu2 %v10674_v23  ;;  %v10502_v53 = vor.u32 %v11542_v42, %v10501_v7  ;;  %v11518_v23 = vld [vmem:[#allocation10 + $0x88] sm:$0xff]  ;;  %v11495_v7 = vld [vmem:[#allocation3 + $0x154] sm:$0xf] }
 0x428   : > { %v6790_v39 = vmul.f32 %v13485_v0, %v6771_v3  ;;  %v11598_v3 = vld [vmem:[#allocation10 + $0x188] sm:$0xff]  ;;  %7870 = vmatpush.bf16.msra.mxu0 %v11518_v23 }
 0x429   : > { %8272 = vmatpush.bf16.msra.mxu1 %v11598_v3  ;;  %v11548_v3 = vld [vmem:[#allocation3 + $0x190] sm:$0xf0] }
 0x42a   : > { %v13536_v1 = vpop.f32.mrf.mxu3  ;;  %v6809_v28 = vadd.f32 %v13490_v36, %v6790_v39  ;;  %v6700_v46 = vpop.f32.mrf.mxu1  ;;  %v10699_v39 = vld [vmem:[#allocation3 + $0x15c] sm:$0xf0] }
 0x42b   : > { %v6744_v55 = vpop.f32.mrf.mxu2 }
 0x42c   : > { %v6857_v31 = vadd.f32 %v11637_v8, %v6809_v28  ;;  %v6745_v18 = vadd.f32 %v6744_v55, %v6696_v20 }
 0x42d   : > { %7478 = vmatmul.bf16.gmra.mxu1 %v10502_v53  ;;  %v6651_v47 = vpop.f32.mrf.mxu0 }
 0x42e   : > { %v6873_v33 = vmax.f32 %v6857_v31, 0.0  ;;  %v6772_v32 = vadd.f32 %v6745_v18, %v13455_v15  ;;  %v6701_v61 = vadd.f32 %v6700_v46, %v6651_v47  ;;  %v10702_v31 = vor.u32 %v11495_v7, %v10699_v39  ;;  %v10519_v7 = vld [vmem:[#allocation3 + $0x18c] sm:$0xf0] }
 0x42f   : > { %7848 = vmatmul.bf16.gmra.mxu3 %v10690_v11 }
 0x430   : > { %v11672_v17 = vpack.c.bf16 %v6873_v33, %v6872_v12  ;;  %7429 = vmatmul.bf16.gmra.mxu0 %v10498_v26  ;;  %v6791_v44 = vmul.f32 %v13485_v0, %v6772_v32  ;;  %v11543_v33 = vld [vmem:[#allocation3 + $0x16c] sm:$0xf] }
 0x431   : > { %v10510_v46 = vor.u32 %v11543_v33, %v10507_v57 }
 0x432   : > { %v13540_v41 = vpop.f32.mrf.mxu3  ;;  %11775 = vst [vmem:[%s13504_s16 + $0x18] sm:$0xff] %v11672_v17   ;;  %v6702_v5 = vpop.f32.mrf.mxu1  ;;  %v6810_v51 = vadd.f32 %v13490_v36, %v6791_v44  ;;  %v11605_v44 = vld [vmem:[#allocation10 + $0x1c0] sm:$0xff] }
 0x433   : > { %v6746_v43 = vpop.f32.mrf.mxu2  ;;  %8322 = vmatpush.bf16.msra.mxu2 %v11605_v44  ;;  %v10709_v44 = vld [vmem:[#allocation3 + $0x168] sm:$0xf] }
 0x434   : > { %v6747_v15 = vadd.f32 %v6746_v43, %v6698_v58  ;;  %v6858_v8 = vadd.f32 %v11640_v52, %v6810_v51  ;;  %v11613_v58 = vld [vmem:[#allocation10 + $0x200] sm:$0xff]  ;;  %v11496_v43 = vld [vmem:[#allocation3 + $0x158] sm:$0xf0] }
 0x435   : > { %v6653_v27 = vpop.f32.mrf.mxu0  ;;  %8371 = vmatpush.bf16.msra.mxu3 %v11613_v58  ;;  %v10698_v51 = vor.u32 %v11496_v43, %v10697_v50  ;;  %v11499_v58 = vld [vmem:[#allocation3 + $0x170] sm:$0xf0] }
 0x436   : > { %v6773_v22 = vadd.f32 %v6747_v15, %v13458_v16  ;;  %v10513_v16 = vld [vmem:[#allocation3 + $0x170] sm:$0xf]  ;;  %v6874_v18 = vmax.f32 %v6858_v8, 0.0  ;;  %v6703_v26 = vadd.f32 %v6702_v5, %v6653_v27  ;;  %v11645_v27 = vunpack.c.h.bf16 %v11770_v21 }
 0x437   : > { %7799 = vmatmul.bf16.gmra.mxu2 %v10686_v63  ;;  %v10514_v20 = vor.u32 %v11545_v10, %v10513_v16  ;;  %v11517_v63 = vld [vmem:[#allocation10 + $0x80] sm:$0xff]  ;;  %v11498_v16 = vld [vmem:[#allocation3 + $0x16c] sm:$0xf]  ;;  %v10710_v43 = vor.u32 %v11499_v58, %v10709_v44 }
 0x438   : > { %v6792_v37 = vmul.f32 %v13485_v0, %v6773_v22  ;;  %v11597_v22 = vld [vmem:[#allocation10 + $0x180] sm:$0xff]  ;;  %7871 = vmatpush.bf16.msra.mxu0 %v11517_v63 }
 0x439   : > { %8273 = vmatpush.bf16.msra.mxu1 %v11597_v22 }
 0x43a   : > { %v13548_v24 = vpop.f32.mrf.mxu3  ;;  %v6811_v42 = vadd.f32 %v13490_v36, %v6792_v37  ;;  %v6705_v30 = vpop.f32.mrf.mxu1  ;;  %v10711_v37 = vld [vmem:[#allocation3 + $0x174] sm:$0xf0] }
 0x43b   : > { %v6749_v28 = vpop.f32.mrf.mxu2 }
 0x43c   : > { %v6859_v55 = vadd.f32 %v11641_v14, %v6811_v42  ;;  %v6750_v53 = vadd.f32 %v6749_v28, %v6701_v61 }
 0x43d   : > { %7483 = vmatmul.bf16.gmra.mxu1 %v10514_v20  ;;  %v6656_v12 = vpop.f32.mrf.mxu0 }
 0x43e   : > { %v6875_v2 = vmax.f32 %v6859_v55, 0.0  ;;  %v6774_v11 = vadd.f32 %v6750_v53, %v13461_v49  ;;  %v6706_v39 = vadd.f32 %v6705_v30, %v6656_v12  ;;  %v10714_v55 = vor.u32 %v11498_v16, %v10711_v37 }
 0x43f   : > { %7853 = vmatmul.bf16.gmra.mxu3 %v10702_v31 }
 0x440   : > { %v11677_v32 = vpack.c.bf16 %v6875_v2, %v6874_v18  ;;  %7434 = vmatmul.bf16.gmra.mxu0 %v10510_v46  ;;  %v6793_v13 = vmul.f32 %v13485_v0, %v6774_v11  ;;  %v11546_v2 = vld [vmem:[#allocation3 + $0x184] sm:$0xf] }
 0x441   : > { %v10522_v30 = vor.u32 %v11546_v2, %v10519_v7 }
 0x442   : > { %v13552_v47 = vpop.f32.mrf.mxu3  ;;  %11776 = vst [vmem:[%s13504_s16 + $0x20] sm:$0xff] %v11677_v32   ;;  %v6707_v17 = vpop.f32.mrf.mxu1  ;;  %v6812_v59 = vadd.f32 %v13490_v36, %v6793_v13  ;;  %v11771_v13 = vld [vmem:[%s12303_s15 + $0x30] sm:$0xff]  }
 0x443   : > { %v6751_v48 = vpop.f32.mrf.mxu2 }
 0x444   : > { %v6752_v49 = vadd.f32 %v6751_v48, %v6703_v26  ;;  %v6860_v14 = vadd.f32 %v11644_v54, %v6812_v59  ;;  %v11648_v48 = vunpack.c.l.bf16 %v11771_v13  ;;  %v11649_v54 = vunpack.c.h.bf16 %v11771_v13 }
 0x445   : > { %v6658_v52 = vpop.f32.mrf.mxu0 }
 0x446   : > { %v6775_v15 = vadd.f32 %v6752_v49, %v13464_v60  ;;  %v10525_v60 = vld [vmem:[#allocation3 + $0x188] sm:$0xf]  ;;  %v6876_v53 = vmax.f32 %v6860_v14, 0.0  ;;  %v6708_v46 = vadd.f32 %v6707_v17, %v6658_v52  ;;  %v11575_v52 = vld [vmem:[#allocation3 + $0x100] sm:$0xf0] }
 0x447   : > { %7804 = vmatmul.bf16.gmra.mxu2 %v10698_v51  ;;  %v10526_v61 = vor.u32 %v11548_v3, %v10525_v60  ;;  %v11574_v51 = vld [vmem:[#allocation3 + $0xf8] sm:$0xf0]  ;;  %v10825_v14 = vld [vmem:[#allocation3 + $0xf8] sm:$0xf] }
 0x448   : > { %v6794_v5 = vmul.f32 %v13485_v0, %v6775_v15  ;;  %v10817_v15 = vld [vmem:[#allocation3 + $0xf0] sm:$0xf]  ;;  %v10826_v60 = vor.u32 %v11575_v52, %v10825_v14 }
 0x449   : > { %v10818_v37 = vor.u32 %v11574_v51, %v10817_v15 }
 0x44a   : > { %v13560_v23 = vpop.f32.mrf.mxu3  ;;  %v6813_v10 = vadd.f32 %v13490_v36, %v6794_v5  ;;  %v6710_v8 = vpop.f32.mrf.mxu1 }
 0x44b   : > { %v6754_v42 = vpop.f32.mrf.mxu2 }
 0x44c   : > { %v6861_v28 = vadd.f32 %v11645_v27, %v6813_v10  ;;  %v6755_v20 = vadd.f32 %v6754_v42, %v6706_v39  ;;  %v11479_v39 = vld [vmem:[#allocation3 + $0xd0] sm:$0xf0] }
 0x44d   : > { %7488 = vmatmul.bf16.gmra.mxu1 %v10526_v61  ;;  %v6661_v18 = vpop.f32.mrf.mxu0 }
 0x44e   : > { %v6877_v57 = vmax.f32 %v6861_v28, 0.0  ;;  %v6776_v31 = vadd.f32 %v6755_v20, %v13467_v40  ;;  %v6711_v5 = vadd.f32 %v6710_v8, %v6661_v18  ;;  %v10633_v20 = vld [vmem:[#allocation3 + $0xc8] sm:$0xf] }
 0x44f   : > { %7858 = vmatmul.bf16.gmra.mxu3 %v10714_v55  ;;  %v10634_v7 = vor.u32 %v11479_v39, %v10633_v20 }
 0x450   : > { %v11682_v11 = vpack.c.bf16 %v6877_v57, %v6876_v53  ;;  %7439 = vmatmul.bf16.gmra.mxu0 %v10522_v30  ;;  %v6795_v33 = vmul.f32 %v13485_v0, %v6776_v31  ;;  %v11772_v30 = vld [vmem:[%s12303_s15 + $0x38] sm:$0xff]  }
 0x452   : > { %v13564_v12 = vpop.f32.mrf.mxu3  ;;  %11777 = vst [vmem:[%s13504_s16 + $0x28] sm:$0xff] %v11682_v11   ;;  %v6712_v32 = vpop.f32.mrf.mxu1  ;;  %v6814_v40 = vadd.f32 %v13490_v36, %v6795_v33  ;;  %v10819_v33 = vld [vmem:[#allocation3 + $0xfc] sm:$0xf0] }
 0x453   : > { %v6756_v26 = vpop.f32.mrf.mxu2 }
 0x454   : > { %v6757_v21 = vadd.f32 %v6756_v26, %v6708_v46  ;;  %v6862_v22 = vadd.f32 %v11648_v48, %v6814_v40  ;;  %v11652_v26 = vunpack.c.l.bf16 %v11772_v30  ;;  %v11653_v48 = vunpack.c.h.bf16 %v11772_v30  ;;  %v11581_v30 = vld [vmem:[#allocation3 + $0x130] sm:$0xf0] }
 0x455   : > { %v6663_v49 = vpop.f32.mrf.mxu0 }
 0x456   : > { %v6777_v50 = vadd.f32 %v6757_v21, %v13470_v4  ;;  %v6878_v42 = vmax.f32 %v6862_v22, 0.0  ;;  %v6713_v18 = vadd.f32 %v6712_v32, %v6663_v49  ;;  %v10829_v32 = vld [vmem:[#allocation3 + $0x108] sm:$0xf] }
 0x457   : > { %7809 = vmatmul.bf16.gmra.mxu2 %v10710_v43 }
 0x458   : > { %v6796_v59 = vmul.f32 %v13485_v0, %v6777_v50  ;;  %v11577_v50 = vld [vmem:[#allocation3 + $0x110] sm:$0xf0] }
 0x459   : > { %v10830_v22 = vor.u32 %v11577_v50, %v10829_v32 }
 0x45a   : > { %v13572_v17 = vpop.f32.mrf.mxu3  ;;  %v6815_v63 = vadd.f32 %v13490_v36, %v6796_v59  ;;  %v7454_v27 = vpop.f32.mrf.mxu1  ;;  %v11578_v59 = vld [vmem:[#allocation3 + $0x118] sm:$0xf0] }
 0x45b   : > { %v6759_v3 = vpop.f32.mrf.mxu2 }
 0x45c   : > { %v6863_v4 = vadd.f32 %v11649_v54, %v6815_v63  ;;  %v6760_v10 = vadd.f32 %v6759_v3, %v6711_v5 }
 0x45d   : > { %8274 = vmatmul.bf16.vlgmr.msra.gmra.mxu1 %v10818_v37  ;;  %v7405_v28 = vpop.f32.mrf.mxu0 }
 0x45e   : > { %v6879_v61 = vmax.f32 %v6863_v4, 0.0  ;;  %v6778_v16 = vadd.f32 %v6760_v10, %v13473_v34  ;;  %v7406_v8 = vadd.f32 %v7405_v28, %v13475_v56  ;;  %v11573_v34 = vld [vmem:[#allocation3 + $0xf4] sm:$0xf]  ;;  %v10645_v4 = vld [vmem:[#allocation3 + $0xe0] sm:$0xf] }
 0x45f   : > { %8372 = vmatmul.bf16.vlgmr.msra.gmra.mxu3 %v10826_v60  ;;  %v10822_v44 = vor.u32 %v11573_v34, %v10819_v33  ;;  %v10831_v28 = vld [vmem:[#allocation3 + $0x114] sm:$0xf0]  ;;  %v10849_v34 = vld [vmem:[#allocation3 + $0x128] sm:$0xf] }
 0x460   : > { %v11687_v55 = vpack.c.bf16 %v6879_v61, %v6878_v42  ;;  %v7455_v53 = vadd.f32 %v7454_v27, %v7406_v8  ;;  %7872 = vmatmul.bf16.vlgmr.msra.gmra.mxu0 %v10634_v7  ;;  %v6797_v31 = vmul.f32 %v13485_v0, %v6778_v16  ;;  %v11576_v8 = vld [vmem:[#allocation3 + $0x10c] sm:$0xf] }
 0x462   : > { %v7824_v57 = vpop.f32.mrf.mxu3  ;;  %11778 = vst [vmem:[%s13504_s16 + $0x30] sm:$0xff] %v11687_v55   ;;  %v7456_v2 = vpop.f32.mrf.mxu1  ;;  %v6816_v13 = vadd.f32 %v13490_v36, %v6797_v31  ;;  %v10834_v55 = vor.u32 %v11576_v8, %v10831_v28  ;;  %v10841_v31 = vld [vmem:[#allocation3 + $0x120] sm:$0xf] }
 0x463   : > { %v6761_v11 = vpop.f32.mrf.mxu2 }
 0x464   : > { %v6762_v46 = vadd.f32 %v6761_v11, %v6713_v18  ;;  %v6864_v54 = vadd.f32 %v11652_v26, %v6816_v13  ;;  %v11485_v26 = vld [vmem:[#allocation3 + $0x100] sm:$0xf0] }
 0x465   : > { %v7407_v58 = vpop.f32.mrf.mxu0 }
 0x466   : > { %v6779_v56 = vadd.f32 %v6762_v46, %v13477_v35  ;;  %v7408_v21 = vadd.f32 %v7407_v58, %v13479_v6  ;;  %v10837_v35 = vld [vmem:[#allocation3 + $0x110] sm:$0xf]  ;;  %v11482_v6 = vld [vmem:[#allocation3 + $0xe8] sm:$0xf0] }
 0x467   : > { %8323 = vmatmul.bf16.vlgmr.msra.gmra.mxu2 %v10822_v44  ;;  %v10838_v27 = vor.u32 %v11578_v59, %v10837_v35  ;;  %v10853_v35 = vld [vmem:[#allocation3 + $0x138] sm:$0xf] }
 0x468   : > { %v6798_v40 = vmul.f32 %v13485_v0, %v6779_v56  ;;  %v7457_v43 = vadd.f32 %v7456_v2, %v7408_v21  ;;  %v6880_v0 = vmax.f32 %v6864_v54, 0.0  ;;  %v10850_v56 = vor.u32 %v11581_v30, %v10849_v34  ;;  %v10657_v21 = vld [vmem:[#allocation3 + $0xf8] sm:$0xf]  ;;  %v11579_v54 = vld [vmem:[#allocation3 + $0x124] sm:$0xf] }
 0x469   : > { %v10865_v30 = vld [vmem:[#allocation3 + $0x150] sm:$0xf] }
 0x46a   : > { %v7826_v49 = vpop.f32.mrf.mxu3  ;;  %v6817_v15 = vadd.f32 %v13490_v36, %v6798_v40  ;;  %v7459_v51 = vpop.f32.mrf.mxu1  ;;  %v10646_v36 = vor.u32 %v11482_v6, %v10645_v4  ;;  %v10658_v40 = vor.u32 %v11485_v26, %v10657_v21  ;;  %v11584_v6 = vld [vmem:[#allocation3 + $0x148] sm:$0xf0]  ;;  %v11491_v21 = vld [vmem:[#allocation3 + $0x130] sm:$0xf0] }
 0x46b   : > { %v7775_v52 = vpop.f32.mrf.mxu2 }
 0x46c   : > { %v6865_v63 = vadd.f32 %v11653_v48, %v6817_v15  ;;  %v7776_v5 = vadd.f32 %v7775_v52, %v7455_v53 }
 0x46d   : > { %8279 = vmatmul.bf16.gmra.mxu1 %v10830_v22  ;;  %v7410_v14 = vpop.f32.mrf.mxu0 }
 0x46e   : > { %v6881_v3 = vmax.f32 %v6865_v63, 0.0  ;;  %v13585_v37 = vadd.f32 %v7824_v57, %v7776_v5  ;;  %v7411_v10 = vadd.f32 %v7410_v14, %v13487_v19  ;;  %v11580_v19 = vld [vmem:[#allocation3 + $0x128] sm:$0xf0]  ;;  %v11583_v63 = vld [vmem:[#allocation3 + $0x140] sm:$0xf0] }
 0x46f   : > { %8377 = vmatmul.bf16.gmra.mxu3 %v10838_v27  ;;  %v10842_v46 = vor.u32 %v11580_v19, %v10841_v31  ;;  %v10861_v14 = vld [vmem:[#allocation3 + $0x140] sm:$0xf] }
 0x470   : > { %v11692_v39 = vpack.c.bf16 %v6881_v3, %v6880_v0  ;;  %v7460_v60 = vadd.f32 %v7459_v51, %v7411_v10  ;;  %7877 = vmatmul.bf16.gmra.mxu0 %v10646_v36  ;;  %v10854_v3 = vor.u32 %v11583_v63, %v10853_v35  ;;  %v11488_v10 = vld [vmem:[#allocation3 + $0x118] sm:$0xf0]  ;;  %v10862_v36 = vor.u32 %v11584_v6, %v10861_v14  ;;  %v10877_v6 = vld [vmem:[#allocation3 + $0x168] sm:$0xf] }
 0x472   : > { %v7829_v42 = vpop.f32.mrf.mxu3  ;;  %11779 = vst [vmem:[%s13504_s16 + $0x38] sm:$0xff] %v11692_v39   ;;  %v7461_v61 = vpop.f32.mrf.mxu1 }
 0x473   : > { %v7777_v16 = vpop.f32.mrf.mxu2 }
 0x474   : > { %v7778_v20 = vadd.f32 %v7777_v16, %v7457_v43 }
 0x475   : > { %v7412_v53 = vpop.f32.mrf.mxu0 }
 0x476   : > { %v13589_v7 = vadd.f32 %v7826_v49, %v7778_v20  ;;  %v7413_v57 = vadd.f32 %v7412_v53, %v13496_v38  ;;  %v10843_v49 = vld [vmem:[#allocation3 + $0x12c] sm:$0xf0] }
 0x477   : > { %8328 = vmatmul.bf16.gmra.mxu2 %v10834_v55  ;;  %v10846_v51 = vor.u32 %v11579_v54, %v10843_v49  ;;  %v10855_v55 = vld [vmem:[#allocation3 + $0x144] sm:$0xf0] }
 0x478   : > { %v7462_v18 = vadd.f32 %v7461_v61, %v7413_v57  ;;  %v11582_v57 = vld [vmem:[#allocation3 + $0x13c] sm:$0xf] }
 0x479   : > { %v10858_v19 = vor.u32 %v11582_v57, %v10855_v55 }
 0x47a   : > { %v7831_v2 = vpop.f32.mrf.mxu3  ;;  %v7464_v11 = vpop.f32.mrf.mxu1 }
 0x47b   : > { %v7780_v33 = vpop.f32.mrf.mxu2 }
 0x47c   : > { %v7781_v13 = vadd.f32 %v7780_v33, %v7460_v60 }
 0x47d   : > { %8284 = vmatmul.bf16.gmra.mxu1 %v10842_v46  ;;  %v7415_v58 = vpop.f32.mrf.mxu0  ;;  %v11587_v46 = vld [vmem:[#allocation3 + $0x160] sm:$0xf0] }
 0x47e   : > { %v13592_v44 = vadd.f32 %v7829_v42, %v7781_v13  ;;  %v7416_v38 = vadd.f32 %v7415_v58, %v13500_v29  ;;  %v10669_v42 = vld [vmem:[#allocation3 + $0x110] sm:$0xf] }
 0x47f   : > { %8382 = vmatmul.bf16.gmra.mxu3 %v10850_v56  ;;  %v10670_v61 = vor.u32 %v11488_v10, %v10669_v42  ;;  %v10873_v56 = vld [vmem:[#allocation3 + $0x158] sm:$0xf]  ;;  %v11494_v42 = vld [vmem:[#allocation3 + $0x148] sm:$0xf0] }
 0x480   : > { %v7465_v48 = vadd.f32 %v7464_v11, %v7416_v38  ;;  %7882 = vmatmul.bf16.gmra.mxu0 %v10658_v40  ;;  %v11586_v11 = vld [vmem:[#allocation3 + $0x158] sm:$0xf0]  ;;  %v10874_v38 = vor.u32 %v11587_v46, %v10873_v56  ;;  %v10889_v46 = vld [vmem:[#allocation3 + $0x180] sm:$0xf] }
 0x481   : > { %v10866_v26 = vor.u32 %v11586_v11, %v10865_v30 }
 0x482   : > { %v7834_v32 = vpop.f32.mrf.mxu3  ;;  %v7466_v50 = vpop.f32.mrf.mxu1 }
 0x483   : > { %v7782_v43 = vpop.f32.mrf.mxu2 }
 0x484   : > { %v7783_v59 = vadd.f32 %v7782_v43, %v7462_v18 }
 0x485   : > { %v7417_v52 = vpop.f32.mrf.mxu0 }
 0x486   : > { %v13595_v15 = vadd.f32 %v7831_v2, %v7783_v59  ;;  %v7418_v22 = vadd.f32 %v7417_v52, %v13512_v9 }
 0x487   : > { %8333 = vmatmul.bf16.gmra.mxu2 %v10846_v51  ;;  %v10867_v51 = vld [vmem:[#allocation3 + $0x15c] sm:$0xf0] }
 0x488   : > { %v7467_v5 = vadd.f32 %v7466_v50, %v7418_v22  ;;  %v11585_v22 = vld [vmem:[#allocation3 + $0x154] sm:$0xf] }
 0x489   : > { %v10870_v63 = vor.u32 %v11585_v22, %v10867_v51 }
 0x48a   : > { %v7836_v29 = vpop.f32.mrf.mxu3  ;;  %v7469_v27 = vpop.f32.mrf.mxu1 }
 0x48b   : > { %v7785_v0 = vpop.f32.mrf.mxu2 }
 0x48c   : > { %v7786_v4 = vadd.f32 %v7785_v0, %v7465_v48 }
 0x48d   : > { %8289 = vmatmul.bf16.gmra.mxu1 %v10854_v3  ;;  %v7420_v60 = vpop.f32.mrf.mxu0  ;;  %v11590_v3 = vld [vmem:[#allocation3 + $0x178] sm:$0xf0] }
 0x48e   : > { %v13598_v39 = vadd.f32 %v7834_v32, %v7786_v4  ;;  %v7421_v9 = vadd.f32 %v7420_v60, %v13516_v62  ;;  %v10681_v32 = vld [vmem:[#allocation3 + $0x128] sm:$0xf] }
 0x48f   : > { %8387 = vmatmul.bf16.gmra.mxu3 %v10862_v36  ;;  %v10682_v50 = vor.u32 %v11491_v21, %v10681_v32  ;;  %v10885_v36 = vld [vmem:[#allocation3 + $0x170] sm:$0xf]  ;;  %v11497_v32 = vld [vmem:[#allocation3 + $0x160] sm:$0xf0] }
 0x490   : > { %v7470_v16 = vadd.f32 %v7469_v27, %v7421_v9  ;;  %7887 = vmatmul.bf16.gmra.mxu0 %v10670_v61  ;;  %v11589_v27 = vld [vmem:[#allocation3 + $0x170] sm:$0xf0]  ;;  %v10886_v9 = vor.u32 %v11590_v3, %v10885_v36  ;;  %v11595_v3 = vld [vmem:[#allocation3 + $0x1a0] sm:$0xf0] }
 0x491   : > { %v10878_v10 = vor.u32 %v11589_v27, %v10877_v6 }
 0x492   : > { %v7839_v28 = vpop.f32.mrf.mxu3  ;;  %v7471_v20 = vpop.f32.mrf.mxu1 }
 0x493   : > { %v7787_v8 = vpop.f32.mrf.mxu2 }
 0x494   : > { %v7788_v53 = vadd.f32 %v7787_v8, %v7467_v5 }
 0x495   : > { %v7422_v18 = vpop.f32.mrf.mxu0 }
 0x496   : > { %v13601_v31 = vadd.f32 %v7836_v29, %v7788_v53  ;;  %v7423_v2 = vadd.f32 %v7422_v18, %v13524_v25 }
 0x497   : > { %8338 = vmatmul.bf16.gmra.mxu2 %v10858_v19  ;;  %v10879_v19 = vld [vmem:[#allocation3 + $0x174] sm:$0xf0] }
 0x498   : > { %v7472_v33 = vadd.f32 %v7471_v20, %v7423_v2  ;;  %v11588_v2 = vld [vmem:[#allocation3 + $0x16c] sm:$0xf] }
 0x499   : > { %v10882_v11 = vor.u32 %v11588_v2, %v10879_v19  ;;  %v11594_v19 = vld [vmem:[#allocation3 + $0x19c] sm:$0xf] }
 0x49a   : > { %v7841_v62 = vpop.f32.mrf.mxu3  ;;  %v7474_v34 = vpop.f32.mrf.mxu1 }
 0x49b   : > { %v7790_v13 = vpop.f32.mrf.mxu2 }
 0x49c   : > { %v7791_v58 = vadd.f32 %v7790_v13, %v7470_v16 }
 0x49d   : > { %8294 = vmatmul.bf16.gmra.mxu1 %v10866_v26  ;;  %v7425_v48 = vpop.f32.mrf.mxu0  ;;  %v11593_v26 = vld [vmem:[#allocation3 + $0x190] sm:$0xf0] }
 0x49e   : > { %v13604_v40 = vadd.f32 %v7839_v28, %v7791_v58  ;;  %v7426_v25 = vadd.f32 %v7425_v48, %v13528_v45  ;;  %v10693_v28 = vld [vmem:[#allocation3 + $0x140] sm:$0xf] }
 0x49f   : > { %8392 = vmatmul.bf16.gmra.mxu3 %v10874_v38  ;;  %v10694_v20 = vor.u32 %v11494_v42, %v10693_v28  ;;  %v10897_v38 = vld [vmem:[#allocation3 + $0x188] sm:$0xf] }
 0x4a0   : > { %v7475_v43 = vadd.f32 %v7474_v34, %v7426_v25  ;;  %7892 = vmatmul.bf16.gmra.mxu0 %v10682_v50  ;;  %v11592_v34 = vld [vmem:[#allocation3 + $0x188] sm:$0xf0]  ;;  %v10898_v25 = vor.u32 %v11593_v26, %v10897_v38 }
 0x4a1   : > { %v10890_v21 = vor.u32 %v11592_v34, %v10889_v46 }
 0x4a2   : > { %v7844_v49 = vpop.f32.mrf.mxu3  ;;  %v7476_v59 = vpop.f32.mrf.mxu1 }
 0x4a3   : > { %v7792_v54 = vpop.f32.mrf.mxu2 }
 0x4a4   : > { %v7793_v52 = vadd.f32 %v7792_v54, %v7472_v33 }
 0x4a5   : > { %v7427_v5 = vpop.f32.mrf.mxu0 }
 0x4a6   : > { %v13607_v35 = vadd.f32 %v7841_v62, %v7793_v52  ;;  %v7428_v29 = vadd.f32 %v7427_v5, %v13536_v1 }
 0x4a7   : > { %8343 = vmatmul.bf16.gmra.mxu2 %v10870_v63  ;;  %v10891_v63 = vld [vmem:[#allocation3 + $0x18c] sm:$0xf0] }
 0x4a8   : > { %v7477_v0 = vadd.f32 %v7476_v59, %v7428_v29  ;;  %v11591_v29 = vld [vmem:[#allocation3 + $0x184] sm:$0xf] }
 0x4a9   : > { %v10894_v27 = vor.u32 %v11591_v29, %v10891_v63 }
 0x4aa   : > { %v7846_v45 = vpop.f32.mrf.mxu3  ;;  %v7479_v14 = vpop.f32.mrf.mxu1 }
 0x4ab   : > { %v7795_v4 = vpop.f32.mrf.mxu2 }
 0x4ac   : > { %v7796_v60 = vadd.f32 %v7795_v4, %v7475_v43  ;;  %v10909_v4 = vld [vmem:[#allocation3 + $0x1a0] sm:$0xf] }
 0x4ad   : > { %8299 = vmatmul.bf16.gmra.mxu1 %v10878_v10  ;;  %v7430_v16 = vpop.f32.mrf.mxu0  ;;  %v11596_v10 = vld [vmem:[#allocation3 + $0x1a8] sm:$0xf0] }
 0x4ae   : > { %v13610_v61 = vadd.f32 %v7844_v49, %v7796_v60  ;;  %v7431_v1 = vadd.f32 %v7430_v16, %v13540_v41  ;;  %v10705_v49 = vld [vmem:[#allocation3 + $0x158] sm:$0xf] }
 0x4af   : > { %8397 = vmatmul.bf16.gmra.mxu3 %v10886_v9  ;;  %v10706_v59 = vor.u32 %v11497_v32, %v10705_v49  ;;  %v10910_v9 = vor.u32 %v11596_v10, %v10909_v4  ;;  %v11780_v10 = vld [vmem:[%s12303_s15 + $0x40] sm:$0xff]  }
 0x4b0   : > { %v7480_v8 = vadd.f32 %v7479_v14, %v7431_v1  ;;  %7897 = vmatmul.bf16.gmra.mxu0 %v10694_v20  ;;  %v11500_v1 = vld [vmem:[#allocation3 + $0x178] sm:$0xf0] }
 0x4b2   : > { %v7849_v55 = vpop.f32.mrf.mxu3  ;;  %v7481_v53 = vpop.f32.mrf.mxu1 }
 0x4b3   : > { %v7797_v57 = vpop.f32.mrf.mxu2 }
 0x4b4   : > { %v7798_v18 = vadd.f32 %v7797_v57, %v7477_v0 }
 0x4b5   : > { %v7432_v33 = vpop.f32.mrf.mxu0 }
 0x4b6   : > { %v13613_v30 = vadd.f32 %v7846_v45, %v7798_v18  ;;  %v7433_v62 = vadd.f32 %v7432_v33, %v13548_v24  ;;  %v10901_v45 = vld [vmem:[#allocation3 + $0x198] sm:$0xf]  ;;  %v10903_v18 = vld [vmem:[#allocation3 + $0x1a4] sm:$0xf0] }
 0x4b7   : > { %8348 = vmatmul.bf16.gmra.mxu2 %v10882_v11  ;;  %v10902_v60 = vor.u32 %v11595_v3, %v10901_v45  ;;  %v10906_v46 = vor.u32 %v11594_v19, %v10903_v18  ;;  %v13636_v3 = vld [vmem:[%s13742_s5] ss:$0 sm:$0xff] }
 0x4b8   : > { %v7482_v13 = vadd.f32 %v7481_v53, %v7433_v62 }
 0x4ba   : > { %v7851_v41 = vpop.f32.mrf.mxu3  ;;  %v7484_v56 = vpop.f32.mrf.mxu1 }
 0x4bb   : > { %v7800_v58 = vpop.f32.mrf.mxu2 }
 0x4bc   : > { %v7801_v48 = vadd.f32 %v7800_v58, %v7480_v8 }
 0x4bd   : > { %8304 = vmatmul.bf16.gmra.mxu1 %v10890_v21  ;;  %v7435_v43 = vpop.f32.mrf.mxu0 }
 0x4be   : > { %v13616_v50 = vadd.f32 %v7849_v55, %v7801_v48  ;;  %v7436_v24 = vadd.f32 %v7435_v43, %v13552_v47  ;;  %v10717_v55 = vld [vmem:[#allocation3 + $0x170] sm:$0xf] }
 0x4bf   : > { %8402 = vmatmul.bf16.gmra.mxu3 %v10898_v25 }
 0x4c0   : > { %v7485_v54 = vadd.f32 %v7484_v56, %v7436_v24  ;;  %7902 = vmatmul.bf16.gmra.mxu0 %v10706_v59 }
 0x4c2   : > { %v7854_v51 = vpop.f32.mrf.mxu3  ;;  %v7486_v52 = vpop.f32.mrf.mxu1 }
 0x4c3   : > { %v7802_v22 = vpop.f32.mrf.mxu2 }
 0x4c4   : > { %v7803_v5 = vadd.f32 %v7802_v22, %v7482_v13 }
 0x4c5   : > { %v7437_v0 = vpop.f32.mrf.mxu0 }
 0x4c6   : > { %v13619_v6 = vadd.f32 %v7851_v41, %v7803_v5  ;;  %v7438_v14 = vadd.f32 %v7437_v0, %v13560_v23  ;;  %v10718_v23 = vor.u32 %v11500_v1, %v10717_v55 }
 0x4c7   : > { %8353 = vmatmul.bf16.gmra.mxu2 %v10894_v27 }
 0x4c8   : > { %v7487_v47 = vadd.f32 %v7486_v52, %v7438_v14 }
 0x4ca   : > { %v7856_v36 = vpop.f32.mrf.mxu3  ;;  %v7489_v42 = vpop.f32.mrf.mxu1 }
 0x4cb   : > { %v7805_v16 = vpop.f32.mrf.mxu2 }
 0x4cc   : > { %v7806_v28 = vadd.f32 %v7805_v16, %v7485_v54 }
 0x4cd   : > { %8309 = vmatmul.bf16.gmra.mxu1 %v10902_v60  ;;  %v7440_v8 = vpop.f32.mrf.mxu0 }
 0x4ce   : > { %v13622_v20 = vadd.f32 %v7854_v51, %v7806_v28  ;;  %v7441_v53 = vadd.f32 %v7440_v8, %v13564_v12  ;;  %v11697_v8 = vunpack.c.h.bf16 %v11780_v10 }
 0x4cf   : > { %8407 = vmatmul.bf16.gmra.mxu3 %v10910_v9  ;;  %v11696_v9 = vunpack.c.l.bf16 %v11780_v10 }
 0x4d0   : > { %v7490_v57 = vadd.f32 %v7489_v42, %v7441_v53  ;;  %7907 = vmatmul.bf16.gmra.mxu0 %v10718_v23 }
 0x4d2   : > { %v7859_v2 = vpop.f32.mrf.mxu3  ;;  %v7491_v11 = vpop.f32.mrf.mxu1 }
 0x4d3   : > { %v7807_v33 = vpop.f32.mrf.mxu2 }
 0x4d4   : > { %v7808_v62 = vadd.f32 %v7807_v33, %v7487_v47 }
 0x4d5   : > { %v7442_v13 = vpop.f32.mrf.mxu0 }
 0x4d6   : > { %v13625_v34 = vadd.f32 %v7856_v36, %v7808_v62  ;;  %v7443_v41 = vadd.f32 %v7442_v13, %v13572_v17 }
 0x4d7   : > { %8358 = vmatmul.bf16.gmra.mxu2 %v10906_v46 }
 0x4d8   : > { %v7492_v26 = vadd.f32 %v7491_v11, %v7443_v41 }
 0x4da   : > { %v7861_v56 = vpop.f32.mrf.mxu3  ;;  %v8275_v58 = vpop.f32.mrf.mxu1 }
 0x4db   : > { %v7810_v12 = vpop.f32.mrf.mxu2 }
 0x4dc   : > { %v7811_v21 = vadd.f32 %v7810_v12, %v7490_v57 }
 0x4dd   : > { %v7873_v48 = vpop.f32.mrf.mxu0 }
 0x4de   : > { %v13628_v38 = vadd.f32 %v7859_v2, %v7811_v21  ;;  %v7874_v22 = vadd.f32 %v7873_v48, %v13585_v37  ;;  %v13641_v37 = vld [vmem:[#allocation12] ss:$0 sm:$0xff]  ;;  %v11781_v21 = vld [vmem:[%s12303_s15 + $0x48] sm:$0xff]  }
 0x4e2   : > { %v8373_v32 = vpop.f32.mrf.mxu3  ;;  %v8277_v25 = vpop.f32.mrf.mxu1 }
 0x4e3   : > { %v7812_v43 = vpop.f32.mrf.mxu2 }
 0x4e4   : > { %v7813_v49 = vadd.f32 %v7812_v43, %v7492_v26  ;;  %v11700_v43 = vunpack.c.l.bf16 %v11781_v21 }
 0x4e5   : > { %v7875_v59 = vpop.f32.mrf.mxu0 }
 0x4e6   : > { %v13630_v24 = vadd.f32 %v7861_v56, %v7813_v49  ;;  %v7876_v47 = vadd.f32 %v7875_v59, %v13589_v7 }
 0x4ea   : > { %v8375_v54 = vpop.f32.mrf.mxu3  ;;  %v8280_v51 = vpop.f32.mrf.mxu1 }
 0x4eb   : > { %v8324_v17 = vpop.f32.mrf.mxu2 }
 0x4ec   : > { %v8325_v52 = vadd.f32 %v8324_v17, %v8275_v58 }
 0x4ed   : > { %v7878_v5 = vpop.f32.mrf.mxu0 }
 0x4ee   : > { %v8374_v63 = vadd.f32 %v8373_v32, %v8325_v52  ;;  %v7879_v18 = vadd.f32 %v7878_v5, %v13592_v44 }
 0x4f0   : > { %v8413_v29 = vadd.f32 %v8374_v63, %v7874_v22 }
 0x4f2   : > { %v8378_v27 = vpop.f32.mrf.mxu3  ;;  %v8282_v0 = vpop.f32.mrf.mxu1  ;;  %v8429_v14 = vmul.f32 %v13636_v3, %v8413_v29 }
 0x4f3   : > { %v8326_v45 = vpop.f32.mrf.mxu2 }
 0x4f4   : > { %v8327_v4 = vadd.f32 %v8326_v45, %v8277_v25  ;;  %v8445_v42 = vadd.f32 %v13641_v37, %v8429_v14 }
 0x4f5   : > { %v7880_v60 = vpop.f32.mrf.mxu0 }
 0x4f6   : > { %v8376_v36 = vadd.f32 %v8375_v54, %v8327_v4  ;;  %v8494_v23 = vadd.f32 %v11696_v9, %v8445_v42  ;;  %v7881_v48 = vadd.f32 %v7880_v60, %v13595_v15 }
 0x4f8   : > { %v8414_v16 = vadd.f32 %v8376_v36, %v7876_v47  ;;  %v8510_v33 = vmax.f32 %v8494_v23, 0.0 }
 0x4fa   : > { %v8380_v28 = vpop.f32.mrf.mxu3  ;;  %v8430_v1 = vmul.f32 %v13636_v3, %v8414_v16  ;;  %v8285_v55 = vpop.f32.mrf.mxu1  ;;  %v11782_v16 = vld [vmem:[%s12303_s15 + $0x50] sm:$0xff]  }
 0x4fb   : > { %v8329_v53 = vpop.f32.mrf.mxu2 }
 0x4fc   : > { %v8446_v57 = vadd.f32 %v13641_v37, %v8430_v1  ;;  %v8330_v7 = vadd.f32 %v8329_v53, %v8280_v51  ;;  %v11701_v51 = vunpack.c.h.bf16 %v11781_v21 }
 0x4fd   : > { %v7883_v11 = vpop.f32.mrf.mxu0 }
 0x4fe   : > { %v8495_v19 = vadd.f32 %v11697_v8, %v8446_v57  ;;  %v8379_v2 = vadd.f32 %v8378_v27, %v8330_v7  ;;  %v7884_v15 = vadd.f32 %v7883_v11, %v13598_v39  ;;  %v11705_v7 = vunpack.c.h.bf16 %v11782_v16 }
 0x500   : > { %v8511_v62 = vmax.f32 %v8495_v19, 0.0  ;;  %v8415_v46 = vadd.f32 %v8379_v2, %v7879_v18 }
 0x502   : > { %v8383_v13 = vpop.f32.mrf.mxu3  ;;  %v11729_v41 = vpack.c.bf16 %v8511_v62, %v8510_v33  ;;  %v8287_v26 = vpop.f32.mrf.mxu1  ;;  %v8431_v58 = vmul.f32 %v13636_v3, %v8415_v46 }
 0x503   : > { %v8331_v56 = vpop.f32.mrf.mxu2 }
 0x504   : > { %11788 = vst [vmem:[%s13504_s16 + $0x40] sm:$0xff] %v11729_v41   ;;  %v8332_v12 = vadd.f32 %v8331_v56, %v8282_v0  ;;  %v8447_v44 = vadd.f32 %v13641_v37, %v8431_v58 }
 0x505   : > { %v7885_v25 = vpop.f32.mrf.mxu0 }
 0x506   : > { %v8381_v32 = vadd.f32 %v8380_v28, %v8332_v12  ;;  %v8496_v22 = vadd.f32 %v11700_v43, %v8447_v44  ;;  %v7886_v28 = vadd.f32 %v7885_v25, %v13601_v31  ;;  %v11783_v25 = vld [vmem:[%s12303_s15 + $0x58] sm:$0xff]  }
 0x508   : > { %v8416_v49 = vadd.f32 %v8381_v32, %v7881_v48  ;;  %v8512_v45 = vmax.f32 %v8496_v22, 0.0  ;;  %v11709_v22 = vunpack.c.h.bf16 %v11783_v25 }
 0x50a   : > { %v8385_v59 = vpop.f32.mrf.mxu3  ;;  %v8432_v54 = vmul.f32 %v13636_v3, %v8416_v49  ;;  %v8290_v17 = vpop.f32.mrf.mxu1 }
 0x50b   : > { %v8334_v52 = vpop.f32.mrf.mxu2 }
 0x50c   : > { %v8448_v63 = vadd.f32 %v13641_v37, %v8432_v54  ;;  %v8335_v5 = vadd.f32 %v8334_v52, %v8285_v55  ;;  %v11704_v55 = vunpack.c.l.bf16 %v11782_v16  ;;  %v11708_v54 = vunpack.c.l.bf16 %v11783_v25 }
 0x50d   : > { %v7888_v0 = vpop.f32.mrf.mxu0 }
 0x50e   : > { %v8497_v29 = vadd.f32 %v11701_v51, %v8448_v63  ;;  %v8384_v27 = vadd.f32 %v8383_v13, %v8335_v5  ;;  %v7889_v31 = vadd.f32 %v7888_v0, %v13604_v40 }
 0x510   : > { %v8513_v14 = vmax.f32 %v8497_v29, 0.0  ;;  %v8417_v4 = vadd.f32 %v8384_v27, %v7884_v15 }
 0x512   : > { %v8388_v10 = vpop.f32.mrf.mxu3  ;;  %v11734_v47 = vpack.c.bf16 %v8513_v14, %v8512_v45  ;;  %v8292_v36 = vpop.f32.mrf.mxu1  ;;  %v8433_v42 = vmul.f32 %v13636_v3, %v8417_v4 }
 0x513   : > { %v8336_v60 = vpop.f32.mrf.mxu2 }
 0x514   : > { %11789 = vst [vmem:[%s13504_s16 + $0x48] sm:$0xff] %v11734_v47   ;;  %v8337_v9 = vadd.f32 %v8336_v60, %v8287_v26  ;;  %v8449_v39 = vadd.f32 %v13641_v37, %v8433_v42 }
 0x515   : > { %v7890_v8 = vpop.f32.mrf.mxu0 }
 0x516   : > { %v8386_v1 = vadd.f32 %v8385_v59, %v8337_v9  ;;  %v8498_v18 = vadd.f32 %v11704_v55, %v8449_v39  ;;  %v7891_v44 = vadd.f32 %v7890_v8, %v13607_v35 }
 0x518   : > { %v8418_v53 = vadd.f32 %v8386_v1, %v7886_v28  ;;  %v8514_v41 = vmax.f32 %v8498_v18, 0.0  ;;  %v11784_v28 = vld [vmem:[%s12303_s15 + $0x60] sm:$0xff]  }
 0x51a   : > { %v8390_v23 = vpop.f32.mrf.mxu3  ;;  %v8434_v57 = vmul.f32 %v13636_v3, %v8418_v53  ;;  %v8295_v33 = vpop.f32.mrf.mxu1 }
 0x51b   : > { %v8339_v19 = vpop.f32.mrf.mxu2 }
 0x51c   : > { %v8450_v2 = vadd.f32 %v13641_v37, %v8434_v57  ;;  %v8340_v11 = vadd.f32 %v8339_v19, %v8290_v17 }
 0x51d   : > { %v7893_v13 = vpop.f32.mrf.mxu0 }
 0x51e   : > { %v8499_v62 = vadd.f32 %v11705_v7, %v8450_v2  ;;  %v8389_v46 = vadd.f32 %v8388_v10, %v8340_v11  ;;  %v7894_v35 = vadd.f32 %v7893_v13, %v13610_v61  ;;  %v11712_v61 = vunpack.c.l.bf16 %v11784_v28 }
 0x520   : > { %v8515_v26 = vmax.f32 %v8499_v62, 0.0  ;;  %v8419_v56 = vadd.f32 %v8389_v46, %v7889_v31 }
 0x522   : > { %v8393_v58 = vpop.f32.mrf.mxu3  ;;  %v11739_v12 = vpack.c.bf16 %v8515_v26, %v8514_v41  ;;  %v8435_v48 = vmul.f32 %v13636_v3, %v8419_v56  ;;  %v8297_v49 = vpop.f32.mrf.mxu1 }
 0x523   : > { %v8341_v21 = vpop.f32.mrf.mxu2 }
 0x524   : > { %11790 = vst [vmem:[%s13504_s16 + $0x50] sm:$0xff] %v11739_v12   ;;  %v8342_v32 = vadd.f32 %v8341_v21, %v8292_v36  ;;  %v8451_v40 = vadd.f32 %v13641_v37, %v8435_v48  ;;  %v11785_v48 = vld [vmem:[%s12303_s15 + $0x68] sm:$0xff]  }
 0x525   : > { %v7895_v59 = vpop.f32.mrf.mxu0 }
 0x526   : > { %v8391_v43 = vadd.f32 %v8390_v23, %v8342_v32  ;;  %v8500_v5 = vadd.f32 %v11708_v54, %v8451_v40  ;;  %v7896_v1 = vadd.f32 %v7895_v59, %v13613_v30  ;;  %v11713_v23 = vunpack.c.h.bf16 %v11784_v28 }
 0x527   : > { %v11717_v54 = vunpack.c.h.bf16 %v11785_v48 }
 0x528   : > { %v8420_v51 = vadd.f32 %v8391_v43, %v7891_v44  ;;  %v8516_v45 = vmax.f32 %v8500_v5, 0.0 }
 0x52a   : > { %v8395_v17 = vpop.f32.mrf.mxu3  ;;  %v8436_v52 = vmul.f32 %v13636_v3, %v8420_v51  ;;  %v8300_v10 = vpop.f32.mrf.mxu1 }
 0x52b   : > { %v8344_v63 = vpop.f32.mrf.mxu2 }
 0x52c   : > { %v8452_v29 = vadd.f32 %v13641_v37, %v8436_v52  ;;  %v8345_v15 = vadd.f32 %v8344_v63, %v8295_v33 }
 0x52d   : > { %v7898_v47 = vpop.f32.mrf.mxu0 }
 0x52e   : > { %v8501_v27 = vadd.f32 %v11709_v22, %v8452_v29  ;;  %v8394_v0 = vadd.f32 %v8393_v58, %v8345_v15  ;;  %v7899_v30 = vadd.f32 %v7898_v47, %v13616_v50  ;;  %v11716_v50 = vunpack.c.l.bf16 %v11785_v48 }
 0x530   : > { %v8517_v14 = vmax.f32 %v8501_v27, 0.0  ;;  %v8421_v4 = vadd.f32 %v8394_v0, %v7894_v35 }
 0x532   : > { %v11744_v36 = vpack.c.bf16 %v8517_v14, %v8516_v45  ;;  %v8398_v42 = vpop.f32.mrf.mxu3  ;;  %v8437_v9 = vmul.f32 %v13636_v3, %v8421_v4  ;;  %v8302_v57 = vpop.f32.mrf.mxu1 }
 0x533   : > { %v8346_v60 = vpop.f32.mrf.mxu2 }
 0x534   : > { %11791 = vst [vmem:[%s13504_s16 + $0x58] sm:$0xff] %v11744_v36   ;;  %v8347_v16 = vadd.f32 %v8346_v60, %v8297_v49  ;;  %v8453_v39 = vadd.f32 %v13641_v37, %v8437_v9  ;;  %v11786_v36 = vld [vmem:[%s12303_s15 + $0x70] sm:$0xff]  }
 0x535   : > { %v7900_v19 = vpop.f32.mrf.mxu0 }
 0x536   : > { %v8396_v8 = vadd.f32 %v8395_v17, %v8347_v16  ;;  %v8502_v18 = vadd.f32 %v11712_v61, %v8453_v39  ;;  %v7901_v25 = vadd.f32 %v7900_v19, %v13619_v6  ;;  %v11721_v39 = vunpack.c.h.bf16 %v11786_v36 }
 0x538   : > { %v8422_v55 = vadd.f32 %v8396_v8, %v7896_v1  ;;  %v8518_v46 = vmax.f32 %v8502_v18, 0.0 }
 0x53a   : > { %v8438_v53 = vmul.f32 %v13636_v3, %v8422_v55  ;;  %v8400_v33 = vpop.f32.mrf.mxu3  ;;  %v8305_v21 = vpop.f32.mrf.mxu1 }
 0x53b   : > { %v8349_v7 = vpop.f32.mrf.mxu2 }
 0x53c   : > { %v8454_v2 = vadd.f32 %v13641_v37, %v8438_v53  ;;  %v8350_v11 = vadd.f32 %v8349_v7, %v8300_v10 }
 0x53d   : > { %v7903_v32 = vpop.f32.mrf.mxu0 }
 0x53e   : > { %v8503_v62 = vadd.f32 %v11713_v23, %v8454_v2  ;;  %v8399_v31 = vadd.f32 %v8398_v42, %v8350_v11  ;;  %v7904_v5 = vadd.f32 %v7903_v32, %v13622_v20  ;;  %v11720_v20 = vunpack.c.l.bf16 %v11786_v36 }
 0x540   : > { %v8519_v13 = vmax.f32 %v8503_v62, 0.0  ;;  %v8423_v41 = vadd.f32 %v8399_v31, %v7899_v30 }
 0x542   : > { %v11749_v26 = vpack.c.bf16 %v8519_v13, %v8518_v46  ;;  %v8439_v58 = vmul.f32 %v13636_v3, %v8423_v41  ;;  %v8403_v43 = vpop.f32.mrf.mxu3  ;;  %v8307_v29 = vpop.f32.mrf.mxu1  ;;  %v11787_v41 = vld [vmem:[%s12303_s15 + $0x78] sm:$0xff]   ;;  %s8572_s15 = sshll.u32 %s13504_s16, 4  ;;  %s8573_s15 = int_to_ptr.vmem [resolvable:$true] %s8572_s15 }
 0x543   : > { %v8351_v56 = vpop.f32.mrf.mxu2  ;;  %v11725_v32 = vunpack.c.h.bf16 %v11787_v41 }
 0x544   : > { %11792 = vst [vmem:[%s13504_s16 + $0x60] sm:$0xff] %v11749_v26   ;;  %v8352_v12 = vadd.f32 %v8351_v56, %v8302_v57  ;;  %v8455_v49 = vadd.f32 %v13641_v37, %v8439_v58 }
 0x545   : > { %v7905_v15 = vpop.f32.mrf.mxu0 }
 0x546   : > { %v8401_v44 = vadd.f32 %v8400_v33, %v8352_v12  ;;  %v8504_v17 = vadd.f32 %v11716_v50, %v8455_v49  ;;  %v7906_v60 = vadd.f32 %v7905_v15, %v13625_v34  ;;  %v11724_v12 = vunpack.c.l.bf16 %v11787_v41 }
 0x548   : > { %v8424_v59 = vadd.f32 %v8401_v44, %v7901_v25  ;;  %v8520_v27 = vmax.f32 %v8504_v17, 0.0 }
 0x54a   : > { %v8440_v40 = vmul.f32 %v13636_v3, %v8424_v59  ;;  %v8405_v45 = vpop.f32.mrf.mxu3  ;;  %v8310_v28 = vpop.f32.mrf.mxu1 }
 0x54b   : > { %v8354_v51 = vpop.f32.mrf.mxu2 }
 0x54c   : > { %v8456_v52 = vadd.f32 %v13641_v37, %v8440_v40  ;;  %v8355_v22 = vadd.f32 %v8354_v51, %v8305_v21 }
 0x54d   : > { %v7908_v1 = vpop.f32.mrf.mxu0 }
 0x54e   : > { %v8505_v63 = vadd.f32 %v11717_v54, %v8456_v52  ;;  %v8404_v6 = vadd.f32 %v8403_v43, %v8355_v22  ;;  %v7909_v34 = vadd.f32 %v7908_v1, %v13628_v38 }
 0x550   : > { %v8521_v35 = vmax.f32 %v8505_v63, 0.0  ;;  %v8425_v0 = vadd.f32 %v8404_v6, %v7904_v5 }
 0x552   : > { %v11754_v14 = vpack.c.bf16 %v8521_v35, %v8520_v27  ;;  %v8441_v10 = vmul.f32 %v13636_v3, %v8425_v0  ;;  %v8408_v55 = vpop.f32.mrf.mxu3  ;;  %v8312_v62 = vpop.f32.mrf.mxu1 }
 0x553   : > { %v8356_v4 = vpop.f32.mrf.mxu2 }
 0x554   : > { %11793 = vst [vmem:[%s13504_s16 + $0x68] sm:$0xff] %v11754_v14   ;;  %v8357_v47 = vadd.f32 %v8356_v4, %v8307_v29  ;;  %v8457_v9 = vadd.f32 %v13641_v37, %v8441_v10 }
 0x555   : > { %v7910_v30 = vpop.f32.mrf.mxu0 }
 0x556   : > { %v8406_v42 = vadd.f32 %v8405_v45, %v8357_v47  ;;  %v8506_v53 = vadd.f32 %v11720_v20, %v8457_v9  ;;  %v7911_v56 = vadd.f32 %v7910_v30, %v13630_v24 }
 0x558   : > { %v8426_v16 = vadd.f32 %v8406_v42, %v7906_v60  ;;  %v8522_v18 = vmax.f32 %v8506_v53, 0.0 }
 0x55a   : > { %v8442_v8 = vmul.f32 %v13636_v3, %v8426_v16  ;;  %v8410_v26 = vpop.f32.mrf.mxu3 }
 0x55b   : > { %v8359_v61 = vpop.f32.mrf.mxu2 }
 0x55c   : > { %v8458_v23 = vadd.f32 %v13641_v37, %v8442_v8  ;;  %v8360_v57 = vadd.f32 %v8359_v61, %v8310_v28 }
 0x55e   : > { %v8507_v7 = vadd.f32 %v11721_v39, %v8458_v23  ;;  %v8409_v19 = vadd.f32 %v8408_v55, %v8360_v57 }
 0x560   : > { %v8523_v2 = vmax.f32 %v8507_v7, 0.0  ;;  %v8427_v11 = vadd.f32 %v8409_v19, %v7909_v34 }
 0x562   : > { %v11759_v33 = vpack.c.bf16 %v8523_v2, %v8522_v18  ;;  %v8443_v46 = vmul.f32 %v13636_v3, %v8427_v11 }
 0x563   : > { %v8361_v31 = vpop.f32.mrf.mxu2 }
 0x564   : > { %11794 = vst [vmem:[%s13504_s16 + $0x70] sm:$0xff] %v11759_v33   ;;  %v8362_v13 = vadd.f32 %v8361_v31, %v8312_v62  ;;  %v8459_v38 = vadd.f32 %v13641_v37, %v8443_v46 }
 0x566   : > { %v8411_v58 = vadd.f32 %v8410_v26, %v8362_v13  ;;  %v8508_v25 = vadd.f32 %v11724_v12, %v8459_v38 }
 0x568   : > { %v8428_v21 = vadd.f32 %v8411_v58, %v7911_v56  ;;  %v8524_v43 = vmax.f32 %v8508_v25, 0.0 }
 0x56a   : > { %v8444_v48 = vmul.f32 %v13636_v3, %v8428_v21 }
 0x56c   : > { %v8460_v44 = vadd.f32 %v13641_v37, %v8444_v48 }
 0x56e   : > { %v8509_v24 = vadd.f32 %v11725_v32, %v8460_v44 }
 0x570   : > { %v8525_v49 = vmax.f32 %v8509_v24, 0.0 }
 0x572   : > { %v11764_v50 = vpack.c.bf16 %v8525_v49, %v8524_v43 }
 0x574   : > { %11795 = vst [vmem:[%s13504_s16 + $0x78] sm:$0xff] %v11764_v50  }
 0x575   : > { %12076 = shalt.err (!%p12073_p10)
}
 0x576   : > { %s12132_s11 = smov 64   ;;  %s12133_s16 = smov 4  }
 0x577   : > { %11814 = dma.vmem_to_hbm [thread:$0]  (%p12264_p3), %s8573_s15, 2048, %s8575_s19, %s8560_s28, %s12132_s11, %s12132_s11, %s12133_s16  }
 0x578 PF: > { %s8589_s1 = sand.u32 1, %s12111_s24   ;;  %p13769_p12 = scmp.ge.s32.totalorder %s12123_s27, 2 }
 0x579   : > { %s8590_s20 = scalar_lea.sflag [#allocation6], %s8589_s1 }
 0x57a   : > { %p11834_p13 = pnand %p13769_p12, %p12209_p6 }
 0x57c   : > { %p11835_p0 = pneg %p11834_p13 }
 0x57e   : > { %12106 = dma.done.wait (%p11835_p0), %s8590_s20, 2048  }
 0x57f   : > { %12108 = vsyncadd (%p11835_p0), %s8590_s20, 4294965248  ;;  %p22_p5 = scmp.ge.s32.totalorder %s12254_s18, 4   ;;  %s13770_s24 = smov %s12115_s25 }
 0x580   : > { %s13771_s25 = smov %s12119_s26  ;;  %s13772_s26 = smov %s12270_s9 }
 0x581   : > { %s13773_s27 = smov %s12254_s18  ;;  %24 = sbr.rel (!%p22_p5) target bundleno = 9 (0x9), region = 127 }
 0x586   :  { %8596 = vsyncpa [#allocation5], 1 }
 0x587   :  { %8598 = vsyncpa [#allocation5 + $0x1], 1 }
 0x588   :  { %8599 = vsyncpa [#allocation8], 1 }
 0x589   :  { %8600 = vsyncpa [#allocation11], 1 }
 0x58a   :  { %8601 = vsyncpa [#allocation6], 1 }
 0x58b   :  { %8603 = vsyncpa [#allocation6 + $0x1], 1 }

</bundles_post_ra>
